<compile_context>
chip_gen: v6e
topology: v6e:2x2x1
jax: 0.10.0
libtpu: 0.0.40
codegen_flags: <defaults>
</compile_context>

<pallas_src>
import jax
import jax.numpy as jnp
from jax.experimental import pallas as pl
from jax.experimental.pallas import tpu as pltpu

# Constants fixed by PrimaryCaps.__init__
NUM_CAPS = 16
C_IN = 512
C_OUT = 32           # per-capsule conv output channels
KH = KW = 3
STRIDE = 2
PAD = 2

K_DIM = C_IN * KH * KW        # 4608 : im2col contraction dim
N_DIM = C_OUT * NUM_CAPS      # 512  : fused output columns, ordered (c_out, capsule)


def _round_up(x, m):
    return ((x + m - 1) // m) * m


def _tpu_generation():
    """Best-effort TPU generation (5 / 6 / 7) from device_kind; None if unknown."""
    try:
        kind = jax.devices()[0].device_kind.lower()
    except Exception:
        return None
    for g in (7, 6, 5):
        if str(g) in kind:
            return g
    return None


def _choose_tiling(n_rows, tp_user, gen):
    """Pick (row_tile, padded_rows).

    Tiles are multiples of 128 (>=256 when there is enough work). On v7x (2 TensorCores,
    64 MiB VMEM/TC) the block count is kept even so both cores get equal work; on v5e/v6e
    (1 TC) a single full-size tile is used whenever it fits.
    """
    if gen == 7:
        num_tc, tp_max = 2, 1024      # 64 MiB VMEM per TC -> keep per-TC buffers ~30 MB
    elif gen in (5, 6):
        num_tc, tp_max = 1, 2048      # 128 MiB VMEM; v6e is HBM-bound -> biggest tiles win
    else:
        num_tc, tp_max = 1, 1024

    if tp_user is not None:
        tp = max(128, _round_up(tp_user, 128))
        n_blk = pl.cdiv(n_rows, tp)
        if num_tc > 1:
            n_blk = _round_up(n_blk, num_tc)
        return tp, n_blk * tp

    per_core = pl.cdiv(n_rows, num_tc)
    tp = min(tp_max, max(256, _round_up(per_core, 256)))
    n_blk = num_tc * pl.cdiv(n_rows, num_tc * tp)          # even on v7x
    # Shrink the tile to the actual per-block work to cut padding waste (keep mult of 128).
    tp = max(128, _round_up(pl.cdiv(n_rows, n_blk), 128))
    return tp, n_blk * tp


def _vmem_limit(tp, out_itemsize, gen):
    n_bytes = (2 * tp * K_DIM * 2            # double-buffered bf16 patch tiles
               + 2 * K_DIM * N_DIM * 2       # bf16 fused weights (grid-invariant, 2 pipeline bufs)
               + 2 * N_DIM * 4               # f32 bias
               + 2 * N_DIM * C_OUT * 2       # bf16 group-sum matrix
               + 2 * C_OUT * N_DIM * 4       # f32 group-broadcast matrix
               + 2 * tp * N_DIM * out_itemsize)  # double-buffered output tiles
    cap = (48 if gen == 7 else 96) * 1024 * 1024
    return int(min(cap, max(32 * 1024 * 1024, n_bytes + 16 * 1024 * 1024)))


def primary_caps_kernel(p_ref, w_ref, b_ref, gsum_ref, gbc_ref, o_ref):
    # p_ref:    (TP, K_DIM)     bf16 im2col patch tile
    # w_ref:    (K_DIM, N_DIM)  bf16 fused weights of the 16 capsule convs
    # b_ref:    (1, N_DIM)      f32 fused biases
    # gsum_ref: (N_DIM, C_OUT)  bf16 0/1: sums the 16 columns of each capsule group
    # gbc_ref:  (C_OUT, N_DIM)  f32  0/1: broadcasts the per-group factor to all 16 columns
    m = jnp.dot(p_ref[...], w_ref[...],
                preferred_element_type=jnp.float32) + b_ref[...]
    msq = m * m                                                    # f32 on the VPU
    sq_g = jnp.dot(msq.astype(jnp.bfloat16), gsum_ref[...],
                   preferred_element_type=jnp.float32)             # (TP, 32) group ||.||^2
    # squash: sq*v / ((1+sq)*sqrt(sq)) == v * sqrt(sq) / (1+sq)   (finite when sq == 0)
    # computed in f32 on the lane-sparse (TP, 32) tile, then broadcast (exact 0/1 matmul).
    fac_g = jnp.sqrt(sq_g) * pl.reciprocal(1.0 + sq_g, approx=True)
    fac = jnp.dot(fac_g, gbc_ref[...],
                  preferred_element_type=jnp.float32)              # (TP, 512)
    o_ref[...] = (m * fac).astype(o_ref.dtype)


def primary_caps_forward(x, weights, biases, *, tp=None, out_dtype=jnp.bfloat16):
    """x: NCHW (B, 512, H, W); weights: (16, 32, 512, 3, 3); biases: (16, 32).

    tp: row tile override (multiple of 128); None = auto-pick per TPU generation.
    out_dtype: kernel/return dtype; bf16 halves output HBM traffic (values come from a bf16
    MXU anyway). Pass jnp.float32 for a full-precision result buffer.
    """
    B, C, H, W = x.shape
    assert C == C_IN
    Ho = (H + 2 * PAD - KH) // STRIDE + 1
    Wo = (W + 2 * PAD - KW) // STRIDE + 1
    n_rows = B * Ho * Wo

    # ---- glue: im2col with (kh, kw, c_in) column order, c_in innermost ----
    # Cast to bf16 FIRST: every following glue copy (transpose, pad, slices, concat) then
    # moves half the bytes, and bf16 is what the MXU consumes anyway.
    xb = jnp.transpose(x.astype(jnp.bfloat16), (0, 2, 3, 1))          # NHWC, channel-last
    xp = jnp.pad(xb, ((0, 0), (PAD, PAD), (PAD, PAD), (0, 0)))
    cols = []
    for kh in range(KH):
        for kw in range(KW):
            cols.append(xp[:, kh:kh + STRIDE * (Ho - 1) + 1:STRIDE,
                            kw:kw + STRIDE * (Wo - 1) + 1:STRIDE, :])  # (B, Ho, Wo, C_IN)
    patches = jnp.concatenate(cols, axis=-1).reshape(n_rows, K_DIM)

    gen = _tpu_generation()
    tp_eff, n_pad = _choose_tiling(n_rows, tp, gen)
    # Padded rows see m = bias (nonzero) in-kernel and are sliced off below.
    patches = jnp.pad(patches, ((0, n_pad - n_rows), (0, 0)))

    # ---- glue: fuse the 16 capsule convolutions into one weight matrix ----
    # w_comb[(kh*3+kw)*C_IN + c_in, c_out*NUM_CAPS + cap]  (rows match the patch columns)
    w_comb = weights.transpose(3, 4, 2, 1, 0).reshape(K_DIM, N_DIM).astype(jnp.bfloat16)
    b_comb = biases.T.reshape(1, N_DIM).astype(jnp.float32)      # (c_out, cap) column order

    # group-sum (512,32) bf16 and group-broadcast (32,512) f32 0/1 matrices
    col = jnp.arange(N_DIM) // NUM_CAPS
    grp = jnp.arange(C_OUT)
    gsum = (col[:, None] == grp[None, :]).astype(jnp.bfloat16)   # (N_DIM, C_OUT)
    gbc = (grp[:, None] == col[None, :]).astype(jnp.float32)     # (C_OUT, N_DIM)

    out = pl.pallas_call(
        primary_caps_kernel,
        out_shape=jax.ShapeDtypeStruct((n_pad, N_DIM), out_dtype),
        grid=(n_pad // tp_eff,),
        in_specs=[
            pl.BlockSpec((tp_eff, K_DIM), lambda i: (i, 0)),
            pl.BlockSpec((K_DIM, N_DIM), lambda i: (0, 0)),
            pl.BlockSpec((1, N_DIM), lambda i: (0, 0)),
            pl.BlockSpec((N_DIM, C_OUT), lambda i: (0, 0)),
            pl.BlockSpec((C_OUT, N_DIM), lambda i: (0, 0)),
        ],
        out_specs=pl.BlockSpec((tp_eff, N_DIM), lambda i: (i, 0)),
        compiler_params=pltpu.CompilerParams(
            dimension_semantics=("parallel",),
            vmem_limit_bytes=_vmem_limit(tp_eff, jnp.dtype(out_dtype).itemsize, gen),
        ),
    )(patches, w_comb, b_comb, gsum, gbc)

    # ---- glue: rows (b, h, w) + columns (c_out, cap) -> PyTorch (B, C_OUT*Ho*Wo, 16) ----
    out = out[:n_rows].reshape(B, Ho, Wo, C_OUT, NUM_CAPS)
    out = out.transpose(0, 3, 1, 2, 4)            # (B, C_OUT, Ho, Wo, NUM_CAPS), in out_dtype
    return out.reshape(B, C_OUT * Ho * Wo, NUM_CAPS)


def primary_caps_reference(x, weights, biases):
    """Pure-JAX f32 reference mirroring the PyTorch forward."""
    B = x.shape[0]
    outs = []
    for cap in range(NUM_CAPS):
        y = jax.lax.conv_general_dilated(
            x, weights[cap], window_strides=(STRIDE, STRIDE),
            padding=((PAD, PAD), (PAD, PAD)),
            dimension_numbers=("NCHW", "OIHW", "NCHW"),
            precision=jax.lax.Precision.HIGHEST)
        outs.append(y + biases[cap][None, :, None, None])
    u = jnp.stack(outs, axis=1)              # (B, 16, 32, Ho, Wo)
    u = u.transpose(0, 2, 3, 4, 1)           # (B, 32, Ho, Wo, 16)
    u = u.reshape(B, -1, NUM_CAPS)
    sq = jnp.sum(u * u, axis=-1, keepdims=True)
    return sq * u / ((1.0 + sq) * jnp.sqrt(sq))


if __name__ == "__main__":
    key = jax.random.PRNGKey(0)
    kx, kwt, kb = jax.random.split(key, 3)

    B, H, W = 2, 8, 8                         # small spatial; channels fixed at 512 by the module
    x = jax.random.normal(kx, (B, C_IN, H, W), jnp.float32)

    # deterministic Conv2d-style init: uniform(-1/sqrt(fan_in), 1/sqrt(fan_in))
    bound = 1.0 / float((C_IN * KH * KW) ** 0.5)
    weights = jax.random.uniform(kwt, (NUM_CAPS, C_OUT, C_IN, KH, KW),
                                 jnp.float32, -bound, bound)
    biases = jax.random.uniform(kb, (NUM_CAPS, C_OUT), jnp.float32, -bound, bound)

    out = jax.block_until_ready(jax.jit(primary_caps_forward)(x, weights, biases))

    Ho = (H + 2 * PAD - KH) // STRIDE + 1
    Wo = (W + 2 * PAD - KW) // STRIDE + 1
    assert out.shape == (B, C_OUT * Ho * Wo, NUM_CAPS), out.shape

    ref = primary_caps_reference(x, weights, biases)
    outf = out.astype(jnp.float32)
    # bf16 MXU inputs + bf16 output vs. the f32 HIGHEST reference: loosened tolerance.
    err = float(jnp.max(jnp.abs(outf - ref)))
    assert jnp.allclose(outf, ref, atol=2e-2, rtol=2e-2), f"max abs err {err}"

    print("KERNEL_OK")
</pallas_src>

<mosaic_0001>
module attributes {stable_mosaic.version = 11 : i64} {
  func.func @primary_caps_kernel(%arg0: i32, %arg1: memref<128x4608xbf16, #tpu.memory_space<vmem>>, %arg2: memref<4608x512xbf16, #tpu.memory_space<vmem>>, %arg3: memref<1x512xf32, #tpu.memory_space<vmem>>, %arg4: memref<512x32xbf16, #tpu.memory_space<vmem>>, %arg5: memref<32x512xf32, #tpu.memory_space<vmem>>, %arg6: memref<128x512xbf16, #tpu.memory_space<vmem>>) attributes {dimension_semantics = [#tpu.dimension_semantics<parallel>], iteration_bounds = array<i64: 1>, scalar_prefetch = 0 : i64, scratch_operands = 0 : i64, tpu.core_type = #tpu.core_type<tc>, window_params = [{transform_indices = @transform_0, window_bounds = array<i64: 128, 4608>}, {pipeline_mode = #tpu.pipeline_mode<synchronous>, transform_indices = @transform_1, window_bounds = array<i64: 4608, 512>}, {pipeline_mode = #tpu.pipeline_mode<synchronous>, transform_indices = @transform_2, window_bounds = array<i64: 1, 512>}, {pipeline_mode = #tpu.pipeline_mode<synchronous>, transform_indices = @transform_3, window_bounds = array<i64: 512, 32>}, {pipeline_mode = #tpu.pipeline_mode<synchronous>, transform_indices = @transform_4, window_bounds = array<i64: 32, 512>}, {transform_indices = @transform_5, window_bounds = array<i64: 128, 512>}]} {
    %c0 = arith.constant 0 : index
    %c0_0 = arith.constant 0 : index
    %0 = vector.load %arg1[%c0, %c0_0] : memref<128x4608xbf16, #tpu.memory_space<vmem>>, vector<128x4608xbf16>
    %c0_1 = arith.constant 0 : index
    %c0_2 = arith.constant 0 : index
    %1 = vector.load %arg2[%c0_1, %c0_2] : memref<4608x512xbf16, #tpu.memory_space<vmem>>, vector<4608x512xbf16>
    %cst = arith.constant dense<0.000000e+00> : vector<128x512xf32>
    %2 = tpu.matmul %0, %1, %cst {dimension_numbers = #tpu.dot_dimension_numbers<[1], [0], [0], [1], [0, 0, 1, 1], [], []>} : vector<128x4608xbf16>, vector<4608x512xbf16>, vector<128x512xf32> -> vector<128x512xf32>
    %c0_3 = arith.constant 0 : index
    %c0_4 = arith.constant 0 : index
    %3 = vector.load %arg3[%c0_3, %c0_4] : memref<1x512xf32, #tpu.memory_space<vmem>>, vector<1x512xf32>
    %4 = vector.broadcast %3 : vector<1x512xf32> to vector<128x512xf32>
    %5 = arith.addf %2, %4 : vector<128x512xf32>
    %6 = arith.mulf %5, %5 : vector<128x512xf32>
    %7 = arith.truncf %6 : vector<128x512xf32> to vector<128x512xbf16>
    %c0_5 = arith.constant 0 : index
    %c0_6 = arith.constant 0 : index
    %8 = vector.load %arg4[%c0_5, %c0_6] : memref<512x32xbf16, #tpu.memory_space<vmem>>, vector<512x32xbf16>
    %cst_7 = arith.constant dense<0.000000e+00> : vector<128x32xf32>
    %9 = tpu.matmul %7, %8, %cst_7 {dimension_numbers = #tpu.dot_dimension_numbers<[1], [0], [0], [1], [0, 0, 1, 1], [], []>} : vector<128x512xbf16>, vector<512x32xbf16>, vector<128x32xf32> -> vector<128x32xf32>
    %10 = math.sqrt %9 : vector<128x32xf32>
    %cst_8 = arith.constant 1.000000e+00 : f32
    %11 = vector.broadcast %cst_8 : f32 to vector<128x32xf32>
    %12 = arith.addf %11, %9 : vector<128x32xf32>
    %13 = tpu.reciprocal %12 {approx = true} : vector<128x32xf32> -> vector<128x32xf32>
    %14 = arith.mulf %10, %13 : vector<128x32xf32>
    %c0_9 = arith.constant 0 : index
    %c0_10 = arith.constant 0 : index
    %15 = vector.load %arg5[%c0_9, %c0_10] : memref<32x512xf32, #tpu.memory_space<vmem>>, vector<32x512xf32>
    %cst_11 = arith.constant dense<0.000000e+00> : vector<128x512xf32>
    %16 = tpu.matmul %14, %15, %cst_11 {dimension_numbers = #tpu.dot_dimension_numbers<[1], [0], [0], [1], [0, 0, 1, 1], [], []>} : vector<128x32xf32>, vector<32x512xf32>, vector<128x512xf32> -> vector<128x512xf32>
    %17 = arith.mulf %5, %16 : vector<128x512xf32>
    %18 = arith.truncf %17 : vector<128x512xf32> to vector<128x512xbf16>
    %c0_12 = arith.constant 0 : index
    %c0_13 = arith.constant 0 : index
    %19 = vector.load %arg6[%c0_12, %c0_13] : memref<128x512xbf16, #tpu.memory_space<vmem>>, vector<128x512xbf16>
    tpu.vector_store %arg6[%c0_12, %c0_13], %18 {strides = array<i32>} : memref<128x512xbf16, #tpu.memory_space<vmem>>, vector<128x512xbf16>,
    return
  }
  func.func @transform_0(%arg0: i32) -> (i32, i32) {
    %c0_i32 = arith.constant 0 : i32
    %c0_i32_0 = arith.constant 0 : i32
    return %arg0, %c0_i32 : i32, i32
  }
  func.func @transform_1(%arg0: i32) -> (i32, i32) {
    %c0_i32 = arith.constant 0 : i32
    %c0_i32_0 = arith.constant 0 : i32
    %c0_i32_1 = arith.constant 0 : i32
    return %c0_i32, %c0_i32_0 : i32, i32
  }
  func.func @transform_2(%arg0: i32) -> (i32, i32) {
    %c0_i32 = arith.constant 0 : i32
    %c0_i32_0 = arith.constant 0 : i32
    %c0_i32_1 = arith.constant 0 : i32
    return %c0_i32, %c0_i32_0 : i32, i32
  }
  func.func @transform_3(%arg0: i32) -> (i32, i32) {
    %c0_i32 = arith.constant 0 : i32
    %c0_i32_0 = arith.constant 0 : i32
    %c0_i32_1 = arith.constant 0 : i32
    return %c0_i32, %c0_i32_0 : i32, i32
  }
  func.func @transform_4(%arg0: i32) -> (i32, i32) {
    %c0_i32 = arith.constant 0 : i32
    %c0_i32_0 = arith.constant 0 : i32
    %c0_i32_1 = arith.constant 0 : i32
    return %c0_i32, %c0_i32_0 : i32, i32
  }
  func.func @transform_5(%arg0: i32) -> (i32, i32) {
    %c0_i32 = arith.constant 0 : i32
    %c0_i32_0 = arith.constant 0 : i32
    return %arg0, %c0_i32 : i32, i32
  }
}

</mosaic_0001>

<bundles_post_ra>
// kernel: primary_caps_forward.1
= control target key start
LH: loop header
LB: loop body
LE: loop exit
PB: predicated region body
PF: predicated region fallthrough
CT: control target
= control target key end

     0   :  { %vm13473_vm2 = vcmask 261120   ;;  %s26125_s1 = inlined_call_operand.vmem [shape: bf16[4608,512], index: 1, kind: input, shape index: {}]   ;;  %s26126_s0 = inlined_call_operand.vmem [shape: bf16[128,4608], index: 0, kind: input, shape index: {}]   ;;  %s26127_s2 = inlined_call_operand.vmem [shape: f32[1,512], index: 2, kind: input, shape index: {}]   ;;  %s26128_s3 = inlined_call_operand.vmem [shape: bf16[512,32], index: 3, kind: input, shape index: {}]   ;;  %s26129_s4 = inlined_call_operand.vmem [shape: f32[32,512], index: 4, kind: input, shape index: {}]   ;;  %s26130_s5 = inlined_call_operand.vmem [shape: bf16[128,512], index: 5, kind: output, shape index: {}]  }
   0x1   :  { %v15833_v0 = vld [vmem:[%s26125_s1 + $0xe4] ss:$16 sps:$4 sm:$0xff]   ;;  %v15837_v2 = vld [vmem:[%s26125_s1 + $0xe0] ss:$16 sps:$4 sm:$0xff]   ;;  %v15934_v51 = vld [vmem:[%s26126_s0 + $0xc] ss:$144 sps:$4 sm:$0xff]  }
   0x2   :  { %v15835_v1 = vld [vmem:[%s26125_s1 + $0x2e4] ss:$16 sps:$4 sm:$0xff]   ;;  %8683 = vmatprep.subr.bf16.mxu0 %v15833_v0  ;;  %v15838_v3 = vld [vmem:[%s26125_s1 + $0x2e0] ss:$16 sps:$4 sm:$0xff]   ;;  %8828 = vmatprep.mubr.bf16.mxu1 %v15934_v51 }
   0x3   :  { %8796 = vmatprep.subr.bf16.mxu1 %v15835_v1  ;;  %v15839_v4 = vld [vmem:[%s26125_s1 + $0xc4] ss:$16 sps:$4 sm:$0xff]   ;;  %8684 = vmatpush1.bf16.msra.mxu0 %v15837_v2  ;;  %v15843_v6 = vld [vmem:[%s26125_s1 + $0xc0] ss:$16 sps:$4 sm:$0xff]  }
   0x4   :  { %8797 = vmatpush1.bf16.msra.mxu1 %v15838_v3  ;;  %v15841_v5 = vld [vmem:[%s26125_s1 + $0x2c4] ss:$16 sps:$4 sm:$0xff]   ;;  %8685 = vmatprep.subr.bf16.mxu0 %v15839_v4  ;;  %v15844_v7 = vld [vmem:[%s26125_s1 + $0x2c0] ss:$16 sps:$4 sm:$0xff]  }
   0x5   :  { %8798 = vmatprep.subr.bf16.mxu1 %v15841_v5  ;;  %v15845_v8 = vld [vmem:[%s26125_s1 + $0xa4] ss:$16 sps:$4 sm:$0xff]   ;;  %v15849_v10 = vld [vmem:[%s26125_s1 + $0xa0] ss:$16 sps:$4 sm:$0xff]   ;;  %v15932_v5 = vld [vmem:[%s26126_s0 + $0x8] ss:$144 sps:$4 sm:$0xff]  }
   0x6   :  { %v15847_v9 = vld [vmem:[%s26125_s1 + $0x2a4] ss:$16 sps:$4 sm:$0xff]   ;;  %v15850_v11 = vld [vmem:[%s26125_s1 + $0x2a0] ss:$16 sps:$4 sm:$0xff]  }
   0x7   :  { %8686 = vmatpush1.bf16.msra.mxu0 %v15843_v6  ;;  %v15851_v12 = vld [vmem:[%s26125_s1 + $0x84] ss:$16 sps:$4 sm:$0xff]   ;;  %v15855_v14 = vld [vmem:[%s26125_s1 + $0x80] ss:$16 sps:$4 sm:$0xff]  }
   0x8   :  { %8799 = vmatpush1.bf16.msra.mxu1 %v15844_v7  ;;  %8687 = vmatprep.subr.bf16.mxu0 %v15845_v8  ;;  %v15853_v13 = vld [vmem:[%s26125_s1 + $0x284] ss:$16 sps:$4 sm:$0xff]   ;;  %v15856_v15 = vld [vmem:[%s26125_s1 + $0x280] ss:$16 sps:$4 sm:$0xff]  }
   0x9   :  { %8800 = vmatprep.subr.bf16.mxu1 %v15847_v9  ;;  %v15857_v16 = vld [vmem:[%s26125_s1 + $0x64] ss:$16 sps:$4 sm:$0xff]   ;;  %v15861_v18 = vld [vmem:[%s26125_s1 + $0x60] ss:$16 sps:$4 sm:$0xff]  }
   0xa   :  { %v15859_v17 = vld [vmem:[%s26125_s1 + $0x264] ss:$16 sps:$4 sm:$0xff]   ;;  %v15862_v19 = vld [vmem:[%s26125_s1 + $0x260] ss:$16 sps:$4 sm:$0xff]  }
   0xb   :  { %8688 = vmatpush1.bf16.msra.mxu0 %v15849_v10  ;;  %v15863_v20 = vld [vmem:[%s26125_s1 + $0x44] ss:$16 sps:$4 sm:$0xff]   ;;  %v15867_v22 = vld [vmem:[%s26125_s1 + $0x40] ss:$16 sps:$4 sm:$0xff]  }
   0xc   :  { %8801 = vmatpush1.bf16.msra.mxu1 %v15850_v11  ;;  %8689 = vmatprep.subr.bf16.mxu0 %v15851_v12  ;;  %v15865_v21 = vld [vmem:[%s26125_s1 + $0x244] ss:$16 sps:$4 sm:$0xff]   ;;  %v15868_v23 = vld [vmem:[%s26125_s1 + $0x240] ss:$16 sps:$4 sm:$0xff]   ;;  %v15949_v11 = vld [vmem:[%s26126_s0 + $0x12c] ss:$144 sps:$4 sm:$0xff]  }
   0xd   :  { %8802 = vmatprep.subr.bf16.mxu1 %v15853_v13  ;;  %v15869_v24 = vld [vmem:[%s26125_s1 + $0x24] ss:$16 sps:$4 sm:$0xff]   ;;  %v15873_v26 = vld [vmem:[%s26125_s1 + $0x20] ss:$16 sps:$4 sm:$0xff]  }
   0xe   :  { %v15871_v25 = vld [vmem:[%s26125_s1 + $0x224] ss:$16 sps:$4 sm:$0xff]   ;;  %v15874_v27 = vld [vmem:[%s26125_s1 + $0x220] ss:$16 sps:$4 sm:$0xff]  }
   0xf   :  { %8690 = vmatpush1.bf16.msra.mxu0 %v15855_v14  ;;  %v15875_v28 = vld [vmem:[%s26125_s1 + $0x4] ss:$16 sps:$4 sm:$0xff]   ;;  %v15879_v30 = vld [vmem:[%s26125_s1] ss:$16 sps:$4 sm:$0xff]  }
  0x10   :  { %8803 = vmatpush1.bf16.msra.mxu1 %v15856_v15  ;;  %8691 = vmatprep.subr.bf16.mxu0 %v15857_v16  ;;  %v15877_v29 = vld [vmem:[%s26125_s1 + $0x204] ss:$16 sps:$4 sm:$0xff]   ;;  %v15880_v31 = vld [vmem:[%s26125_s1 + $0x200] ss:$16 sps:$4 sm:$0xff]  }
  0x11   :  { %8804 = vmatprep.subr.bf16.mxu1 %v15859_v17  ;;  %v15881_v32 = vld [vmem:[%s26125_s1 + $0x1e4] ss:$16 sps:$4 sm:$0xff]   ;;  %v15885_v34 = vld [vmem:[%s26125_s1 + $0x1e0] ss:$16 sps:$4 sm:$0xff]   ;;  %v15952_v17 = vld [vmem:[%s26126_s0 + $0x128] ss:$144 sps:$4 sm:$0xff]  }
  0x12   :  { %v15883_v33 = vld [vmem:[%s26125_s1 + $0x3e4] ss:$16 sps:$4 sm:$0xff]   ;;  %v15886_v35 = vld [vmem:[%s26125_s1 + $0x3e0] ss:$16 sps:$4 sm:$0xff]  }
  0x13   :  { %8692 = vmatpush1.bf16.msra.mxu0 %v15861_v18  ;;  %v15887_v36 = vld [vmem:[%s26125_s1 + $0x1c4] ss:$16 sps:$4 sm:$0xff]   ;;  %v15891_v38 = vld [vmem:[%s26125_s1 + $0x1c0] ss:$16 sps:$4 sm:$0xff]  }
  0x14   :  { %8805 = vmatpush1.bf16.msra.mxu1 %v15862_v19  ;;  %8693 = vmatprep.subr.bf16.mxu0 %v15863_v20  ;;  %v15889_v37 = vld [vmem:[%s26125_s1 + $0x3c4] ss:$16 sps:$4 sm:$0xff]   ;;  %v15892_v39 = vld [vmem:[%s26125_s1 + $0x3c0] ss:$16 sps:$4 sm:$0xff]  }
  0x15   :  { %8806 = vmatprep.subr.bf16.mxu1 %v15865_v21  ;;  %v15893_v40 = vld [vmem:[%s26125_s1 + $0x1a4] ss:$16 sps:$4 sm:$0xff]   ;;  %v15897_v42 = vld [vmem:[%s26125_s1 + $0x1a0] ss:$16 sps:$4 sm:$0xff]  }
  0x16   :  { %v15895_v41 = vld [vmem:[%s26125_s1 + $0x3a4] ss:$16 sps:$4 sm:$0xff]   ;;  %v15898_v43 = vld [vmem:[%s26125_s1 + $0x3a0] ss:$16 sps:$4 sm:$0xff]  }
  0x17   :  { %8694 = vmatpush1.bf16.msra.mxu0 %v15867_v22  ;;  %v15899_v44 = vld [vmem:[%s26125_s1 + $0x184] ss:$16 sps:$4 sm:$0xff]   ;;  %v15903_v46 = vld [vmem:[%s26125_s1 + $0x180] ss:$16 sps:$4 sm:$0xff]  }
  0x18   :  { %8807 = vmatpush1.bf16.msra.mxu1 %v15868_v23  ;;  %8695 = vmatprep.subr.bf16.mxu0 %v15869_v24  ;;  %v15901_v45 = vld [vmem:[%s26125_s1 + $0x384] ss:$16 sps:$4 sm:$0xff]   ;;  %v15904_v47 = vld [vmem:[%s26125_s1 + $0x380] ss:$16 sps:$4 sm:$0xff]   ;;  %v15967_v23 = vld [vmem:[%s26126_s0 + $0x24c] ss:$144 sps:$4 sm:$0xff]  }
  0x19   :  { %8808 = vmatprep.subr.bf16.mxu1 %v15871_v25  ;;  %v15905_v48 = vld [vmem:[%s26125_s1 + $0x164] ss:$16 sps:$4 sm:$0xff]   ;;  %v15909_v52 = vld [vmem:[%s26125_s1 + $0x160] ss:$16 sps:$4 sm:$0xff]  }
  0x1a   :  { %v15931_v49 = vld [vmem:[%s26126_s0 + $0x4] ss:$144 sps:$4 sm:$0xff]   ;;  %v15910_v53 = vld [vmem:[%s26125_s1 + $0x360] ss:$16 sps:$4 sm:$0xff]  }
  0x1b   :  { %8696 = vmatpush1.bf16.msra.mxu0 %v15873_v26  ;;  %v15907_v50 = vld [vmem:[%s26125_s1 + $0x364] ss:$16 sps:$4 sm:$0xff]   ;;  %8715 = vmatprep.mubr.bf16.mxu0 %v15931_v49  ;;  %v15915_v56 = vld [vmem:[%s26125_s1 + $0x140] ss:$16 sps:$4 sm:$0xff]  }
  0x1c   :  { %8809 = vmatpush1.bf16.msra.mxu1 %v15874_v27  ;;  %8697 = vmatprep.subr.bf16.mxu0 %v15875_v28  ;;  %v15911_v54 = vld [vmem:[%s26125_s1 + $0x144] ss:$16 sps:$4 sm:$0xff]   ;;  %v15916_v57 = vld [vmem:[%s26125_s1 + $0x340] ss:$16 sps:$4 sm:$0xff]  }
  0x1d   :  { %8810 = vmatprep.subr.bf16.mxu1 %v15877_v29  ;;  %v15913_v55 = vld [vmem:[%s26125_s1 + $0x344] ss:$16 sps:$4 sm:$0xff]   ;;  %v15921_v60 = vld [vmem:[%s26125_s1 + $0x120] ss:$16 sps:$4 sm:$0xff]   ;;  %v15970_v29 = vld [vmem:[%s26126_s0 + $0x248] ss:$144 sps:$4 sm:$0xff]  }
  0x1e   :  { %v15917_v58 = vld [vmem:[%s26125_s1 + $0x124] ss:$16 sps:$4 sm:$0xff]   ;;  %v15922_v61 = vld [vmem:[%s26125_s1 + $0x320] ss:$16 sps:$4 sm:$0xff]  }
  0x1f   :  { %8698 = vmatpush1.bf16.msra.mxu0 %v15879_v30  ;;  %v15919_v59 = vld [vmem:[%s26125_s1 + $0x324] ss:$16 sps:$4 sm:$0xff]   ;;  %v15927_v0 = vld [vmem:[%s26125_s1 + $0x100] ss:$16 sps:$4 sm:$0xff]  }
  0x20   :  { %8811 = vmatpush1.bf16.msra.mxu1 %v15880_v31  ;;  %8699 = vmatprep.subr.bf16.mxu0 %v15881_v32  ;;  %v15923_v62 = vld [vmem:[%s26125_s1 + $0x104] ss:$16 sps:$4 sm:$0xff]   ;;  %v15928_v1 = vld [vmem:[%s26125_s1 + $0x300] ss:$16 sps:$4 sm:$0xff]  }
  0x21   :  { %8812 = vmatprep.subr.bf16.mxu1 %v15883_v33  ;;  %v15925_v63 = vld [vmem:[%s26125_s1 + $0x304] ss:$16 sps:$4 sm:$0xff]   ;;  %v15929_v4 = vld [vmem:[%s26126_s0] ss:$144 sps:$4 sm:$0xff]  }
  0x22   :  { %v15937_v2 = vld [vmem:[%s26125_s1 + $0x4e4] ss:$16 sps:$4 sm:$0xff]   ;;  %v15935_v6 = vld [vmem:[%s26125_s1 + $0x4e0] ss:$16 sps:$4 sm:$0xff]  }
  0x23   :  { %8700 = vmatpush2.bf16.msra.mxu0 %v15885_v34  ;;  %v15940_v3 = vld [vmem:[%s26125_s1 + $0x6e4] ss:$16 sps:$4 sm:$0xff]   ;;  %v15938_v7 = vld [vmem:[%s26125_s1 + $0x6e0] ss:$16 sps:$4 sm:$0xff]  }
  0x24   :  { %8813 = vmatpush2.bf16.msra.mxu1 %v15886_v35  ;;  %8701 = vmatprep.subr.bf16.mxu0 %v15887_v36  ;;  %v15943_v8 = vld [vmem:[%s26125_s1 + $0x4c4] ss:$16 sps:$4 sm:$0xff]   ;;  %v15941_v12 = vld [vmem:[%s26125_s1 + $0x4c0] ss:$16 sps:$4 sm:$0xff]   ;;  %v15985_v35 = vld [vmem:[%s26126_s0 + $0x36c] ss:$144 sps:$4 sm:$0xff]  }
  0x25   :  { %8814 = vmatprep.subr.bf16.mxu1 %v15889_v37  ;;  %v15946_v9 = vld [vmem:[%s26125_s1 + $0x6c4] ss:$16 sps:$4 sm:$0xff]   ;;  %v15944_v13 = vld [vmem:[%s26125_s1 + $0x6c0] ss:$16 sps:$4 sm:$0xff]  }
  0x26   :  { %v15947_v10 = vld [vmem:[%s26126_s0 + $0x124] ss:$144 sps:$4 sm:$0xff]   ;;  %v15951_v16 = vld [vmem:[%s26126_s0 + $0x120] ss:$144 sps:$4 sm:$0xff]  }
  0x27   :  { %8702 = vmatpush2.bf16.msra.mxu0 %v15891_v38  ;;  %v15955_v14 = vld [vmem:[%s26125_s1 + $0x4a4] ss:$16 sps:$4 sm:$0xff]   ;;  %v15953_v18 = vld [vmem:[%s26125_s1 + $0x4a0] ss:$16 sps:$4 sm:$0xff]  }
  0x28   :  { %8815 = vmatpush2.bf16.msra.mxu1 %v15892_v39  ;;  %8703 = vmatprep.subr.bf16.mxu0 %v15893_v40  ;;  %v15958_v15 = vld [vmem:[%s26125_s1 + $0x6a4] ss:$16 sps:$4 sm:$0xff]   ;;  %v15956_v19 = vld [vmem:[%s26125_s1 + $0x6a0] ss:$16 sps:$4 sm:$0xff]  }
  0x29   :  { %8816 = vmatprep.subr.bf16.mxu1 %v15895_v41  ;;  %v15961_v20 = vld [vmem:[%s26125_s1 + $0x484] ss:$16 sps:$4 sm:$0xff]   ;;  %v15959_v24 = vld [vmem:[%s26125_s1 + $0x480] ss:$16 sps:$4 sm:$0xff]   ;;  %v15988_v41 = vld [vmem:[%s26126_s0 + $0x368] ss:$144 sps:$4 sm:$0xff]  }
  0x2a   :  { %v15964_v21 = vld [vmem:[%s26125_s1 + $0x684] ss:$16 sps:$4 sm:$0xff]   ;;  %v15962_v25 = vld [vmem:[%s26125_s1 + $0x680] ss:$16 sps:$4 sm:$0xff]  }
  0x2b   :  { %8704 = vmatpush2.bf16.msra.mxu0 %v15897_v42  ;;  %v15965_v22 = vld [vmem:[%s26126_s0 + $0x244] ss:$144 sps:$4 sm:$0xff]   ;;  %v15969_v28 = vld [vmem:[%s26126_s0 + $0x240] ss:$144 sps:$4 sm:$0xff]  }
  0x2c   :  { %8817 = vmatpush2.bf16.msra.mxu1 %v15898_v43  ;;  %8705 = vmatprep.subr.bf16.mxu0 %v15899_v44  ;;  %v15973_v26 = vld [vmem:[%s26125_s1 + $0x464] ss:$16 sps:$4 sm:$0xff]   ;;  %v15971_v30 = vld [vmem:[%s26125_s1 + $0x460] ss:$16 sps:$4 sm:$0xff]  }
  0x2d   :  { %8818 = vmatprep.subr.bf16.mxu1 %v15901_v45  ;;  %v15976_v27 = vld [vmem:[%s26125_s1 + $0x664] ss:$16 sps:$4 sm:$0xff]   ;;  %v15974_v31 = vld [vmem:[%s26125_s1 + $0x660] ss:$16 sps:$4 sm:$0xff]  }
  0x2e   :  { %v15979_v32 = vld [vmem:[%s26125_s1 + $0x444] ss:$16 sps:$4 sm:$0xff]   ;;  %v15977_v36 = vld [vmem:[%s26125_s1 + $0x440] ss:$16 sps:$4 sm:$0xff]  }
  0x2f   :  { %8706 = vmatpush2.bf16.msra.mxu0 %v15903_v46  ;;  %v15982_v33 = vld [vmem:[%s26125_s1 + $0x644] ss:$16 sps:$4 sm:$0xff]   ;;  %v15980_v37 = vld [vmem:[%s26125_s1 + $0x640] ss:$16 sps:$4 sm:$0xff]  }
  0x30   :  { %8819 = vmatpush2.bf16.msra.mxu1 %v15904_v47  ;;  %8707 = vmatprep.subr.bf16.mxu0 %v15905_v48  ;;  %v15983_v34 = vld [vmem:[%s26126_s0 + $0x364] ss:$144 sps:$4 sm:$0xff]   ;;  %v15987_v40 = vld [vmem:[%s26126_s0 + $0x360] ss:$144 sps:$4 sm:$0xff]   ;;  %v16003_v47 = vld [vmem:[%s26126_s0 + $0x48c] ss:$144 sps:$4 sm:$0xff]  }
  0x31   :  { %8820 = vmatprep.subr.bf16.mxu1 %v15907_v50  ;;  %v15991_v38 = vld [vmem:[%s26125_s1 + $0x424] ss:$16 sps:$4 sm:$0xff]   ;;  %v15989_v42 = vld [vmem:[%s26125_s1 + $0x420] ss:$16 sps:$4 sm:$0xff]  }
  0x32   :  { %v15994_v39 = vld [vmem:[%s26125_s1 + $0x624] ss:$16 sps:$4 sm:$0xff]   ;;  %v15992_v43 = vld [vmem:[%s26125_s1 + $0x620] ss:$16 sps:$4 sm:$0xff]  }
  0x33   :  { %8708 = vmatpush2.bf16.msra.mxu0 %v15909_v52  ;;  %v15997_v44 = vld [vmem:[%s26125_s1 + $0x404] ss:$16 sps:$4 sm:$0xff]   ;;  %v15995_v48 = vld [vmem:[%s26125_s1 + $0x400] ss:$16 sps:$4 sm:$0xff]  }
  0x34   :  { %8821 = vmatpush2.bf16.msra.mxu1 %v15910_v53  ;;  %8709 = vmatprep.subr.bf16.mxu0 %v15911_v54  ;;  %v16000_v45 = vld [vmem:[%s26125_s1 + $0x604] ss:$16 sps:$4 sm:$0xff]   ;;  %v15998_v49 = vld [vmem:[%s26125_s1 + $0x600] ss:$16 sps:$4 sm:$0xff]   ;;  %v16006_v53 = vld [vmem:[%s26126_s0 + $0x488] ss:$144 sps:$4 sm:$0xff]  }
  0x35   :  { %8822 = vmatprep.subr.bf16.mxu1 %v15913_v55  ;;  %v16001_v46 = vld [vmem:[%s26126_s0 + $0x484] ss:$144 sps:$4 sm:$0xff]   ;;  %v16005_v52 = vld [vmem:[%s26126_s0 + $0x480] ss:$144 sps:$4 sm:$0xff]  }
  0x36   :  { %v16009_v50 = vld [vmem:[%s26125_s1 + $0x5e4] ss:$16 sps:$4 sm:$0xff]   ;;  %v16007_v54 = vld [vmem:[%s26125_s1 + $0x5e0] ss:$16 sps:$4 sm:$0xff]  }
  0x37   :  { %8710 = vmatpush2.bf16.msra.mxu0 %v15915_v56  ;;  %v16012_v51 = vld [vmem:[%s26125_s1 + $0x7e4] ss:$16 sps:$4 sm:$0xff]   ;;  %v16010_v55 = vld [vmem:[%s26125_s1 + $0x7e0] ss:$16 sps:$4 sm:$0xff]  }
  0x38   :  { %8823 = vmatpush2.bf16.msra.mxu1 %v15916_v57  ;;  %8711 = vmatprep.subr.bf16.mxu0 %v15917_v58  ;;  %v16015_v56 = vld [vmem:[%s26125_s1 + $0x5c4] ss:$16 sps:$4 sm:$0xff]  }
  0x39   :  { %8824 = vmatprep.subr.bf16.mxu1 %v15919_v59  ;;  %v16018_v57 = vld [vmem:[%s26125_s1 + $0x7c4] ss:$16 sps:$4 sm:$0xff]   ;;  %v16021_v59 = vld [vmem:[%s26126_s0 + $0x5ac] ss:$144 sps:$4 sm:$0xff]  }
  0x3a   :  { %v16019_v58 = vld [vmem:[%s26126_s0 + $0x5a4] ss:$144 sps:$4 sm:$0xff]  }
  0x3b   :  { %8712 = vmatpush2.bf16.msra.mxu0 %v15921_v60  ;;  %v16013_v60 = vld [vmem:[%s26125_s1 + $0x5c0] ss:$16 sps:$4 sm:$0xff]  }
  0x3c   :  { %8825 = vmatpush2.bf16.msra.mxu1 %v15922_v61  ;;  %8713 = vmatprep.subr.bf16.mxu0 %v15923_v62  ;;  %v16016_v61 = vld [vmem:[%s26125_s1 + $0x7c0] ss:$16 sps:$4 sm:$0xff]   ;;  %v16027_v62 = vld [vmem:[%s26125_s1 + $0x5a4] ss:$16 sps:$4 sm:$0xff]  }
  0x3d   :  { %8826 = vmatprep.subr.bf16.mxu1 %v15925_v63  ;;  %v16030_v63 = vld [vmem:[%s26125_s1 + $0x7a4] ss:$16 sps:$4 sm:$0xff]  }
  0x3f   :  { %8714 = vmatpush2.bf16.msra.mxu0 %v15927_v0  ;;  %v16023_v0 = vld [vmem:[%s26126_s0 + $0x5a0] ss:$144 sps:$4 sm:$0xff]  }
  0x40   :  { %8827 = vmatpush2.bf16.msra.mxu1 %v15928_v1  ;;  %8909 = vmatprep.subr.bf16.mxu0 %v15937_v2  ;;  %v16024_v1 = vld [vmem:[%s26126_s0 + $0x5a8] ss:$144 sps:$4 sm:$0xff]   ;;  %v16025_v2 = vld [vmem:[%s26125_s1 + $0x5a0] ss:$16 sps:$4 sm:$0xff]  }
  0x41   :  { %9022 = vmatprep.subr.bf16.mxu1 %v15940_v3  ;;  %v16028_v3 = vld [vmem:[%s26125_s1 + $0x7a0] ss:$16 sps:$4 sm:$0xff]  }
  0x42   :  { %8716 = vmatmul.mubr.bf16.vlgmr.msra.gmra.mxu0 %v15929_v4  ;;  %v16033_v4 = vld [vmem:[%s26125_s1 + $0x584] ss:$16 sps:$4 sm:$0xff]  }
  0x43   :  { %8829 = vmatmul.mubr.bf16.vlgmr.msra.gmra.mxu1 %v15932_v5  ;;  %8910 = vmatpush1.bf16.msra.mxu0 %v15935_v6  ;;  %v16036_v5 = vld [vmem:[%s26125_s1 + $0x784] ss:$16 sps:$4 sm:$0xff]  }
  0x44   :  { %9023 = vmatpush1.bf16.msra.mxu1 %v15938_v7  ;;  %8911 = vmatprep.subr.bf16.mxu0 %v15943_v8  ;;  %v16037_v6 = vld [vmem:[%s26126_s0 + $0x6c4] ss:$144 sps:$4 sm:$0xff]   ;;  %v16039_v7 = vld [vmem:[%s26126_s0 + $0x6cc] ss:$144 sps:$4 sm:$0xff]   ;;  %v16031_v8 = vld [vmem:[%s26125_s1 + $0x580] ss:$16 sps:$4 sm:$0xff]  }
  0x45   :  { %9024 = vmatprep.subr.bf16.mxu1 %v15946_v9  ;;  %8725 = vmatprep.mubr.bf16.mxu0 %v15947_v10  ;;  %v16034_v9 = vld [vmem:[%s26125_s1 + $0x780] ss:$16 sps:$4 sm:$0xff]   ;;  %v16045_v10 = vld [vmem:[%s26125_s1 + $0x564] ss:$16 sps:$4 sm:$0xff]  }
  0x46   :  { %8838 = vmatprep.mubr.bf16.mxu1 %v15949_v11  ;;  %v16048_v11 = vld [vmem:[%s26125_s1 + $0x764] ss:$16 sps:$4 sm:$0xff]  }
  0x47   :  { %8912 = vmatpush1.bf16.msra.mxu0 %v15941_v12  ;;  %v16041_v12 = vld [vmem:[%s26126_s0 + $0x6c0] ss:$144 sps:$4 sm:$0xff]  }
  0x48   :  { %9025 = vmatpush1.bf16.msra.mxu1 %v15944_v13  ;;  %8913 = vmatprep.subr.bf16.mxu0 %v15955_v14  ;;  %v16042_v13 = vld [vmem:[%s26126_s0 + $0x6c8] ss:$144 sps:$4 sm:$0xff]   ;;  %v16043_v14 = vld [vmem:[%s26125_s1 + $0x560] ss:$16 sps:$4 sm:$0xff]  }
  0x49   :  { %9026 = vmatprep.subr.bf16.mxu1 %v15958_v15  ;;  %v16046_v15 = vld [vmem:[%s26125_s1 + $0x760] ss:$16 sps:$4 sm:$0xff]  }
  0x4a   :  { %8726 = vmatmul.mubr.bf16.gmra.mxu0 %v15951_v16  ;;  %v16051_v16 = vld [vmem:[%s26125_s1 + $0x544] ss:$16 sps:$4 sm:$0xff]  }
  0x4b   :  { %8839 = vmatmul.mubr.bf16.gmra.mxu1 %v15952_v17  ;;  %8914 = vmatpush1.bf16.msra.mxu0 %v15953_v18  ;;  %v16054_v17 = vld [vmem:[%s26125_s1 + $0x744] ss:$16 sps:$4 sm:$0xff]  }
  0x4c   :  { %9027 = vmatpush1.bf16.msra.mxu1 %v15956_v19  ;;  %8915 = vmatprep.subr.bf16.mxu0 %v15961_v20  ;;  %v16055_v18 = vld [vmem:[%s26126_s0 + $0x7e4] ss:$144 sps:$4 sm:$0xff]   ;;  %v16057_v19 = vld [vmem:[%s26126_s0 + $0x7ec] ss:$144 sps:$4 sm:$0xff]   ;;  %v16049_v20 = vld [vmem:[%s26125_s1 + $0x540] ss:$16 sps:$4 sm:$0xff]  }
  0x4d   :  { %9028 = vmatprep.subr.bf16.mxu1 %v15964_v21  ;;  %8735 = vmatprep.mubr.bf16.mxu0 %v15965_v22  ;;  %v16052_v21 = vld [vmem:[%s26125_s1 + $0x740] ss:$16 sps:$4 sm:$0xff]   ;;  %v16063_v22 = vld [vmem:[%s26125_s1 + $0x524] ss:$16 sps:$4 sm:$0xff]  }
  0x4e   :  { %8848 = vmatprep.mubr.bf16.mxu1 %v15967_v23  ;;  %v16066_v23 = vld [vmem:[%s26125_s1 + $0x724] ss:$16 sps:$4 sm:$0xff]  }
  0x4f   :  { %8916 = vmatpush1.bf16.msra.mxu0 %v15959_v24  ;;  %v16059_v24 = vld [vmem:[%s26126_s0 + $0x7e0] ss:$144 sps:$4 sm:$0xff]  }
  0x50   :  { %9029 = vmatpush1.bf16.msra.mxu1 %v15962_v25  ;;  %8917 = vmatprep.subr.bf16.mxu0 %v15973_v26  ;;  %v16060_v25 = vld [vmem:[%s26126_s0 + $0x7e8] ss:$144 sps:$4 sm:$0xff]   ;;  %v16061_v26 = vld [vmem:[%s26125_s1 + $0x520] ss:$16 sps:$4 sm:$0xff]  }
  0x51   :  { %9030 = vmatprep.subr.bf16.mxu1 %v15976_v27  ;;  %v16064_v27 = vld [vmem:[%s26125_s1 + $0x720] ss:$16 sps:$4 sm:$0xff]  }
  0x52   :  { %8736 = vmatmul.mubr.bf16.gmra.mxu0 %v15969_v28  ;;  %v16069_v28 = vld [vmem:[%s26125_s1 + $0x504] ss:$16 sps:$4 sm:$0xff]  }
  0x53   :  { %8849 = vmatmul.mubr.bf16.gmra.mxu1 %v15970_v29  ;;  %8918 = vmatpush1.bf16.msra.mxu0 %v15971_v30  ;;  %v16072_v29 = vld [vmem:[%s26125_s1 + $0x704] ss:$16 sps:$4 sm:$0xff]  }
  0x54   :  { %9031 = vmatpush1.bf16.msra.mxu1 %v15974_v31  ;;  %8919 = vmatprep.subr.bf16.mxu0 %v15979_v32  ;;  %v16075_v30 = vld [vmem:[%s26126_s0 + $0x14] ss:$144 sps:$4 sm:$0xff]   ;;  %v16078_v31 = vld [vmem:[%s26126_s0 + $0x1c] ss:$144 sps:$4 sm:$0xff]   ;;  %v16067_v32 = vld [vmem:[%s26125_s1 + $0x500] ss:$16 sps:$4 sm:$0xff]  }
  0x55   :  { %9032 = vmatprep.subr.bf16.mxu1 %v15982_v33  ;;  %8745 = vmatprep.mubr.bf16.mxu0 %v15983_v34  ;;  %v16070_v33 = vld [vmem:[%s26125_s1 + $0x700] ss:$16 sps:$4 sm:$0xff]   ;;  %v16081_v34 = vld [vmem:[%s26125_s1 + $0x8e4] ss:$16 sps:$4 sm:$0xff]  }
  0x56   :  { %8858 = vmatprep.mubr.bf16.mxu1 %v15985_v35  ;;  %v16084_v35 = vld [vmem:[%s26125_s1 + $0xae4] ss:$16 sps:$4 sm:$0xff]  }
  0x57   :  { %8920 = vmatpush1.bf16.msra.mxu0 %v15977_v36  ;;  %v16073_v36 = vld [vmem:[%s26126_s0 + $0x10] ss:$144 sps:$4 sm:$0xff]  }
  0x58   :  { %9033 = vmatpush1.bf16.msra.mxu1 %v15980_v37  ;;  %8921 = vmatprep.subr.bf16.mxu0 %v15991_v38  ;;  %v16076_v37 = vld [vmem:[%s26126_s0 + $0x18] ss:$144 sps:$4 sm:$0xff]   ;;  %v16079_v38 = vld [vmem:[%s26125_s1 + $0x8e0] ss:$16 sps:$4 sm:$0xff]  }
  0x59   :  { %9034 = vmatprep.subr.bf16.mxu1 %v15994_v39  ;;  %v16082_v39 = vld [vmem:[%s26125_s1 + $0xae0] ss:$16 sps:$4 sm:$0xff]  }
  0x5a   :  { %8746 = vmatmul.mubr.bf16.gmra.mxu0 %v15987_v40  ;;  %v16087_v40 = vld [vmem:[%s26125_s1 + $0x8c4] ss:$16 sps:$4 sm:$0xff]  }
  0x5b   :  { %8859 = vmatmul.mubr.bf16.gmra.mxu1 %v15988_v41  ;;  %8922 = vmatpush1.bf16.msra.mxu0 %v15989_v42  ;;  %v16090_v41 = vld [vmem:[%s26125_s1 + $0xac4] ss:$16 sps:$4 sm:$0xff]  }
  0x5c   :  { %9035 = vmatpush1.bf16.msra.mxu1 %v15992_v43  ;;  %8923 = vmatprep.subr.bf16.mxu0 %v15997_v44  ;;  %v16091_v42 = vld [vmem:[%s26126_s0 + $0x134] ss:$144 sps:$4 sm:$0xff]   ;;  %v16093_v43 = vld [vmem:[%s26126_s0 + $0x13c] ss:$144 sps:$4 sm:$0xff]   ;;  %v16085_v44 = vld [vmem:[%s26125_s1 + $0x8c0] ss:$16 sps:$4 sm:$0xff]  }
  0x5d   :  { %9036 = vmatprep.subr.bf16.mxu1 %v16000_v45  ;;  %8755 = vmatprep.mubr.bf16.mxu0 %v16001_v46  ;;  %v16088_v45 = vld [vmem:[%s26125_s1 + $0xac0] ss:$16 sps:$4 sm:$0xff]   ;;  %v16099_v46 = vld [vmem:[%s26125_s1 + $0x8a4] ss:$16 sps:$4 sm:$0xff]  }
  0x5e   :  { %8868 = vmatprep.mubr.bf16.mxu1 %v16003_v47  ;;  %v16102_v47 = vld [vmem:[%s26125_s1 + $0xaa4] ss:$16 sps:$4 sm:$0xff]  }
  0x5f   :  { %8924 = vmatpush1.bf16.msra.mxu0 %v15995_v48  ;;  %v16095_v48 = vld [vmem:[%s26126_s0 + $0x130] ss:$144 sps:$4 sm:$0xff]  }
  0x60   :  { %9037 = vmatpush1.bf16.msra.mxu1 %v15998_v49  ;;  %8925 = vmatprep.subr.bf16.mxu0 %v16009_v50  ;;  %v16096_v49 = vld [vmem:[%s26126_s0 + $0x138] ss:$144 sps:$4 sm:$0xff]   ;;  %v16097_v50 = vld [vmem:[%s26125_s1 + $0x8a0] ss:$16 sps:$4 sm:$0xff]  }
  0x61   :  { %9038 = vmatprep.subr.bf16.mxu1 %v16012_v51  ;;  %v16100_v51 = vld [vmem:[%s26125_s1 + $0xaa0] ss:$16 sps:$4 sm:$0xff]  }
  0x62   :  { %8756 = vmatmul.mubr.bf16.gmra.mxu0 %v16005_v52  ;;  %v16105_v52 = vld [vmem:[%s26125_s1 + $0x884] ss:$16 sps:$4 sm:$0xff]  }
  0x63   :  { %8869 = vmatmul.mubr.bf16.gmra.mxu1 %v16006_v53  ;;  %8926 = vmatpush2.bf16.msra.mxu0 %v16007_v54  ;;  %v16108_v53 = vld [vmem:[%s26125_s1 + $0xa84] ss:$16 sps:$4 sm:$0xff]  }
  0x64   :  { %9039 = vmatpush2.bf16.msra.mxu1 %v16010_v55  ;;  %8927 = vmatprep.subr.bf16.mxu0 %v16015_v56  ;;  %v16109_v54 = vld [vmem:[%s26126_s0 + $0x254] ss:$144 sps:$4 sm:$0xff]   ;;  %v16111_v55 = vld [vmem:[%s26126_s0 + $0x25c] ss:$144 sps:$4 sm:$0xff]   ;;  %v16103_v56 = vld [vmem:[%s26125_s1 + $0x880] ss:$16 sps:$4 sm:$0xff]  }
  0x65   :  { %9040 = vmatprep.subr.bf16.mxu1 %v16018_v57  ;;  %8765 = vmatprep.mubr.bf16.mxu0 %v16019_v58  ;;  %v16106_v57 = vld [vmem:[%s26125_s1 + $0xa80] ss:$16 sps:$4 sm:$0xff]   ;;  %v16117_v58 = vld [vmem:[%s26125_s1 + $0x864] ss:$16 sps:$4 sm:$0xff]  }
  0x66   :  { %8878 = vmatprep.mubr.bf16.mxu1 %v16021_v59  ;;  %v16120_v59 = vld [vmem:[%s26125_s1 + $0xa64] ss:$16 sps:$4 sm:$0xff]  }
  0x67   :  { %8928 = vmatpush2.bf16.msra.mxu0 %v16013_v60  ;;  %v16113_v60 = vld [vmem:[%s26126_s0 + $0x250] ss:$144 sps:$4 sm:$0xff]  }
  0x68   :  { %9041 = vmatpush2.bf16.msra.mxu1 %v16016_v61  ;;  %8929 = vmatprep.subr.bf16.mxu0 %v16027_v62  ;;  %v16114_v61 = vld [vmem:[%s26126_s0 + $0x258] ss:$144 sps:$4 sm:$0xff]   ;;  %v16115_v62 = vld [vmem:[%s26125_s1 + $0x860] ss:$16 sps:$4 sm:$0xff]  }
  0x69   :  { %9042 = vmatprep.subr.bf16.mxu1 %v16030_v63  ;;  %v16118_v63 = vld [vmem:[%s26125_s1 + $0xa60] ss:$16 sps:$4 sm:$0xff]  }
  0x6a   :  { %8766 = vmatmul.mubr.bf16.gmra.mxu0 %v16023_v0  ;;  %v16123_v0 = vld [vmem:[%s26125_s1 + $0x844] ss:$16 sps:$4 sm:$0xff]  }
  0x6b   :  { %8879 = vmatmul.mubr.bf16.gmra.mxu1 %v16024_v1  ;;  %8930 = vmatpush2.bf16.msra.mxu0 %v16025_v2  ;;  %v16126_v1 = vld [vmem:[%s26125_s1 + $0xa44] ss:$16 sps:$4 sm:$0xff]  }
  0x6c   :  { %9043 = vmatpush2.bf16.msra.mxu1 %v16028_v3  ;;  %8931 = vmatprep.subr.bf16.mxu0 %v16033_v4  ;;  %v16127_v2 = vld [vmem:[%s26126_s0 + $0x374] ss:$144 sps:$4 sm:$0xff]   ;;  %v16129_v3 = vld [vmem:[%s26126_s0 + $0x37c] ss:$144 sps:$4 sm:$0xff]   ;;  %v16121_v4 = vld [vmem:[%s26125_s1 + $0x840] ss:$16 sps:$4 sm:$0xff]  }
  0x6d   :  { %9044 = vmatprep.subr.bf16.mxu1 %v16036_v5  ;;  %8775 = vmatprep.mubr.bf16.mxu0 %v16037_v6  ;;  %v16124_v5 = vld [vmem:[%s26125_s1 + $0xa40] ss:$16 sps:$4 sm:$0xff]   ;;  %v16135_v6 = vld [vmem:[%s26125_s1 + $0x824] ss:$16 sps:$4 sm:$0xff]  }
  0x6e   :  { %8888 = vmatprep.mubr.bf16.mxu1 %v16039_v7  ;;  %v16138_v7 = vld [vmem:[%s26125_s1 + $0xa24] ss:$16 sps:$4 sm:$0xff]  }
  0x6f   :  { %8932 = vmatpush2.bf16.msra.mxu0 %v16031_v8  ;;  %v16131_v8 = vld [vmem:[%s26126_s0 + $0x370] ss:$144 sps:$4 sm:$0xff]  }
  0x70   :  { %9045 = vmatpush2.bf16.msra.mxu1 %v16034_v9  ;;  %8933 = vmatprep.subr.bf16.mxu0 %v16045_v10  ;;  %v16132_v9 = vld [vmem:[%s26126_s0 + $0x378] ss:$144 sps:$4 sm:$0xff]   ;;  %v16133_v10 = vld [vmem:[%s26125_s1 + $0x820] ss:$16 sps:$4 sm:$0xff]  }
  0x71   :  { %9046 = vmatprep.subr.bf16.mxu1 %v16048_v11  ;;  %v16136_v11 = vld [vmem:[%s26125_s1 + $0xa20] ss:$16 sps:$4 sm:$0xff]  }
  0x72   :  { %8776 = vmatmul.mubr.bf16.gmra.mxu0 %v16041_v12  ;;  %v16141_v12 = vld [vmem:[%s26125_s1 + $0x804] ss:$16 sps:$4 sm:$0xff]  }
  0x73   :  { %8889 = vmatmul.mubr.bf16.gmra.mxu1 %v16042_v13  ;;  %8934 = vmatpush2.bf16.msra.mxu0 %v16043_v14  ;;  %v16144_v13 = vld [vmem:[%s26125_s1 + $0xa04] ss:$16 sps:$4 sm:$0xff]  }
  0x74   :  { %9047 = vmatpush2.bf16.msra.mxu1 %v16046_v15  ;;  %8935 = vmatprep.subr.bf16.mxu0 %v16051_v16  ;;  %v16145_v14 = vld [vmem:[%s26126_s0 + $0x494] ss:$144 sps:$4 sm:$0xff]   ;;  %v16147_v15 = vld [vmem:[%s26126_s0 + $0x49c] ss:$144 sps:$4 sm:$0xff]   ;;  %v16139_v16 = vld [vmem:[%s26125_s1 + $0x800] ss:$16 sps:$4 sm:$0xff]  }
  0x75   :  { %9048 = vmatprep.subr.bf16.mxu1 %v16054_v17  ;;  %8785 = vmatprep.mubr.bf16.mxu0 %v16055_v18  ;;  %v16142_v17 = vld [vmem:[%s26125_s1 + $0xa00] ss:$16 sps:$4 sm:$0xff]   ;;  %v16153_v18 = vld [vmem:[%s26125_s1 + $0x9e4] ss:$16 sps:$4 sm:$0xff]  }
  0x76   :  { %8898 = vmatprep.mubr.bf16.mxu1 %v16057_v19  ;;  %v16156_v19 = vld [vmem:[%s26125_s1 + $0xbe4] ss:$16 sps:$4 sm:$0xff]  }
  0x77   :  { %8936 = vmatpush2.bf16.msra.mxu0 %v16049_v20  ;;  %v16149_v20 = vld [vmem:[%s26126_s0 + $0x490] ss:$144 sps:$4 sm:$0xff]  }
  0x78   :  { %9049 = vmatpush2.bf16.msra.mxu1 %v16052_v21  ;;  %8937 = vmatprep.subr.bf16.mxu0 %v16063_v22  ;;  %v16150_v21 = vld [vmem:[%s26126_s0 + $0x498] ss:$144 sps:$4 sm:$0xff]   ;;  %v16151_v22 = vld [vmem:[%s26125_s1 + $0x9e0] ss:$16 sps:$4 sm:$0xff]  }
  0x79   :  { %9050 = vmatprep.subr.bf16.mxu1 %v16066_v23  ;;  %v16154_v23 = vld [vmem:[%s26125_s1 + $0xbe0] ss:$16 sps:$4 sm:$0xff]  }
  0x7a   :  { %8786 = vmatmul.mubr.bf16.gmra.mxu0 %v16059_v24  ;;  %v16159_v24 = vld [vmem:[%s26125_s1 + $0x9c4] ss:$16 sps:$4 sm:$0xff]  }
  0x7b   :  { %8899 = vmatmul.mubr.bf16.gmra.mxu1 %v16060_v25  ;;  %8938 = vmatpush2.bf16.msra.mxu0 %v16061_v26  ;;  %v16162_v25 = vld [vmem:[%s26125_s1 + $0xbc4] ss:$16 sps:$4 sm:$0xff]  }
  0x7c   :  { %9051 = vmatpush2.bf16.msra.mxu1 %v16064_v27  ;;  %8939 = vmatprep.subr.bf16.mxu0 %v16069_v28  ;;  %v16163_v26 = vld [vmem:[%s26126_s0 + $0x5b4] ss:$144 sps:$4 sm:$0xff]   ;;  %v16165_v27 = vld [vmem:[%s26126_s0 + $0x5bc] ss:$144 sps:$4 sm:$0xff]   ;;  %v16157_v28 = vld [vmem:[%s26125_s1 + $0x9c0] ss:$16 sps:$4 sm:$0xff]  }
  0x7d   :  { %9052 = vmatprep.subr.bf16.mxu1 %v16072_v29  ;;  %8941 = vmatprep.mubr.bf16.mxu0 %v16075_v30  ;;  %v16160_v29 = vld [vmem:[%s26125_s1 + $0xbc0] ss:$16 sps:$4 sm:$0xff]   ;;  %v16171_v30 = vld [vmem:[%s26125_s1 + $0x9a4] ss:$16 sps:$4 sm:$0xff]  }
  0x7e   :  { %9054 = vmatprep.mubr.bf16.mxu1 %v16078_v31  ;;  %v16174_v31 = vld [vmem:[%s26125_s1 + $0xba4] ss:$16 sps:$4 sm:$0xff]  }
  0x7f   :  { %8940 = vmatpush2.bf16.msra.mxu0 %v16067_v32  ;;  %v16167_v32 = vld [vmem:[%s26126_s0 + $0x5b0] ss:$144 sps:$4 sm:$0xff]  }
  0x80   :  { %9053 = vmatpush2.bf16.msra.mxu1 %v16070_v33  ;;  %9135 = vmatprep.subr.bf16.mxu0 %v16081_v34  ;;  %v16168_v33 = vld [vmem:[%s26126_s0 + $0x5b8] ss:$144 sps:$4 sm:$0xff]   ;;  %v16169_v34 = vld [vmem:[%s26125_s1 + $0x9a0] ss:$16 sps:$4 sm:$0xff]  }
  0x81   :  { %9248 = vmatprep.subr.bf16.mxu1 %v16084_v35  ;;  %v16172_v35 = vld [vmem:[%s26125_s1 + $0xba0] ss:$16 sps:$4 sm:$0xff]  }
  0x82   :  { %8942 = vmatmul.mubr.bf16.vlgmr.msra.gmra.mxu0 %v16073_v36  ;;  %v16177_v36 = vld [vmem:[%s26125_s1 + $0x984] ss:$16 sps:$4 sm:$0xff]  }
  0x83   :  { %9055 = vmatmul.mubr.bf16.vlgmr.msra.gmra.mxu1 %v16076_v37  ;;  %9136 = vmatpush1.bf16.msra.mxu0 %v16079_v38  ;;  %v16180_v37 = vld [vmem:[%s26125_s1 + $0xb84] ss:$16 sps:$4 sm:$0xff]  }
  0x84   :  { %9249 = vmatpush1.bf16.msra.mxu1 %v16082_v39  ;;  %9137 = vmatprep.subr.bf16.mxu0 %v16087_v40  ;;  %v16181_v38 = vld [vmem:[%s26126_s0 + $0x6d4] ss:$144 sps:$4 sm:$0xff]   ;;  %v16183_v39 = vld [vmem:[%s26126_s0 + $0x6dc] ss:$144 sps:$4 sm:$0xff]   ;;  %v16175_v40 = vld [vmem:[%s26125_s1 + $0x980] ss:$16 sps:$4 sm:$0xff]  }
  0x85   :  { %9250 = vmatprep.subr.bf16.mxu1 %v16090_v41  ;;  %8951 = vmatprep.mubr.bf16.mxu0 %v16091_v42  ;;  %v16178_v41 = vld [vmem:[%s26125_s1 + $0xb80] ss:$16 sps:$4 sm:$0xff]   ;;  %v16189_v42 = vld [vmem:[%s26125_s1 + $0x964] ss:$16 sps:$4 sm:$0xff]  }
  0x86   :  { %9064 = vmatprep.mubr.bf16.mxu1 %v16093_v43  ;;  %v16192_v43 = vld [vmem:[%s26125_s1 + $0xb64] ss:$16 sps:$4 sm:$0xff]  }
  0x87   :  { %9138 = vmatpush1.bf16.msra.mxu0 %v16085_v44  ;;  %v16185_v44 = vld [vmem:[%s26126_s0 + $0x6d0] ss:$144 sps:$4 sm:$0xff]  }
  0x88   :  { %9251 = vmatpush1.bf16.msra.mxu1 %v16088_v45  ;;  %9139 = vmatprep.subr.bf16.mxu0 %v16099_v46  ;;  %v16186_v45 = vld [vmem:[%s26126_s0 + $0x6d8] ss:$144 sps:$4 sm:$0xff]   ;;  %v16187_v46 = vld [vmem:[%s26125_s1 + $0x960] ss:$16 sps:$4 sm:$0xff]  }
  0x89   :  { %9252 = vmatprep.subr.bf16.mxu1 %v16102_v47  ;;  %v16190_v47 = vld [vmem:[%s26125_s1 + $0xb60] ss:$16 sps:$4 sm:$0xff]  }
  0x8a   :  { %8952 = vmatmul.mubr.bf16.gmra.mxu0 %v16095_v48  ;;  %v16195_v48 = vld [vmem:[%s26125_s1 + $0x944] ss:$16 sps:$4 sm:$0xff]  }
  0x8b   :  { %9065 = vmatmul.mubr.bf16.gmra.mxu1 %v16096_v49  ;;  %9140 = vmatpush1.bf16.msra.mxu0 %v16097_v50  ;;  %v16198_v49 = vld [vmem:[%s26125_s1 + $0xb44] ss:$16 sps:$4 sm:$0xff]  }
  0x8c   :  { %9253 = vmatpush1.bf16.msra.mxu1 %v16100_v51  ;;  %9141 = vmatprep.subr.bf16.mxu0 %v16105_v52  ;;  %v16199_v50 = vld [vmem:[%s26126_s0 + $0x7f4] ss:$144 sps:$4 sm:$0xff]   ;;  %v16201_v51 = vld [vmem:[%s26126_s0 + $0x7fc] ss:$144 sps:$4 sm:$0xff]   ;;  %v16193_v52 = vld [vmem:[%s26125_s1 + $0x940] ss:$16 sps:$4 sm:$0xff]  }
  0x8d   :  { %9254 = vmatprep.subr.bf16.mxu1 %v16108_v53  ;;  %8961 = vmatprep.mubr.bf16.mxu0 %v16109_v54  ;;  %v16196_v53 = vld [vmem:[%s26125_s1 + $0xb40] ss:$16 sps:$4 sm:$0xff]   ;;  %v16207_v54 = vld [vmem:[%s26125_s1 + $0x924] ss:$16 sps:$4 sm:$0xff]  }
  0x8e   :  { %9074 = vmatprep.mubr.bf16.mxu1 %v16111_v55  ;;  %v16210_v55 = vld [vmem:[%s26125_s1 + $0xb24] ss:$16 sps:$4 sm:$0xff]  }
  0x8f   :  { %9142 = vmatpush1.bf16.msra.mxu0 %v16103_v56  ;;  %v16203_v56 = vld [vmem:[%s26126_s0 + $0x7f0] ss:$144 sps:$4 sm:$0xff]  }
  0x90   :  { %9255 = vmatpush1.bf16.msra.mxu1 %v16106_v57  ;;  %9143 = vmatprep.subr.bf16.mxu0 %v16117_v58  ;;  %v16204_v57 = vld [vmem:[%s26126_s0 + $0x7f8] ss:$144 sps:$4 sm:$0xff]   ;;  %v16205_v58 = vld [vmem:[%s26125_s1 + $0x920] ss:$16 sps:$4 sm:$0xff]  }
  0x91   :  { %9256 = vmatprep.subr.bf16.mxu1 %v16120_v59  ;;  %v16208_v59 = vld [vmem:[%s26125_s1 + $0xb20] ss:$16 sps:$4 sm:$0xff]  }
  0x92   :  { %8962 = vmatmul.mubr.bf16.gmra.mxu0 %v16113_v60  ;;  %v16213_v60 = vld [vmem:[%s26125_s1 + $0x904] ss:$16 sps:$4 sm:$0xff]  }
  0x93   :  { %9075 = vmatmul.mubr.bf16.gmra.mxu1 %v16114_v61  ;;  %9144 = vmatpush1.bf16.msra.mxu0 %v16115_v62  ;;  %v16216_v61 = vld [vmem:[%s26125_s1 + $0xb04] ss:$16 sps:$4 sm:$0xff]  }
  0x94   :  { %9257 = vmatpush1.bf16.msra.mxu1 %v16118_v63  ;;  %9145 = vmatprep.subr.bf16.mxu0 %v16123_v0  ;;  %v16219_v62 = vld [vmem:[%s26126_s0 + $0x24] ss:$144 sps:$4 sm:$0xff]   ;;  %v16222_v63 = vld [vmem:[%s26126_s0 + $0x2c] ss:$144 sps:$4 sm:$0xff]   ;;  %v16211_v0 = vld [vmem:[%s26125_s1 + $0x900] ss:$16 sps:$4 sm:$0xff]  }
  0x95   :  { %9258 = vmatprep.subr.bf16.mxu1 %v16126_v1  ;;  %8971 = vmatprep.mubr.bf16.mxu0 %v16127_v2  ;;  %v16214_v1 = vld [vmem:[%s26125_s1 + $0xb00] ss:$16 sps:$4 sm:$0xff]   ;;  %v16225_v2 = vld [vmem:[%s26125_s1 + $0xce4] ss:$16 sps:$4 sm:$0xff]  }
  0x96   :  { %9084 = vmatprep.mubr.bf16.mxu1 %v16129_v3  ;;  %v16228_v3 = vld [vmem:[%s26125_s1 + $0xee4] ss:$16 sps:$4 sm:$0xff]  }
  0x97   :  { %9146 = vmatpush1.bf16.msra.mxu0 %v16121_v4  ;;  %v16217_v4 = vld [vmem:[%s26126_s0 + $0x20] ss:$144 sps:$4 sm:$0xff]  }
  0x98   :  { %9259 = vmatpush1.bf16.msra.mxu1 %v16124_v5  ;;  %9147 = vmatprep.subr.bf16.mxu0 %v16135_v6  ;;  %v16220_v5 = vld [vmem:[%s26126_s0 + $0x28] ss:$144 sps:$4 sm:$0xff]   ;;  %v16223_v6 = vld [vmem:[%s26125_s1 + $0xce0] ss:$16 sps:$4 sm:$0xff]  }
  0x99   :  { %9260 = vmatprep.subr.bf16.mxu1 %v16138_v7  ;;  %v16226_v7 = vld [vmem:[%s26125_s1 + $0xee0] ss:$16 sps:$4 sm:$0xff]  }
  0x9a   :  { %8972 = vmatmul.mubr.bf16.gmra.mxu0 %v16131_v8  ;;  %v16231_v8 = vld [vmem:[%s26125_s1 + $0xcc4] ss:$16 sps:$4 sm:$0xff]  }
  0x9b   :  { %9085 = vmatmul.mubr.bf16.gmra.mxu1 %v16132_v9  ;;  %9148 = vmatpush1.bf16.msra.mxu0 %v16133_v10  ;;  %v16234_v9 = vld [vmem:[%s26125_s1 + $0xec4] ss:$16 sps:$4 sm:$0xff]  }
  0x9c   :  { %9261 = vmatpush1.bf16.msra.mxu1 %v16136_v11  ;;  %9149 = vmatprep.subr.bf16.mxu0 %v16141_v12  ;;  %v16235_v10 = vld [vmem:[%s26126_s0 + $0x144] ss:$144 sps:$4 sm:$0xff]   ;;  %v16237_v11 = vld [vmem:[%s26126_s0 + $0x14c] ss:$144 sps:$4 sm:$0xff]   ;;  %v16229_v12 = vld [vmem:[%s26125_s1 + $0xcc0] ss:$16 sps:$4 sm:$0xff]  }
  0x9d   :  { %9262 = vmatprep.subr.bf16.mxu1 %v16144_v13  ;;  %8981 = vmatprep.mubr.bf16.mxu0 %v16145_v14  ;;  %v16232_v13 = vld [vmem:[%s26125_s1 + $0xec0] ss:$16 sps:$4 sm:$0xff]   ;;  %v16243_v14 = vld [vmem:[%s26125_s1 + $0xca4] ss:$16 sps:$4 sm:$0xff]  }
  0x9e   :  { %9094 = vmatprep.mubr.bf16.mxu1 %v16147_v15  ;;  %v16246_v15 = vld [vmem:[%s26125_s1 + $0xea4] ss:$16 sps:$4 sm:$0xff]  }
  0x9f   :  { %9150 = vmatpush1.bf16.msra.mxu0 %v16139_v16  ;;  %v16239_v16 = vld [vmem:[%s26126_s0 + $0x140] ss:$144 sps:$4 sm:$0xff]  }
  0xa0   :  { %9263 = vmatpush1.bf16.msra.mxu1 %v16142_v17  ;;  %9151 = vmatprep.subr.bf16.mxu0 %v16153_v18  ;;  %v16240_v17 = vld [vmem:[%s26126_s0 + $0x148] ss:$144 sps:$4 sm:$0xff]   ;;  %v16241_v18 = vld [vmem:[%s26125_s1 + $0xca0] ss:$16 sps:$4 sm:$0xff]  }
  0xa1   :  { %9264 = vmatprep.subr.bf16.mxu1 %v16156_v19  ;;  %v16244_v19 = vld [vmem:[%s26125_s1 + $0xea0] ss:$16 sps:$4 sm:$0xff]  }
  0xa2   :  { %8982 = vmatmul.mubr.bf16.gmra.mxu0 %v16149_v20  ;;  %v16249_v20 = vld [vmem:[%s26125_s1 + $0xc84] ss:$16 sps:$4 sm:$0xff]  }
  0xa3   :  { %9095 = vmatmul.mubr.bf16.gmra.mxu1 %v16150_v21  ;;  %9152 = vmatpush2.bf16.msra.mxu0 %v16151_v22  ;;  %v16252_v21 = vld [vmem:[%s26125_s1 + $0xe84] ss:$16 sps:$4 sm:$0xff]  }
  0xa4   :  { %9265 = vmatpush2.bf16.msra.mxu1 %v16154_v23  ;;  %9153 = vmatprep.subr.bf16.mxu0 %v16159_v24  ;;  %v16253_v22 = vld [vmem:[%s26126_s0 + $0x264] ss:$144 sps:$4 sm:$0xff]   ;;  %v16255_v23 = vld [vmem:[%s26126_s0 + $0x26c] ss:$144 sps:$4 sm:$0xff]   ;;  %v16247_v24 = vld [vmem:[%s26125_s1 + $0xc80] ss:$16 sps:$4 sm:$0xff]  }
  0xa5   :  { %9266 = vmatprep.subr.bf16.mxu1 %v16162_v25  ;;  %8991 = vmatprep.mubr.bf16.mxu0 %v16163_v26  ;;  %v16250_v25 = vld [vmem:[%s26125_s1 + $0xe80] ss:$16 sps:$4 sm:$0xff]   ;;  %v16261_v26 = vld [vmem:[%s26125_s1 + $0xc64] ss:$16 sps:$4 sm:$0xff]  }
  0xa6   :  { %9104 = vmatprep.mubr.bf16.mxu1 %v16165_v27  ;;  %v16264_v27 = vld [vmem:[%s26125_s1 + $0xe64] ss:$16 sps:$4 sm:$0xff]  }
  0xa7   :  { %9154 = vmatpush2.bf16.msra.mxu0 %v16157_v28  ;;  %v16257_v28 = vld [vmem:[%s26126_s0 + $0x260] ss:$144 sps:$4 sm:$0xff]  }
  0xa8   :  { %9267 = vmatpush2.bf16.msra.mxu1 %v16160_v29  ;;  %9155 = vmatprep.subr.bf16.mxu0 %v16171_v30  ;;  %v16258_v29 = vld [vmem:[%s26126_s0 + $0x268] ss:$144 sps:$4 sm:$0xff]   ;;  %v16259_v30 = vld [vmem:[%s26125_s1 + $0xc60] ss:$16 sps:$4 sm:$0xff]  }
  0xa9   :  { %9268 = vmatprep.subr.bf16.mxu1 %v16174_v31  ;;  %v16262_v31 = vld [vmem:[%s26125_s1 + $0xe60] ss:$16 sps:$4 sm:$0xff]  }
  0xaa   :  { %8992 = vmatmul.mubr.bf16.gmra.mxu0 %v16167_v32  ;;  %v16267_v32 = vld [vmem:[%s26125_s1 + $0xc44] ss:$16 sps:$4 sm:$0xff]  }
  0xab   :  { %9105 = vmatmul.mubr.bf16.gmra.mxu1 %v16168_v33  ;;  %9156 = vmatpush2.bf16.msra.mxu0 %v16169_v34  ;;  %v16270_v33 = vld [vmem:[%s26125_s1 + $0xe44] ss:$16 sps:$4 sm:$0xff]  }
  0xac   :  { %9269 = vmatpush2.bf16.msra.mxu1 %v16172_v35  ;;  %9157 = vmatprep.subr.bf16.mxu0 %v16177_v36  ;;  %v16271_v34 = vld [vmem:[%s26126_s0 + $0x384] ss:$144 sps:$4 sm:$0xff]   ;;  %v16273_v35 = vld [vmem:[%s26126_s0 + $0x38c] ss:$144 sps:$4 sm:$0xff]   ;;  %v16265_v36 = vld [vmem:[%s26125_s1 + $0xc40] ss:$16 sps:$4 sm:$0xff]  }
  0xad   :  { %9270 = vmatprep.subr.bf16.mxu1 %v16180_v37  ;;  %9001 = vmatprep.mubr.bf16.mxu0 %v16181_v38  ;;  %v16268_v37 = vld [vmem:[%s26125_s1 + $0xe40] ss:$16 sps:$4 sm:$0xff]   ;;  %v16279_v38 = vld [vmem:[%s26125_s1 + $0xc24] ss:$16 sps:$4 sm:$0xff]  }
  0xae   :  { %9114 = vmatprep.mubr.bf16.mxu1 %v16183_v39  ;;  %v16282_v39 = vld [vmem:[%s26125_s1 + $0xe24] ss:$16 sps:$4 sm:$0xff]  }
  0xaf   :  { %9158 = vmatpush2.bf16.msra.mxu0 %v16175_v40  ;;  %v16275_v40 = vld [vmem:[%s26126_s0 + $0x380] ss:$144 sps:$4 sm:$0xff]  }
  0xb0   :  { %9271 = vmatpush2.bf16.msra.mxu1 %v16178_v41  ;;  %9159 = vmatprep.subr.bf16.mxu0 %v16189_v42  ;;  %v16276_v41 = vld [vmem:[%s26126_s0 + $0x388] ss:$144 sps:$4 sm:$0xff]   ;;  %v16277_v42 = vld [vmem:[%s26125_s1 + $0xc20] ss:$16 sps:$4 sm:$0xff]  }
  0xb1   :  { %9272 = vmatprep.subr.bf16.mxu1 %v16192_v43  ;;  %v16280_v43 = vld [vmem:[%s26125_s1 + $0xe20] ss:$16 sps:$4 sm:$0xff]  }
  0xb2   :  { %9002 = vmatmul.mubr.bf16.gmra.mxu0 %v16185_v44  ;;  %v16285_v44 = vld [vmem:[%s26125_s1 + $0xc04] ss:$16 sps:$4 sm:$0xff]  }
  0xb3   :  { %9115 = vmatmul.mubr.bf16.gmra.mxu1 %v16186_v45  ;;  %9160 = vmatpush2.bf16.msra.mxu0 %v16187_v46  ;;  %v16288_v45 = vld [vmem:[%s26125_s1 + $0xe04] ss:$16 sps:$4 sm:$0xff]  }
  0xb4   :  { %9273 = vmatpush2.bf16.msra.mxu1 %v16190_v47  ;;  %9161 = vmatprep.subr.bf16.mxu0 %v16195_v48  ;;  %v16289_v46 = vld [vmem:[%s26126_s0 + $0x4a4] ss:$144 sps:$4 sm:$0xff]   ;;  %v16291_v47 = vld [vmem:[%s26126_s0 + $0x4ac] ss:$144 sps:$4 sm:$0xff]   ;;  %v16283_v48 = vld [vmem:[%s26125_s1 + $0xc00] ss:$16 sps:$4 sm:$0xff]  }
  0xb5   :  { %9274 = vmatprep.subr.bf16.mxu1 %v16198_v49  ;;  %9011 = vmatprep.mubr.bf16.mxu0 %v16199_v50  ;;  %v16286_v49 = vld [vmem:[%s26125_s1 + $0xe00] ss:$16 sps:$4 sm:$0xff]   ;;  %v16297_v50 = vld [vmem:[%s26125_s1 + $0xde4] ss:$16 sps:$4 sm:$0xff]  }
  0xb6   :  { %9124 = vmatprep.mubr.bf16.mxu1 %v16201_v51  ;;  %v16300_v51 = vld [vmem:[%s26125_s1 + $0xfe4] ss:$16 sps:$4 sm:$0xff]  }
  0xb7   :  { %9162 = vmatpush2.bf16.msra.mxu0 %v16193_v52  ;;  %v16293_v52 = vld [vmem:[%s26126_s0 + $0x4a0] ss:$144 sps:$4 sm:$0xff]  }
  0xb8   :  { %9275 = vmatpush2.bf16.msra.mxu1 %v16196_v53  ;;  %9163 = vmatprep.subr.bf16.mxu0 %v16207_v54  ;;  %v16294_v53 = vld [vmem:[%s26126_s0 + $0x4a8] ss:$144 sps:$4 sm:$0xff]   ;;  %v16295_v54 = vld [vmem:[%s26125_s1 + $0xde0] ss:$16 sps:$4 sm:$0xff]  }
  0xb9   :  { %9276 = vmatprep.subr.bf16.mxu1 %v16210_v55  ;;  %v16298_v55 = vld [vmem:[%s26125_s1 + $0xfe0] ss:$16 sps:$4 sm:$0xff]  }
  0xba   :  { %9012 = vmatmul.mubr.bf16.gmra.mxu0 %v16203_v56  ;;  %v16303_v56 = vld [vmem:[%s26125_s1 + $0xdc4] ss:$16 sps:$4 sm:$0xff]  }
  0xbb   :  { %9125 = vmatmul.mubr.bf16.gmra.mxu1 %v16204_v57  ;;  %9164 = vmatpush2.bf16.msra.mxu0 %v16205_v58  ;;  %v16306_v57 = vld [vmem:[%s26125_s1 + $0xfc4] ss:$16 sps:$4 sm:$0xff]  }
  0xbc   :  { %9277 = vmatpush2.bf16.msra.mxu1 %v16208_v59  ;;  %9165 = vmatprep.subr.bf16.mxu0 %v16213_v60  ;;  %v16307_v58 = vld [vmem:[%s26126_s0 + $0x5c4] ss:$144 sps:$4 sm:$0xff]   ;;  %v16309_v59 = vld [vmem:[%s26126_s0 + $0x5cc] ss:$144 sps:$4 sm:$0xff]   ;;  %v16301_v60 = vld [vmem:[%s26125_s1 + $0xdc0] ss:$16 sps:$4 sm:$0xff]  }
  0xbd   :  { %9278 = vmatprep.subr.bf16.mxu1 %v16216_v61  ;;  %9167 = vmatprep.mubr.bf16.mxu0 %v16219_v62  ;;  %v16304_v61 = vld [vmem:[%s26125_s1 + $0xfc0] ss:$16 sps:$4 sm:$0xff]   ;;  %v16315_v62 = vld [vmem:[%s26125_s1 + $0xda4] ss:$16 sps:$4 sm:$0xff]  }
  0xbe   :  { %9280 = vmatprep.mubr.bf16.mxu1 %v16222_v63  ;;  %v16318_v63 = vld [vmem:[%s26125_s1 + $0xfa4] ss:$16 sps:$4 sm:$0xff]  }
  0xbf   :  { %9166 = vmatpush2.bf16.msra.mxu0 %v16211_v0  ;;  %v16311_v0 = vld [vmem:[%s26126_s0 + $0x5c0] ss:$144 sps:$4 sm:$0xff]  }
  0xc0   :  { %9279 = vmatpush2.bf16.msra.mxu1 %v16214_v1  ;;  %9361 = vmatprep.subr.bf16.mxu0 %v16225_v2  ;;  %v16312_v1 = vld [vmem:[%s26126_s0 + $0x5c8] ss:$144 sps:$4 sm:$0xff]   ;;  %v16313_v2 = vld [vmem:[%s26125_s1 + $0xda0] ss:$16 sps:$4 sm:$0xff]  }
  0xc1   :  { %9474 = vmatprep.subr.bf16.mxu1 %v16228_v3  ;;  %v16316_v3 = vld [vmem:[%s26125_s1 + $0xfa0] ss:$16 sps:$4 sm:$0xff]  }
  0xc2   :  { %9168 = vmatmul.mubr.bf16.vlgmr.msra.gmra.mxu0 %v16217_v4  ;;  %v16321_v4 = vld [vmem:[%s26125_s1 + $0xd84] ss:$16 sps:$4 sm:$0xff]  }
  0xc3   :  { %9281 = vmatmul.mubr.bf16.vlgmr.msra.gmra.mxu1 %v16220_v5  ;;  %9362 = vmatpush1.bf16.msra.mxu0 %v16223_v6  ;;  %v16324_v5 = vld [vmem:[%s26125_s1 + $0xf84] ss:$16 sps:$4 sm:$0xff]  }
  0xc4   :  { %9475 = vmatpush1.bf16.msra.mxu1 %v16226_v7  ;;  %9363 = vmatprep.subr.bf16.mxu0 %v16231_v8  ;;  %v16325_v6 = vld [vmem:[%s26126_s0 + $0x6e4] ss:$144 sps:$4 sm:$0xff]   ;;  %v16327_v7 = vld [vmem:[%s26126_s0 + $0x6ec] ss:$144 sps:$4 sm:$0xff]   ;;  %v16319_v8 = vld [vmem:[%s26125_s1 + $0xd80] ss:$16 sps:$4 sm:$0xff]  }
  0xc5   :  { %9476 = vmatprep.subr.bf16.mxu1 %v16234_v9  ;;  %9177 = vmatprep.mubr.bf16.mxu0 %v16235_v10  ;;  %v16322_v9 = vld [vmem:[%s26125_s1 + $0xf80] ss:$16 sps:$4 sm:$0xff]   ;;  %v16333_v10 = vld [vmem:[%s26125_s1 + $0xd64] ss:$16 sps:$4 sm:$0xff]  }
  0xc6   :  { %9290 = vmatprep.mubr.bf16.mxu1 %v16237_v11  ;;  %v16336_v11 = vld [vmem:[%s26125_s1 + $0xf64] ss:$16 sps:$4 sm:$0xff]  }
  0xc7   :  { %9364 = vmatpush1.bf16.msra.mxu0 %v16229_v12  ;;  %v16329_v12 = vld [vmem:[%s26126_s0 + $0x6e0] ss:$144 sps:$4 sm:$0xff]  }
  0xc8   :  { %9477 = vmatpush1.bf16.msra.mxu1 %v16232_v13  ;;  %9365 = vmatprep.subr.bf16.mxu0 %v16243_v14  ;;  %v16330_v13 = vld [vmem:[%s26126_s0 + $0x6e8] ss:$144 sps:$4 sm:$0xff]   ;;  %v16331_v14 = vld [vmem:[%s26125_s1 + $0xd60] ss:$16 sps:$4 sm:$0xff]  }
  0xc9   :  { %9478 = vmatprep.subr.bf16.mxu1 %v16246_v15  ;;  %v16334_v15 = vld [vmem:[%s26125_s1 + $0xf60] ss:$16 sps:$4 sm:$0xff]  }
  0xca   :  { %9178 = vmatmul.mubr.bf16.gmra.mxu0 %v16239_v16  ;;  %v16339_v16 = vld [vmem:[%s26125_s1 + $0xd44] ss:$16 sps:$4 sm:$0xff]  }
  0xcb   :  { %9291 = vmatmul.mubr.bf16.gmra.mxu1 %v16240_v17  ;;  %9366 = vmatpush1.bf16.msra.mxu0 %v16241_v18  ;;  %v16342_v17 = vld [vmem:[%s26125_s1 + $0xf44] ss:$16 sps:$4 sm:$0xff]  }
  0xcc   :  { %9479 = vmatpush1.bf16.msra.mxu1 %v16244_v19  ;;  %9367 = vmatprep.subr.bf16.mxu0 %v16249_v20  ;;  %v16343_v18 = vld [vmem:[%s26126_s0 + $0x804] ss:$144 sps:$4 sm:$0xff]   ;;  %v16345_v19 = vld [vmem:[%s26126_s0 + $0x80c] ss:$144 sps:$4 sm:$0xff]   ;;  %v16337_v20 = vld [vmem:[%s26125_s1 + $0xd40] ss:$16 sps:$4 sm:$0xff]  }
  0xcd   :  { %9480 = vmatprep.subr.bf16.mxu1 %v16252_v21  ;;  %9187 = vmatprep.mubr.bf16.mxu0 %v16253_v22  ;;  %v16340_v21 = vld [vmem:[%s26125_s1 + $0xf40] ss:$16 sps:$4 sm:$0xff]   ;;  %v1463_v22 = vlaneseq }
  0xce   :  { %9300 = vmatprep.mubr.bf16.mxu1 %v16255_v23  ;;  %v16351_v23 = vld [vmem:[%s26125_s1 + $0xd24] ss:$16 sps:$4 sm:$0xff]  }
  0xcf   :  { %9368 = vmatpush1.bf16.msra.mxu0 %v16247_v24  ;;  %v16354_v24 = vld [vmem:[%s26125_s1 + $0xf24] ss:$16 sps:$4 sm:$0xff]  }
  0xd0   :  { %9481 = vmatpush1.bf16.msra.mxu1 %v16250_v25  ;;  %9369 = vmatprep.subr.bf16.mxu0 %v16261_v26  ;;  %v16347_v25 = vld [vmem:[%s26126_s0 + $0x800] ss:$144 sps:$4 sm:$0xff]   ;;  %v16348_v26 = vld [vmem:[%s26126_s0 + $0x808] ss:$144 sps:$4 sm:$0xff]  }
  0xd1   :  { %9482 = vmatprep.subr.bf16.mxu1 %v16264_v27  ;;  %v16349_v27 = vld [vmem:[%s26125_s1 + $0xd20] ss:$16 sps:$4 sm:$0xff]  }
  0xd2   :  { %9188 = vmatmul.mubr.bf16.gmra.mxu0 %v16257_v28  ;;  %v16352_v28 = vld [vmem:[%s26125_s1 + $0xf20] ss:$16 sps:$4 sm:$0xff]  }
  0xd3   :  { %9301 = vmatmul.mubr.bf16.gmra.mxu1 %v16258_v29  ;;  %9370 = vmatpush1.bf16.msra.mxu0 %v16259_v30  ;;  %v19453_v29 = vshrl.u32 %v1463_v22, 7  ;;  %v16357_v30 = vld [vmem:[%s26125_s1 + $0xd04] ss:$16 sps:$4 sm:$0xff]  }
  0xd4   :  { %9483 = vmatpush1.bf16.msra.mxu1 %v16262_v31  ;;  %9371 = vmatprep.subr.bf16.mxu0 %v16267_v32  ;;  %v16360_v31 = vld [vmem:[%s26125_s1 + $0xf04] ss:$16 sps:$4 sm:$0xff]   ;;  %v16355_v32 = vld [vmem:[%s26125_s1 + $0xd00] ss:$16 sps:$4 sm:$0xff]  }
  0xd5   :  { %9484 = vmatprep.subr.bf16.mxu1 %v16270_v33  ;;  %9197 = vmatprep.mubr.bf16.mxu0 %v16271_v34  ;;  %v16363_v33 = vld [vmem:[%s26126_s0 + $0x34] ss:$144 sps:$4 sm:$0xff]   ;;  %v16366_v34 = vld [vmem:[%s26126_s0 + $0x3c] ss:$144 sps:$4 sm:$0xff]  }
  0xd6   :  { %9310 = vmatprep.mubr.bf16.mxu1 %v16273_v35  ;;  %v16358_v35 = vld [vmem:[%s26125_s1 + $0xf00] ss:$16 sps:$4 sm:$0xff]   ;;  %v16405_v22 = vld [vmem:[%s26125_s1 + $0x1064] ss:$16 sps:$4 sm:$0xff]  }
  0xd7   :  { %9372 = vmatpush1.bf16.msra.mxu0 %v16265_v36  ;;  %v1461_v36 = vld [vmem:[%s26127_s2] sm:$0xf] }
  0xd8   :  { %9485 = vmatpush1.bf16.msra.mxu1 %v16268_v37  ;;  %9373 = vmatprep.subr.bf16.mxu0 %v16279_v38  ;;  %v1465_v37 = vsub.s32 0, %v19453_v29  ;;  %v16369_v38 = vld [vmem:[%s26125_s1 + $0x10e4] ss:$16 sps:$4 sm:$0xff]  }
  0xd9   :  { %9486 = vmatprep.subr.bf16.mxu1 %v16282_v39  ;;  %v16372_v39 = vld [vmem:[%s26125_s1 + $0x12e4] ss:$16 sps:$4 sm:$0xff]  }
  0xda   :  { %9198 = vmatmul.mubr.bf16.gmra.mxu0 %v16275_v40  ;;  %v16361_v40 = vld [vmem:[%s26126_s0 + $0x30] ss:$144 sps:$4 sm:$0xff]  }
  0xdb   :  { %9311 = vmatmul.mubr.bf16.gmra.mxu1 %v16276_v41  ;;  %9374 = vmatpush1.bf16.msra.mxu0 %v16277_v42  ;;  %v16364_v41 = vld [vmem:[%s26126_s0 + $0x38] ss:$144 sps:$4 sm:$0xff]   ;;  %v1469_v42 = vsub.s32 1, %v19453_v29 }
  0xdc   :  { %9487 = vmatpush1.bf16.msra.mxu1 %v16280_v43  ;;  %9375 = vmatprep.subr.bf16.mxu0 %v16285_v44  ;;  %v16367_v43 = vld [vmem:[%s26125_s1 + $0x10e0] ss:$16 sps:$4 sm:$0xff]   ;;  %v19493_v44 = vrot.slane %v1461_v36, %v1465_v37  ;;  %v16411_v37 = vld [vmem:[%s26125_s1 + $0x1044] ss:$16 sps:$4 sm:$0xff]  }
  0xdd   :  { %9488 = vmatprep.subr.bf16.mxu1 %v16288_v45  ;;  %9207 = vmatprep.mubr.bf16.mxu0 %v16289_v46  ;;  %v16370_v45 = vld [vmem:[%s26125_s1 + $0x12e0] ss:$16 sps:$4 sm:$0xff]   ;;  %v16375_v46 = vld [vmem:[%s26125_s1 + $0x10c4] ss:$16 sps:$4 sm:$0xff]  }
  0xde   :  { %9320 = vmatprep.mubr.bf16.mxu1 %v16291_v47  ;;  %v16378_v47 = vld [vmem:[%s26125_s1 + $0x12c4] ss:$16 sps:$4 sm:$0xff]  }
  0xdf   :  { %9376 = vmatpush1.bf16.msra.mxu0 %v16283_v48  ;;  %v19504_v48 = vrot.slane %v1461_v36, %v1469_v42  ;;  %v16417_v42 = vld [vmem:[%s26126_s0 + $0x39c] ss:$144 sps:$4 sm:$0xff]  }
  0xe0   :  { %9489 = vmatpush1.bf16.msra.mxu1 %v16286_v49  ;;  %9377 = vmatprep.subr.bf16.mxu0 %v16297_v50  ;;  %v16379_v49 = vld [vmem:[%s26126_s0 + $0x154] ss:$144 sps:$4 sm:$0xff]   ;;  %v16381_v50 = vld [vmem:[%s26126_s0 + $0x15c] ss:$144 sps:$4 sm:$0xff]  }
  0xe1   :  { %9490 = vmatprep.subr.bf16.mxu1 %v16300_v51 }
  0xe2   :  { %9208 = vmatmul.mubr.bf16.gmra.mxu0 %v16293_v52 }
  0xe3   :  { %9321 = vmatmul.mubr.bf16.gmra.mxu1 %v16294_v53  ;;  %9378 = vmatpush2.bf16.msra.mxu0 %v16295_v54  ;;  %v16373_v53 = vld [vmem:[%s26125_s1 + $0x10c0] ss:$16 sps:$4 sm:$0xff]  }
  0xe4   :  { %9491 = vmatpush2.bf16.msra.mxu1 %v16298_v55  ;;  %9379 = vmatprep.subr.bf16.mxu0 %v16303_v56  ;;  %v16376_v55 = vld [vmem:[%s26125_s1 + $0x12c0] ss:$16 sps:$4 sm:$0xff]  }
  0xe5   :  { %9492 = vmatprep.subr.bf16.mxu1 %v16306_v57  ;;  %9217 = vmatprep.mubr.bf16.mxu0 %v16307_v58  ;;  %v16387_v58 = vld [vmem:[%s26125_s1 + $0x10a4] ss:$16 sps:$4 sm:$0xff]  }
  0xe6   :  { %9330 = vmatprep.mubr.bf16.mxu1 %v16309_v59  ;;  %v16390_v59 = vld [vmem:[%s26125_s1 + $0x12a4] ss:$16 sps:$4 sm:$0xff]  }
  0xe7   :  { %9380 = vmatpush2.bf16.msra.mxu0 %v16301_v60 }
  0xe8   :  { %9493 = vmatpush2.bf16.msra.mxu1 %v16304_v61  ;;  %9381 = vmatprep.subr.bf16.mxu0 %v16315_v62  ;;  %v16383_v62 = vld [vmem:[%s26126_s0 + $0x150] ss:$144 sps:$4 sm:$0xff]  }
  0xe9   :  { %9494 = vmatprep.subr.bf16.mxu1 %v16318_v63  ;;  %v16384_v63 = vld [vmem:[%s26126_s0 + $0x158] ss:$144 sps:$4 sm:$0xff]  }
  0xea   :  { %9218 = vmatmul.mubr.bf16.gmra.mxu0 %v16311_v0 }
  0xeb   :  { %9331 = vmatmul.mubr.bf16.gmra.mxu1 %v16312_v1  ;;  %9382 = vmatpush2.bf16.msra.mxu0 %v16313_v2  ;;  %v16385_v2 = vld [vmem:[%s26125_s1 + $0x10a0] ss:$16 sps:$4 sm:$0xff]  }
  0xec   :  { %9495 = vmatpush2.bf16.msra.mxu1 %v16316_v3  ;;  %9383 = vmatprep.subr.bf16.mxu0 %v16321_v4 }
  0xed   :  { %9496 = vmatprep.subr.bf16.mxu1 %v16324_v5  ;;  %9227 = vmatprep.mubr.bf16.mxu0 %v16325_v6  ;;  %v16388_v5 = vld [vmem:[%s26125_s1 + $0x12a0] ss:$16 sps:$4 sm:$0xff]  }
  0xee   :  { %9340 = vmatprep.mubr.bf16.mxu1 %v16327_v7 }
  0xef   :  { %9384 = vmatpush2.bf16.msra.mxu0 %v16319_v8  ;;  %v16393_v8 = vld [vmem:[%s26125_s1 + $0x1084] ss:$16 sps:$4 sm:$0xff]  }
  0xf0   :  { %9497 = vmatpush2.bf16.msra.mxu1 %v16322_v9  ;;  %9385 = vmatprep.subr.bf16.mxu0 %v16333_v10  ;;  %v16396_v9 = vld [vmem:[%s26125_s1 + $0x1284] ss:$16 sps:$4 sm:$0xff]  }
  0xf1   :  { %9498 = vmatprep.subr.bf16.mxu1 %v16336_v11 }
  0xf2   :  { %9228 = vmatmul.mubr.bf16.gmra.mxu0 %v16329_v12  ;;  %v16397_v12 = vld [vmem:[%s26126_s0 + $0x274] ss:$144 sps:$4 sm:$0xff]  }
  0xf3   :  { %9341 = vmatmul.mubr.bf16.gmra.mxu1 %v16330_v13  ;;  %9386 = vmatpush2.bf16.msra.mxu0 %v16331_v14  ;;  %v16399_v13 = vld [vmem:[%s26126_s0 + $0x27c] ss:$144 sps:$4 sm:$0xff]  }
  0xf4   :  { %9499 = vmatpush2.bf16.msra.mxu1 %v16334_v15  ;;  %9387 = vmatprep.subr.bf16.mxu0 %v16339_v16  ;;  %v16391_v16 = vld [vmem:[%s26125_s1 + $0x1080] ss:$16 sps:$4 sm:$0xff]  }
  0xf5   :  { %9500 = vmatprep.subr.bf16.mxu1 %v16342_v17  ;;  %9237 = vmatprep.mubr.bf16.mxu0 %v16343_v18 }
  0xf6   :  { %9350 = vmatprep.mubr.bf16.mxu1 %v16345_v19  ;;  %v16394_v19 = vld [vmem:[%s26125_s1 + $0x1280] ss:$16 sps:$4 sm:$0xff]  }
  0xf7   :  { %9388 = vmatpush2.bf16.msra.mxu0 %v16337_v20 }
  0xf8   :  { %9501 = vmatpush2.bf16.msra.mxu1 %v16340_v21  ;;  %9389 = vmatprep.subr.bf16.mxu0 %v16351_v23  ;;  %v16408_v23 = vld [vmem:[%s26125_s1 + $0x1264] ss:$16 sps:$4 sm:$0xff]  }
  0xf9   :  { %9502 = vmatprep.subr.bf16.mxu1 %v16354_v24 }
  0xfa   :  { %9238 = vmatmul.mubr.bf16.gmra.mxu0 %v16347_v25 }
  0xfb   :  { %9351 = vmatmul.mubr.bf16.gmra.mxu1 %v16348_v26  ;;  %9390 = vmatpush2.bf16.msra.mxu0 %v16349_v27  ;;  %v16401_v26 = vld [vmem:[%s26126_s0 + $0x270] ss:$144 sps:$4 sm:$0xff]   ;;  %v16402_v27 = vld [vmem:[%s26126_s0 + $0x278] ss:$144 sps:$4 sm:$0xff]  }
  0xfc   :  { %9503 = vmatpush2.bf16.msra.mxu1 %v16352_v28  ;;  %9391 = vmatprep.subr.bf16.mxu0 %v16357_v30 }
  0xfd   :  { %9504 = vmatprep.subr.bf16.mxu1 %v16360_v31  ;;  %9393 = vmatprep.mubr.bf16.mxu0 %v16363_v33  ;;  %v16403_v31 = vld [vmem:[%s26125_s1 + $0x1060] ss:$16 sps:$4 sm:$0xff]  }
  0xfe   :  { %9506 = vmatprep.mubr.bf16.mxu1 %v16366_v34  ;;  %v16406_v34 = vld [vmem:[%s26125_s1 + $0x1260] ss:$16 sps:$4 sm:$0xff]  }
  0xff   :  { %9392 = vmatpush2.bf16.msra.mxu0 %v16355_v32 }
 0x100   :  { %9505 = vmatpush2.bf16.msra.mxu1 %v16358_v35  ;;  %9587 = vmatprep.subr.bf16.mxu0 %v16369_v38  ;;  %v16414_v38 = vld [vmem:[%s26125_s1 + $0x1244] ss:$16 sps:$4 sm:$0xff]  }
 0x101   :  { %9700 = vmatprep.subr.bf16.mxu1 %v16372_v39 }
 0x102   :  { %v8717_v51 = vpop.f32.mrf.mxu0  ;;  %9394 = vmatmul.mubr.bf16.vlgmr.msra.gmra.mxu0 %v16361_v40 }
 0x103   :  { %v8830_v52 = vpop.f32.mrf.mxu1  ;;  %9507 = vmatmul.mubr.bf16.vlgmr.msra.gmra.mxu1 %v16364_v41  ;;  %v8718_v54 = vadd.f32 %v8717_v51, %v19493_v44  ;;  %9588 = vmatpush1.bf16.msra.mxu0 %v16367_v43  ;;  %v16415_v41 = vld [vmem:[%s26126_s0 + $0x394] ss:$144 sps:$4 sm:$0xff]  }
 0x104   :  { %9701 = vmatpush1.bf16.msra.mxu1 %v16370_v45  ;;  %v8719_v56 = vpop.f32.mrf.mxu0  ;;  %9589 = vmatprep.subr.bf16.mxu0 %v16375_v46  ;;  %v16409_v46 = vld [vmem:[%s26125_s1 + $0x1040] ss:$16 sps:$4 sm:$0xff]  }
 0x105   :  { %v8832_v57 = vpop.f32.mrf.mxu1  ;;  %9702 = vmatprep.subr.bf16.mxu1 %v16378_v47  ;;  %v19525_v60 = vadd.f32 %v8830_v52, %v8718_v54  ;;  %v8720_v61 = vadd.f32 %v8719_v56, %v19504_v48  ;;  %9403 = vmatprep.mubr.bf16.mxu0 %v16379_v49  ;;  %v16426_v54 = vld [vmem:[%s26125_s1 + $0x1224] ss:$16 sps:$4 sm:$0xff]  }
 0x106   :  { %9516 = vmatprep.mubr.bf16.mxu1 %v16381_v50  ;;  %v8721_v0 = vpop.f32.mrf.mxu0  ;;  %v16412_v50 = vld [vmem:[%s26125_s1 + $0x1240] ss:$16 sps:$4 sm:$0xff]  }
 0x107   :  { %v8834_v1 = vpop.f32.mrf.mxu1  ;;  %v19537_v3 = vadd.f32 %v8832_v57, %v8720_v61  ;;  %v8722_v4 = vadd.f32 %v8721_v0, %v19493_v44  ;;  %9590 = vmatpush1.bf16.msra.mxu0 %v16373_v53  ;;  %v16423_v53 = vld [vmem:[%s26125_s1 + $0x1024] ss:$16 sps:$4 sm:$0xff]   ;;  %v16419_v57 = vld [vmem:[%s26126_s0 + $0x390] ss:$144 sps:$4 sm:$0xff]  }
 0x108   :  { %9703 = vmatpush1.bf16.msra.mxu1 %v16376_v55  ;;  %v8723_v6 = vpop.f32.mrf.mxu0  ;;  %9591 = vmatprep.subr.bf16.mxu0 %v16387_v58  ;;  %v16420_v58 = vld [vmem:[%s26126_s0 + $0x398] ss:$144 sps:$4 sm:$0xff]  }
 0x109   :  { %v8836_v7 = vpop.f32.mrf.mxu1  ;;  %9704 = vmatprep.subr.bf16.mxu1 %v16390_v59  ;;  %v19549_v10 = vadd.f32 %v8834_v1, %v8722_v4  ;;  %v8724_v11 = vadd.f32 %v8723_v6, %v19504_v48  ;;  %v16424_v1 = vld [vmem:[%s26125_s1 + $0x1220] ss:$16 sps:$4 sm:$0xff]   ;;  %v16432_v6 = vld [vmem:[%s26125_s1 + $0x1204] ss:$16 sps:$4 sm:$0xff]  }
 0x10a   :  { %v8727_v14 = vpop.f32.mrf.mxu0  ;;  %9404 = vmatmul.mubr.bf16.gmra.mxu0 %v16383_v62  ;;  %v16421_v62 = vld [vmem:[%s26125_s1 + $0x1020] ss:$16 sps:$4 sm:$0xff]  }
 0x10b   :  { %v8840_v15 = vpop.f32.mrf.mxu1  ;;  %9517 = vmatmul.mubr.bf16.gmra.mxu1 %v16384_v63  ;;  %v19561_v17 = vadd.f32 %v8836_v7, %v8724_v11  ;;  %v8728_v18 = vadd.f32 %v8727_v14, %v19493_v44  ;;  %9592 = vmatpush1.bf16.msra.mxu0 %v16385_v2  ;;  %v16438_v11 = vld [vmem:[%s26126_s0 + $0x4bc] ss:$144 sps:$4 sm:$0xff]   ;;  %v16427_v14 = vld [vmem:[%s26125_s1 + $0x1000] ss:$16 sps:$4 sm:$0xff]  }
 0x10c   :  { %9705 = vmatpush1.bf16.msra.mxu1 %v16388_v5  ;;  %v8729_v20 = vpop.f32.mrf.mxu0  ;;  %9593 = vmatprep.subr.bf16.mxu0 %v16393_v8  ;;  %v16429_v5 = vld [vmem:[%s26125_s1 + $0x1004] ss:$16 sps:$4 sm:$0xff]  }
 0x10d   :  { %v8842_v21 = vpop.f32.mrf.mxu1  ;;  %9706 = vmatprep.subr.bf16.mxu1 %v16396_v9  ;;  %v19573_v24 = vadd.f32 %v8840_v15, %v8728_v18  ;;  %v8730_v25 = vadd.f32 %v8729_v20, %v19504_v48  ;;  %9413 = vmatprep.mubr.bf16.mxu0 %v16397_v12  ;;  %v16435_v9 = vld [vmem:[%s26126_s0 + $0x4b4] ss:$144 sps:$4 sm:$0xff]   ;;  %v16430_v18 = vld [vmem:[%s26125_s1 + $0x1200] ss:$16 sps:$4 sm:$0xff]  }
 0x10e   :  { %9526 = vmatprep.mubr.bf16.mxu1 %v16399_v13  ;;  %v8731_v28 = vpop.f32.mrf.mxu0 }
 0x10f   :  { %v8844_v30 = vpop.f32.mrf.mxu1  ;;  %v19585_v32 = vadd.f32 %v8842_v21, %v8730_v25  ;;  %v8732_v33 = vadd.f32 %v8731_v28, %v19493_v44  ;;  %9594 = vmatpush1.bf16.msra.mxu0 %v16391_v16  ;;  %v16441_v21 = vld [vmem:[%s26125_s1 + $0x11e4] ss:$16 sps:$4 sm:$0xff]  }
 0x110   :  { %9707 = vmatpush1.bf16.msra.mxu1 %v16394_v19  ;;  %v8733_v35 = vpop.f32.mrf.mxu0  ;;  %9595 = vmatprep.subr.bf16.mxu0 %v16405_v22  ;;  %v16444_v22 = vld [vmem:[%s26125_s1 + $0x13e4] ss:$16 sps:$4 sm:$0xff]  }
 0x111   :  { %v8846_v36 = vpop.f32.mrf.mxu1  ;;  %9708 = vmatprep.subr.bf16.mxu1 %v16408_v23  ;;  %v19597_v39 = vadd.f32 %v8844_v30, %v8732_v33  ;;  %v8734_v40 = vadd.f32 %v8733_v35, %v19504_v48  ;;  %v16442_v35 = vld [vmem:[%s26125_s1 + $0x13e0] ss:$16 sps:$4 sm:$0xff]  }
 0x112   :  { %v8737_v43 = vpop.f32.mrf.mxu0  ;;  %9414 = vmatmul.mubr.bf16.gmra.mxu0 %v16401_v26  ;;  %v16433_v26 = vld [vmem:[%s26126_s0 + $0x4b0] ss:$144 sps:$4 sm:$0xff]  }
 0x113   :  { %v8850_v45 = vpop.f32.mrf.mxu1  ;;  %9527 = vmatmul.mubr.bf16.gmra.mxu1 %v16402_v27  ;;  %v19609_v47 = vadd.f32 %v8846_v36, %v8734_v40  ;;  %v8738_v49 = vadd.f32 %v8737_v43, %v19493_v44  ;;  %9596 = vmatpush1.bf16.msra.mxu0 %v16403_v31  ;;  %v16436_v27 = vld [vmem:[%s26126_s0 + $0x4b8] ss:$144 sps:$4 sm:$0xff]   ;;  %v16439_v31 = vld [vmem:[%s26125_s1 + $0x11e0] ss:$16 sps:$4 sm:$0xff]   ;;  %v16450_v40 = vld [vmem:[%s26125_s1 + $0x13c4] ss:$16 sps:$4 sm:$0xff]  }
 0x114   :  { %9709 = vmatpush1.bf16.msra.mxu1 %v16406_v34  ;;  %v8739_v51 = vpop.f32.mrf.mxu0  ;;  %9597 = vmatprep.subr.bf16.mxu0 %v16411_v37  ;;  %v16453_v43 = vld [vmem:[%s26126_s0 + $0x5d4] ss:$144 sps:$4 sm:$0xff]  }
 0x115   :  { %v8852_v52 = vpop.f32.mrf.mxu1  ;;  %9710 = vmatprep.subr.bf16.mxu1 %v16414_v38  ;;  %v19621_v55 = vadd.f32 %v8850_v45, %v8738_v49  ;;  %v8740_v56 = vadd.f32 %v8739_v51, %v19504_v48  ;;  %9423 = vmatprep.mubr.bf16.mxu0 %v16415_v41  ;;  %v16447_v38 = vld [vmem:[%s26125_s1 + $0x11c4] ss:$16 sps:$4 sm:$0xff]   ;;  %v16456_v45 = vld [vmem:[%s26126_s0 + $0x5dc] ss:$144 sps:$4 sm:$0xff]  }
 0x116   :  { %9536 = vmatprep.mubr.bf16.mxu1 %v16417_v42  ;;  %v8741_v59 = vpop.f32.mrf.mxu0 }
 0x117   :  { %v8854_v61 = vpop.f32.mrf.mxu1  ;;  %v19633_v63 = vadd.f32 %v8852_v52, %v8740_v56  ;;  %v8742_v0 = vadd.f32 %v8741_v59, %v19493_v44  ;;  %9598 = vmatpush1.bf16.msra.mxu0 %v16409_v46 }
 0x118   :  { %9711 = vmatpush1.bf16.msra.mxu1 %v16412_v50  ;;  %v8743_v2 = vpop.f32.mrf.mxu0  ;;  %9599 = vmatprep.subr.bf16.mxu0 %v16423_v53  ;;  %v16445_v50 = vld [vmem:[%s26125_s1 + $0x11c0] ss:$16 sps:$4 sm:$0xff]  }
 0x119   :  { %v8856_v4 = vpop.f32.mrf.mxu1  ;;  %9712 = vmatprep.subr.bf16.mxu1 %v16426_v54  ;;  %v19645_v7 = vadd.f32 %v8854_v61, %v8742_v0  ;;  %v8744_v8 = vadd.f32 %v8743_v2, %v19504_v48  ;;  %v16448_v53 = vld [vmem:[%s26125_s1 + $0x13c0] ss:$16 sps:$4 sm:$0xff]   ;;  %v16454_v0 = vld [vmem:[%s26126_s0 + $0x5d8] ss:$144 sps:$4 sm:$0xff]  }
 0x11a   :  { %v8747_v12 = vpop.f32.mrf.mxu0  ;;  %9424 = vmatmul.mubr.bf16.gmra.mxu0 %v16419_v57  ;;  %v16459_v57 = vld [vmem:[%s26125_s1 + $0x11a4] ss:$16 sps:$4 sm:$0xff]  }
 0x11b   :  { %v8860_v13 = vpop.f32.mrf.mxu1  ;;  %9537 = vmatmul.mubr.bf16.gmra.mxu1 %v16420_v58  ;;  %v19657_v15 = vadd.f32 %v8856_v4, %v8744_v8  ;;  %v8748_v16 = vadd.f32 %v8747_v12, %v19493_v44  ;;  %9600 = vmatpush1.bf16.msra.mxu0 %v16421_v62  ;;  %v16462_v58 = vld [vmem:[%s26125_s1 + $0x13a4] ss:$16 sps:$4 sm:$0xff]   ;;  %v16451_v62 = vld [vmem:[%s26126_s0 + $0x5d0] ss:$144 sps:$4 sm:$0xff]  }
 0x11c   :  { %9713 = vmatpush1.bf16.msra.mxu1 %v16424_v1  ;;  %v8749_v19 = vpop.f32.mrf.mxu0  ;;  %9601 = vmatprep.subr.bf16.mxu0 %v16429_v5  ;;  %v16457_v4 = vld [vmem:[%s26125_s1 + $0x11a0] ss:$16 sps:$4 sm:$0xff]   ;;  %v16465_v12 = vld [vmem:[%s26125_s1 + $0x1184] ss:$16 sps:$4 sm:$0xff]  }
 0x11d   :  { %v8862_v20 = vpop.f32.mrf.mxu1  ;;  %9714 = vmatprep.subr.bf16.mxu1 %v16432_v6  ;;  %v19669_v23 = vadd.f32 %v8860_v13, %v8748_v16  ;;  %v8750_v25 = vadd.f32 %v8749_v19, %v19504_v48  ;;  %9433 = vmatprep.mubr.bf16.mxu0 %v16435_v9  ;;  %v16460_v8 = vld [vmem:[%s26125_s1 + $0x13a0] ss:$16 sps:$4 sm:$0xff]   ;;  %v16468_v13 = vld [vmem:[%s26125_s1 + $0x1384] ss:$16 sps:$4 sm:$0xff]   ;;  %v16474_v19 = vld [vmem:[%s26126_s0 + $0x6fc] ss:$144 sps:$4 sm:$0xff]  }
 0x11e   :  { %9546 = vmatprep.mubr.bf16.mxu1 %v16438_v11  ;;  %v8751_v28 = vpop.f32.mrf.mxu0 }
 0x11f   :  { %v8864_v30 = vpop.f32.mrf.mxu1  ;;  %v19681_v33 = vadd.f32 %v8862_v20, %v8750_v25  ;;  %v8752_v34 = vadd.f32 %v8751_v28, %v19493_v44  ;;  %9602 = vmatpush1.bf16.msra.mxu0 %v16427_v14 }
 0x120   :  { %9715 = vmatpush1.bf16.msra.mxu1 %v16430_v18  ;;  %v8753_v36 = vpop.f32.mrf.mxu0  ;;  %9603 = vmatprep.subr.bf16.mxu0 %v16441_v21  ;;  %v16471_v18 = vld [vmem:[%s26126_s0 + $0x6f4] ss:$144 sps:$4 sm:$0xff]  }
 0x121   :  { %v8866_v37 = vpop.f32.mrf.mxu1  ;;  %9716 = vmatprep.subr.bf16.mxu1 %v16444_v22  ;;  %v19693_v41 = vadd.f32 %v8864_v30, %v8752_v34  ;;  %v8754_v42 = vadd.f32 %v8753_v36, %v19504_v48  ;;  %v16463_v22 = vld [vmem:[%s26125_s1 + $0x1180] ss:$16 sps:$4 sm:$0xff]   ;;  %v16480_v34 = vld [vmem:[%s26125_s1 + $0x1364] ss:$16 sps:$4 sm:$0xff]  }
 0x122   :  { %v8757_v46 = vpop.f32.mrf.mxu0  ;;  %9434 = vmatmul.mubr.bf16.gmra.mxu0 %v16433_v26 }
 0x123   :  { %v8870_v49 = vpop.f32.mrf.mxu1  ;;  %9547 = vmatmul.mubr.bf16.gmra.mxu1 %v16436_v27  ;;  %v19705_v51 = vadd.f32 %v8866_v37, %v8754_v42  ;;  %v8758_v52 = vadd.f32 %v8757_v46, %v19493_v44  ;;  %9604 = vmatpush2.bf16.msra.mxu0 %v16439_v31  ;;  %v16466_v27 = vld [vmem:[%s26125_s1 + $0x1380] ss:$16 sps:$4 sm:$0xff]   ;;  %v16477_v31 = vld [vmem:[%s26125_s1 + $0x1164] ss:$16 sps:$4 sm:$0xff]  }
 0x124   :  { %9717 = vmatpush2.bf16.msra.mxu1 %v16442_v35  ;;  %v8759_v54 = vpop.f32.mrf.mxu0  ;;  %9605 = vmatprep.subr.bf16.mxu0 %v16447_v38  ;;  %v16469_v37 = vld [vmem:[%s26126_s0 + $0x6f0] ss:$144 sps:$4 sm:$0xff]   ;;  %v16472_v38 = vld [vmem:[%s26126_s0 + $0x6f8] ss:$144 sps:$4 sm:$0xff]  }
 0x125   :  { %v8872_v56 = vpop.f32.mrf.mxu1  ;;  %9718 = vmatprep.subr.bf16.mxu1 %v16450_v40  ;;  %v19717_v59 = vadd.f32 %v8870_v49, %v8758_v52  ;;  %v8760_v61 = vadd.f32 %v8759_v54, %v19504_v48  ;;  %9443 = vmatprep.mubr.bf16.mxu0 %v16453_v43  ;;  %v16475_v43 = vld [vmem:[%s26125_s1 + $0x1160] ss:$16 sps:$4 sm:$0xff]   ;;  %v16486_v54 = vld [vmem:[%s26125_s1 + $0x1344] ss:$16 sps:$4 sm:$0xff]  }
 0x126   :  { %9556 = vmatprep.mubr.bf16.mxu1 %v16456_v45  ;;  %v8761_v1 = vpop.f32.mrf.mxu0  ;;  %v16478_v49 = vld [vmem:[%s26125_s1 + $0x1360] ss:$16 sps:$4 sm:$0xff]  }
 0x127   :  { %v8874_v2 = vpop.f32.mrf.mxu1  ;;  %v19729_v5 = vadd.f32 %v8872_v56, %v8760_v61  ;;  %v8762_v6 = vadd.f32 %v8761_v1, %v19493_v44  ;;  %9606 = vmatpush2.bf16.msra.mxu0 %v16445_v50  ;;  %v16492_v61 = vld [vmem:[%s26126_s0 + $0x81c] ss:$144 sps:$4 sm:$0xff]   ;;  %v16481_v1 = vld [vmem:[%s26125_s1 + $0x1140] ss:$16 sps:$4 sm:$0xff]  }
 0x128   :  { %9719 = vmatpush2.bf16.msra.mxu1 %v16448_v53  ;;  %v8763_v9 = vpop.f32.mrf.mxu0  ;;  %9607 = vmatprep.subr.bf16.mxu0 %v16459_v57  ;;  %v16483_v53 = vld [vmem:[%s26125_s1 + $0x1144] ss:$16 sps:$4 sm:$0xff]  }
 0x129   :  { %v8876_v11 = vpop.f32.mrf.mxu1  ;;  %9720 = vmatprep.subr.bf16.mxu1 %v16462_v58  ;;  %v19741_v14 = vadd.f32 %v8874_v2, %v8762_v6  ;;  %v8764_v16 = vadd.f32 %v8763_v9, %v19504_v48  ;;  %v16489_v58 = vld [vmem:[%s26126_s0 + $0x814] ss:$144 sps:$4 sm:$0xff]   ;;  %v16484_v6 = vld [vmem:[%s26125_s1 + $0x1340] ss:$16 sps:$4 sm:$0xff]  }
 0x12a   :  { %v8767_v20 = vpop.f32.mrf.mxu0  ;;  %9444 = vmatmul.mubr.bf16.gmra.mxu0 %v16451_v62 }
 0x12b   :  { %v8880_v21 = vpop.f32.mrf.mxu1  ;;  %9557 = vmatmul.mubr.bf16.gmra.mxu1 %v16454_v0  ;;  %v19753_v25 = vadd.f32 %v8876_v11, %v8764_v16  ;;  %v8768_v26 = vadd.f32 %v8767_v20, %v19493_v44  ;;  %9608 = vmatpush2.bf16.msra.mxu0 %v16457_v4  ;;  %v16495_v11 = vld [vmem:[%s26125_s1 + $0x1124] ss:$16 sps:$4 sm:$0xff]  }
 0x12c   :  { %9721 = vmatpush2.bf16.msra.mxu1 %v16460_v8  ;;  %v8769_v28 = vpop.f32.mrf.mxu0  ;;  %9609 = vmatprep.subr.bf16.mxu0 %v16465_v12  ;;  %v16498_v12 = vld [vmem:[%s26125_s1 + $0x1324] ss:$16 sps:$4 sm:$0xff]  }
 0x12d   :  { %v8882_v30 = vpop.f32.mrf.mxu1  ;;  %9722 = vmatprep.subr.bf16.mxu1 %v16468_v13  ;;  %v19765_v35 = vadd.f32 %v8880_v21, %v8768_v26  ;;  %v8770_v36 = vadd.f32 %v8769_v28, %v19504_v48  ;;  %9453 = vmatprep.mubr.bf16.mxu0 %v16471_v18  ;;  %v16487_v18 = vld [vmem:[%s26126_s0 + $0x810] ss:$144 sps:$4 sm:$0xff]  }
 0x12e   :  { %9566 = vmatprep.mubr.bf16.mxu1 %v16474_v19  ;;  %v8771_v40 = vpop.f32.mrf.mxu0  ;;  %v16490_v19 = vld [vmem:[%s26126_s0 + $0x818] ss:$144 sps:$4 sm:$0xff]   ;;  %v16496_v28 = vld [vmem:[%s26125_s1 + $0x1320] ss:$16 sps:$4 sm:$0xff]  }
 0x12f   :  { %v8884_v42 = vpop.f32.mrf.mxu1  ;;  %v19777_v45 = vadd.f32 %v8882_v30, %v8770_v36  ;;  %v8772_v46 = vadd.f32 %v8771_v40, %v19493_v44  ;;  %9610 = vmatpush2.bf16.msra.mxu0 %v16463_v22  ;;  %v16493_v22 = vld [vmem:[%s26125_s1 + $0x1120] ss:$16 sps:$4 sm:$0xff]   ;;  %v16504_v36 = vld [vmem:[%s26125_s1 + $0x1304] ss:$16 sps:$4 sm:$0xff]  }
 0x130   :  { %9723 = vmatpush2.bf16.msra.mxu1 %v16466_v27  ;;  %v8773_v50 = vpop.f32.mrf.mxu0  ;;  %9611 = vmatprep.subr.bf16.mxu0 %v16477_v31  ;;  %v16507_v40 = vld [vmem:[%s26126_s0 + $0x44] ss:$144 sps:$4 sm:$0xff]  }
 0x131   :  { %v8886_v52 = vpop.f32.mrf.mxu1  ;;  %9724 = vmatprep.subr.bf16.mxu1 %v16480_v34  ;;  %v19789_v56 = vadd.f32 %v8884_v42, %v8772_v46  ;;  %v8774_v57 = vadd.f32 %v8773_v50, %v19504_v48  ;;  %v16501_v34 = vld [vmem:[%s26125_s1 + $0x1104] ss:$16 sps:$4 sm:$0xff]   ;;  %v16510_v42 = vld [vmem:[%s26126_s0 + $0x4c] ss:$144 sps:$4 sm:$0xff]  }
 0x132   :  { %v8777_v62 = vpop.f32.mrf.mxu0  ;;  %9454 = vmatmul.mubr.bf16.gmra.mxu0 %v16469_v37 }
 0x133   :  { %v8890_v0 = vpop.f32.mrf.mxu1  ;;  %9567 = vmatmul.mubr.bf16.gmra.mxu1 %v16472_v38  ;;  %v19801_v2 = vadd.f32 %v8886_v52, %v8774_v57  ;;  %v8778_v4 = vadd.f32 %v8777_v62, %v19493_v44  ;;  %9612 = vmatpush2.bf16.msra.mxu0 %v16475_v43 }
 0x134   :  { %9725 = vmatpush2.bf16.msra.mxu1 %v16478_v49  ;;  %v8779_v8 = vpop.f32.mrf.mxu0  ;;  %9613 = vmatprep.subr.bf16.mxu0 %v16483_v53  ;;  %v16499_v49 = vld [vmem:[%s26125_s1 + $0x1100] ss:$16 sps:$4 sm:$0xff]  }
 0x135   :  { %v8892_v9 = vpop.f32.mrf.mxu1  ;;  %9726 = vmatprep.subr.bf16.mxu1 %v16486_v54  ;;  %v19813_v13 = vadd.f32 %v8890_v0, %v8778_v4  ;;  %v8780_v16 = vadd.f32 %v8779_v8, %v19504_v48  ;;  %9463 = vmatprep.mubr.bf16.mxu0 %v16489_v58  ;;  %v16502_v53 = vld [vmem:[%s26125_s1 + $0x1300] ss:$16 sps:$4 sm:$0xff]   ;;  %v16513_v58 = vld [vmem:[%s26125_s1 + $0x14e4] ss:$16 sps:$4 sm:$0xff]   ;;  %v16508_v4 = vld [vmem:[%s26126_s0 + $0x48] ss:$144 sps:$4 sm:$0xff]  }
 0x136   :  { %9576 = vmatprep.mubr.bf16.mxu1 %v16492_v61  ;;  %v8781_v20 = vpop.f32.mrf.mxu0  ;;  %v16516_v61 = vld [vmem:[%s26125_s1 + $0x16e4] ss:$16 sps:$4 sm:$0xff]  }
 0x137   :  { %v8894_v21 = vpop.f32.mrf.mxu1  ;;  %v19825_v26 = vadd.f32 %v8892_v9, %v8780_v16  ;;  %v8782_v27 = vadd.f32 %v8781_v20, %v19493_v44  ;;  %9614 = vmatpush2.bf16.msra.mxu0 %v16481_v1  ;;  %v16505_v1 = vld [vmem:[%s26126_s0 + $0x40] ss:$144 sps:$4 sm:$0xff]   ;;  %v16519_v20 = vld [vmem:[%s26125_s1 + $0x14c4] ss:$16 sps:$4 sm:$0xff]  }
 0x138   :  { %9727 = vmatpush2.bf16.msra.mxu1 %v16484_v6  ;;  %v8783_v30 = vpop.f32.mrf.mxu0  ;;  %9615 = vmatprep.subr.bf16.mxu0 %v16495_v11  ;;  %v16511_v9 = vld [vmem:[%s26125_s1 + $0x14e0] ss:$16 sps:$4 sm:$0xff]  }
 0x139   :  { %v8896_v31 = vpop.f32.mrf.mxu1  ;;  %9728 = vmatprep.subr.bf16.mxu1 %v16498_v12  ;;  %v19837_v37 = vadd.f32 %v8894_v21, %v8782_v27  ;;  %v8784_v38 = vadd.f32 %v8783_v30, %v19504_v48  ;;  %v16514_v16 = vld [vmem:[%s26125_s1 + $0x16e0] ss:$16 sps:$4 sm:$0xff]   ;;  %v16522_v21 = vld [vmem:[%s26125_s1 + $0x16c4] ss:$16 sps:$4 sm:$0xff]  }
 0x13a   :  { %v8787_v43 = vpop.f32.mrf.mxu0  ;;  %9464 = vmatmul.mubr.bf16.gmra.mxu0 %v16487_v18  ;;  %v16525_v27 = vld [vmem:[%s26126_s0 + $0x164] ss:$144 sps:$4 sm:$0xff]  }
 0x13b   :  { %v8900_v46 = vpop.f32.mrf.mxu1  ;;  %9577 = vmatmul.mubr.bf16.gmra.mxu1 %v16490_v19  ;;  %v19849_v50 = vadd.f32 %v8896_v31, %v8784_v38  ;;  %v8788_v52 = vadd.f32 %v8787_v43, %v19493_v44  ;;  %9616 = vmatpush2.bf16.msra.mxu0 %v16493_v22  ;;  %v16520_v38 = vld [vmem:[%s26125_s1 + $0x16c0] ss:$16 sps:$4 sm:$0xff]   ;;  %v16531_v43 = vld [vmem:[%s26125_s1 + $0x14a4] ss:$16 sps:$4 sm:$0xff]  }
 0x13c   :  { %9729 = vmatpush2.bf16.msra.mxu1 %v16496_v28  ;;  %v8789_v54 = vpop.f32.mrf.mxu0  ;;  %9617 = vmatprep.subr.bf16.mxu0 %v16501_v34  ;;  %v16528_v28 = vld [vmem:[%s26126_s0 + $0x16c] ss:$144 sps:$4 sm:$0xff]   ;;  %v16517_v34 = vld [vmem:[%s26125_s1 + $0x14c0] ss:$16 sps:$4 sm:$0xff]  }
 0x13d   :  { %v8902_v57 = vpop.f32.mrf.mxu1  ;;  %9730 = vmatprep.subr.bf16.mxu1 %v16504_v36  ;;  %v19861_v62 = vadd.f32 %v8900_v46, %v8788_v52  ;;  %v8790_v0 = vadd.f32 %v8789_v54, %v19504_v48  ;;  %9619 = vmatprep.mubr.bf16.mxu0 %v16507_v40  ;;  %v16534_v46 = vld [vmem:[%s26125_s1 + $0x16a4] ss:$16 sps:$4 sm:$0xff]   ;;  %v16523_v52 = vld [vmem:[%s26126_s0 + $0x160] ss:$144 sps:$4 sm:$0xff]  }
 0x13e   :  { %9732 = vmatprep.mubr.bf16.mxu1 %v16510_v42  ;;  %v8791_v6 = vpop.f32.mrf.mxu0 }
 0x13f   :  { %v8904_v8 = vpop.f32.mrf.mxu1  ;;  %v19873_v11 = vadd.f32 %v8902_v57, %v8790_v0  ;;  %v8792_v12 = vadd.f32 %v8791_v6, %v19493_v44  ;;  %9618 = vmatpush2.bf16.msra.mxu0 %v16499_v49  ;;  %v16532_v0 = vld [vmem:[%s26125_s1 + $0x16a0] ss:$16 sps:$4 sm:$0xff]   ;;  %v16537_v6 = vld [vmem:[%s26125_s1 + $0x1484] ss:$16 sps:$4 sm:$0xff]  }
 0x140   :  { %9731 = vmatpush2.bf16.msra.mxu1 %v16502_v53  ;;  %v8793_v18 = vpop.f32.mrf.mxu0  ;;  %9813 = vmatprep.subr.bf16.mxu0 %v16513_v58  ;;  %v16526_v53 = vld [vmem:[%s26126_s0 + $0x168] ss:$144 sps:$4 sm:$0xff]   ;;  %v16529_v58 = vld [vmem:[%s26125_s1 + $0x14a0] ss:$16 sps:$4 sm:$0xff]  }
 0x141   :  { %v8906_v19 = vpop.f32.mrf.mxu1  ;;  %9926 = vmatprep.subr.bf16.mxu1 %v16516_v61  ;;  %v19885_v22 = vadd.f32 %v8904_v8, %v8792_v12  ;;  %v8794_v44 = vadd.f32 %v8793_v18, %v19504_v48  ;;  %v16540_v8 = vld [vmem:[%s26125_s1 + $0x1684] ss:$16 sps:$4 sm:$0xff]  }
 0x142   :  { %v8943_v30 = vpop.f32.mrf.mxu0  ;;  %9620 = vmatmul.mubr.bf16.vlgmr.msra.gmra.mxu0 %v16505_v1  ;;  %v16543_v12 = vld [vmem:[%s26126_s0 + $0x284] ss:$144 sps:$4 sm:$0xff]  }
 0x143   :  { %v9056_v31 = vpop.f32.mrf.mxu1  ;;  %9733 = vmatmul.mubr.bf16.vlgmr.msra.gmra.mxu1 %v16508_v4  ;;  %v19897_v36 = vadd.f32 %v8906_v19, %v8794_v44  ;;  %v8944_v48 = vadd.f32 %v8943_v30, %v19525_v60  ;;  %9814 = vmatpush1.bf16.msra.mxu0 %v16511_v9  ;;  %v16538_v44 = vld [vmem:[%s26125_s1 + $0x1680] ss:$16 sps:$4 sm:$0xff]   ;;  %v16549_v30 = vld [vmem:[%s26125_s1 + $0x1464] ss:$16 sps:$4 sm:$0xff]  }
 0x144   :  { %9927 = vmatpush1.bf16.msra.mxu1 %v16514_v16  ;;  %v8945_v40 = vpop.f32.mrf.mxu0  ;;  %9815 = vmatprep.subr.bf16.mxu0 %v16519_v20  ;;  %v16546_v16 = vld [vmem:[%s26126_s0 + $0x28c] ss:$144 sps:$4 sm:$0xff]   ;;  %v16535_v20 = vld [vmem:[%s26125_s1 + $0x1480] ss:$16 sps:$4 sm:$0xff]  }
 0x145   :  { %v9058_v42 = vpop.f32.mrf.mxu1  ;;  %9928 = vmatprep.subr.bf16.mxu1 %v16522_v21  ;;  %v19909_v49 = vadd.f32 %v9056_v31, %v8944_v48  ;;  %v8946_v60 = vadd.f32 %v8945_v40, %v19537_v3  ;;  %9629 = vmatprep.mubr.bf16.mxu0 %v16525_v27  ;;  %v16552_v31 = vld [vmem:[%s26125_s1 + $0x1664] ss:$16 sps:$4 sm:$0xff]   ;;  %v16541_v48 = vld [vmem:[%s26126_s0 + $0x280] ss:$144 sps:$4 sm:$0xff]  }
 0x146   :  { %9742 = vmatprep.mubr.bf16.mxu1 %v16528_v28  ;;  %v8947_v54 = vpop.f32.mrf.mxu0 }
 0x147   :  { %v9060_v57 = vpop.f32.mrf.mxu1  ;;  %v19921_v61 = vadd.f32 %v9058_v42, %v8946_v60  ;;  %v8948_v3 = vadd.f32 %v8947_v54, %v19549_v10  ;;  %9816 = vmatpush1.bf16.msra.mxu0 %v16517_v34  ;;  %v16550_v60 = vld [vmem:[%s26125_s1 + $0x1660] ss:$16 sps:$4 sm:$0xff]   ;;  %v16555_v54 = vld [vmem:[%s26125_s1 + $0x1444] ss:$16 sps:$4 sm:$0xff]  }
 0x148   :  { %9929 = vmatpush1.bf16.msra.mxu1 %v16520_v38  ;;  %v8949_v1 = vpop.f32.mrf.mxu0  ;;  %9817 = vmatprep.subr.bf16.mxu0 %v16531_v43  ;;  %v16544_v38 = vld [vmem:[%s26126_s0 + $0x288] ss:$144 sps:$4 sm:$0xff]   ;;  %v16547_v43 = vld [vmem:[%s26125_s1 + $0x1460] ss:$16 sps:$4 sm:$0xff]  }
 0x149   :  { %v9062_v4 = vpop.f32.mrf.mxu1  ;;  %9930 = vmatprep.subr.bf16.mxu1 %v16534_v46  ;;  %v19933_v9 = vadd.f32 %v9060_v57, %v8948_v3  ;;  %v8950_v10 = vadd.f32 %v8949_v1, %v19561_v17  ;;  %v16558_v57 = vld [vmem:[%s26125_s1 + $0x1644] ss:$16 sps:$4 sm:$0xff]  }
 0x14a   :  { %v8953_v18 = vpop.f32.mrf.mxu0  ;;  %9630 = vmatmul.mubr.bf16.gmra.mxu0 %v16523_v52  ;;  %v16561_v3 = vld [vmem:[%s26126_s0 + $0x3a4] ss:$144 sps:$4 sm:$0xff]  }
 0x14b   :  { %v9066_v19 = vpop.f32.mrf.mxu1  ;;  %9743 = vmatmul.mubr.bf16.gmra.mxu1 %v16526_v53  ;;  %v19945_v21 = vadd.f32 %v9062_v4, %v8950_v10  ;;  %v8954_v17 = vadd.f32 %v8953_v18, %v19573_v24  ;;  %9818 = vmatpush1.bf16.msra.mxu0 %v16529_v58  ;;  %v16556_v10 = vld [vmem:[%s26125_s1 + $0x1640] ss:$16 sps:$4 sm:$0xff]   ;;  %v16567_v18 = vld [vmem:[%s26125_s1 + $0x1424] ss:$16 sps:$4 sm:$0xff]  }
 0x14c   :  { %9931 = vmatpush1.bf16.msra.mxu1 %v16532_v0  ;;  %v8955_v27 = vpop.f32.mrf.mxu0  ;;  %9819 = vmatprep.subr.bf16.mxu0 %v16537_v6  ;;  %v16564_v0 = vld [vmem:[%s26126_s0 + $0x3ac] ss:$144 sps:$4 sm:$0xff]   ;;  %v16553_v6 = vld [vmem:[%s26125_s1 + $0x1440] ss:$16 sps:$4 sm:$0xff]  }
 0x14d   :  { %v9068_v28 = vpop.f32.mrf.mxu1  ;;  %9932 = vmatprep.subr.bf16.mxu1 %v16540_v8  ;;  %v19957_v34 = vadd.f32 %v9066_v19, %v8954_v17  ;;  %v8956_v24 = vadd.f32 %v8955_v27, %v19585_v32  ;;  %9639 = vmatprep.mubr.bf16.mxu0 %v16543_v12  ;;  %v16570_v19 = vld [vmem:[%s26125_s1 + $0x1624] ss:$16 sps:$4 sm:$0xff]   ;;  %v16559_v17 = vld [vmem:[%s26126_s0 + $0x3a0] ss:$144 sps:$4 sm:$0xff]  }
 0x14e   :  { %9752 = vmatprep.mubr.bf16.mxu1 %v16546_v16  ;;  %v8957_v40 = vpop.f32.mrf.mxu0 }
 0x14f   :  { %v9070_v42 = vpop.f32.mrf.mxu1  ;;  %v19969_v46 = vadd.f32 %v9068_v28, %v8956_v24  ;;  %v8958_v32 = vadd.f32 %v8957_v40, %v19597_v39  ;;  %9820 = vmatpush1.bf16.msra.mxu0 %v16535_v20  ;;  %v16568_v24 = vld [vmem:[%s26125_s1 + $0x1620] ss:$16 sps:$4 sm:$0xff]   ;;  %v16573_v40 = vld [vmem:[%s26125_s1 + $0x1404] ss:$16 sps:$4 sm:$0xff]  }
 0x150   :  { %9933 = vmatpush1.bf16.msra.mxu1 %v16538_v44  ;;  %v8959_v52 = vpop.f32.mrf.mxu0  ;;  %9821 = vmatprep.subr.bf16.mxu0 %v16549_v30  ;;  %v16562_v44 = vld [vmem:[%s26126_s0 + $0x3a8] ss:$144 sps:$4 sm:$0xff]   ;;  %v16565_v30 = vld [vmem:[%s26125_s1 + $0x1420] ss:$16 sps:$4 sm:$0xff]  }
 0x151   :  { %v9072_v53 = vpop.f32.mrf.mxu1  ;;  %9934 = vmatprep.subr.bf16.mxu1 %v16552_v31  ;;  %v19981_v58 = vadd.f32 %v9070_v42, %v8958_v32  ;;  %v8960_v39 = vadd.f32 %v8959_v52, %v19609_v47  ;;  %v16576_v42 = vld [vmem:[%s26125_s1 + $0x1604] ss:$16 sps:$4 sm:$0xff]  }
 0x152   :  { %v8963_v1 = vpop.f32.mrf.mxu0  ;;  %9640 = vmatmul.mubr.bf16.gmra.mxu0 %v16541_v48  ;;  %v16579_v32 = vld [vmem:[%s26126_s0 + $0x4c4] ss:$144 sps:$4 sm:$0xff]  }
 0x153   :  { %v9076_v4 = vpop.f32.mrf.mxu1  ;;  %9753 = vmatmul.mubr.bf16.gmra.mxu1 %v16544_v38  ;;  %v19993_v8 = vadd.f32 %v9072_v53, %v8960_v39  ;;  %v8964_v47 = vadd.f32 %v8963_v1, %v19621_v55  ;;  %9822 = vmatpush1.bf16.msra.mxu0 %v16547_v43  ;;  %v16574_v39 = vld [vmem:[%s26125_s1 + $0x1600] ss:$16 sps:$4 sm:$0xff]   ;;  %v16585_v1 = vld [vmem:[%s26125_s1 + $0x15e4] ss:$16 sps:$4 sm:$0xff]  }
 0x154   :  { %9935 = vmatpush1.bf16.msra.mxu1 %v16550_v60  ;;  %v8965_v12 = vpop.f32.mrf.mxu0  ;;  %9823 = vmatprep.subr.bf16.mxu0 %v16555_v54  ;;  %v16582_v60 = vld [vmem:[%s26126_s0 + $0x4cc] ss:$144 sps:$4 sm:$0xff]   ;;  %v16571_v54 = vld [vmem:[%s26125_s1 + $0x1400] ss:$16 sps:$4 sm:$0xff]  }
 0x155   :  { %v9078_v16 = vpop.f32.mrf.mxu1  ;;  %9936 = vmatprep.subr.bf16.mxu1 %v16558_v57  ;;  %v20005_v20 = vadd.f32 %v9076_v4, %v8964_v47  ;;  %v8966_v55 = vadd.f32 %v8965_v12, %v19633_v63  ;;  %9649 = vmatprep.mubr.bf16.mxu0 %v16561_v3  ;;  %v16588_v4 = vld [vmem:[%s26125_s1 + $0x17e4] ss:$16 sps:$4 sm:$0xff]   ;;  %v16577_v47 = vld [vmem:[%s26126_s0 + $0x4c0] ss:$144 sps:$4 sm:$0xff]  }
 0x156   :  { %9762 = vmatprep.mubr.bf16.mxu1 %v16564_v0  ;;  %v8967_v27 = vpop.f32.mrf.mxu0 }
 0x157   :  { %v9080_v28 = vpop.f32.mrf.mxu1  ;;  %v20017_v31 = vadd.f32 %v9078_v16, %v8966_v55  ;;  %v8968_v63 = vadd.f32 %v8967_v27, %v19645_v7  ;;  %9824 = vmatpush1.bf16.msra.mxu0 %v16553_v6  ;;  %v16586_v55 = vld [vmem:[%s26125_s1 + $0x17e0] ss:$16 sps:$4 sm:$0xff]   ;;  %v16591_v27 = vld [vmem:[%s26125_s1 + $0x15c4] ss:$16 sps:$4 sm:$0xff]  }
 0x158   :  { %9937 = vmatpush1.bf16.msra.mxu1 %v16556_v10  ;;  %v8969_v48 = vpop.f32.mrf.mxu0  ;;  %9825 = vmatprep.subr.bf16.mxu0 %v16567_v18  ;;  %v16580_v10 = vld [vmem:[%s26126_s0 + $0x4c8] ss:$144 sps:$4 sm:$0xff]   ;;  %v16583_v18 = vld [vmem:[%s26125_s1 + $0x15e0] ss:$16 sps:$4 sm:$0xff]  }
 0x159   :  { %v9082_v38 = vpop.f32.mrf.mxu1  ;;  %9938 = vmatprep.subr.bf16.mxu1 %v16570_v19  ;;  %v20029_v43 = vadd.f32 %v9080_v28, %v8968_v63  ;;  %v8970_v7 = vadd.f32 %v8969_v48, %v19657_v15  ;;  %v16594_v28 = vld [vmem:[%s26125_s1 + $0x17c4] ss:$16 sps:$4 sm:$0xff]  }
 0x15a   :  { %v8973_v52 = vpop.f32.mrf.mxu0  ;;  %9650 = vmatmul.mubr.bf16.gmra.mxu0 %v16559_v17  ;;  %v16597_v63 = vld [vmem:[%s26126_s0 + $0x5e4] ss:$144 sps:$4 sm:$0xff]  }
 0x15b   :  { %v9086_v53 = vpop.f32.mrf.mxu1  ;;  %9763 = vmatmul.mubr.bf16.gmra.mxu1 %v16562_v44  ;;  %v20041_v57 = vadd.f32 %v9082_v38, %v8970_v7  ;;  %v8974_v15 = vadd.f32 %v8973_v52, %v19669_v23  ;;  %9826 = vmatpush1.bf16.msra.mxu0 %v16565_v30  ;;  %v16592_v7 = vld [vmem:[%s26125_s1 + $0x17c0] ss:$16 sps:$4 sm:$0xff]   ;;  %v16603_v52 = vld [vmem:[%s26125_s1 + $0x15a4] ss:$16 sps:$4 sm:$0xff]  }
 0x15c   :  { %9939 = vmatpush1.bf16.msra.mxu1 %v16568_v24  ;;  %v8975_v3 = vpop.f32.mrf.mxu0  ;;  %9827 = vmatprep.subr.bf16.mxu0 %v16573_v40  ;;  %v16600_v24 = vld [vmem:[%s26126_s0 + $0x5ec] ss:$144 sps:$4 sm:$0xff]   ;;  %v16589_v40 = vld [vmem:[%s26125_s1 + $0x15c0] ss:$16 sps:$4 sm:$0xff]  }
 0x15d   :  { %v9088_v0 = vpop.f32.mrf.mxu1  ;;  %9940 = vmatprep.subr.bf16.mxu1 %v16576_v42  ;;  %v20053_v6 = vadd.f32 %v9086_v53, %v8974_v15  ;;  %v8976_v23 = vadd.f32 %v8975_v3, %v19681_v33  ;;  %9659 = vmatprep.mubr.bf16.mxu0 %v16579_v32  ;;  %v16606_v53 = vld [vmem:[%s26125_s1 + $0x17a4] ss:$16 sps:$4 sm:$0xff]   ;;  %v16595_v15 = vld [vmem:[%s26126_s0 + $0x5e0] ss:$144 sps:$4 sm:$0xff]  }
 0x15e   :  { %9772 = vmatprep.mubr.bf16.mxu1 %v16582_v60  ;;  %v8977_v12 = vpop.f32.mrf.mxu0 }
 0x15f   :  { %v9090_v16 = vpop.f32.mrf.mxu1  ;;  %v20065_v19 = vadd.f32 %v9088_v0, %v8976_v23  ;;  %v8978_v33 = vadd.f32 %v8977_v12, %v19693_v41  ;;  %9828 = vmatpush1.bf16.msra.mxu0 %v16571_v54  ;;  %v16604_v23 = vld [vmem:[%s26125_s1 + $0x17a0] ss:$16 sps:$4 sm:$0xff]   ;;  %v16609_v12 = vld [vmem:[%s26125_s1 + $0x1584] ss:$16 sps:$4 sm:$0xff]  }
 0x160   :  { %9941 = vmatpush1.bf16.msra.mxu1 %v16574_v39  ;;  %v8979_v17 = vpop.f32.mrf.mxu0  ;;  %9829 = vmatprep.subr.bf16.mxu0 %v16585_v1  ;;  %v16598_v39 = vld [vmem:[%s26126_s0 + $0x5e8] ss:$144 sps:$4 sm:$0xff]   ;;  %v16601_v1 = vld [vmem:[%s26125_s1 + $0x15a0] ss:$16 sps:$4 sm:$0xff]  }
 0x161   :  { %v9092_v44 = vpop.f32.mrf.mxu1  ;;  %9942 = vmatprep.subr.bf16.mxu1 %v16588_v4  ;;  %v20077_v30 = vadd.f32 %v9090_v16, %v8978_v33  ;;  %v8980_v41 = vadd.f32 %v8979_v17, %v19705_v51  ;;  %v16612_v16 = vld [vmem:[%s26125_s1 + $0x1784] ss:$16 sps:$4 sm:$0xff]  }
 0x162   :  { %v8983_v48 = vpop.f32.mrf.mxu0  ;;  %9660 = vmatmul.mubr.bf16.gmra.mxu0 %v16577_v47  ;;  %v16615_v33 = vld [vmem:[%s26126_s0 + $0x704] ss:$144 sps:$4 sm:$0xff]  }
 0x163   :  { %v9096_v38 = vpop.f32.mrf.mxu1  ;;  %9773 = vmatmul.mubr.bf16.gmra.mxu1 %v16580_v10  ;;  %v20089_v42 = vadd.f32 %v9092_v44, %v8980_v41  ;;  %v8984_v51 = vadd.f32 %v8983_v48, %v19717_v59  ;;  %9830 = vmatpush2.bf16.msra.mxu0 %v16583_v18  ;;  %v16610_v41 = vld [vmem:[%s26125_s1 + $0x1780] ss:$16 sps:$4 sm:$0xff]   ;;  %v16621_v48 = vld [vmem:[%s26125_s1 + $0x1564] ss:$16 sps:$4 sm:$0xff]  }
 0x164   :  { %9943 = vmatpush2.bf16.msra.mxu1 %v16586_v55  ;;  %v8985_v32 = vpop.f32.mrf.mxu0  ;;  %9831 = vmatprep.subr.bf16.mxu0 %v16591_v27  ;;  %v16618_v55 = vld [vmem:[%s26126_s0 + $0x70c] ss:$144 sps:$4 sm:$0xff]   ;;  %v16607_v27 = vld [vmem:[%s26125_s1 + $0x1580] ss:$16 sps:$4 sm:$0xff]  }
 0x165   :  { %v9098_v60 = vpop.f32.mrf.mxu1  ;;  %9944 = vmatprep.subr.bf16.mxu1 %v16594_v28  ;;  %v20101_v54 = vadd.f32 %v9096_v38, %v8984_v51  ;;  %v8986_v59 = vadd.f32 %v8985_v32, %v19729_v5  ;;  %9669 = vmatprep.mubr.bf16.mxu0 %v16597_v63  ;;  %v16624_v38 = vld [vmem:[%s26125_s1 + $0x1764] ss:$16 sps:$4 sm:$0xff]   ;;  %v16613_v51 = vld [vmem:[%s26126_s0 + $0x700] ss:$144 sps:$4 sm:$0xff]  }
 0x166   :  { %9782 = vmatprep.mubr.bf16.mxu1 %v16600_v24  ;;  %v8987_v3 = vpop.f32.mrf.mxu0 }
 0x167   :  { %v9100_v0 = vpop.f32.mrf.mxu1  ;;  %v20113_v4 = vadd.f32 %v9098_v60, %v8986_v59  ;;  %v8988_v5 = vadd.f32 %v8987_v3, %v19741_v14  ;;  %9832 = vmatpush2.bf16.msra.mxu0 %v16589_v40  ;;  %v16622_v59 = vld [vmem:[%s26125_s1 + $0x1760] ss:$16 sps:$4 sm:$0xff]   ;;  %v16627_v3 = vld [vmem:[%s26125_s1 + $0x1544] ss:$16 sps:$4 sm:$0xff]  }
 0x168   :  { %9945 = vmatpush2.bf16.msra.mxu1 %v16592_v7  ;;  %v8989_v47 = vpop.f32.mrf.mxu0  ;;  %9833 = vmatprep.subr.bf16.mxu0 %v16603_v52  ;;  %v16616_v7 = vld [vmem:[%s26126_s0 + $0x708] ss:$144 sps:$4 sm:$0xff]   ;;  %v16619_v52 = vld [vmem:[%s26125_s1 + $0x1560] ss:$16 sps:$4 sm:$0xff]  }
 0x169   :  { %v9102_v10 = vpop.f32.mrf.mxu1  ;;  %9946 = vmatprep.subr.bf16.mxu1 %v16606_v53  ;;  %v20125_v18 = vadd.f32 %v9100_v0, %v8988_v5  ;;  %v8990_v14 = vadd.f32 %v8989_v47, %v19753_v25  ;;  %v16630_v0 = vld [vmem:[%s26125_s1 + $0x1744] ss:$16 sps:$4 sm:$0xff]  }
 0x16a   :  { %v8993_v17 = vpop.f32.mrf.mxu0  ;;  %9670 = vmatmul.mubr.bf16.gmra.mxu0 %v16595_v15  ;;  %v16633_v5 = vld [vmem:[%s26126_s0 + $0x824] ss:$144 sps:$4 sm:$0xff]  }
 0x16b   :  { %v9106_v44 = vpop.f32.mrf.mxu1  ;;  %9783 = vmatmul.mubr.bf16.gmra.mxu1 %v16598_v39  ;;  %v20137_v28 = vadd.f32 %v9102_v10, %v8990_v14  ;;  %v8994_v25 = vadd.f32 %v8993_v17, %v19765_v35  ;;  %9834 = vmatpush2.bf16.msra.mxu0 %v16601_v1  ;;  %v16628_v14 = vld [vmem:[%s26125_s1 + $0x1740] ss:$16 sps:$4 sm:$0xff]   ;;  %v16639_v17 = vld [vmem:[%s26125_s1 + $0x1524] ss:$16 sps:$4 sm:$0xff]  }
 0x16c   :  { %9947 = vmatpush2.bf16.msra.mxu1 %v16604_v23  ;;  %v8995_v63 = vpop.f32.mrf.mxu0  ;;  %9835 = vmatprep.subr.bf16.mxu0 %v16609_v12  ;;  %v16636_v23 = vld [vmem:[%s26126_s0 + $0x82c] ss:$144 sps:$4 sm:$0xff]   ;;  %v16625_v12 = vld [vmem:[%s26125_s1 + $0x1540] ss:$16 sps:$4 sm:$0xff]  }
 0x16d   :  { %v9108_v24 = vpop.f32.mrf.mxu1  ;;  %9948 = vmatprep.subr.bf16.mxu1 %v16612_v16  ;;  %v20149_v40 = vadd.f32 %v9106_v44, %v8994_v25  ;;  %v8996_v35 = vadd.f32 %v8995_v63, %v19777_v45  ;;  %9679 = vmatprep.mubr.bf16.mxu0 %v16615_v33  ;;  %v16642_v44 = vld [vmem:[%s26125_s1 + $0x1724] ss:$16 sps:$4 sm:$0xff]   ;;  %v16631_v25 = vld [vmem:[%s26126_s0 + $0x820] ss:$144 sps:$4 sm:$0xff]  }
 0x16e   :  { %9792 = vmatprep.mubr.bf16.mxu1 %v16618_v55  ;;  %v8997_v32 = vpop.f32.mrf.mxu0 }
 0x16f   :  { %v9110_v60 = vpop.f32.mrf.mxu1  ;;  %v20161_v53 = vadd.f32 %v9108_v24, %v8996_v35  ;;  %v8998_v45 = vadd.f32 %v8997_v32, %v19789_v56  ;;  %9836 = vmatpush2.bf16.msra.mxu0 %v16607_v27  ;;  %v16640_v35 = vld [vmem:[%s26125_s1 + $0x1720] ss:$16 sps:$4 sm:$0xff]   ;;  %v16645_v32 = vld [vmem:[%s26125_s1 + $0x1504] ss:$16 sps:$4 sm:$0xff]  }
 0x170   :  { %9949 = vmatpush2.bf16.msra.mxu1 %v16610_v41  ;;  %v8999_v15 = vpop.f32.mrf.mxu0  ;;  %9837 = vmatprep.subr.bf16.mxu0 %v16621_v48  ;;  %v16634_v41 = vld [vmem:[%s26126_s0 + $0x828] ss:$144 sps:$4 sm:$0xff]   ;;  %v16637_v48 = vld [vmem:[%s26125_s1 + $0x1520] ss:$16 sps:$4 sm:$0xff]  }
 0x171   :  { %v9112_v39 = vpop.f32.mrf.mxu1  ;;  %9950 = vmatprep.subr.bf16.mxu1 %v16624_v38  ;;  %v20173_v1 = vadd.f32 %v9110_v60, %v8998_v45  ;;  %v9000_v56 = vadd.f32 %v8999_v15, %v19801_v2  ;;  %v16648_v60 = vld [vmem:[%s26125_s1 + $0x1704] ss:$16 sps:$4 sm:$0xff]  }
 0x172   :  { %v9003_v47 = vpop.f32.mrf.mxu0  ;;  %9680 = vmatmul.mubr.bf16.gmra.mxu0 %v16613_v51  ;;  %v16651_v45 = vld [vmem:[%s26126_s0 + $0x54] ss:$144 sps:$4 sm:$0xff]  }
 0x173   :  { %v9116_v10 = vpop.f32.mrf.mxu1  ;;  %9793 = vmatmul.mubr.bf16.gmra.mxu1 %v16616_v7  ;;  %v20185_v16 = vadd.f32 %v9112_v39, %v9000_v56  ;;  %v9004_v2 = vadd.f32 %v9003_v47, %v19813_v13  ;;  %9838 = vmatpush2.bf16.msra.mxu0 %v16619_v52  ;;  %v16646_v56 = vld [vmem:[%s26125_s1 + $0x1700] ss:$16 sps:$4 sm:$0xff]   ;;  %v16657_v47 = vld [vmem:[%s26125_s1 + $0x18e4] ss:$16 sps:$4 sm:$0xff]  }
 0x174   :  { %9951 = vmatpush2.bf16.msra.mxu1 %v16622_v59  ;;  %v9005_v33 = vpop.f32.mrf.mxu0  ;;  %9839 = vmatprep.subr.bf16.mxu0 %v16627_v3  ;;  %v16654_v59 = vld [vmem:[%s26126_s0 + $0x5c] ss:$144 sps:$4 sm:$0xff]   ;;  %v16643_v3 = vld [vmem:[%s26125_s1 + $0x1500] ss:$16 sps:$4 sm:$0xff]  }
 0x175   :  { %v9118_v55 = vpop.f32.mrf.mxu1  ;;  %9952 = vmatprep.subr.bf16.mxu1 %v16630_v0  ;;  %v20197_v27 = vadd.f32 %v9116_v10, %v9004_v2  ;;  %v9006_v13 = vadd.f32 %v9005_v33, %v19825_v26  ;;  %9689 = vmatprep.mubr.bf16.mxu0 %v16633_v5  ;;  %v16660_v10 = vld [vmem:[%s26125_s1 + $0x1ae4] ss:$16 sps:$4 sm:$0xff]   ;;  %v16649_v2 = vld [vmem:[%s26126_s0 + $0x50] ss:$144 sps:$4 sm:$0xff]  }
 0x176   :  { %9802 = vmatprep.mubr.bf16.mxu1 %v16636_v23  ;;  %v9007_v63 = vpop.f32.mrf.mxu0 }
 0x177   :  { %v9120_v24 = vpop.f32.mrf.mxu1  ;;  %v20209_v38 = vadd.f32 %v9118_v55, %v9006_v13  ;;  %v9008_v26 = vadd.f32 %v9007_v63, %v19837_v37  ;;  %9840 = vmatpush2.bf16.msra.mxu0 %v16625_v12  ;;  %v16658_v13 = vld [vmem:[%s26125_s1 + $0x1ae0] ss:$16 sps:$4 sm:$0xff]   ;;  %v16663_v63 = vld [vmem:[%s26125_s1 + $0x18c4] ss:$16 sps:$4 sm:$0xff]  }
 0x178   :  { %9953 = vmatpush2.bf16.msra.mxu1 %v16628_v14  ;;  %v9009_v51 = vpop.f32.mrf.mxu0  ;;  %9841 = vmatprep.subr.bf16.mxu0 %v16639_v17  ;;  %v16652_v14 = vld [vmem:[%s26126_s0 + $0x58] ss:$144 sps:$4 sm:$0xff]   ;;  %v16655_v17 = vld [vmem:[%s26125_s1 + $0x18e0] ss:$16 sps:$4 sm:$0xff]  }
 0x179   :  { %v9122_v7 = vpop.f32.mrf.mxu1  ;;  %9954 = vmatprep.subr.bf16.mxu1 %v16642_v44  ;;  %v20221_v52 = vadd.f32 %v9120_v24, %v9008_v26  ;;  %v9010_v37 = vadd.f32 %v9009_v51, %v19849_v50  ;;  %v16666_v24 = vld [vmem:[%s26125_s1 + $0x1ac4] ss:$16 sps:$4 sm:$0xff]  }
 0x17a   :  { %v9013_v15 = vpop.f32.mrf.mxu0  ;;  %9690 = vmatmul.mubr.bf16.gmra.mxu0 %v16631_v25  ;;  %v16669_v26 = vld [vmem:[%s26126_s0 + $0x174] ss:$144 sps:$4 sm:$0xff]  }
 0x17b   :  { %v9126_v39 = vpop.f32.mrf.mxu1  ;;  %9803 = vmatmul.mubr.bf16.gmra.mxu1 %v16634_v41  ;;  %v20233_v0 = vadd.f32 %v9122_v7, %v9010_v37  ;;  %v9014_v50 = vadd.f32 %v9013_v15, %v19861_v62  ;;  %9842 = vmatpush2.bf16.msra.mxu0 %v16637_v48  ;;  %v16664_v37 = vld [vmem:[%s26125_s1 + $0x1ac0] ss:$16 sps:$4 sm:$0xff]   ;;  %v16675_v15 = vld [vmem:[%s26125_s1 + $0x18a4] ss:$16 sps:$4 sm:$0xff]  }
 0x17c   :  { %9955 = vmatpush2.bf16.msra.mxu1 %v16640_v35  ;;  %v9015_v5 = vpop.f32.mrf.mxu0  ;;  %9843 = vmatprep.subr.bf16.mxu0 %v16645_v32  ;;  %v16672_v35 = vld [vmem:[%s26126_s0 + $0x17c] ss:$144 sps:$4 sm:$0xff]   ;;  %v16661_v32 = vld [vmem:[%s26125_s1 + $0x18c0] ss:$16 sps:$4 sm:$0xff]  }
 0x17d   :  { %v9128_v23 = vpop.f32.mrf.mxu1  ;;  %9956 = vmatprep.subr.bf16.mxu1 %v16648_v60  ;;  %v20245_v12 = vadd.f32 %v9126_v39, %v9014_v50  ;;  %v9016_v62 = vadd.f32 %v9015_v5, %v19873_v11  ;;  %9845 = vmatprep.mubr.bf16.mxu0 %v16651_v45  ;;  %v16678_v39 = vld [vmem:[%s26125_s1 + $0x1aa4] ss:$16 sps:$4 sm:$0xff]   ;;  %v16667_v50 = vld [vmem:[%s26126_s0 + $0x170] ss:$144 sps:$4 sm:$0xff]  }
 0x17e   :  { %9958 = vmatprep.mubr.bf16.mxu1 %v16654_v59  ;;  %v9017_v33 = vpop.f32.mrf.mxu0 }
 0x17f   :  { %v9130_v55 = vpop.f32.mrf.mxu1  ;;  %v20257_v44 = vadd.f32 %v9128_v23, %v9016_v62  ;;  %v9018_v11 = vadd.f32 %v9017_v33, %v19885_v22  ;;  %9844 = vmatpush2.bf16.msra.mxu0 %v16643_v3  ;;  %v16676_v62 = vld [vmem:[%s26125_s1 + $0x1aa0] ss:$16 sps:$4 sm:$0xff]   ;;  %v16681_v33 = vld [vmem:[%s26125_s1 + $0x1884] ss:$16 sps:$4 sm:$0xff]  }
 0x180   :  { %9957 = vmatpush2.bf16.msra.mxu1 %v16646_v56  ;;  %v9019_v25 = vpop.f32.mrf.mxu0  ;;  %10039 = vmatprep.subr.bf16.mxu0 %v16657_v47  ;;  %v16670_v56 = vld [vmem:[%s26126_s0 + $0x178] ss:$144 sps:$4 sm:$0xff]   ;;  %v16673_v47 = vld [vmem:[%s26125_s1 + $0x18a0] ss:$16 sps:$4 sm:$0xff]  }
 0x181   :  { %v9132_v41 = vpop.f32.mrf.mxu1  ;;  %10152 = vmatprep.subr.bf16.mxu1 %v16660_v10  ;;  %v20269_v48 = vadd.f32 %v9130_v55, %v9018_v11  ;;  %v9020_v22 = vadd.f32 %v9019_v25, %v19897_v36  ;;  %v16684_v55 = vld [vmem:[%s26125_s1 + $0x1a84] ss:$16 sps:$4 sm:$0xff]  }
 0x182   :  { %v9169_v51 = vpop.f32.mrf.mxu0  ;;  %9846 = vmatmul.mubr.bf16.vlgmr.msra.gmra.mxu0 %v16649_v2  ;;  %v16687_v11 = vld [vmem:[%s26126_s0 + $0x294] ss:$144 sps:$4 sm:$0xff]  }
 0x183   :  { %v9282_v7 = vpop.f32.mrf.mxu1  ;;  %9959 = vmatmul.mubr.bf16.vlgmr.msra.gmra.mxu1 %v16652_v14  ;;  %v20281_v60 = vadd.f32 %v9132_v41, %v9020_v22  ;;  %v9170_v36 = vadd.f32 %v9169_v51, %v19909_v49  ;;  %10040 = vmatpush1.bf16.msra.mxu0 %v16655_v17  ;;  %v16682_v22 = vld [vmem:[%s26125_s1 + $0x1a80] ss:$16 sps:$4 sm:$0xff]   ;;  %v16693_v51 = vld [vmem:[%s26125_s1 + $0x1864] ss:$16 sps:$4 sm:$0xff]  }
 0x184   :  { %10153 = vmatpush1.bf16.msra.mxu1 %v16658_v13  ;;  %v9171_v45 = vpop.f32.mrf.mxu0  ;;  %10041 = vmatprep.subr.bf16.mxu0 %v16663_v63  ;;  %v16690_v13 = vld [vmem:[%s26126_s0 + $0x29c] ss:$144 sps:$4 sm:$0xff]   ;;  %v16679_v63 = vld [vmem:[%s26125_s1 + $0x1880] ss:$16 sps:$4 sm:$0xff]  }
 0x185   :  { %v9284_v59 = vpop.f32.mrf.mxu1  ;;  %10154 = vmatprep.subr.bf16.mxu1 %v16666_v24  ;;  %v20293_v3 = vadd.f32 %v9282_v7, %v9170_v36  ;;  %v9172_v49 = vadd.f32 %v9171_v45, %v19921_v61  ;;  %9855 = vmatprep.mubr.bf16.mxu0 %v16669_v26  ;;  %v16696_v7 = vld [vmem:[%s26125_s1 + $0x1a64] ss:$16 sps:$4 sm:$0xff]   ;;  %v16685_v36 = vld [vmem:[%s26126_s0 + $0x290] ss:$144 sps:$4 sm:$0xff]  }
 0x186   :  { %9968 = vmatprep.mubr.bf16.mxu1 %v16672_v35  ;;  %v9173_v5 = vpop.f32.mrf.mxu0 }
 0x187   :  { %v9286_v23 = vpop.f32.mrf.mxu1  ;;  %v20305_v10 = vadd.f32 %v9284_v59, %v9172_v49  ;;  %v9174_v61 = vadd.f32 %v9173_v5, %v19933_v9  ;;  %10042 = vmatpush1.bf16.msra.mxu0 %v16661_v32  ;;  %v16694_v49 = vld [vmem:[%s26125_s1 + $0x1a60] ss:$16 sps:$4 sm:$0xff]   ;;  %v16699_v5 = vld [vmem:[%s26125_s1 + $0x1844] ss:$16 sps:$4 sm:$0xff]  }
 0x188   :  { %10155 = vmatpush1.bf16.msra.mxu1 %v16664_v37  ;;  %v9175_v2 = vpop.f32.mrf.mxu0  ;;  %10043 = vmatprep.subr.bf16.mxu0 %v16675_v15  ;;  %v16688_v37 = vld [vmem:[%s26126_s0 + $0x298] ss:$144 sps:$4 sm:$0xff]   ;;  %v16691_v15 = vld [vmem:[%s26125_s1 + $0x1860] ss:$16 sps:$4 sm:$0xff]  }
 0x189   :  { %v9288_v14 = vpop.f32.mrf.mxu1  ;;  %10156 = vmatprep.subr.bf16.mxu1 %v16678_v39  ;;  %v20317_v17 = vadd.f32 %v9286_v23, %v9174_v61  ;;  %v9176_v9 = vadd.f32 %v9175_v2, %v19945_v21  ;;  %v16702_v23 = vld [vmem:[%s26125_s1 + $0x1a44] ss:$16 sps:$4 sm:$0xff]  }
 0x18a   :  { %v9179_v25 = vpop.f32.mrf.mxu0  ;;  %9856 = vmatmul.mubr.bf16.gmra.mxu0 %v16667_v50  ;;  %v16705_v61 = vld [vmem:[%s26126_s0 + $0x3b4] ss:$144 sps:$4 sm:$0xff]  }
 0x18b   :  { %v9292_v41 = vpop.f32.mrf.mxu1  ;;  %9969 = vmatmul.mubr.bf16.gmra.mxu1 %v16670_v56  ;;  %v20329_v24 = vadd.f32 %v9288_v14, %v9176_v9  ;;  %v9180_v21 = vadd.f32 %v9179_v25, %v19957_v34  ;;  %10044 = vmatpush1.bf16.msra.mxu0 %v16673_v47  ;;  %v16700_v9 = vld [vmem:[%s26125_s1 + $0x1a40] ss:$16 sps:$4 sm:$0xff]   ;;  %v16711_v25 = vld [vmem:[%s26125_s1 + $0x1824] ss:$16 sps:$4 sm:$0xff]  }
 0x18c   :  { %10157 = vmatpush1.bf16.msra.mxu1 %v16676_v62  ;;  %v9181_v26 = vpop.f32.mrf.mxu0  ;;  %10045 = vmatprep.subr.bf16.mxu0 %v16681_v33  ;;  %v16708_v62 = vld [vmem:[%s26126_s0 + $0x3bc] ss:$144 sps:$4 sm:$0xff]   ;;  %v16697_v33 = vld [vmem:[%s26125_s1 + $0x1840] ss:$16 sps:$4 sm:$0xff]  }
 0x18d   :  { %v9294_v35 = vpop.f32.mrf.mxu1  ;;  %10158 = vmatprep.subr.bf16.mxu1 %v16684_v55  ;;  %v20341_v32 = vadd.f32 %v9292_v41, %v9180_v21  ;;  %v9182_v34 = vadd.f32 %v9181_v26, %v19969_v46  ;;  %9865 = vmatprep.mubr.bf16.mxu0 %v16687_v11  ;;  %v16714_v41 = vld [vmem:[%s26125_s1 + $0x1a24] ss:$16 sps:$4 sm:$0xff]   ;;  %v16703_v21 = vld [vmem:[%s26126_s0 + $0x3b0] ss:$144 sps:$4 sm:$0xff]  }
 0x18e   :  { %9978 = vmatprep.mubr.bf16.mxu1 %v16690_v13  ;;  %v9183_v45 = vpop.f32.mrf.mxu0 }
 0x18f   :  { %v9296_v59 = vpop.f32.mrf.mxu1  ;;  %v20353_v39 = vadd.f32 %v9294_v35, %v9182_v34  ;;  %v9184_v46 = vadd.f32 %v9183_v45, %v19981_v58  ;;  %10046 = vmatpush1.bf16.msra.mxu0 %v16679_v63  ;;  %v16712_v34 = vld [vmem:[%s26125_s1 + $0x1a20] ss:$16 sps:$4 sm:$0xff]   ;;  %v16717_v45 = vld [vmem:[%s26125_s1 + $0x1804] ss:$16 sps:$4 sm:$0xff]  }
 0x190   :  { %10159 = vmatpush1.bf16.msra.mxu1 %v16682_v22  ;;  %v9185_v50 = vpop.f32.mrf.mxu0  ;;  %10047 = vmatprep.subr.bf16.mxu0 %v16693_v51  ;;  %v16706_v22 = vld [vmem:[%s26126_s0 + $0x3b8] ss:$144 sps:$4 sm:$0xff]   ;;  %v16709_v51 = vld [vmem:[%s26125_s1 + $0x1820] ss:$16 sps:$4 sm:$0xff]  }
 0x191   :  { %v9298_v56 = vpop.f32.mrf.mxu1  ;;  %10160 = vmatprep.subr.bf16.mxu1 %v16696_v7  ;;  %v20365_v47 = vadd.f32 %v9296_v59, %v9184_v46  ;;  %v9186_v58 = vadd.f32 %v9185_v50, %v19993_v8  ;;  %v16720_v59 = vld [vmem:[%s26125_s1 + $0x1a04] ss:$16 sps:$4 sm:$0xff]  }
 0x192   :  { %v9189_v2 = vpop.f32.mrf.mxu0  ;;  %9866 = vmatmul.mubr.bf16.gmra.mxu0 %v16685_v36  ;;  %v16723_v46 = vld [vmem:[%s26126_s0 + $0x4d4] ss:$144 sps:$4 sm:$0xff]  }
 0x193   :  { %v9302_v14 = vpop.f32.mrf.mxu1  ;;  %9979 = vmatmul.mubr.bf16.gmra.mxu1 %v16688_v37  ;;  %v20377_v55 = vadd.f32 %v9298_v56, %v9186_v58  ;;  %v9190_v8 = vadd.f32 %v9189_v2, %v20005_v20  ;;  %10048 = vmatpush1.bf16.msra.mxu0 %v16691_v15  ;;  %v16718_v58 = vld [vmem:[%s26125_s1 + $0x1a00] ss:$16 sps:$4 sm:$0xff]   ;;  %v16729_v2 = vld [vmem:[%s26125_s1 + $0x19e4] ss:$16 sps:$4 sm:$0xff]  }
 0x194   :  { %10161 = vmatpush1.bf16.msra.mxu1 %v16694_v49  ;;  %v9191_v11 = vpop.f32.mrf.mxu0  ;;  %10049 = vmatprep.subr.bf16.mxu0 %v16699_v5  ;;  %v16726_v49 = vld [vmem:[%s26126_s0 + $0x4dc] ss:$144 sps:$4 sm:$0xff]   ;;  %v16715_v5 = vld [vmem:[%s26125_s1 + $0x1800] ss:$16 sps:$4 sm:$0xff]  }
 0x195   :  { %v9304_v13 = vpop.f32.mrf.mxu1  ;;  %10162 = vmatprep.subr.bf16.mxu1 %v16702_v23  ;;  %v20389_v63 = vadd.f32 %v9302_v14, %v9190_v8  ;;  %v9192_v20 = vadd.f32 %v9191_v11, %v20017_v31  ;;  %9875 = vmatprep.mubr.bf16.mxu0 %v16705_v61  ;;  %v16732_v14 = vld [vmem:[%s26125_s1 + $0x1be4] ss:$16 sps:$4 sm:$0xff]   ;;  %v16721_v8 = vld [vmem:[%s26126_s0 + $0x4d0] ss:$144 sps:$4 sm:$0xff]  }
 0x196   :  { %9988 = vmatprep.mubr.bf16.mxu1 %v16708_v62  ;;  %v9193_v26 = vpop.f32.mrf.mxu0 }
 0x197   :  { %v9306_v35 = vpop.f32.mrf.mxu1  ;;  %v20401_v7 = vadd.f32 %v9304_v13, %v9192_v20  ;;  %v9194_v31 = vadd.f32 %v9193_v26, %v20029_v43  ;;  %10050 = vmatpush1.bf16.msra.mxu0 %v16697_v33  ;;  %v16730_v20 = vld [vmem:[%s26125_s1 + $0x1be0] ss:$16 sps:$4 sm:$0xff]   ;;  %v16735_v26 = vld [vmem:[%s26125_s1 + $0x19c4] ss:$16 sps:$4 sm:$0xff]  }
 0x198   :  { %10163 = vmatpush1.bf16.msra.mxu1 %v16700_v9  ;;  %v9195_v36 = vpop.f32.mrf.mxu0  ;;  %10051 = vmatprep.subr.bf16.mxu0 %v16711_v25  ;;  %v16724_v9 = vld [vmem:[%s26126_s0 + $0x4d8] ss:$144 sps:$4 sm:$0xff]   ;;  %v16727_v25 = vld [vmem:[%s26125_s1 + $0x19e0] ss:$16 sps:$4 sm:$0xff]  }
 0x199   :  { %v9308_v37 = vpop.f32.mrf.mxu1  ;;  %10164 = vmatprep.subr.bf16.mxu1 %v16714_v41  ;;  %v20413_v15 = vadd.f32 %v9306_v35, %v9194_v31  ;;  %v9196_v43 = vadd.f32 %v9195_v36, %v20041_v57  ;;  %v16738_v35 = vld [vmem:[%s26125_s1 + $0x1bc4] ss:$16 sps:$4 sm:$0xff]  }
 0x19a   :  { %v9199_v50 = vpop.f32.mrf.mxu0  ;;  %9876 = vmatmul.mubr.bf16.gmra.mxu0 %v16703_v21  ;;  %v16741_v31 = vld [vmem:[%s26126_s0 + $0x5f4] ss:$144 sps:$4 sm:$0xff]  }
 0x19b   :  { %v9312_v56 = vpop.f32.mrf.mxu1  ;;  %9989 = vmatmul.mubr.bf16.gmra.mxu1 %v16706_v22  ;;  %v20425_v23 = vadd.f32 %v9308_v37, %v9196_v43  ;;  %v9200_v57 = vadd.f32 %v9199_v50, %v20053_v6  ;;  %10052 = vmatpush1.bf16.msra.mxu0 %v16709_v51  ;;  %v16736_v43 = vld [vmem:[%s26125_s1 + $0x1bc0] ss:$16 sps:$4 sm:$0xff]   ;;  %v16747_v50 = vld [vmem:[%s26125_s1 + $0x19a4] ss:$16 sps:$4 sm:$0xff]  }
 0x19c   :  { %10165 = vmatpush1.bf16.msra.mxu1 %v16712_v34  ;;  %v9201_v61 = vpop.f32.mrf.mxu0  ;;  %10053 = vmatprep.subr.bf16.mxu0 %v16717_v45  ;;  %v16744_v34 = vld [vmem:[%s26126_s0 + $0x5fc] ss:$144 sps:$4 sm:$0xff]   ;;  %v16733_v45 = vld [vmem:[%s26125_s1 + $0x19c0] ss:$16 sps:$4 sm:$0xff]  }
 0x19d   :  { %v9314_v62 = vpop.f32.mrf.mxu1  ;;  %10166 = vmatprep.subr.bf16.mxu1 %v16720_v59  ;;  %v20437_v33 = vadd.f32 %v9312_v56, %v9200_v57  ;;  %v9202_v6 = vadd.f32 %v9201_v61, %v20065_v19  ;;  %9885 = vmatprep.mubr.bf16.mxu0 %v16723_v46  ;;  %v16750_v56 = vld [vmem:[%s26125_s1 + $0x1ba4] ss:$16 sps:$4 sm:$0xff]   ;;  %v16739_v57 = vld [vmem:[%s26126_s0 + $0x5f0] ss:$144 sps:$4 sm:$0xff]  }
 0x19e   :  { %9998 = vmatprep.mubr.bf16.mxu1 %v16726_v49  ;;  %v9203_v11 = vpop.f32.mrf.mxu0 }
 0x19f   :  { %v9316_v13 = vpop.f32.mrf.mxu1  ;;  %v20449_v41 = vadd.f32 %v9314_v62, %v9202_v6  ;;  %v9204_v19 = vadd.f32 %v9203_v11, %v20077_v30  ;;  %10054 = vmatpush1.bf16.msra.mxu0 %v16715_v5  ;;  %v16748_v6 = vld [vmem:[%s26125_s1 + $0x1ba0] ss:$16 sps:$4 sm:$0xff]   ;;  %v16753_v11 = vld [vmem:[%s26125_s1 + $0x1984] ss:$16 sps:$4 sm:$0xff]  }
 0x1a0   :  { %10167 = vmatpush1.bf16.msra.mxu1 %v16718_v58  ;;  %v9205_v21 = vpop.f32.mrf.mxu0  ;;  %10055 = vmatprep.subr.bf16.mxu0 %v16729_v2  ;;  %v16742_v58 = vld [vmem:[%s26126_s0 + $0x5f8] ss:$144 sps:$4 sm:$0xff]   ;;  %v16745_v2 = vld [vmem:[%s26125_s1 + $0x19a0] ss:$16 sps:$4 sm:$0xff]  }
 0x1a1   :  { %v9318_v22 = vpop.f32.mrf.mxu1  ;;  %10168 = vmatprep.subr.bf16.mxu1 %v16732_v14  ;;  %v20461_v51 = vadd.f32 %v9316_v13, %v9204_v19  ;;  %v9206_v30 = vadd.f32 %v9205_v21, %v20089_v42  ;;  %v16756_v13 = vld [vmem:[%s26125_s1 + $0x1b84] ss:$16 sps:$4 sm:$0xff]  }
 0x1a2   :  { %v9209_v36 = vpop.f32.mrf.mxu0  ;;  %9886 = vmatmul.mubr.bf16.gmra.mxu0 %v16721_v8  ;;  %v16759_v19 = vld [vmem:[%s26126_s0 + $0x714] ss:$144 sps:$4 sm:$0xff]  }
 0x1a3   :  { %v9322_v37 = vpop.f32.mrf.mxu1  ;;  %9999 = vmatmul.mubr.bf16.gmra.mxu1 %v16724_v9  ;;  %v20473_v59 = vadd.f32 %v9318_v22, %v9206_v30  ;;  %v9210_v42 = vadd.f32 %v9209_v36, %v20101_v54  ;;  %10056 = vmatpush2.bf16.msra.mxu0 %v16727_v25  ;;  %v16754_v30 = vld [vmem:[%s26125_s1 + $0x1b80] ss:$16 sps:$4 sm:$0xff]   ;;  %v16765_v36 = vld [vmem:[%s26125_s1 + $0x1964] ss:$16 sps:$4 sm:$0xff]  }
 0x1a4   :  { %10169 = vmatpush2.bf16.msra.mxu1 %v16730_v20  ;;  %v9211_v46 = vpop.f32.mrf.mxu0  ;;  %10057 = vmatprep.subr.bf16.mxu0 %v16735_v26  ;;  %v16762_v20 = vld [vmem:[%s26126_s0 + $0x71c] ss:$144 sps:$4 sm:$0xff]   ;;  %v16751_v26 = vld [vmem:[%s26125_s1 + $0x1980] ss:$16 sps:$4 sm:$0xff]  }
 0x1a5   :  { %v9324_v49 = vpop.f32.mrf.mxu1  ;;  %10170 = vmatprep.subr.bf16.mxu1 %v16738_v35  ;;  %v20485_v5 = vadd.f32 %v9322_v37, %v9210_v42  ;;  %v9212_v54 = vadd.f32 %v9211_v46, %v20113_v4  ;;  %9895 = vmatprep.mubr.bf16.mxu0 %v16741_v31  ;;  %v16768_v37 = vld [vmem:[%s26125_s1 + $0x1b64] ss:$16 sps:$4 sm:$0xff]   ;;  %v16757_v42 = vld [vmem:[%s26126_s0 + $0x710] ss:$144 sps:$4 sm:$0xff]  }
 0x1a6   :  { %10008 = vmatprep.mubr.bf16.mxu1 %v16744_v34  ;;  %v9213_v61 = vpop.f32.mrf.mxu0 }
 0x1a7   :  { %v9326_v62 = vpop.f32.mrf.mxu1  ;;  %v20497_v14 = vadd.f32 %v9324_v49, %v9212_v54  ;;  %v9214_v4 = vadd.f32 %v9213_v61, %v20125_v18  ;;  %10058 = vmatpush2.bf16.msra.mxu0 %v16733_v45  ;;  %v16766_v54 = vld [vmem:[%s26125_s1 + $0x1b60] ss:$16 sps:$4 sm:$0xff]   ;;  %v16771_v61 = vld [vmem:[%s26125_s1 + $0x1944] ss:$16 sps:$4 sm:$0xff]  }
 0x1a8   :  { %10171 = vmatpush2.bf16.msra.mxu1 %v16736_v43  ;;  %v9215_v8 = vpop.f32.mrf.mxu0  ;;  %10059 = vmatprep.subr.bf16.mxu0 %v16747_v50  ;;  %v16760_v43 = vld [vmem:[%s26126_s0 + $0x718] ss:$144 sps:$4 sm:$0xff]   ;;  %v16763_v50 = vld [vmem:[%s26125_s1 + $0x1960] ss:$16 sps:$4 sm:$0xff]  }
 0x1a9   :  { %v9328_v9 = vpop.f32.mrf.mxu1  ;;  %10172 = vmatprep.subr.bf16.mxu1 %v16750_v56  ;;  %v20509_v25 = vadd.f32 %v9326_v62, %v9214_v4  ;;  %v9216_v18 = vadd.f32 %v9215_v8, %v20137_v28  ;;  %v16774_v62 = vld [vmem:[%s26125_s1 + $0x1b44] ss:$16 sps:$4 sm:$0xff]  }
 0x1aa   :  { %v9219_v21 = vpop.f32.mrf.mxu0  ;;  %9896 = vmatmul.mubr.bf16.gmra.mxu0 %v16739_v57  ;;  %v16777_v4 = vld [vmem:[%s26126_s0 + $0x834] ss:$144 sps:$4 sm:$0xff]  }
 0x1ab   :  { %v9332_v22 = vpop.f32.mrf.mxu1  ;;  %10009 = vmatmul.mubr.bf16.gmra.mxu1 %v16742_v58  ;;  %v20521_v35 = vadd.f32 %v9328_v9, %v9216_v18  ;;  %v9220_v28 = vadd.f32 %v9219_v21, %v20149_v40  ;;  %10060 = vmatpush2.bf16.msra.mxu0 %v16745_v2  ;;  %v16772_v18 = vld [vmem:[%s26125_s1 + $0x1b40] ss:$16 sps:$4 sm:$0xff]   ;;  %v16783_v21 = vld [vmem:[%s26125_s1 + $0x1924] ss:$16 sps:$4 sm:$0xff]  }
 0x1ac   :  { %10173 = vmatpush2.bf16.msra.mxu1 %v16748_v6  ;;  %v9221_v31 = vpop.f32.mrf.mxu0  ;;  %10061 = vmatprep.subr.bf16.mxu0 %v16753_v11  ;;  %v16780_v6 = vld [vmem:[%s26126_s0 + $0x83c] ss:$144 sps:$4 sm:$0xff]   ;;  %v16769_v11 = vld [vmem:[%s26125_s1 + $0x1940] ss:$16 sps:$4 sm:$0xff]  }
 0x1ad   :  { %v9334_v34 = vpop.f32.mrf.mxu1  ;;  %10174 = vmatprep.subr.bf16.mxu1 %v16756_v13  ;;  %v20533_v45 = vadd.f32 %v9332_v22, %v9220_v28  ;;  %v9222_v40 = vadd.f32 %v9221_v31, %v20161_v53  ;;  %9905 = vmatprep.mubr.bf16.mxu0 %v16759_v19  ;;  %v16786_v22 = vld [vmem:[%s26125_s1 + $0x1b24] ss:$16 sps:$4 sm:$0xff]   ;;  %v16775_v28 = vld [vmem:[%s26126_s0 + $0x830] ss:$144 sps:$4 sm:$0xff]  }
 0x1ae   :  { %10018 = vmatprep.mubr.bf16.mxu1 %v16762_v20  ;;  %v9223_v46 = vpop.f32.mrf.mxu0 }
 0x1af   :  { %v9336_v49 = vpop.f32.mrf.mxu1  ;;  %v20545_v56 = vadd.f32 %v9334_v34, %v9222_v40  ;;  %v9224_v53 = vadd.f32 %v9223_v46, %v20173_v1  ;;  %10062 = vmatpush2.bf16.msra.mxu0 %v16751_v26  ;;  %v16784_v40 = vld [vmem:[%s26125_s1 + $0x1b20] ss:$16 sps:$4 sm:$0xff]   ;;  %v16789_v46 = vld [vmem:[%s26125_s1 + $0x1904] ss:$16 sps:$4 sm:$0xff]  }
 0x1b0   :  { %10175 = vmatpush2.bf16.msra.mxu1 %v16754_v30  ;;  %v9225_v57 = vpop.f32.mrf.mxu0  ;;  %10063 = vmatprep.subr.bf16.mxu0 %v16765_v36  ;;  %v16778_v30 = vld [vmem:[%s26126_s0 + $0x838] ss:$144 sps:$4 sm:$0xff]   ;;  %v16781_v36 = vld [vmem:[%s26125_s1 + $0x1920] ss:$16 sps:$4 sm:$0xff]  }
 0x1b1   :  { %v9338_v58 = vpop.f32.mrf.mxu1  ;;  %10176 = vmatprep.subr.bf16.mxu1 %v16768_v37  ;;  %v20557_v2 = vadd.f32 %v9336_v49, %v9224_v53  ;;  %v9226_v1 = vadd.f32 %v9225_v57, %v20185_v16  ;;  %v16792_v49 = vld [vmem:[%s26125_s1 + $0x1b04] ss:$16 sps:$4 sm:$0xff]  }
 0x1b2   :  { %v9229_v8 = vpop.f32.mrf.mxu0  ;;  %9906 = vmatmul.mubr.bf16.gmra.mxu0 %v16757_v42  ;;  %v16795_v53 = vld [vmem:[%s26126_s0 + $0x64] ss:$144 sps:$4 sm:$0xff]  }
 0x1b3   :  { %v9342_v9 = vpop.f32.mrf.mxu1  ;;  %10019 = vmatmul.mubr.bf16.gmra.mxu1 %v16760_v43  ;;  %v20569_v13 = vadd.f32 %v9338_v58, %v9226_v1  ;;  %v9230_v16 = vadd.f32 %v9229_v8, %v20197_v27  ;;  %10064 = vmatpush2.bf16.msra.mxu0 %v16763_v50  ;;  %v16790_v1 = vld [vmem:[%s26125_s1 + $0x1b00] ss:$16 sps:$4 sm:$0xff]   ;;  %v16801_v8 = vld [vmem:[%s26125_s1 + $0x1ce4] ss:$16 sps:$4 sm:$0xff]  }
 0x1b4   :  { %10177 = vmatpush2.bf16.msra.mxu1 %v16766_v54  ;;  %v9231_v19 = vpop.f32.mrf.mxu0  ;;  %10065 = vmatprep.subr.bf16.mxu0 %v16771_v61  ;;  %v16798_v54 = vld [vmem:[%s26126_s0 + $0x6c] ss:$144 sps:$4 sm:$0xff]   ;;  %v16787_v61 = vld [vmem:[%s26125_s1 + $0x1900] ss:$16 sps:$4 sm:$0xff]  }
 0x1b5   :  { %v9344_v20 = vpop.f32.mrf.mxu1  ;;  %10178 = vmatprep.subr.bf16.mxu1 %v16774_v62  ;;  %v20581_v26 = vadd.f32 %v9342_v9, %v9230_v16  ;;  %v9232_v27 = vadd.f32 %v9231_v19, %v20209_v38  ;;  %9915 = vmatprep.mubr.bf16.mxu0 %v16777_v4  ;;  %v16804_v9 = vld [vmem:[%s26125_s1 + $0x1ee4] ss:$16 sps:$4 sm:$0xff]   ;;  %v16793_v16 = vld [vmem:[%s26126_s0 + $0x60] ss:$144 sps:$4 sm:$0xff]  }
 0x1b6   :  { %10028 = vmatprep.mubr.bf16.mxu1 %v16780_v6  ;;  %v9233_v31 = vpop.f32.mrf.mxu0 }
 0x1b7   :  { %v9346_v34 = vpop.f32.mrf.mxu1  ;;  %v20593_v37 = vadd.f32 %v9344_v20, %v9232_v27  ;;  %v9234_v38 = vadd.f32 %v9233_v31, %v20221_v52  ;;  %10066 = vmatpush2.bf16.msra.mxu0 %v16769_v11  ;;  %v16802_v27 = vld [vmem:[%s26125_s1 + $0x1ee0] ss:$16 sps:$4 sm:$0xff]   ;;  %v16807_v31 = vld [vmem:[%s26125_s1 + $0x1cc4] ss:$16 sps:$4 sm:$0xff]  }
 0x1b8   :  { %10179 = vmatpush2.bf16.msra.mxu1 %v16772_v18  ;;  %v9235_v42 = vpop.f32.mrf.mxu0  ;;  %10067 = vmatprep.subr.bf16.mxu0 %v16783_v21  ;;  %v16796_v18 = vld [vmem:[%s26126_s0 + $0x68] ss:$144 sps:$4 sm:$0xff]   ;;  %v16799_v21 = vld [vmem:[%s26125_s1 + $0x1ce0] ss:$16 sps:$4 sm:$0xff]  }
 0x1b9   :  { %v9348_v43 = vpop.f32.mrf.mxu1  ;;  %10180 = vmatprep.subr.bf16.mxu1 %v16786_v22  ;;  %v20605_v50 = vadd.f32 %v9346_v34, %v9234_v38  ;;  %v9236_v52 = vadd.f32 %v9235_v42, %v20233_v0  ;;  %v16810_v34 = vld [vmem:[%s26125_s1 + $0x1ec4] ss:$16 sps:$4 sm:$0xff]  }
 0x1ba   :  { %v9239_v57 = vpop.f32.mrf.mxu0  ;;  %9916 = vmatmul.mubr.bf16.gmra.mxu0 %v16775_v28  ;;  %v16813_v38 = vld [vmem:[%s26126_s0 + $0x184] ss:$144 sps:$4 sm:$0xff]  }
 0x1bb   :  { %v9352_v58 = vpop.f32.mrf.mxu1  ;;  %10029 = vmatmul.mubr.bf16.gmra.mxu1 %v16778_v30  ;;  %v20617_v62 = vadd.f32 %v9348_v43, %v9236_v52  ;;  %v9240_v0 = vadd.f32 %v9239_v57, %v20245_v12  ;;  %10068 = vmatpush2.bf16.msra.mxu0 %v16781_v36  ;;  %v16808_v52 = vld [vmem:[%s26125_s1 + $0x1ec0] ss:$16 sps:$4 sm:$0xff]   ;;  %v16819_v57 = vld [vmem:[%s26125_s1 + $0x1ca4] ss:$16 sps:$4 sm:$0xff]  }
 0x1bc   :  { %10181 = vmatpush2.bf16.msra.mxu1 %v16784_v40  ;;  %v9241_v4 = vpop.f32.mrf.mxu0  ;;  %10069 = vmatprep.subr.bf16.mxu0 %v16789_v46  ;;  %v16816_v40 = vld [vmem:[%s26126_s0 + $0x18c] ss:$144 sps:$4 sm:$0xff]   ;;  %v16805_v46 = vld [vmem:[%s26125_s1 + $0x1cc0] ss:$16 sps:$4 sm:$0xff]  }
 0x1bd   :  { %v9354_v6 = vpop.f32.mrf.mxu1  ;;  %10182 = vmatprep.subr.bf16.mxu1 %v16792_v49  ;;  %v20629_v11 = vadd.f32 %v9352_v58, %v9240_v0  ;;  %v9242_v12 = vadd.f32 %v9241_v4, %v20257_v44  ;;  %10071 = vmatprep.mubr.bf16.mxu0 %v16795_v53  ;;  %v16822_v58 = vld [vmem:[%s26125_s1 + $0x1ea4] ss:$16 sps:$4 sm:$0xff]   ;;  %v16811_v0 = vld [vmem:[%s26126_s0 + $0x180] ss:$144 sps:$4 sm:$0xff]  }
 0x1be   :  { %10184 = vmatprep.mubr.bf16.mxu1 %v16798_v54  ;;  %v9243_v19 = vpop.f32.mrf.mxu0 }
 0x1bf   :  { %v9356_v20 = vpop.f32.mrf.mxu1  ;;  %v20641_v22 = vadd.f32 %v9354_v6, %v9242_v12  ;;  %v9244_v44 = vadd.f32 %v9243_v19, %v20269_v48  ;;  %10070 = vmatpush2.bf16.msra.mxu0 %v16787_v61  ;;  %v16820_v12 = vld [vmem:[%s26125_s1 + $0x1ea0] ss:$16 sps:$4 sm:$0xff]   ;;  %v16825_v19 = vld [vmem:[%s26125_s1 + $0x1c84] ss:$16 sps:$4 sm:$0xff]  }
 0x1c0   :  { %10183 = vmatpush2.bf16.msra.mxu1 %v16790_v1  ;;  %v9245_v28 = vpop.f32.mrf.mxu0  ;;  %10265 = vmatprep.subr.bf16.mxu0 %v16801_v8  ;;  %v16814_v1 = vld [vmem:[%s26126_s0 + $0x188] ss:$144 sps:$4 sm:$0xff]   ;;  %v16817_v8 = vld [vmem:[%s26125_s1 + $0x1ca0] ss:$16 sps:$4 sm:$0xff]  }
 0x1c1   :  { %v9358_v30 = vpop.f32.mrf.mxu1  ;;  %10378 = vmatprep.subr.bf16.mxu1 %v16804_v9  ;;  %v20653_v36 = vadd.f32 %v9356_v20, %v9244_v44  ;;  %v9246_v48 = vadd.f32 %v9245_v28, %v20281_v60  ;;  %v16828_v20 = vld [vmem:[%s26125_s1 + $0x1e84] ss:$16 sps:$4 sm:$0xff]  }
 0x1c2   :  { %v9395_v42 = vpop.f32.mrf.mxu0  ;;  %10072 = vmatmul.mubr.bf16.vlgmr.msra.gmra.mxu0 %v16793_v16  ;;  %v16831_v44 = vld [vmem:[%s26126_s0 + $0x2a4] ss:$144 sps:$4 sm:$0xff]  }
 0x1c3   :  { %v9508_v43 = vpop.f32.mrf.mxu1  ;;  %10185 = vmatmul.mubr.bf16.vlgmr.msra.gmra.mxu1 %v16796_v18  ;;  %v20665_v49 = vadd.f32 %v9358_v30, %v9246_v48  ;;  %v9396_v60 = vadd.f32 %v9395_v42, %v20293_v3  ;;  %10266 = vmatpush1.bf16.msra.mxu0 %v16799_v21  ;;  %v16826_v48 = vld [vmem:[%s26125_s1 + $0x1e80] ss:$16 sps:$4 sm:$0xff]   ;;  %v16837_v42 = vld [vmem:[%s26125_s1 + $0x1c64] ss:$16 sps:$4 sm:$0xff]  }
 0x1c4   :  { %10379 = vmatpush1.bf16.msra.mxu1 %v16802_v27  ;;  %v9397_v53 = vpop.f32.mrf.mxu0  ;;  %10267 = vmatprep.subr.bf16.mxu0 %v16807_v31  ;;  %v16834_v27 = vld [vmem:[%s26126_s0 + $0x2ac] ss:$144 sps:$4 sm:$0xff]   ;;  %v16823_v31 = vld [vmem:[%s26125_s1 + $0x1c80] ss:$16 sps:$4 sm:$0xff]  }
 0x1c5   :  { %v9510_v54 = vpop.f32.mrf.mxu1  ;;  %10380 = vmatprep.subr.bf16.mxu1 %v16810_v34  ;;  %v20677_v61 = vadd.f32 %v9508_v43, %v9396_v60  ;;  %v9398_v3 = vadd.f32 %v9397_v53, %v20305_v10  ;;  %10081 = vmatprep.mubr.bf16.mxu0 %v16813_v38  ;;  %v16840_v43 = vld [vmem:[%s26125_s1 + $0x1e64] ss:$16 sps:$4 sm:$0xff]   ;;  %v16829_v60 = vld [vmem:[%s26126_s0 + $0x2a0] ss:$144 sps:$4 sm:$0xff]  }
 0x1c6   :  { %10194 = vmatprep.mubr.bf16.mxu1 %v16816_v40  ;;  %v9399_v4 = vpop.f32.mrf.mxu0 }
 0x1c7   :  { %v9512_v6 = vpop.f32.mrf.mxu1  ;;  %v20689_v9 = vadd.f32 %v9510_v54, %v9398_v3  ;;  %v9400_v10 = vadd.f32 %v9399_v4, %v20317_v17  ;;  %10268 = vmatpush1.bf16.msra.mxu0 %v16805_v46  ;;  %v16838_v3 = vld [vmem:[%s26125_s1 + $0x1e60] ss:$16 sps:$4 sm:$0xff]   ;;  %v16843_v4 = vld [vmem:[%s26125_s1 + $0x1c44] ss:$16 sps:$4 sm:$0xff]  }
 0x1c8   :  { %10381 = vmatpush1.bf16.msra.mxu1 %v16808_v52  ;;  %v9401_v16 = vpop.f32.mrf.mxu0  ;;  %10269 = vmatprep.subr.bf16.mxu0 %v16819_v57  ;;  %v16832_v52 = vld [vmem:[%s26126_s0 + $0x2a8] ss:$144 sps:$4 sm:$0xff]   ;;  %v16835_v57 = vld [vmem:[%s26125_s1 + $0x1c60] ss:$16 sps:$4 sm:$0xff]  }
 0x1c9   :  { %v9514_v18 = vpop.f32.mrf.mxu1  ;;  %10382 = vmatprep.subr.bf16.mxu1 %v16822_v58  ;;  %v20701_v21 = vadd.f32 %v9512_v6, %v9400_v10  ;;  %v9402_v17 = vadd.f32 %v9401_v16, %v20329_v24  ;;  %v16846_v6 = vld [vmem:[%s26125_s1 + $0x1e44] ss:$16 sps:$4 sm:$0xff]  }
 0x1ca   :  { %v9405_v28 = vpop.f32.mrf.mxu0  ;;  %10082 = vmatmul.mubr.bf16.gmra.mxu0 %v16811_v0  ;;  %v16849_v10 = vld [vmem:[%s26126_s0 + $0x3c4] ss:$144 sps:$4 sm:$0xff]  }
 0x1cb   :  { %v9518_v30 = vpop.f32.mrf.mxu1  ;;  %10195 = vmatmul.mubr.bf16.gmra.mxu1 %v16814_v1  ;;  %v20713_v34 = vadd.f32 %v9514_v18, %v9402_v17  ;;  %v9406_v24 = vadd.f32 %v9405_v28, %v20341_v32  ;;  %10270 = vmatpush1.bf16.msra.mxu0 %v16817_v8  ;;  %v16844_v17 = vld [vmem:[%s26125_s1 + $0x1e40] ss:$16 sps:$4 sm:$0xff]   ;;  %v16855_v28 = vld [vmem:[%s26125_s1 + $0x1c24] ss:$16 sps:$4 sm:$0xff]  }
 0x1cc   :  { %10383 = vmatpush1.bf16.msra.mxu1 %v16820_v12  ;;  %v9407_v38 = vpop.f32.mrf.mxu0  ;;  %10271 = vmatprep.subr.bf16.mxu0 %v16825_v19  ;;  %v16852_v12 = vld [vmem:[%s26126_s0 + $0x3cc] ss:$144 sps:$4 sm:$0xff]   ;;  %v16841_v19 = vld [vmem:[%s26125_s1 + $0x1c40] ss:$16 sps:$4 sm:$0xff]  }
 0x1cd   :  { %v9520_v40 = vpop.f32.mrf.mxu1  ;;  %10384 = vmatprep.subr.bf16.mxu1 %v16828_v20  ;;  %v20725_v46 = vadd.f32 %v9518_v30, %v9406_v24  ;;  %v9408_v32 = vadd.f32 %v9407_v38, %v20353_v39  ;;  %10091 = vmatprep.mubr.bf16.mxu0 %v16831_v44  ;;  %v16858_v30 = vld [vmem:[%s26125_s1 + $0x1e24] ss:$16 sps:$4 sm:$0xff]   ;;  %v16847_v24 = vld [vmem:[%s26126_s0 + $0x3c0] ss:$144 sps:$4 sm:$0xff]  }
 0x1ce   :  { %10204 = vmatprep.mubr.bf16.mxu1 %v16834_v27  ;;  %v9409_v53 = vpop.f32.mrf.mxu0 }
 0x1cf   :  { %v9522_v54 = vpop.f32.mrf.mxu1  ;;  %v20737_v58 = vadd.f32 %v9520_v40, %v9408_v32  ;;  %v9410_v39 = vadd.f32 %v9409_v53, %v20365_v47  ;;  %10272 = vmatpush1.bf16.msra.mxu0 %v16823_v31  ;;  %v16856_v32 = vld [vmem:[%s26125_s1 + $0x1e20] ss:$16 sps:$4 sm:$0xff]   ;;  %v16861_v53 = vld [vmem:[%s26125_s1 + $0x1c04] ss:$16 sps:$4 sm:$0xff]  }
 0x1d0   :  { %10385 = vmatpush1.bf16.msra.mxu1 %v16826_v48  ;;  %v9411_v0 = vpop.f32.mrf.mxu0  ;;  %10273 = vmatprep.subr.bf16.mxu0 %v16837_v42  ;;  %v16850_v48 = vld [vmem:[%s26126_s0 + $0x3c8] ss:$144 sps:$4 sm:$0xff]   ;;  %v16853_v42 = vld [vmem:[%s26125_s1 + $0x1c20] ss:$16 sps:$4 sm:$0xff]  }
 0x1d1   :  { %v9524_v1 = vpop.f32.mrf.mxu1  ;;  %10386 = vmatprep.subr.bf16.mxu1 %v16840_v43  ;;  %v20749_v8 = vadd.f32 %v9522_v54, %v9410_v39  ;;  %v9412_v47 = vadd.f32 %v9411_v0, %v20377_v55  ;;  %v16864_v54 = vld [vmem:[%s26125_s1 + $0x1e04] ss:$16 sps:$4 sm:$0xff]  }
 0x1d2   :  { %v9415_v16 = vpop.f32.mrf.mxu0  ;;  %10092 = vmatmul.mubr.bf16.gmra.mxu0 %v16829_v60  ;;  %v16867_v39 = vld [vmem:[%s26126_s0 + $0x4e4] ss:$144 sps:$4 sm:$0xff]  }
 0x1d3   :  { %v9528_v18 = vpop.f32.mrf.mxu1  ;;  %10205 = vmatmul.mubr.bf16.gmra.mxu1 %v16832_v52  ;;  %v20761_v20 = vadd.f32 %v9524_v1, %v9412_v47  ;;  %v9416_v55 = vadd.f32 %v9415_v16, %v20389_v63  ;;  %10274 = vmatpush1.bf16.msra.mxu0 %v16835_v57  ;;  %v16862_v47 = vld [vmem:[%s26125_s1 + $0x1e00] ss:$16 sps:$4 sm:$0xff]   ;;  %v16873_v16 = vld [vmem:[%s26125_s1 + $0x1de4] ss:$16 sps:$4 sm:$0xff]  }
 0x1d4   :  { %10387 = vmatpush1.bf16.msra.mxu1 %v16838_v3  ;;  %v9417_v44 = vpop.f32.mrf.mxu0  ;;  %10275 = vmatprep.subr.bf16.mxu0 %v16843_v4  ;;  %v16870_v3 = vld [vmem:[%s26126_s0 + $0x4ec] ss:$144 sps:$4 sm:$0xff]   ;;  %v16859_v4 = vld [vmem:[%s26125_s1 + $0x1c00] ss:$16 sps:$4 sm:$0xff]  }
 0x1d5   :  { %v9530_v27 = vpop.f32.mrf.mxu1  ;;  %10388 = vmatprep.subr.bf16.mxu1 %v16846_v6  ;;  %v20773_v31 = vadd.f32 %v9528_v18, %v9416_v55  ;;  %v9418_v63 = vadd.f32 %v9417_v44, %v20401_v7  ;;  %10101 = vmatprep.mubr.bf16.mxu0 %v16849_v10  ;;  %v16876_v18 = vld [vmem:[%s26125_s1 + $0x1fe4] ss:$16 sps:$4 sm:$0xff]   ;;  %v16865_v55 = vld [vmem:[%s26126_s0 + $0x4e0] ss:$144 sps:$4 sm:$0xff]  }
 0x1d6   :  { %10214 = vmatprep.mubr.bf16.mxu1 %v16852_v12  ;;  %v9419_v38 = vpop.f32.mrf.mxu0 }
 0x1d7   :  { %v9532_v40 = vpop.f32.mrf.mxu1  ;;  %v20785_v43 = vadd.f32 %v9530_v27, %v9418_v63  ;;  %v9420_v7 = vadd.f32 %v9419_v38, %v20413_v15  ;;  %10276 = vmatpush1.bf16.msra.mxu0 %v16841_v19  ;;  %v16874_v63 = vld [vmem:[%s26125_s1 + $0x1fe0] ss:$16 sps:$4 sm:$0xff]   ;;  %v16879_v38 = vld [vmem:[%s26125_s1 + $0x1dc4] ss:$16 sps:$4 sm:$0xff]  }
 0x1d8   :  { %10389 = vmatpush1.bf16.msra.mxu1 %v16844_v17  ;;  %v9421_v60 = vpop.f32.mrf.mxu0  ;;  %10277 = vmatprep.subr.bf16.mxu0 %v16855_v28  ;;  %v16868_v17 = vld [vmem:[%s26126_s0 + $0x4e8] ss:$144 sps:$4 sm:$0xff]   ;;  %v16871_v28 = vld [vmem:[%s26125_s1 + $0x1de0] ss:$16 sps:$4 sm:$0xff]  }
 0x1d9   :  { %v9534_v52 = vpop.f32.mrf.mxu1  ;;  %10390 = vmatprep.subr.bf16.mxu1 %v16858_v30  ;;  %v20797_v57 = vadd.f32 %v9532_v40, %v9420_v7  ;;  %v9422_v15 = vadd.f32 %v9421_v60, %v20425_v23  ;;  %v16882_v40 = vld [vmem:[%s26125_s1 + $0x1fc4] ss:$16 sps:$4 sm:$0xff]  }
 0x1da   :  { %v9425_v0 = vpop.f32.mrf.mxu0  ;;  %10102 = vmatmul.mubr.bf16.gmra.mxu0 %v16847_v24  ;;  %v16885_v7 = vld [vmem:[%s26126_s0 + $0x604] ss:$144 sps:$4 sm:$0xff]  }
 0x1db   :  { %v9538_v1 = vpop.f32.mrf.mxu1  ;;  %10215 = vmatmul.mubr.bf16.gmra.mxu1 %v16850_v48  ;;  %v20809_v6 = vadd.f32 %v9534_v52, %v9422_v15  ;;  %v9426_v23 = vadd.f32 %v9425_v0, %v20437_v33  ;;  %10278 = vmatpush1.bf16.msra.mxu0 %v16853_v42  ;;  %v16880_v15 = vld [vmem:[%s26125_s1 + $0x1fc0] ss:$16 sps:$4 sm:$0xff]   ;;  %v16891_v0 = vld [vmem:[%s26125_s1 + $0x1da4] ss:$16 sps:$4 sm:$0xff]  }
 0x1dc   :  { %10391 = vmatpush1.bf16.msra.mxu1 %v16856_v32  ;;  %v9427_v10 = vpop.f32.mrf.mxu0  ;;  %10279 = vmatprep.subr.bf16.mxu0 %v16861_v53  ;;  %v16888_v32 = vld [vmem:[%s26126_s0 + $0x60c] ss:$144 sps:$4 sm:$0xff]   ;;  %v16877_v53 = vld [vmem:[%s26125_s1 + $0x1dc0] ss:$16 sps:$4 sm:$0xff]  }
 0x1dd   :  { %v9540_v12 = vpop.f32.mrf.mxu1  ;;  %10392 = vmatprep.subr.bf16.mxu1 %v16864_v54  ;;  %v20821_v19 = vadd.f32 %v9538_v1, %v9426_v23  ;;  %v9428_v33 = vadd.f32 %v9427_v10, %v20449_v41  ;;  %10111 = vmatprep.mubr.bf16.mxu0 %v16867_v39  ;;  %v16894_v1 = vld [vmem:[%s26125_s1 + $0x1fa4] ss:$16 sps:$4 sm:$0xff]   ;;  %v16883_v23 = vld [vmem:[%s26126_s0 + $0x600] ss:$144 sps:$4 sm:$0xff]  }
 0x1de   :  { %10224 = vmatprep.mubr.bf16.mxu1 %v16870_v3  ;;  %v9429_v44 = vpop.f32.mrf.mxu0 }
 0x1df   :  { %v9542_v27 = vpop.f32.mrf.mxu1  ;;  %v20833_v30 = vadd.f32 %v9540_v12, %v9428_v33  ;;  %v9430_v41 = vadd.f32 %v9429_v44, %v20461_v51  ;;  %10280 = vmatpush1.bf16.msra.mxu0 %v16859_v4  ;;  %v16892_v33 = vld [vmem:[%s26125_s1 + $0x1fa0] ss:$16 sps:$4 sm:$0xff]   ;;  %v16897_v44 = vld [vmem:[%s26125_s1 + $0x1d84] ss:$16 sps:$4 sm:$0xff]  }
 0x1e0   :  { %10393 = vmatpush1.bf16.msra.mxu1 %v16862_v47  ;;  %v9431_v24 = vpop.f32.mrf.mxu0  ;;  %10281 = vmatprep.subr.bf16.mxu0 %v16873_v16  ;;  %v16886_v47 = vld [vmem:[%s26126_s0 + $0x608] ss:$144 sps:$4 sm:$0xff]   ;;  %v16889_v16 = vld [vmem:[%s26125_s1 + $0x1da0] ss:$16 sps:$4 sm:$0xff]  }
 0x1e1   :  { %v9544_v48 = vpop.f32.mrf.mxu1  ;;  %10394 = vmatprep.subr.bf16.mxu1 %v16876_v18  ;;  %v20845_v42 = vadd.f32 %v9542_v27, %v9430_v41  ;;  %v9432_v51 = vadd.f32 %v9431_v24, %v20473_v59  ;;  %v16900_v27 = vld [vmem:[%s26125_s1 + $0x1f84] ss:$16 sps:$4 sm:$0xff]  }
 0x1e2   :  { %v9435_v60 = vpop.f32.mrf.mxu0  ;;  %10112 = vmatmul.mubr.bf16.gmra.mxu0 %v16865_v55  ;;  %v16903_v41 = vld [vmem:[%s26126_s0 + $0x724] ss:$144 sps:$4 sm:$0xff]  }
 0x1e3   :  { %v9548_v52 = vpop.f32.mrf.mxu1  ;;  %10225 = vmatmul.mubr.bf16.gmra.mxu1 %v16868_v17  ;;  %v20857_v54 = vadd.f32 %v9544_v48, %v9432_v51  ;;  %v9436_v59 = vadd.f32 %v9435_v60, %v20485_v5  ;;  %10282 = vmatpush2.bf16.msra.mxu0 %v16871_v28  ;;  %v16898_v51 = vld [vmem:[%s26125_s1 + $0x1f80] ss:$16 sps:$4 sm:$0xff]   ;;  %v16909_v60 = vld [vmem:[%s26125_s1 + $0x1d64] ss:$16 sps:$4 sm:$0xff]  }
 0x1e4   :  { %10395 = vmatpush2.bf16.msra.mxu1 %v16874_v63  ;;  %v9437_v39 = vpop.f32.mrf.mxu0  ;;  %10283 = vmatprep.subr.bf16.mxu0 %v16879_v38  ;;  %v16906_v63 = vld [vmem:[%s26126_s0 + $0x72c] ss:$144 sps:$4 sm:$0xff]   ;;  %v16895_v38 = vld [vmem:[%s26125_s1 + $0x1d80] ss:$16 sps:$4 sm:$0xff]  }
 0x1e5   :  { %v9550_v3 = vpop.f32.mrf.mxu1  ;;  %10396 = vmatprep.subr.bf16.mxu1 %v16882_v40  ;;  %v20869_v4 = vadd.f32 %v9548_v52, %v9436_v59  ;;  %v9438_v5 = vadd.f32 %v9437_v39, %v20497_v14  ;;  %10121 = vmatprep.mubr.bf16.mxu0 %v16885_v7  ;;  %v16912_v52 = vld [vmem:[%s26125_s1 + $0x1f64] ss:$16 sps:$4 sm:$0xff]   ;;  %v16901_v59 = vld [vmem:[%s26126_s0 + $0x720] ss:$144 sps:$4 sm:$0xff]  }
 0x1e6   :  { %10234 = vmatprep.mubr.bf16.mxu1 %v16888_v32  ;;  %v9439_v10 = vpop.f32.mrf.mxu0 }
 0x1e7   :  { %v9552_v12 = vpop.f32.mrf.mxu1  ;;  %v20881_v18 = vadd.f32 %v9550_v3, %v9438_v5  ;;  %v9440_v14 = vadd.f32 %v9439_v10, %v20509_v25  ;;  %10284 = vmatpush2.bf16.msra.mxu0 %v16877_v53  ;;  %v16910_v5 = vld [vmem:[%s26125_s1 + $0x1f60] ss:$16 sps:$4 sm:$0xff]   ;;  %v16915_v10 = vld [vmem:[%s26125_s1 + $0x1d44] ss:$16 sps:$4 sm:$0xff]  }
 0x1e8   :  { %10397 = vmatpush2.bf16.msra.mxu1 %v16880_v15  ;;  %v9441_v55 = vpop.f32.mrf.mxu0  ;;  %10285 = vmatprep.subr.bf16.mxu0 %v16891_v0  ;;  %v16904_v15 = vld [vmem:[%s26126_s0 + $0x728] ss:$144 sps:$4 sm:$0xff]   ;;  %v16907_v0 = vld [vmem:[%s26125_s1 + $0x1d60] ss:$16 sps:$4 sm:$0xff]  }
 0x1e9   :  { %v9554_v17 = vpop.f32.mrf.mxu1  ;;  %10398 = vmatprep.subr.bf16.mxu1 %v16894_v1  ;;  %v20893_v28 = vadd.f32 %v9552_v12, %v9440_v14  ;;  %v9442_v25 = vadd.f32 %v9441_v55, %v20521_v35  ;;  %v16918_v12 = vld [vmem:[%s26125_s1 + $0x1f44] ss:$16 sps:$4 sm:$0xff]  }
 0x1ea   :  { %v9445_v24 = vpop.f32.mrf.mxu0  ;;  %10122 = vmatmul.mubr.bf16.gmra.mxu0 %v16883_v23  ;;  %v16921_v14 = vld [vmem:[%s26126_s0 + $0x844] ss:$144 sps:$4 sm:$0xff]  }
 0x1eb   :  { %v9558_v48 = vpop.f32.mrf.mxu1  ;;  %10235 = vmatmul.mubr.bf16.gmra.mxu1 %v16886_v47  ;;  %v20905_v40 = vadd.f32 %v9554_v17, %v9442_v25  ;;  %v9446_v35 = vadd.f32 %v9445_v24, %v20533_v45  ;;  %10286 = vmatpush2.bf16.msra.mxu0 %v16889_v16  ;;  %v16916_v25 = vld [vmem:[%s26125_s1 + $0x1f40] ss:$16 sps:$4 sm:$0xff]   ;;  %v16927_v24 = vld [vmem:[%s26125_s1 + $0x1d24] ss:$16 sps:$4 sm:$0xff]  }
 0x1ec   :  { %10399 = vmatpush2.bf16.msra.mxu1 %v16892_v33  ;;  %v9447_v7 = vpop.f32.mrf.mxu0  ;;  %10287 = vmatprep.subr.bf16.mxu0 %v16897_v44  ;;  %v16924_v33 = vld [vmem:[%s26126_s0 + $0x84c] ss:$144 sps:$4 sm:$0xff]   ;;  %v16913_v44 = vld [vmem:[%s26125_s1 + $0x1d40] ss:$16 sps:$4 sm:$0xff]  }
 0x1ed   :  { %v9560_v32 = vpop.f32.mrf.mxu1  ;;  %10400 = vmatprep.subr.bf16.mxu1 %v16900_v27  ;;  %v20917_v53 = vadd.f32 %v9558_v48, %v9446_v35  ;;  %v9448_v45 = vadd.f32 %v9447_v7, %v20545_v56  ;;  %10131 = vmatprep.mubr.bf16.mxu0 %v16903_v41  ;;  %v16930_v48 = vld [vmem:[%s26125_s1 + $0x1f24] ss:$16 sps:$4 sm:$0xff]   ;;  %v16919_v35 = vld [vmem:[%s26126_s0 + $0x840] ss:$144 sps:$4 sm:$0xff]  }
 0x1ee   :  { %10244 = vmatprep.mubr.bf16.mxu1 %v16906_v63  ;;  %v9449_v39 = vpop.f32.mrf.mxu0 }
 0x1ef   :  { %v9562_v3 = vpop.f32.mrf.mxu1  ;;  %v20929_v1 = vadd.f32 %v9560_v32, %v9448_v45  ;;  %v9450_v56 = vadd.f32 %v9449_v39, %v20557_v2  ;;  %10288 = vmatpush2.bf16.msra.mxu0 %v16895_v38  ;;  %v16928_v45 = vld [vmem:[%s26125_s1 + $0x1f20] ss:$16 sps:$4 sm:$0xff]   ;;  %v16933_v39 = vld [vmem:[%s26125_s1 + $0x1d04] ss:$16 sps:$4 sm:$0xff]  }
 0x1f0   :  { %10401 = vmatpush2.bf16.msra.mxu1 %v16898_v51  ;;  %v9451_v23 = vpop.f32.mrf.mxu0  ;;  %10289 = vmatprep.subr.bf16.mxu0 %v16909_v60  ;;  %v16922_v51 = vld [vmem:[%s26126_s0 + $0x848] ss:$144 sps:$4 sm:$0xff]   ;;  %v16925_v60 = vld [vmem:[%s26125_s1 + $0x1d20] ss:$16 sps:$4 sm:$0xff]  }
 0x1f1   :  { %v9564_v47 = vpop.f32.mrf.mxu1  ;;  %10402 = vmatprep.subr.bf16.mxu1 %v16912_v52  ;;  %v20941_v16 = vadd.f32 %v9562_v3, %v9450_v56  ;;  %v9452_v2 = vadd.f32 %v9451_v23, %v20569_v13  ;;  %v16936_v3 = vld [vmem:[%s26125_s1 + $0x1f04] ss:$16 sps:$4 sm:$0xff]  }
 0x1f2   :  { %v9455_v55 = vpop.f32.mrf.mxu0  ;;  %10132 = vmatmul.mubr.bf16.gmra.mxu0 %v16901_v59  ;;  %v16939_v56 = vld [vmem:[%s26126_s0 + $0x74] ss:$144 sps:$4 sm:$0xff]  }
 0x1f3   :  { %v9568_v17 = vpop.f32.mrf.mxu1  ;;  %10245 = vmatmul.mubr.bf16.gmra.mxu1 %v16904_v15  ;;  %v20953_v27 = vadd.f32 %v9564_v47, %v9452_v2  ;;  %v9456_v13 = vadd.f32 %v9455_v55, %v20581_v26  ;;  %10290 = vmatpush2.bf16.msra.mxu0 %v16907_v0  ;;  %v16934_v2 = vld [vmem:[%s26125_s1 + $0x1f00] ss:$16 sps:$4 sm:$0xff]   ;;  %v16945_v55 = vld [vmem:[%s26125_s1 + $0x20e4] ss:$16 sps:$4 sm:$0xff]  }
 0x1f4   :  { %10403 = vmatpush2.bf16.msra.mxu1 %v16910_v5  ;;  %v9457_v41 = vpop.f32.mrf.mxu0  ;;  %10291 = vmatprep.subr.bf16.mxu0 %v16915_v10  ;;  %v16942_v5 = vld [vmem:[%s26126_s0 + $0x7c] ss:$144 sps:$4 sm:$0xff]   ;;  %v16931_v10 = vld [vmem:[%s26125_s1 + $0x1d00] ss:$16 sps:$4 sm:$0xff]  }
 0x1f5   :  { %v9570_v63 = vpop.f32.mrf.mxu1  ;;  %10404 = vmatprep.subr.bf16.mxu1 %v16918_v12  ;;  %v20965_v38 = vadd.f32 %v9568_v17, %v9456_v13  ;;  %v9458_v26 = vadd.f32 %v9457_v41, %v20593_v37  ;;  %10141 = vmatprep.mubr.bf16.mxu0 %v16921_v14  ;;  %v16948_v17 = vld [vmem:[%s26125_s1 + $0x22e4] ss:$16 sps:$4 sm:$0xff]   ;;  %v16937_v13 = vld [vmem:[%s26126_s0 + $0x70] ss:$144 sps:$4 sm:$0xff]  }
 0x1f6   :  { %10254 = vmatprep.mubr.bf16.mxu1 %v16924_v33  ;;  %v9459_v7 = vpop.f32.mrf.mxu0 }
 0x1f7   :  { %v9572_v32 = vpop.f32.mrf.mxu1  ;;  %v20977_v52 = vadd.f32 %v9570_v63, %v9458_v26  ;;  %v9460_v37 = vadd.f32 %v9459_v7, %v20605_v50  ;;  %10292 = vmatpush2.bf16.msra.mxu0 %v16913_v44  ;;  %v16946_v26 = vld [vmem:[%s26125_s1 + $0x22e0] ss:$16 sps:$4 sm:$0xff]   ;;  %v16951_v7 = vld [vmem:[%s26125_s1 + $0x20c4] ss:$16 sps:$4 sm:$0xff]  }
 0x1f8   :  { %10405 = vmatpush2.bf16.msra.mxu1 %v16916_v25  ;;  %v9461_v59 = vpop.f32.mrf.mxu0  ;;  %10293 = vmatprep.subr.bf16.mxu0 %v16927_v24  ;;  %v16940_v25 = vld [vmem:[%s26126_s0 + $0x78] ss:$144 sps:$4 sm:$0xff]   ;;  %v16943_v24 = vld [vmem:[%s26125_s1 + $0x20e0] ss:$16 sps:$4 sm:$0xff]  }
 0x1f9   :  { %v9574_v15 = vpop.f32.mrf.mxu1  ;;  %10406 = vmatprep.subr.bf16.mxu1 %v16930_v48  ;;  %v20989_v0 = vadd.f32 %v9572_v32, %v9460_v37  ;;  %v9462_v50 = vadd.f32 %v9461_v59, %v20617_v62  ;;  %v16954_v32 = vld [vmem:[%s26125_s1 + $0x22c4] ss:$16 sps:$4 sm:$0xff]  }
 0x1fa   :  { %v9465_v23 = vpop.f32.mrf.mxu0  ;;  %10142 = vmatmul.mubr.bf16.gmra.mxu0 %v16919_v35  ;;  %v16957_v37 = vld [vmem:[%s26126_s0 + $0x194] ss:$144 sps:$4 sm:$0xff]  }
 0x1fb   :  { %v9578_v47 = vpop.f32.mrf.mxu1  ;;  %10255 = vmatmul.mubr.bf16.gmra.mxu1 %v16922_v51  ;;  %v21001_v12 = vadd.f32 %v9574_v15, %v9462_v50  ;;  %v9466_v62 = vadd.f32 %v9465_v23, %v20629_v11  ;;  %10294 = vmatpush2.bf16.msra.mxu0 %v16925_v60  ;;  %v16952_v50 = vld [vmem:[%s26125_s1 + $0x22c0] ss:$16 sps:$4 sm:$0xff]   ;;  %v16963_v23 = vld [vmem:[%s26125_s1 + $0x20a4] ss:$16 sps:$4 sm:$0xff]  }
 0x1fc   :  { %10407 = vmatpush2.bf16.msra.mxu1 %v16928_v45  ;;  %v9467_v14 = vpop.f32.mrf.mxu0  ;;  %10295 = vmatprep.subr.bf16.mxu0 %v16933_v39  ;;  %v16960_v45 = vld [vmem:[%s26126_s0 + $0x19c] ss:$144 sps:$4 sm:$0xff]   ;;  %v16949_v39 = vld [vmem:[%s26125_s1 + $0x20c0] ss:$16 sps:$4 sm:$0xff]  }
 0x1fd   :  { %v9580_v33 = vpop.f32.mrf.mxu1  ;;  %10408 = vmatprep.subr.bf16.mxu1 %v16936_v3  ;;  %v21013_v44 = vadd.f32 %v9578_v47, %v9466_v62  ;;  %v9468_v11 = vadd.f32 %v9467_v14, %v20641_v22  ;;  %10297 = vmatprep.mubr.bf16.mxu0 %v16939_v56  ;;  %v16966_v47 = vld [vmem:[%s26125_s1 + $0x22a4] ss:$16 sps:$4 sm:$0xff]   ;;  %v16955_v62 = vld [vmem:[%s26126_s0 + $0x190] ss:$144 sps:$4 sm:$0xff]  }
 0x1fe   :  { %10410 = vmatprep.mubr.bf16.mxu1 %v16942_v5  ;;  %v9469_v41 = vpop.f32.mrf.mxu0 }
 0x1ff   :  { %v9582_v63 = vpop.f32.mrf.mxu1  ;;  %v21025_v48 = vadd.f32 %v9580_v33, %v9468_v11  ;;  %v9470_v22 = vadd.f32 %v9469_v41, %v20653_v36  ;;  %10296 = vmatpush2.bf16.msra.mxu0 %v16931_v10  ;;  %v16964_v11 = vld [vmem:[%s26125_s1 + $0x22a0] ss:$16 sps:$4 sm:$0xff]   ;;  %v16969_v41 = vld [vmem:[%s26125_s1 + $0x2084] ss:$16 sps:$4 sm:$0xff]  }
 0x200   :  { %10409 = vmatpush2.bf16.msra.mxu1 %v16934_v2  ;;  %v9471_v35 = vpop.f32.mrf.mxu0  ;;  %10491 = vmatprep.subr.bf16.mxu0 %v16945_v55  ;;  %v16958_v2 = vld [vmem:[%s26126_s0 + $0x198] ss:$144 sps:$4 sm:$0xff]   ;;  %v16961_v55 = vld [vmem:[%s26125_s1 + $0x20a0] ss:$16 sps:$4 sm:$0xff]  }
 0x201   :  { %v9584_v51 = vpop.f32.mrf.mxu1  ;;  %10604 = vmatprep.subr.bf16.mxu1 %v16948_v17  ;;  %v21037_v60 = vadd.f32 %v9582_v63, %v9470_v22  ;;  %v9472_v36 = vadd.f32 %v9471_v35, %v20665_v49  ;;  %v16972_v63 = vld [vmem:[%s26125_s1 + $0x2284] ss:$16 sps:$4 sm:$0xff]  }
 0x202   :  { %v9621_v59 = vpop.f32.mrf.mxu0  ;;  %10298 = vmatmul.mubr.bf16.vlgmr.msra.gmra.mxu0 %v16937_v13  ;;  %v16975_v22 = vld [vmem:[%s26126_s0 + $0x2b4] ss:$144 sps:$4 sm:$0xff]  }
 0x203   :  { %v9734_v15 = vpop.f32.mrf.mxu1  ;;  %10411 = vmatmul.mubr.bf16.vlgmr.msra.gmra.mxu1 %v16940_v25  ;;  %v21049_v3 = vadd.f32 %v9584_v51, %v9472_v36  ;;  %v9622_v49 = vadd.f32 %v9621_v59, %v20677_v61  ;;  %10492 = vmatpush1.bf16.msra.mxu0 %v16943_v24  ;;  %v16970_v36 = vld [vmem:[%s26125_s1 + $0x2280] ss:$16 sps:$4 sm:$0xff]   ;;  %v16981_v59 = vld [vmem:[%s26125_s1 + $0x2064] ss:$16 sps:$4 sm:$0xff]  }
 0x204   :  { %10605 = vmatpush1.bf16.msra.mxu1 %v16946_v26  ;;  %v9623_v56 = vpop.f32.mrf.mxu0  ;;  %10493 = vmatprep.subr.bf16.mxu0 %v16951_v7  ;;  %v16978_v26 = vld [vmem:[%s26126_s0 + $0x2bc] ss:$144 sps:$4 sm:$0xff]   ;;  %v16967_v7 = vld [vmem:[%s26125_s1 + $0x2080] ss:$16 sps:$4 sm:$0xff]  }
 0x205   :  { %v9736_v5 = vpop.f32.mrf.mxu1  ;;  %10606 = vmatprep.subr.bf16.mxu1 %v16954_v32  ;;  %v21061_v10 = vadd.f32 %v9734_v15, %v9622_v49  ;;  %v9624_v61 = vadd.f32 %v9623_v56, %v20689_v9  ;;  %10307 = vmatprep.mubr.bf16.mxu0 %v16957_v37  ;;  %v16984_v15 = vld [vmem:[%s26125_s1 + $0x2264] ss:$16 sps:$4 sm:$0xff]   ;;  %v16973_v49 = vld [vmem:[%s26126_s0 + $0x2b0] ss:$144 sps:$4 sm:$0xff]  }
 0x206   :  { %10420 = vmatprep.mubr.bf16.mxu1 %v16960_v45  ;;  %v9625_v14 = vpop.f32.mrf.mxu0 }
 0x207   :  { %v9738_v33 = vpop.f32.mrf.mxu1  ;;  %v21073_v17 = vadd.f32 %v9736_v5, %v9624_v61  ;;  %v9626_v9 = vadd.f32 %v9625_v14, %v20701_v21  ;;  %10494 = vmatpush1.bf16.msra.mxu0 %v16949_v39  ;;  %v16982_v61 = vld [vmem:[%s26125_s1 + $0x2260] ss:$16 sps:$4 sm:$0xff]   ;;  %v16987_v14 = vld [vmem:[%s26125_s1 + $0x2044] ss:$16 sps:$4 sm:$0xff]  }
 0x208   :  { %10607 = vmatpush1.bf16.msra.mxu1 %v16952_v50  ;;  %v9627_v13 = vpop.f32.mrf.mxu0  ;;  %10495 = vmatprep.subr.bf16.mxu0 %v16963_v23  ;;  %v16976_v50 = vld [vmem:[%s26126_s0 + $0x2b8] ss:$144 sps:$4 sm:$0xff]   ;;  %v16979_v23 = vld [vmem:[%s26125_s1 + $0x2060] ss:$16 sps:$4 sm:$0xff]  }
 0x209   :  { %v9740_v25 = vpop.f32.mrf.mxu1  ;;  %10608 = vmatprep.subr.bf16.mxu1 %v16966_v47  ;;  %v21085_v24 = vadd.f32 %v9738_v33, %v9626_v9  ;;  %v9628_v21 = vadd.f32 %v9627_v13, %v20713_v34  ;;  %v16990_v33 = vld [vmem:[%s26125_s1 + $0x2244] ss:$16 sps:$4 sm:$0xff]  }
 0x20a   :  { %v9631_v35 = vpop.f32.mrf.mxu0  ;;  %10308 = vmatmul.mubr.bf16.gmra.mxu0 %v16955_v62  ;;  %v16993_v9 = vld [vmem:[%s26126_s0 + $0x3d4] ss:$144 sps:$4 sm:$0xff]  }
 0x20b   :  { %v9744_v51 = vpop.f32.mrf.mxu1  ;;  %10421 = vmatmul.mubr.bf16.gmra.mxu1 %v16958_v2  ;;  %v21097_v32 = vadd.f32 %v9740_v25, %v9628_v21  ;;  %v9632_v34 = vadd.f32 %v9631_v35, %v20725_v46  ;;  %10496 = vmatpush1.bf16.msra.mxu0 %v16961_v55  ;;  %v16988_v21 = vld [vmem:[%s26125_s1 + $0x2240] ss:$16 sps:$4 sm:$0xff]   ;;  %v16999_v35 = vld [vmem:[%s26125_s1 + $0x2024] ss:$16 sps:$4 sm:$0xff]  }
 0x20c   :  { %10609 = vmatpush1.bf16.msra.mxu1 %v16964_v11  ;;  %v9633_v37 = vpop.f32.mrf.mxu0  ;;  %10497 = vmatprep.subr.bf16.mxu0 %v16969_v41  ;;  %v16996_v11 = vld [vmem:[%s26126_s0 + $0x3dc] ss:$144 sps:$4 sm:$0xff]   ;;  %v16985_v41 = vld [vmem:[%s26125_s1 + $0x2040] ss:$16 sps:$4 sm:$0xff]  }
 0x20d   :  { %v9746_v45 = vpop.f32.mrf.mxu1  ;;  %10610 = vmatprep.subr.bf16.mxu1 %v16972_v63  ;;  %v21109_v39 = vadd.f32 %v9744_v51, %v9632_v34  ;;  %v9634_v46 = vadd.f32 %v9633_v37, %v20737_v58  ;;  %10317 = vmatprep.mubr.bf16.mxu0 %v16975_v22  ;;  %v17002_v51 = vld [vmem:[%s26125_s1 + $0x2224] ss:$16 sps:$4 sm:$0xff]   ;;  %v16991_v34 = vld [vmem:[%s26126_s0 + $0x3d0] ss:$144 sps:$4 sm:$0xff]  }
 0x20e   :  { %10430 = vmatprep.mubr.bf16.mxu1 %v16978_v26  ;;  %v9635_v56 = vpop.f32.mrf.mxu0 }
 0x20f   :  { %v9748_v5 = vpop.f32.mrf.mxu1  ;;  %v21121_v47 = vadd.f32 %v9746_v45, %v9634_v46  ;;  %v9636_v58 = vadd.f32 %v9635_v56, %v20749_v8  ;;  %10498 = vmatpush1.bf16.msra.mxu0 %v16967_v7  ;;  %v17000_v46 = vld [vmem:[%s26125_s1 + $0x2220] ss:$16 sps:$4 sm:$0xff]   ;;  %v17005_v56 = vld [vmem:[%s26125_s1 + $0x2004] ss:$16 sps:$4 sm:$0xff]  }
 0x210   :  { %10611 = vmatpush1.bf16.msra.mxu1 %v16970_v36  ;;  %v9637_v62 = vpop.f32.mrf.mxu0  ;;  %10499 = vmatprep.subr.bf16.mxu0 %v16981_v59  ;;  %v16994_v36 = vld [vmem:[%s26126_s0 + $0x3d8] ss:$144 sps:$4 sm:$0xff]   ;;  %v16997_v59 = vld [vmem:[%s26125_s1 + $0x2020] ss:$16 sps:$4 sm:$0xff]  }
 0x211   :  { %v9750_v2 = vpop.f32.mrf.mxu1  ;;  %10612 = vmatprep.subr.bf16.mxu1 %v16984_v15  ;;  %v21133_v55 = vadd.f32 %v9748_v5, %v9636_v58  ;;  %v9638_v8 = vadd.f32 %v9637_v62, %v20761_v20  ;;  %v17008_v5 = vld [vmem:[%s26125_s1 + $0x2204] ss:$16 sps:$4 sm:$0xff]  }
 0x212   :  { %v9641_v13 = vpop.f32.mrf.mxu0  ;;  %10318 = vmatmul.mubr.bf16.gmra.mxu0 %v16973_v49  ;;  %v17011_v58 = vld [vmem:[%s26126_s0 + $0x4f4] ss:$144 sps:$4 sm:$0xff]  }
 0x213   :  { %v9754_v25 = vpop.f32.mrf.mxu1  ;;  %10431 = vmatmul.mubr.bf16.gmra.mxu1 %v16976_v50  ;;  %v21145_v63 = vadd.f32 %v9750_v2, %v9638_v8  ;;  %v9642_v20 = vadd.f32 %v9641_v13, %v20773_v31  ;;  %10500 = vmatpush1.bf16.msra.mxu0 %v16979_v23  ;;  %v17006_v8 = vld [vmem:[%s26125_s1 + $0x2200] ss:$16 sps:$4 sm:$0xff]   ;;  %v17017_v13 = vld [vmem:[%s26125_s1 + $0x21e4] ss:$16 sps:$4 sm:$0xff]  }
 0x214   :  { %10613 = vmatpush1.bf16.msra.mxu1 %v16982_v61  ;;  %v9643_v22 = vpop.f32.mrf.mxu0  ;;  %10501 = vmatprep.subr.bf16.mxu0 %v16987_v14  ;;  %v17014_v61 = vld [vmem:[%s26126_s0 + $0x4fc] ss:$144 sps:$4 sm:$0xff]   ;;  %v17003_v14 = vld [vmem:[%s26125_s1 + $0x2000] ss:$16 sps:$4 sm:$0xff]  }
 0x215   :  { %v9756_v26 = vpop.f32.mrf.mxu1  ;;  %10614 = vmatprep.subr.bf16.mxu1 %v16990_v33  ;;  %v21157_v7 = vadd.f32 %v9754_v25, %v9642_v20  ;;  %v9644_v31 = vadd.f32 %v9643_v22, %v20785_v43  ;;  %10327 = vmatprep.mubr.bf16.mxu0 %v16993_v9  ;;  %v17020_v25 = vld [vmem:[%s26125_s1 + $0x23e4] ss:$16 sps:$4 sm:$0xff]   ;;  %v17009_v20 = vld [vmem:[%s26126_s0 + $0x4f0] ss:$144 sps:$4 sm:$0xff]  }
 0x216   :  { %10440 = vmatprep.mubr.bf16.mxu1 %v16996_v11  ;;  %v9645_v37 = vpop.f32.mrf.mxu0 }
 0x217   :  { %v9758_v45 = vpop.f32.mrf.mxu1  ;;  %v21169_v15 = vadd.f32 %v9756_v26, %v9644_v31  ;;  %v9646_v43 = vadd.f32 %v9645_v37, %v20797_v57  ;;  %10502 = vmatpush1.bf16.msra.mxu0 %v16985_v41  ;;  %v17018_v31 = vld [vmem:[%s26125_s1 + $0x23e0] ss:$16 sps:$4 sm:$0xff]   ;;  %v17023_v37 = vld [vmem:[%s26125_s1 + $0x21c4] ss:$16 sps:$4 sm:$0xff]  }
 0x218   :  { %10615 = vmatpush1.bf16.msra.mxu1 %v16988_v21  ;;  %v9647_v49 = vpop.f32.mrf.mxu0  ;;  %10503 = vmatprep.subr.bf16.mxu0 %v16999_v35  ;;  %v17012_v21 = vld [vmem:[%s26126_s0 + $0x4f8] ss:$144 sps:$4 sm:$0xff]   ;;  %v17015_v35 = vld [vmem:[%s26125_s1 + $0x21e0] ss:$16 sps:$4 sm:$0xff]  }
 0x219   :  { %v9760_v50 = vpop.f32.mrf.mxu1  ;;  %10616 = vmatprep.subr.bf16.mxu1 %v17002_v51  ;;  %v21181_v23 = vadd.f32 %v9758_v45, %v9646_v43  ;;  %v9648_v57 = vadd.f32 %v9647_v49, %v20809_v6  ;;  %v17026_v45 = vld [vmem:[%s26125_s1 + $0x23c4] ss:$16 sps:$4 sm:$0xff]  }
 0x21a   :  { %v9651_v62 = vpop.f32.mrf.mxu0  ;;  %10328 = vmatmul.mubr.bf16.gmra.mxu0 %v16991_v34  ;;  %v17029_v43 = vld [vmem:[%s26126_s0 + $0x614] ss:$144 sps:$4 sm:$0xff]  }
 0x21b   :  { %v9764_v2 = vpop.f32.mrf.mxu1  ;;  %10441 = vmatmul.mubr.bf16.gmra.mxu1 %v16994_v36  ;;  %v21193_v33 = vadd.f32 %v9760_v50, %v9648_v57  ;;  %v9652_v6 = vadd.f32 %v9651_v62, %v20821_v19  ;;  %10504 = vmatpush1.bf16.msra.mxu0 %v16997_v59  ;;  %v17024_v57 = vld [vmem:[%s26125_s1 + $0x23c0] ss:$16 sps:$4 sm:$0xff]   ;;  %v17035_v62 = vld [vmem:[%s26125_s1 + $0x21a4] ss:$16 sps:$4 sm:$0xff]  }
 0x21c   :  { %10617 = vmatpush1.bf16.msra.mxu1 %v17000_v46  ;;  %v9653_v9 = vpop.f32.mrf.mxu0  ;;  %10505 = vmatprep.subr.bf16.mxu0 %v17005_v56  ;;  %v17032_v46 = vld [vmem:[%s26126_s0 + $0x61c] ss:$144 sps:$4 sm:$0xff]   ;;  %v17021_v56 = vld [vmem:[%s26125_s1 + $0x21c0] ss:$16 sps:$4 sm:$0xff]  }
 0x21d   :  { %v9766_v11 = vpop.f32.mrf.mxu1  ;;  %10618 = vmatprep.subr.bf16.mxu1 %v17008_v5  ;;  %v21205_v41 = vadd.f32 %v9764_v2, %v9652_v6  ;;  %v9654_v19 = vadd.f32 %v9653_v9, %v20833_v30  ;;  %10337 = vmatprep.mubr.bf16.mxu0 %v17011_v58  ;;  %v17038_v2 = vld [vmem:[%s26125_s1 + $0x23a4] ss:$16 sps:$4 sm:$0xff]   ;;  %v17027_v6 = vld [vmem:[%s26126_s0 + $0x610] ss:$144 sps:$4 sm:$0xff]  }
 0x21e   :  { %10450 = vmatprep.mubr.bf16.mxu1 %v17014_v61  ;;  %v9655_v22 = vpop.f32.mrf.mxu0 }
 0x21f   :  { %v9768_v26 = vpop.f32.mrf.mxu1  ;;  %v21217_v51 = vadd.f32 %v9766_v11, %v9654_v19  ;;  %v9656_v30 = vadd.f32 %v9655_v22, %v20845_v42  ;;  %10506 = vmatpush1.bf16.msra.mxu0 %v17003_v14  ;;  %v17036_v19 = vld [vmem:[%s26125_s1 + $0x23a0] ss:$16 sps:$4 sm:$0xff]   ;;  %v17041_v22 = vld [vmem:[%s26125_s1 + $0x2184] ss:$16 sps:$4 sm:$0xff]  }
 0x220   :  { %10619 = vmatpush1.bf16.msra.mxu1 %v17006_v8  ;;  %v9657_v34 = vpop.f32.mrf.mxu0  ;;  %10507 = vmatprep.subr.bf16.mxu0 %v17017_v13  ;;  %v17030_v8 = vld [vmem:[%s26126_s0 + $0x618] ss:$144 sps:$4 sm:$0xff]   ;;  %v17033_v13 = vld [vmem:[%s26125_s1 + $0x21a0] ss:$16 sps:$4 sm:$0xff]  }
 0x221   :  { %v9770_v36 = vpop.f32.mrf.mxu1  ;;  %10620 = vmatprep.subr.bf16.mxu1 %v17020_v25  ;;  %v21229_v59 = vadd.f32 %v9768_v26, %v9656_v30  ;;  %v9658_v42 = vadd.f32 %v9657_v34, %v20857_v54  ;;  %v17044_v26 = vld [vmem:[%s26125_s1 + $0x2384] ss:$16 sps:$4 sm:$0xff]  }
 0x222   :  { %v9661_v49 = vpop.f32.mrf.mxu0  ;;  %10338 = vmatmul.mubr.bf16.gmra.mxu0 %v17009_v20  ;;  %v17047_v30 = vld [vmem:[%s26126_s0 + $0x734] ss:$144 sps:$4 sm:$0xff]  }
 0x223   :  { %v9774_v50 = vpop.f32.mrf.mxu1  ;;  %10451 = vmatmul.mubr.bf16.gmra.mxu1 %v17012_v21  ;;  %v21241_v5 = vadd.f32 %v9770_v36, %v9658_v42  ;;  %v9662_v54 = vadd.f32 %v9661_v49, %v20869_v4  ;;  %10508 = vmatpush2.bf16.msra.mxu0 %v17015_v35  ;;  %v17042_v42 = vld [vmem:[%s26125_s1 + $0x2380] ss:$16 sps:$4 sm:$0xff]   ;;  %v17053_v49 = vld [vmem:[%s26125_s1 + $0x2164] ss:$16 sps:$4 sm:$0xff]  }
 0x224   :  { %10621 = vmatpush2.bf16.msra.mxu1 %v17018_v31  ;;  %v9663_v58 = vpop.f32.mrf.mxu0  ;;  %10509 = vmatprep.subr.bf16.mxu0 %v17023_v37  ;;  %v17050_v31 = vld [vmem:[%s26126_s0 + $0x73c] ss:$144 sps:$4 sm:$0xff]   ;;  %v17039_v37 = vld [vmem:[%s26125_s1 + $0x2180] ss:$16 sps:$4 sm:$0xff]  }
 0x225   :  { %v9776_v61 = vpop.f32.mrf.mxu1  ;;  %10622 = vmatprep.subr.bf16.mxu1 %v17026_v45  ;;  %v21253_v14 = vadd.f32 %v9774_v50, %v9662_v54  ;;  %v9664_v4 = vadd.f32 %v9663_v58, %v20881_v18  ;;  %10347 = vmatprep.mubr.bf16.mxu0 %v17029_v43  ;;  %v17056_v50 = vld [vmem:[%s26125_s1 + $0x2364] ss:$16 sps:$4 sm:$0xff]   ;;  %v17045_v54 = vld [vmem:[%s26126_s0 + $0x730] ss:$144 sps:$4 sm:$0xff]  }
 0x226   :  { %10460 = vmatprep.mubr.bf16.mxu1 %v17032_v46  ;;  %v9665_v9 = vpop.f32.mrf.mxu0 }
 0x227   :  { %v9778_v11 = vpop.f32.mrf.mxu1  ;;  %v21265_v25 = vadd.f32 %v9776_v61, %v9664_v4  ;;  %v9666_v18 = vadd.f32 %v9665_v9, %v20893_v28  ;;  %10510 = vmatpush2.bf16.msra.mxu0 %v17021_v56  ;;  %v17054_v4 = vld [vmem:[%s26125_s1 + $0x2360] ss:$16 sps:$4 sm:$0xff]   ;;  %v17059_v9 = vld [vmem:[%s26125_s1 + $0x2144] ss:$16 sps:$4 sm:$0xff]  }
 0x228   :  { %10623 = vmatpush2.bf16.msra.mxu1 %v17024_v57  ;;  %v9667_v20 = vpop.f32.mrf.mxu0  ;;  %10511 = vmatprep.subr.bf16.mxu0 %v17035_v62  ;;  %v17048_v57 = vld [vmem:[%s26126_s0 + $0x738] ss:$144 sps:$4 sm:$0xff]   ;;  %v17051_v62 = vld [vmem:[%s26125_s1 + $0x2160] ss:$16 sps:$4 sm:$0xff]  }
 0x229   :  { %v9780_v21 = vpop.f32.mrf.mxu1  ;;  %10624 = vmatprep.subr.bf16.mxu1 %v17038_v2  ;;  %v21277_v35 = vadd.f32 %v9778_v11, %v9666_v18  ;;  %v9668_v28 = vadd.f32 %v9667_v20, %v20905_v40  ;;  %v17062_v11 = vld [vmem:[%s26125_s1 + $0x2344] ss:$16 sps:$4 sm:$0xff]  }
 0x22a   :  { %v9671_v34 = vpop.f32.mrf.mxu0  ;;  %10348 = vmatmul.mubr.bf16.gmra.mxu0 %v17027_v6  ;;  %v17065_v18 = vld [vmem:[%s26126_s0 + $0x854] ss:$144 sps:$4 sm:$0xff]  }
 0x22b   :  { %v9784_v36 = vpop.f32.mrf.mxu1  ;;  %10461 = vmatmul.mubr.bf16.gmra.mxu1 %v17030_v8  ;;  %v21289_v45 = vadd.f32 %v9780_v21, %v9668_v28  ;;  %v9672_v40 = vadd.f32 %v9671_v34, %v20917_v53  ;;  %10512 = vmatpush2.bf16.msra.mxu0 %v17033_v13  ;;  %v17060_v28 = vld [vmem:[%s26125_s1 + $0x2340] ss:$16 sps:$4 sm:$0xff]   ;;  %v17071_v34 = vld [vmem:[%s26125_s1 + $0x2124] ss:$16 sps:$4 sm:$0xff]  }
 0x22c   :  { %10625 = vmatpush2.bf16.msra.mxu1 %v17036_v19  ;;  %v9673_v43 = vpop.f32.mrf.mxu0  ;;  %10513 = vmatprep.subr.bf16.mxu0 %v17041_v22  ;;  %v17068_v19 = vld [vmem:[%s26126_s0 + $0x85c] ss:$144 sps:$4 sm:$0xff]   ;;  %v17057_v22 = vld [vmem:[%s26125_s1 + $0x2140] ss:$16 sps:$4 sm:$0xff]  }
 0x22d   :  { %v9786_v46 = vpop.f32.mrf.mxu1  ;;  %10626 = vmatprep.subr.bf16.mxu1 %v17044_v26  ;;  %v21301_v56 = vadd.f32 %v9784_v36, %v9672_v40  ;;  %v9674_v53 = vadd.f32 %v9673_v43, %v20929_v1  ;;  %10357 = vmatprep.mubr.bf16.mxu0 %v17047_v30  ;;  %v17074_v36 = vld [vmem:[%s26125_s1 + $0x2324] ss:$16 sps:$4 sm:$0xff]   ;;  %v17063_v40 = vld [vmem:[%s26126_s0 + $0x850] ss:$144 sps:$4 sm:$0xff]  }
 0x22e   :  { %10470 = vmatprep.mubr.bf16.mxu1 %v17050_v31  ;;  %v9675_v58 = vpop.f32.mrf.mxu0 }
 0x22f   :  { %v9788_v61 = vpop.f32.mrf.mxu1  ;;  %v21313_v2 = vadd.f32 %v9786_v46, %v9674_v53  ;;  %v9676_v1 = vadd.f32 %v9675_v58, %v20941_v16  ;;  %10514 = vmatpush2.bf16.msra.mxu0 %v17039_v37  ;;  %v17072_v53 = vld [vmem:[%s26125_s1 + $0x2320] ss:$16 sps:$4 sm:$0xff]   ;;  %v17077_v58 = vld [vmem:[%s26125_s1 + $0x2104] ss:$16 sps:$4 sm:$0xff]  }
 0x230   :  { %10627 = vmatpush2.bf16.msra.mxu1 %v17042_v42  ;;  %v9677_v6 = vpop.f32.mrf.mxu0  ;;  %10515 = vmatprep.subr.bf16.mxu0 %v17053_v49  ;;  %v17066_v42 = vld [vmem:[%s26126_s0 + $0x858] ss:$144 sps:$4 sm:$0xff]   ;;  %v17069_v49 = vld [vmem:[%s26125_s1 + $0x2120] ss:$16 sps:$4 sm:$0xff]  }
 0x231   :  { %v9790_v8 = vpop.f32.mrf.mxu1  ;;  %10628 = vmatprep.subr.bf16.mxu1 %v17056_v50  ;;  %v21325_v13 = vadd.f32 %v9788_v61, %v9676_v1  ;;  %v9678_v16 = vadd.f32 %v9677_v6, %v20953_v27  ;;  %v17080_v61 = vld [vmem:[%s26125_s1 + $0x2304] ss:$16 sps:$4 sm:$0xff]  }
 0x232   :  { %v9681_v20 = vpop.f32.mrf.mxu0  ;;  %10358 = vmatmul.mubr.bf16.gmra.mxu0 %v17045_v54  ;;  %v17083_v1 = vld [vmem:[%s26126_s0 + $0x84] ss:$144 sps:$4 sm:$0xff]  }
 0x233   :  { %v9794_v21 = vpop.f32.mrf.mxu1  ;;  %10471 = vmatmul.mubr.bf16.gmra.mxu1 %v17048_v57  ;;  %v21337_v26 = vadd.f32 %v9790_v8, %v9678_v16  ;;  %v9682_v27 = vadd.f32 %v9681_v20, %v20965_v38  ;;  %10516 = vmatpush2.bf16.msra.mxu0 %v17051_v62  ;;  %v17078_v16 = vld [vmem:[%s26125_s1 + $0x2300] ss:$16 sps:$4 sm:$0xff]   ;;  %v17089_v20 = vld [vmem:[%s26125_s1 + $0xec] ss:$16 sps:$4 sm:$0xff]  }
 0x234   :  { %10629 = vmatpush2.bf16.msra.mxu1 %v17054_v4  ;;  %v9683_v30 = vpop.f32.mrf.mxu0  ;;  %10517 = vmatprep.subr.bf16.mxu0 %v17059_v9  ;;  %v17086_v4 = vld [vmem:[%s26126_s0 + $0x8c] ss:$144 sps:$4 sm:$0xff]   ;;  %v17075_v9 = vld [vmem:[%s26125_s1 + $0x2100] ss:$16 sps:$4 sm:$0xff]  }
 0x235   :  { %v9796_v31 = vpop.f32.mrf.mxu1  ;;  %10630 = vmatprep.subr.bf16.mxu1 %v17062_v11  ;;  %v21349_v37 = vadd.f32 %v9794_v21, %v9682_v27  ;;  %v9684_v38 = vadd.f32 %v9683_v30, %v20977_v52  ;;  %10367 = vmatprep.mubr.bf16.mxu0 %v17065_v18  ;;  %v17092_v21 = vld [vmem:[%s26125_s1 + $0x2ec] ss:$16 sps:$4 sm:$0xff]   ;;  %v17081_v27 = vld [vmem:[%s26126_s0 + $0x80] ss:$144 sps:$4 sm:$0xff]  }
 0x236   :  { %10480 = vmatprep.mubr.bf16.mxu1 %v17068_v19  ;;  %v9685_v43 = vpop.f32.mrf.mxu0 }
 0x237   :  { %v9798_v46 = vpop.f32.mrf.mxu1  ;;  %v21361_v50 = vadd.f32 %v9796_v31, %v9684_v38  ;;  %v9686_v52 = vadd.f32 %v9685_v43, %v20989_v0  ;;  %10518 = vmatpush2.bf16.msra.mxu0 %v17057_v22  ;;  %v17090_v38 = vld [vmem:[%s26125_s1 + $0x2e8] ss:$16 sps:$4 sm:$0xff]   ;;  %v17095_v43 = vld [vmem:[%s26125_s1 + $0xcc] ss:$16 sps:$4 sm:$0xff]  }
 0x238   :  { %10631 = vmatpush2.bf16.msra.mxu1 %v17060_v28  ;;  %v9687_v54 = vpop.f32.mrf.mxu0  ;;  %10519 = vmatprep.subr.bf16.mxu0 %v17071_v34  ;;  %v17084_v28 = vld [vmem:[%s26126_s0 + $0x88] ss:$144 sps:$4 sm:$0xff]  }
 0x239   :  { %v9800_v57 = vpop.f32.mrf.mxu1  ;;  %10632 = vmatprep.subr.bf16.mxu1 %v17074_v36  ;;  %v21373_v62 = vadd.f32 %v9798_v46, %v9686_v52  ;;  %v9688_v0 = vadd.f32 %v9687_v54, %v21001_v12  ;;  %v17087_v34 = vld [vmem:[%s26125_s1 + $0xe8] ss:$16 sps:$4 sm:$0xff]   ;;  %v17098_v46 = vld [vmem:[%s26125_s1 + $0x2cc] ss:$16 sps:$4 sm:$0xff]   ;;  %v17101_v52 = vld [vmem:[%s26126_s0 + $0x1a4] ss:$144 sps:$4 sm:$0xff]  }
 0x23a   :  { %v9691_v6 = vpop.f32.mrf.mxu0  ;;  %10368 = vmatmul.mubr.bf16.gmra.mxu0 %v17063_v40 }
 0x23b   :  { %v9804_v8 = vpop.f32.mrf.mxu1  ;;  %10481 = vmatmul.mubr.bf16.gmra.mxu1 %v17066_v42  ;;  %v21385_v11 = vadd.f32 %v9800_v57, %v9688_v0  ;;  %v9692_v12 = vadd.f32 %v9691_v6, %v21013_v44  ;;  %10520 = vmatpush2.bf16.msra.mxu0 %v17069_v49  ;;  %v17096_v0 = vld [vmem:[%s26125_s1 + $0x2c8] ss:$16 sps:$4 sm:$0xff]   ;;  %v17107_v6 = vld [vmem:[%s26125_s1 + $0xac] ss:$16 sps:$4 sm:$0xff]  }
 0x23c   :  { %10633 = vmatpush2.bf16.msra.mxu1 %v17072_v53  ;;  %v9693_v18 = vpop.f32.mrf.mxu0  ;;  %10521 = vmatprep.subr.bf16.mxu0 %v17077_v58  ;;  %v17104_v53 = vld [vmem:[%s26126_s0 + $0x1ac] ss:$144 sps:$4 sm:$0xff]   ;;  %v17093_v58 = vld [vmem:[%s26125_s1 + $0xc8] ss:$16 sps:$4 sm:$0xff]  }
 0x23d   :  { %v9806_v19 = vpop.f32.mrf.mxu1  ;;  %10634 = vmatprep.subr.bf16.mxu1 %v17080_v61  ;;  %v21397_v22 = vadd.f32 %v9804_v8, %v9692_v12  ;;  %v9694_v44 = vadd.f32 %v9693_v18, %v21025_v48  ;;  %10523 = vmatprep.mubr.bf16.mxu0 %v17083_v1  ;;  %v17110_v8 = vld [vmem:[%s26125_s1 + $0x2ac] ss:$16 sps:$4 sm:$0xff]   ;;  %v17099_v12 = vld [vmem:[%s26126_s0 + $0x1a0] ss:$144 sps:$4 sm:$0xff]  }
 0x23e   :  { %10636 = vmatprep.mubr.bf16.mxu1 %v17086_v4  ;;  %v9695_v30 = vpop.f32.mrf.mxu0 }
 0x23f   :  { %v9808_v31 = vpop.f32.mrf.mxu1  ;;  %v21409_v36 = vadd.f32 %v9806_v19, %v9694_v44  ;;  %v9696_v48 = vadd.f32 %v9695_v30, %v21037_v60  ;;  %10522 = vmatpush2.bf16.msra.mxu0 %v17075_v9  ;;  %v17108_v44 = vld [vmem:[%s26125_s1 + $0x2a8] ss:$16 sps:$4 sm:$0xff]   ;;  %v17113_v30 = vld [vmem:[%s26125_s1 + $0x8c] ss:$16 sps:$4 sm:$0xff]  }
 0x240   :  { %10635 = vmatpush2.bf16.msra.mxu1 %v17078_v16  ;;  %v9697_v40 = vpop.f32.mrf.mxu0  ;;  %10717 = vmatprep.subr.bf16.mxu0 %v17089_v20  ;;  %v17102_v16 = vld [vmem:[%s26126_s0 + $0x1a8] ss:$144 sps:$4 sm:$0xff]  }
 0x241   :  { %v9810_v42 = vpop.f32.mrf.mxu1  ;;  %10830 = vmatprep.subr.bf16.mxu1 %v17092_v21  ;;  %v21421_v49 = vadd.f32 %v9808_v31, %v9696_v48  ;;  %v9698_v60 = vadd.f32 %v9697_v40, %v21049_v3  ;;  %v17105_v20 = vld [vmem:[%s26125_s1 + $0xa8] ss:$16 sps:$4 sm:$0xff]   ;;  %v17116_v31 = vld [vmem:[%s26125_s1 + $0x28c] ss:$16 sps:$4 sm:$0xff]   ;;  %v17119_v48 = vld [vmem:[%s26126_s0 + $0x2c4] ss:$144 sps:$4 sm:$0xff]  }
 0x242   :  { %v9847_v54 = vpop.f32.mrf.mxu0  ;;  %10524 = vmatmul.mubr.bf16.vlgmr.msra.gmra.mxu0 %v17081_v27 }
 0x243   :  { %v9960_v57 = vpop.f32.mrf.mxu1  ;;  %10637 = vmatmul.mubr.bf16.vlgmr.msra.gmra.mxu1 %v17084_v28  ;;  %v21433_v61 = vadd.f32 %v9810_v42, %v9698_v60  ;;  %v9848_v3 = vadd.f32 %v9847_v54, %v21061_v10  ;;  %10718 = vmatpush1.bf16.msra.mxu0 %v17087_v34  ;;  %v17114_v60 = vld [vmem:[%s26125_s1 + $0x288] ss:$16 sps:$4 sm:$0xff]   ;;  %v17125_v54 = vld [vmem:[%s26125_s1 + $0x6c] ss:$16 sps:$4 sm:$0xff]  }
 0x244   :  { %10831 = vmatpush1.bf16.msra.mxu1 %v17090_v38  ;;  %v9849_v1 = vpop.f32.mrf.mxu0  ;;  %10719 = vmatprep.subr.bf16.mxu0 %v17095_v43  ;;  %v17122_v38 = vld [vmem:[%s26126_s0 + $0x2cc] ss:$144 sps:$4 sm:$0xff]   ;;  %v17111_v43 = vld [vmem:[%s26125_s1 + $0x88] ss:$16 sps:$4 sm:$0xff]  }
 0x245   :  { %v9962_v4 = vpop.f32.mrf.mxu1  ;;  %10832 = vmatprep.subr.bf16.mxu1 %v17098_v46  ;;  %v21445_v9 = vadd.f32 %v9960_v57, %v9848_v3  ;;  %v9850_v10 = vadd.f32 %v9849_v1, %v21073_v17  ;;  %10533 = vmatprep.mubr.bf16.mxu0 %v17101_v52  ;;  %v17128_v57 = vld [vmem:[%s26125_s1 + $0x26c] ss:$16 sps:$4 sm:$0xff]   ;;  %v17117_v3 = vld [vmem:[%s26126_s0 + $0x2c0] ss:$144 sps:$4 sm:$0xff]  }
 0x246   :  { %10646 = vmatprep.mubr.bf16.mxu1 %v17104_v53  ;;  %v9851_v18 = vpop.f32.mrf.mxu0 }
 0x247   :  { %v9964_v19 = vpop.f32.mrf.mxu1  ;;  %v21457_v21 = vadd.f32 %v9962_v4, %v9850_v10  ;;  %v9852_v17 = vadd.f32 %v9851_v18, %v21085_v24  ;;  %10720 = vmatpush1.bf16.msra.mxu0 %v17093_v58  ;;  %v17126_v10 = vld [vmem:[%s26125_s1 + $0x268] ss:$16 sps:$4 sm:$0xff]   ;;  %v17131_v18 = vld [vmem:[%s26125_s1 + $0x4c] ss:$16 sps:$4 sm:$0xff]  }
 0x248   :  { %10833 = vmatpush1.bf16.msra.mxu1 %v17096_v0  ;;  %v9853_v27 = vpop.f32.mrf.mxu0  ;;  %10721 = vmatprep.subr.bf16.mxu0 %v17107_v6  ;;  %v17120_v0 = vld [vmem:[%s26126_s0 + $0x2c8] ss:$144 sps:$4 sm:$0xff]  }
 0x249   :  { %v9966_v28 = vpop.f32.mrf.mxu1  ;;  %10834 = vmatprep.subr.bf16.mxu1 %v17110_v8  ;;  %v21469_v34 = vadd.f32 %v9964_v19, %v9852_v17  ;;  %v9854_v24 = vadd.f32 %v9853_v27, %v21097_v32  ;;  %v17123_v6 = vld [vmem:[%s26125_s1 + $0x68] ss:$16 sps:$4 sm:$0xff]   ;;  %v17134_v19 = vld [vmem:[%s26125_s1 + $0x24c] ss:$16 sps:$4 sm:$0xff]   ;;  %v17137_v17 = vld [vmem:[%s26126_s0 + $0x3e4] ss:$144 sps:$4 sm:$0xff]  }
 0x24a   :  { %v9857_v40 = vpop.f32.mrf.mxu0  ;;  %10534 = vmatmul.mubr.bf16.gmra.mxu0 %v17099_v12 }
 0x24b   :  { %v9970_v42 = vpop.f32.mrf.mxu1  ;;  %10647 = vmatmul.mubr.bf16.gmra.mxu1 %v17102_v16  ;;  %v21481_v46 = vadd.f32 %v9966_v28, %v9854_v24  ;;  %v9858_v32 = vadd.f32 %v9857_v40, %v21109_v39  ;;  %10722 = vmatpush1.bf16.msra.mxu0 %v17105_v20  ;;  %v17132_v24 = vld [vmem:[%s26125_s1 + $0x248] ss:$16 sps:$4 sm:$0xff]   ;;  %v17143_v40 = vld [vmem:[%s26125_s1 + $0x2c] ss:$16 sps:$4 sm:$0xff]  }
 0x24c   :  { %10835 = vmatpush1.bf16.msra.mxu1 %v17108_v44  ;;  %v9859_v52 = vpop.f32.mrf.mxu0  ;;  %10723 = vmatprep.subr.bf16.mxu0 %v17113_v30  ;;  %v17140_v44 = vld [vmem:[%s26126_s0 + $0x3ec] ss:$144 sps:$4 sm:$0xff]   ;;  %v17129_v30 = vld [vmem:[%s26125_s1 + $0x48] ss:$16 sps:$4 sm:$0xff]  }
 0x24d   :  { %v9972_v53 = vpop.f32.mrf.mxu1  ;;  %10836 = vmatprep.subr.bf16.mxu1 %v17116_v31  ;;  %v21493_v58 = vadd.f32 %v9970_v42, %v9858_v32  ;;  %v9860_v39 = vadd.f32 %v9859_v52, %v21121_v47  ;;  %10543 = vmatprep.mubr.bf16.mxu0 %v17119_v48  ;;  %v17146_v42 = vld [vmem:[%s26125_s1 + $0x22c] ss:$16 sps:$4 sm:$0xff]   ;;  %v17135_v32 = vld [vmem:[%s26126_s0 + $0x3e0] ss:$144 sps:$4 sm:$0xff]  }
 0x24e   :  { %10656 = vmatprep.mubr.bf16.mxu1 %v17122_v38  ;;  %v9861_v1 = vpop.f32.mrf.mxu0 }
 0x24f   :  { %v9974_v4 = vpop.f32.mrf.mxu1  ;;  %v21505_v8 = vadd.f32 %v9972_v53, %v9860_v39  ;;  %v9862_v47 = vadd.f32 %v9861_v1, %v21133_v55  ;;  %10724 = vmatpush1.bf16.msra.mxu0 %v17111_v43  ;;  %v17144_v39 = vld [vmem:[%s26125_s1 + $0x228] ss:$16 sps:$4 sm:$0xff]   ;;  %v17149_v1 = vld [vmem:[%s26125_s1 + $0xc] ss:$16 sps:$4 sm:$0xff]  }
 0x250   :  { %10837 = vmatpush1.bf16.msra.mxu1 %v17114_v60  ;;  %v9863_v12 = vpop.f32.mrf.mxu0  ;;  %10725 = vmatprep.subr.bf16.mxu0 %v17125_v54  ;;  %v17138_v60 = vld [vmem:[%s26126_s0 + $0x3e8] ss:$144 sps:$4 sm:$0xff]  }
 0x251   :  { %v9976_v16 = vpop.f32.mrf.mxu1  ;;  %10838 = vmatprep.subr.bf16.mxu1 %v17128_v57  ;;  %v21517_v20 = vadd.f32 %v9974_v4, %v9862_v47  ;;  %v9864_v55 = vadd.f32 %v9863_v12, %v21145_v63  ;;  %v17141_v54 = vld [vmem:[%s26125_s1 + $0x28] ss:$16 sps:$4 sm:$0xff]   ;;  %v17152_v4 = vld [vmem:[%s26125_s1 + $0x20c] ss:$16 sps:$4 sm:$0xff]   ;;  %v17155_v47 = vld [vmem:[%s26126_s0 + $0x504] ss:$144 sps:$4 sm:$0xff]  }
 0x252   :  { %v9867_v27 = vpop.f32.mrf.mxu0  ;;  %10544 = vmatmul.mubr.bf16.gmra.mxu0 %v17117_v3 }
 0x253   :  { %v9980_v28 = vpop.f32.mrf.mxu1  ;;  %10657 = vmatmul.mubr.bf16.gmra.mxu1 %v17120_v0  ;;  %v21529_v31 = vadd.f32 %v9976_v16, %v9864_v55  ;;  %v9868_v63 = vadd.f32 %v9867_v27, %v21157_v7  ;;  %10726 = vmatpush1.bf16.msra.mxu0 %v17123_v6  ;;  %v17150_v55 = vld [vmem:[%s26125_s1 + $0x208] ss:$16 sps:$4 sm:$0xff]   ;;  %v17161_v27 = vld [vmem:[%s26125_s1 + $0x1ec] ss:$16 sps:$4 sm:$0xff]  }
 0x254   :  { %10839 = vmatpush1.bf16.msra.mxu1 %v17126_v10  ;;  %v9869_v48 = vpop.f32.mrf.mxu0  ;;  %10727 = vmatprep.subr.bf16.mxu0 %v17131_v18  ;;  %v17158_v10 = vld [vmem:[%s26126_s0 + $0x50c] ss:$144 sps:$4 sm:$0xff]   ;;  %v17147_v18 = vld [vmem:[%s26125_s1 + $0x8] ss:$16 sps:$4 sm:$0xff]  }
 0x255   :  { %v9982_v38 = vpop.f32.mrf.mxu1  ;;  %10840 = vmatprep.subr.bf16.mxu1 %v17134_v19  ;;  %v21541_v43 = vadd.f32 %v9980_v28, %v9868_v63  ;;  %v9870_v7 = vadd.f32 %v9869_v48, %v21169_v15  ;;  %10553 = vmatprep.mubr.bf16.mxu0 %v17137_v17  ;;  %v17164_v28 = vld [vmem:[%s26125_s1 + $0x3ec] ss:$16 sps:$4 sm:$0xff]   ;;  %v17153_v63 = vld [vmem:[%s26126_s0 + $0x500] ss:$144 sps:$4 sm:$0xff]  }
 0x256   :  { %10666 = vmatprep.mubr.bf16.mxu1 %v17140_v44  ;;  %v9871_v52 = vpop.f32.mrf.mxu0 }
 0x257   :  { %v9984_v53 = vpop.f32.mrf.mxu1  ;;  %v21553_v57 = vadd.f32 %v9982_v38, %v9870_v7  ;;  %v9872_v15 = vadd.f32 %v9871_v52, %v21181_v23  ;;  %10728 = vmatpush1.bf16.msra.mxu0 %v17129_v30  ;;  %v17162_v7 = vld [vmem:[%s26125_s1 + $0x3e8] ss:$16 sps:$4 sm:$0xff]   ;;  %v17167_v52 = vld [vmem:[%s26125_s1 + $0x1cc] ss:$16 sps:$4 sm:$0xff]  }
 0x258   :  { %10841 = vmatpush1.bf16.msra.mxu1 %v17132_v24  ;;  %v9873_v3 = vpop.f32.mrf.mxu0  ;;  %10729 = vmatprep.subr.bf16.mxu0 %v17143_v40  ;;  %v17156_v24 = vld [vmem:[%s26126_s0 + $0x508] ss:$144 sps:$4 sm:$0xff]  }
 0x259   :  { %v9986_v0 = vpop.f32.mrf.mxu1  ;;  %10842 = vmatprep.subr.bf16.mxu1 %v17146_v42  ;;  %v21565_v6 = vadd.f32 %v9984_v53, %v9872_v15  ;;  %v9874_v23 = vadd.f32 %v9873_v3, %v21193_v33  ;;  %v17159_v40 = vld [vmem:[%s26125_s1 + $0x1e8] ss:$16 sps:$4 sm:$0xff]   ;;  %v17170_v53 = vld [vmem:[%s26125_s1 + $0x3cc] ss:$16 sps:$4 sm:$0xff]   ;;  %v17173_v15 = vld [vmem:[%s26126_s0 + $0x624] ss:$144 sps:$4 sm:$0xff]  }
 0x25a   :  { %v9877_v12 = vpop.f32.mrf.mxu0  ;;  %10554 = vmatmul.mubr.bf16.gmra.mxu0 %v17135_v32 }
 0x25b   :  { %v9990_v16 = vpop.f32.mrf.mxu1  ;;  %10667 = vmatmul.mubr.bf16.gmra.mxu1 %v17138_v60  ;;  %v21577_v19 = vadd.f32 %v9986_v0, %v9874_v23  ;;  %v9878_v33 = vadd.f32 %v9877_v12, %v21205_v41  ;;  %10730 = vmatpush1.bf16.msra.mxu0 %v17141_v54  ;;  %v17168_v23 = vld [vmem:[%s26125_s1 + $0x3c8] ss:$16 sps:$4 sm:$0xff]   ;;  %v17179_v12 = vld [vmem:[%s26125_s1 + $0x1ac] ss:$16 sps:$4 sm:$0xff]  }
 0x25c   :  { %10843 = vmatpush1.bf16.msra.mxu1 %v17144_v39  ;;  %v9879_v17 = vpop.f32.mrf.mxu0  ;;  %10731 = vmatprep.subr.bf16.mxu0 %v17149_v1  ;;  %v17176_v39 = vld [vmem:[%s26126_s0 + $0x62c] ss:$144 sps:$4 sm:$0xff]   ;;  %v17165_v1 = vld [vmem:[%s26125_s1 + $0x1c8] ss:$16 sps:$4 sm:$0xff]  }
 0x25d   :  { %v9992_v44 = vpop.f32.mrf.mxu1  ;;  %10844 = vmatprep.subr.bf16.mxu1 %v17152_v4  ;;  %v21589_v30 = vadd.f32 %v9990_v16, %v9878_v33  ;;  %v9880_v41 = vadd.f32 %v9879_v17, %v21217_v51  ;;  %10563 = vmatprep.mubr.bf16.mxu0 %v17155_v47  ;;  %v17182_v16 = vld [vmem:[%s26125_s1 + $0x3ac] ss:$16 sps:$4 sm:$0xff]   ;;  %v17171_v33 = vld [vmem:[%s26126_s0 + $0x620] ss:$144 sps:$4 sm:$0xff]  }
 0x25e   :  { %10676 = vmatprep.mubr.bf16.mxu1 %v17158_v10  ;;  %v9881_v48 = vpop.f32.mrf.mxu0 }
 0x25f   :  { %v9994_v38 = vpop.f32.mrf.mxu1  ;;  %v21601_v42 = vadd.f32 %v9992_v44, %v9880_v41  ;;  %v9882_v51 = vadd.f32 %v9881_v48, %v21229_v59  ;;  %10732 = vmatpush1.bf16.msra.mxu0 %v17147_v18  ;;  %v17180_v41 = vld [vmem:[%s26125_s1 + $0x3a8] ss:$16 sps:$4 sm:$0xff]   ;;  %v17185_v48 = vld [vmem:[%s26125_s1 + $0x18c] ss:$16 sps:$4 sm:$0xff]  }
 0x260   :  { %10845 = vmatpush1.bf16.msra.mxu1 %v17150_v55  ;;  %v9883_v32 = vpop.f32.mrf.mxu0  ;;  %10733 = vmatprep.subr.bf16.mxu0 %v17161_v27  ;;  %v17174_v55 = vld [vmem:[%s26126_s0 + $0x628] ss:$144 sps:$4 sm:$0xff]  }
 0x261   :  { %v9996_v60 = vpop.f32.mrf.mxu1  ;;  %10846 = vmatprep.subr.bf16.mxu1 %v17164_v28  ;;  %v21613_v54 = vadd.f32 %v9994_v38, %v9882_v51  ;;  %v9884_v59 = vadd.f32 %v9883_v32, %v21241_v5  ;;  %v17177_v27 = vld [vmem:[%s26125_s1 + $0x1a8] ss:$16 sps:$4 sm:$0xff]   ;;  %v17188_v38 = vld [vmem:[%s26125_s1 + $0x38c] ss:$16 sps:$4 sm:$0xff]   ;;  %v17191_v51 = vld [vmem:[%s26126_s0 + $0x744] ss:$144 sps:$4 sm:$0xff]  }
 0x262   :  { %v9887_v3 = vpop.f32.mrf.mxu0  ;;  %10564 = vmatmul.mubr.bf16.gmra.mxu0 %v17153_v63 }
 0x263   :  { %v10000_v0 = vpop.f32.mrf.mxu1  ;;  %10677 = vmatmul.mubr.bf16.gmra.mxu1 %v17156_v24  ;;  %v21625_v4 = vadd.f32 %v9996_v60, %v9884_v59  ;;  %v9888_v5 = vadd.f32 %v9887_v3, %v21253_v14  ;;  %10734 = vmatpush2.bf16.msra.mxu0 %v17159_v40  ;;  %v17186_v59 = vld [vmem:[%s26125_s1 + $0x388] ss:$16 sps:$4 sm:$0xff]   ;;  %v17197_v3 = vld [vmem:[%s26125_s1 + $0x16c] ss:$16 sps:$4 sm:$0xff]  }
 0x264   :  { %10847 = vmatpush2.bf16.msra.mxu1 %v17162_v7  ;;  %v9889_v47 = vpop.f32.mrf.mxu0  ;;  %10735 = vmatprep.subr.bf16.mxu0 %v17167_v52  ;;  %v17194_v7 = vld [vmem:[%s26126_s0 + $0x74c] ss:$144 sps:$4 sm:$0xff]   ;;  %v17183_v52 = vld [vmem:[%s26125_s1 + $0x188] ss:$16 sps:$4 sm:$0xff]  }
 0x265   :  { %v10002_v10 = vpop.f32.mrf.mxu1  ;;  %10848 = vmatprep.subr.bf16.mxu1 %v17170_v53  ;;  %v21637_v18 = vadd.f32 %v10000_v0, %v9888_v5  ;;  %v9890_v14 = vadd.f32 %v9889_v47, %v21265_v25  ;;  %10573 = vmatprep.mubr.bf16.mxu0 %v17173_v15  ;;  %v17200_v0 = vld [vmem:[%s26125_s1 + $0x36c] ss:$16 sps:$4 sm:$0xff]   ;;  %v17189_v5 = vld [vmem:[%s26126_s0 + $0x740] ss:$144 sps:$4 sm:$0xff]  }
 0x266   :  { %10686 = vmatprep.mubr.bf16.mxu1 %v17176_v39  ;;  %v9891_v17 = vpop.f32.mrf.mxu0 }
 0x267   :  { %v10004_v44 = vpop.f32.mrf.mxu1  ;;  %v21649_v28 = vadd.f32 %v10002_v10, %v9890_v14  ;;  %v9892_v25 = vadd.f32 %v9891_v17, %v21277_v35  ;;  %10736 = vmatpush2.bf16.msra.mxu0 %v17165_v1  ;;  %v17198_v14 = vld [vmem:[%s26125_s1 + $0x368] ss:$16 sps:$4 sm:$0xff]   ;;  %v17203_v17 = vld [vmem:[%s26125_s1 + $0x14c] ss:$16 sps:$4 sm:$0xff]  }
 0x268   :  { %10849 = vmatpush2.bf16.msra.mxu1 %v17168_v23  ;;  %v9893_v63 = vpop.f32.mrf.mxu0  ;;  %10737 = vmatprep.subr.bf16.mxu0 %v17179_v12  ;;  %v17192_v23 = vld [vmem:[%s26126_s0 + $0x748] ss:$144 sps:$4 sm:$0xff]  }
 0x269   :  { %v10006_v24 = vpop.f32.mrf.mxu1  ;;  %10850 = vmatprep.subr.bf16.mxu1 %v17182_v16  ;;  %v21661_v40 = vadd.f32 %v10004_v44, %v9892_v25  ;;  %v9894_v35 = vadd.f32 %v9893_v63, %v21289_v45  ;;  %v17195_v12 = vld [vmem:[%s26125_s1 + $0x168] ss:$16 sps:$4 sm:$0xff]   ;;  %v17206_v44 = vld [vmem:[%s26125_s1 + $0x34c] ss:$16 sps:$4 sm:$0xff]   ;;  %v17209_v25 = vld [vmem:[%s26126_s0 + $0x864] ss:$144 sps:$4 sm:$0xff]  }
 0x26a   :  { %v9897_v32 = vpop.f32.mrf.mxu0  ;;  %10574 = vmatmul.mubr.bf16.gmra.mxu0 %v17171_v33 }
 0x26b   :  { %v10010_v60 = vpop.f32.mrf.mxu1  ;;  %10687 = vmatmul.mubr.bf16.gmra.mxu1 %v17174_v55  ;;  %v21673_v53 = vadd.f32 %v10006_v24, %v9894_v35  ;;  %v9898_v45 = vadd.f32 %v9897_v32, %v21301_v56  ;;  %10738 = vmatpush2.bf16.msra.mxu0 %v17177_v27  ;;  %v17204_v35 = vld [vmem:[%s26125_s1 + $0x348] ss:$16 sps:$4 sm:$0xff]   ;;  %v17215_v32 = vld [vmem:[%s26125_s1 + $0x12c] ss:$16 sps:$4 sm:$0xff]  }
 0x26c   :  { %10851 = vmatpush2.bf16.msra.mxu1 %v17180_v41  ;;  %v9899_v15 = vpop.f32.mrf.mxu0  ;;  %10739 = vmatprep.subr.bf16.mxu0 %v17185_v48  ;;  %v17212_v41 = vld [vmem:[%s26126_s0 + $0x86c] ss:$144 sps:$4 sm:$0xff]   ;;  %v17201_v48 = vld [vmem:[%s26125_s1 + $0x148] ss:$16 sps:$4 sm:$0xff]  }
 0x26d   :  { %v10012_v39 = vpop.f32.mrf.mxu1  ;;  %10852 = vmatprep.subr.bf16.mxu1 %v17188_v38  ;;  %v21685_v1 = vadd.f32 %v10010_v60, %v9898_v45  ;;  %v9900_v56 = vadd.f32 %v9899_v15, %v21313_v2  ;;  %10583 = vmatprep.mubr.bf16.mxu0 %v17191_v51  ;;  %v17218_v60 = vld [vmem:[%s26125_s1 + $0x32c] ss:$16 sps:$4 sm:$0xff]   ;;  %v17207_v45 = vld [vmem:[%s26126_s0 + $0x860] ss:$144 sps:$4 sm:$0xff]  }
 0x26e   :  { %10696 = vmatprep.mubr.bf16.mxu1 %v17194_v7  ;;  %v9901_v47 = vpop.f32.mrf.mxu0 }
 0x26f   :  { %v10014_v10 = vpop.f32.mrf.mxu1  ;;  %v21697_v16 = vadd.f32 %v10012_v39, %v9900_v56  ;;  %v9902_v2 = vadd.f32 %v9901_v47, %v21325_v13  ;;  %10740 = vmatpush2.bf16.msra.mxu0 %v17183_v52  ;;  %v17216_v56 = vld [vmem:[%s26125_s1 + $0x328] ss:$16 sps:$4 sm:$0xff]   ;;  %v17221_v47 = vld [vmem:[%s26125_s1 + $0x10c] ss:$16 sps:$4 sm:$0xff]  }
 0x270   :  { %10853 = vmatpush2.bf16.msra.mxu1 %v17186_v59  ;;  %v9903_v33 = vpop.f32.mrf.mxu0  ;;  %10741 = vmatprep.subr.bf16.mxu0 %v17197_v3  ;;  %v17210_v59 = vld [vmem:[%s26126_s0 + $0x868] ss:$144 sps:$4 sm:$0xff]  }
 0x271   :  { %v10016_v55 = vpop.f32.mrf.mxu1  ;;  %10854 = vmatprep.subr.bf16.mxu1 %v17200_v0  ;;  %v21709_v27 = vadd.f32 %v10014_v10, %v9902_v2  ;;  %v9904_v13 = vadd.f32 %v9903_v33, %v21337_v26  ;;  %v17213_v3 = vld [vmem:[%s26125_s1 + $0x128] ss:$16 sps:$4 sm:$0xff]   ;;  %v17224_v10 = vld [vmem:[%s26125_s1 + $0x30c] ss:$16 sps:$4 sm:$0xff]  }
 0x272   :  { %v9907_v63 = vpop.f32.mrf.mxu0  ;;  %10584 = vmatmul.mubr.bf16.gmra.mxu0 %v17189_v5  ;;  %v17219_v33 = vld [vmem:[%s26125_s1 + $0x108] ss:$16 sps:$4 sm:$0xff]  }
 0x273   :  { %v10020_v24 = vpop.f32.mrf.mxu1  ;;  %10697 = vmatmul.mubr.bf16.gmra.mxu1 %v17192_v23  ;;  %v21721_v38 = vadd.f32 %v10016_v55, %v9904_v13  ;;  %v9908_v26 = vadd.f32 %v9907_v63, %v21349_v37  ;;  %10742 = vmatpush2.bf16.msra.mxu0 %v17195_v12 }
 0x274   :  { %10855 = vmatpush2.bf16.msra.mxu1 %v17198_v14  ;;  %v9909_v51 = vpop.f32.mrf.mxu0  ;;  %10743 = vmatprep.subr.bf16.mxu0 %v17203_v17 }
 0x275   :  { %v10022_v7 = vpop.f32.mrf.mxu1  ;;  %10856 = vmatprep.subr.bf16.mxu1 %v17206_v44  ;;  %v21733_v52 = vadd.f32 %v10020_v24, %v9908_v26  ;;  %v9910_v37 = vadd.f32 %v9909_v51, %v21361_v50  ;;  %10593 = vmatprep.mubr.bf16.mxu0 %v17209_v25  ;;  %v17222_v44 = vld [vmem:[%s26125_s1 + $0x308] ss:$16 sps:$4 sm:$0xff]   ;;  %v17227_v25 = vld [vmem:[%s26125_s1 + $0x4ec] ss:$16 sps:$4 sm:$0xff]   ;;  %v18089_v24 = vld [vmem:[%s26126_s0 + $0x4] ss:$144 sps:$4 sm:$0xff]  }
 0x276   :  { %10706 = vmatprep.mubr.bf16.mxu1 %v17212_v41  ;;  %v9911_v15 = vpop.f32.mrf.mxu0  ;;  %v17230_v41 = vld [vmem:[%s26125_s1 + $0x6ec] ss:$16 sps:$4 sm:$0xff]   ;;  %v17225_v51 = vld [vmem:[%s26125_s1 + $0x4e8] ss:$16 sps:$4 sm:$0xff]  }
 0x277   :  { %v10024_v39 = vpop.f32.mrf.mxu1  ;;  %v21745_v0 = vadd.f32 %v10022_v7, %v9910_v37  ;;  %v9912_v50 = vadd.f32 %v9911_v15, %v21373_v62  ;;  %10744 = vmatpush2.bf16.msra.mxu0 %v17201_v48  ;;  %v18090_v48 = vld [vmem:[%s26126_s0 + $0xc] ss:$144 sps:$4 sm:$0xff]  }
 0x278   :  { %10857 = vmatpush2.bf16.msra.mxu1 %v17204_v35  ;;  %v9913_v5 = vpop.f32.mrf.mxu0  ;;  %10745 = vmatprep.subr.bf16.mxu0 %v17215_v32  ;;  %v17228_v32 = vld [vmem:[%s26125_s1 + $0x6e8] ss:$16 sps:$4 sm:$0xff]  }
 0x279   :  { %v10026_v23 = vpop.f32.mrf.mxu1  ;;  %10858 = vmatprep.subr.bf16.mxu1 %v17218_v60  ;;  %v21757_v12 = vadd.f32 %v10024_v39, %v9912_v50  ;;  %v9914_v62 = vadd.f32 %v9913_v5, %v21385_v11  ;;  %v18091_v50 = vld [vmem:[%s26126_s0] ss:$144 sps:$4 sm:$0xff]   ;;  %v17231_v5 = vld [vmem:[%s26125_s1 + $0x4c8] ss:$16 sps:$4 sm:$0xff]  }
 0x27a   :  { %v9917_v2 = vpop.f32.mrf.mxu0  ;;  %10594 = vmatmul.mubr.bf16.gmra.mxu0 %v17207_v45  ;;  %v17233_v45 = vld [vmem:[%s26125_s1 + $0x4cc] ss:$16 sps:$4 sm:$0xff]  }
 0x27b   :  { %v10030_v14 = vpop.f32.mrf.mxu1  ;;  %10707 = vmatmul.mubr.bf16.gmra.mxu1 %v17210_v59  ;;  %v21763_v55 = vadd.f32 %v10026_v23, %v9914_v62  ;;  %v9918_v17 = vadd.f32 %v9917_v2, %v21397_v22  ;;  %10746 = vmatpush2.bf16.msra.mxu0 %v17213_v3  ;;  %v17236_v59 = vld [vmem:[%s26125_s1 + $0x6cc] ss:$16 sps:$4 sm:$0xff]  }
 0x27c   :  { %10859 = vmatpush2.bf16.msra.mxu1 %v17216_v56  ;;  %v9919_v13 = vpop.f32.mrf.mxu0  ;;  %10747 = vmatprep.subr.bf16.mxu0 %v17221_v47  ;;  %v18092_v56 = vld [vmem:[%s26126_s0 + $0x8] ss:$144 sps:$4 sm:$0xff]   ;;  %v17239_v2 = vld [vmem:[%s26125_s1 + $0x4ac] ss:$16 sps:$4 sm:$0xff]  }
 0x27d   :  { %v10032_v11 = vpop.f32.mrf.mxu1  ;;  %10860 = vmatprep.subr.bf16.mxu1 %v17224_v10  ;;  %v21775_v63 = vadd.f32 %v10030_v14, %v9918_v17  ;;  %v9920_v22 = vadd.f32 %v9919_v13, %v21409_v36  ;;  %10749 = vmatprep.mubr.bf16.mxu0 %v18089_v24  ;;  %v17234_v47 = vld [vmem:[%s26125_s1 + $0x6c8] ss:$16 sps:$4 sm:$0xff]   ;;  %v17242_v14 = vld [vmem:[%s26125_s1 + $0x6ac] ss:$16 sps:$4 sm:$0xff]   ;;  %v18093_v17 = vld [vmem:[%s26126_s0 + $0x124] ss:$144 sps:$4 sm:$0xff]  }
 0x27e   :  { %10862 = vmatprep.mubr.bf16.mxu1 %v18090_v48  ;;  %v9921_v26 = vpop.f32.mrf.mxu0 }
 0x27f   :  { %v10034_v35 = vpop.f32.mrf.mxu1  ;;  %v21787_v7 = vadd.f32 %v10032_v11, %v9920_v22  ;;  %v9922_v36 = vadd.f32 %v9921_v26, %v21421_v49  ;;  %10748 = vmatpush2.bf16.msra.mxu0 %v17219_v33  ;;  %v17240_v22 = vld [vmem:[%s26125_s1 + $0x6a8] ss:$16 sps:$4 sm:$0xff]   ;;  %v17245_v26 = vld [vmem:[%s26125_s1 + $0x48c] ss:$16 sps:$4 sm:$0xff]  }
 0x280   :  { %10861 = vmatpush2.bf16.msra.mxu1 %v17222_v44  ;;  %v9923_v60 = vpop.f32.mrf.mxu0  ;;  %10943 = vmatprep.subr.bf16.mxu0 %v17227_v25  ;;  %v18094_v44 = vld [vmem:[%s26126_s0 + $0x12c] ss:$144 sps:$4 sm:$0xff]   ;;  %v17237_v25 = vld [vmem:[%s26125_s1 + $0x4a8] ss:$16 sps:$4 sm:$0xff]  }
 0x281   :  { %v10036_v37 = vpop.f32.mrf.mxu1  ;;  %11056 = vmatprep.subr.bf16.mxu1 %v17230_v41  ;;  %v21799_v15 = vadd.f32 %v10034_v35, %v9922_v36  ;;  %v9924_v49 = vadd.f32 %v9923_v60, %v21433_v61  ;;  %v17248_v35 = vld [vmem:[%s26125_s1 + $0x68c] ss:$16 sps:$4 sm:$0xff]   ;;  %v18095_v60 = vld [vmem:[%s26126_s0 + $0x120] ss:$144 sps:$4 sm:$0xff]  }
 0x282   :  { %v10073_v39 = vpop.f32.mrf.mxu0  ;;  %10750 = vmatmul.mubr.bf16.vlgmr.msra.gmra.mxu0 %v18091_v50  ;;  %v17251_v50 = vld [vmem:[%s26125_s1 + $0x46c] ss:$16 sps:$4 sm:$0xff]  }
 0x283   :  { %v10186_v3 = vpop.f32.mrf.mxu1  ;;  %10863 = vmatmul.mubr.bf16.vlgmr.msra.gmra.mxu1 %v18092_v56  ;;  %v21811_v23 = vadd.f32 %v10036_v37, %v9924_v49  ;;  %v10074_v61 = vadd.f32 %v10073_v39, %v21445_v9  ;;  %10944 = vmatpush1.bf16.msra.mxu0 %v17225_v51  ;;  %v18096_v37 = vld [vmem:[%s26126_s0 + $0x128] ss:$144 sps:$4 sm:$0xff]   ;;  %v17254_v56 = vld [vmem:[%s26125_s1 + $0x66c] ss:$16 sps:$4 sm:$0xff]  }
 0x284   :  { %11057 = vmatpush1.bf16.msra.mxu1 %v17228_v32  ;;  %v10075_v10 = vpop.f32.mrf.mxu0  ;;  %10945 = vmatprep.subr.bf16.mxu0 %v17233_v45  ;;  %v17243_v45 = vld [vmem:[%s26125_s1 + $0x488] ss:$16 sps:$4 sm:$0xff]  }
 0x285   :  { %v10188_v62 = vpop.f32.mrf.mxu1  ;;  %11058 = vmatprep.subr.bf16.mxu1 %v17236_v59  ;;  %v21823_v33 = vadd.f32 %v10186_v3, %v10074_v61  ;;  %v10076_v9 = vadd.f32 %v10075_v10, %v21457_v21  ;;  %10759 = vmatprep.mubr.bf16.mxu0 %v18093_v17  ;;  %v17246_v49 = vld [vmem:[%s26125_s1 + $0x688] ss:$16 sps:$4 sm:$0xff]   ;;  %v18097_v61 = vld [vmem:[%s26126_s0 + $0x244] ss:$144 sps:$4 sm:$0xff]  }
 0x286   :  { %10872 = vmatprep.mubr.bf16.mxu1 %v18094_v44  ;;  %v10077_v13 = vpop.f32.mrf.mxu0 }
 0x287   :  { %v10190_v11 = vpop.f32.mrf.mxu1  ;;  %v21835_v41 = vadd.f32 %v10188_v62, %v10076_v9  ;;  %v10078_v21 = vadd.f32 %v10077_v13, %v21469_v34  ;;  %10946 = vmatpush1.bf16.msra.mxu0 %v17231_v5  ;;  %v17252_v9 = vld [vmem:[%s26125_s1 + $0x668] ss:$16 sps:$4 sm:$0xff]   ;;  %v17257_v13 = vld [vmem:[%s26125_s1 + $0x44c] ss:$16 sps:$4 sm:$0xff]  }
 0x288   :  { %11059 = vmatpush1.bf16.msra.mxu1 %v17234_v47  ;;  %v10079_v24 = vpop.f32.mrf.mxu0  ;;  %10947 = vmatprep.subr.bf16.mxu0 %v17239_v2  ;;  %v18098_v47 = vld [vmem:[%s26126_s0 + $0x24c] ss:$144 sps:$4 sm:$0xff]   ;;  %v17249_v2 = vld [vmem:[%s26125_s1 + $0x468] ss:$16 sps:$4 sm:$0xff]  }
 0x289   :  { %v10192_v48 = vpop.f32.mrf.mxu1  ;;  %11060 = vmatprep.subr.bf16.mxu1 %v17242_v14  ;;  %v21847_v51 = vadd.f32 %v10190_v11, %v10078_v21  ;;  %v10080_v34 = vadd.f32 %v10079_v24, %v21481_v46  ;;  %v17260_v11 = vld [vmem:[%s26125_s1 + $0x64c] ss:$16 sps:$4 sm:$0xff]   ;;  %v18099_v24 = vld [vmem:[%s26126_s0 + $0x240] ss:$144 sps:$4 sm:$0xff]  }
 0x28a   :  { %v10083_v36 = vpop.f32.mrf.mxu0  ;;  %10760 = vmatmul.mubr.bf16.gmra.mxu0 %v18095_v60  ;;  %v17263_v60 = vld [vmem:[%s26125_s1 + $0x42c] ss:$16 sps:$4 sm:$0xff]  }
 0x28b   :  { %v10196_v32 = vpop.f32.mrf.mxu1  ;;  %10873 = vmatmul.mubr.bf16.gmra.mxu1 %v18096_v37  ;;  %v21859_v59 = vadd.f32 %v10192_v48, %v10080_v34  ;;  %v10084_v46 = vadd.f32 %v10083_v36, %v21493_v58  ;;  %10948 = vmatpush1.bf16.msra.mxu0 %v17237_v25  ;;  %v18100_v48 = vld [vmem:[%s26126_s0 + $0x248] ss:$144 sps:$4 sm:$0xff]   ;;  %v17266_v37 = vld [vmem:[%s26125_s1 + $0x62c] ss:$16 sps:$4 sm:$0xff]  }
 0x28c   :  { %11061 = vmatpush1.bf16.msra.mxu1 %v17240_v22  ;;  %v10085_v39 = vpop.f32.mrf.mxu0  ;;  %10949 = vmatprep.subr.bf16.mxu0 %v17245_v26  ;;  %v17255_v26 = vld [vmem:[%s26125_s1 + $0x448] ss:$16 sps:$4 sm:$0xff]  }
 0x28d   :  { %v10198_v3 = vpop.f32.mrf.mxu1  ;;  %11062 = vmatprep.subr.bf16.mxu1 %v17248_v35  ;;  %v21871_v5 = vadd.f32 %v10196_v32, %v10084_v46  ;;  %v10086_v58 = vadd.f32 %v10085_v39, %v21505_v8  ;;  %10769 = vmatprep.mubr.bf16.mxu0 %v18097_v61  ;;  %v17258_v34 = vld [vmem:[%s26125_s1 + $0x648] ss:$16 sps:$4 sm:$0xff]   ;;  %v18101_v46 = vld [vmem:[%s26126_s0 + $0x364] ss:$144 sps:$4 sm:$0xff]  }
 0x28e   :  { %10882 = vmatprep.mubr.bf16.mxu1 %v18098_v47  ;;  %v10087_v10 = vpop.f32.mrf.mxu0 }
 0x28f   :  { %v10200_v62 = vpop.f32.mrf.mxu1  ;;  %v21883_v14 = vadd.f32 %v10198_v3, %v10086_v58  ;;  %v10088_v8 = vadd.f32 %v10087_v10, %v21517_v20  ;;  %10950 = vmatpush1.bf16.msra.mxu0 %v17243_v45  ;;  %v17264_v58 = vld [vmem:[%s26125_s1 + $0x628] ss:$16 sps:$4 sm:$0xff]   ;;  %v17269_v10 = vld [vmem:[%s26125_s1 + $0x40c] ss:$16 sps:$4 sm:$0xff]  }
 0x290   :  { %11063 = vmatpush1.bf16.msra.mxu1 %v17246_v49  ;;  %v10089_v17 = vpop.f32.mrf.mxu0  ;;  %10951 = vmatprep.subr.bf16.mxu0 %v17251_v50  ;;  %v18102_v49 = vld [vmem:[%s26126_s0 + $0x36c] ss:$144 sps:$4 sm:$0xff]   ;;  %v17261_v50 = vld [vmem:[%s26125_s1 + $0x428] ss:$16 sps:$4 sm:$0xff]  }
 0x291   :  { %v10202_v44 = vpop.f32.mrf.mxu1  ;;  %11064 = vmatprep.subr.bf16.mxu1 %v17254_v56  ;;  %v21895_v25 = vadd.f32 %v10200_v62, %v10088_v8  ;;  %v10090_v20 = vadd.f32 %v10089_v17, %v21529_v31  ;;  %v17272_v62 = vld [vmem:[%s26125_s1 + $0x60c] ss:$16 sps:$4 sm:$0xff]   ;;  %v18103_v17 = vld [vmem:[%s26126_s0 + $0x360] ss:$144 sps:$4 sm:$0xff]  }
 0x292   :  { %v10093_v21 = vpop.f32.mrf.mxu0  ;;  %10770 = vmatmul.mubr.bf16.gmra.mxu0 %v18099_v24  ;;  %v17275_v24 = vld [vmem:[%s26125_s1 + $0x5ec] ss:$16 sps:$4 sm:$0xff]  }
 0x293   :  { %v10206_v22 = vpop.f32.mrf.mxu1  ;;  %10883 = vmatmul.mubr.bf16.gmra.mxu1 %v18100_v48  ;;  %v21907_v35 = vadd.f32 %v10202_v44, %v10090_v20  ;;  %v10094_v31 = vadd.f32 %v10093_v21, %v21541_v43  ;;  %10952 = vmatpush1.bf16.msra.mxu0 %v17249_v2  ;;  %v18104_v44 = vld [vmem:[%s26126_s0 + $0x368] ss:$144 sps:$4 sm:$0xff]   ;;  %v17278_v48 = vld [vmem:[%s26125_s1 + $0x7ec] ss:$16 sps:$4 sm:$0xff]  }
 0x294   :  { %11065 = vmatpush1.bf16.msra.mxu1 %v17252_v9  ;;  %v10095_v36 = vpop.f32.mrf.mxu0  ;;  %10953 = vmatprep.subr.bf16.mxu0 %v17257_v13  ;;  %v17267_v13 = vld [vmem:[%s26125_s1 + $0x408] ss:$16 sps:$4 sm:$0xff]  }
 0x295   :  { %v10208_v32 = vpop.f32.mrf.mxu1  ;;  %11066 = vmatprep.subr.bf16.mxu1 %v17260_v11  ;;  %v21919_v45 = vadd.f32 %v10206_v22, %v10094_v31  ;;  %v10096_v43 = vadd.f32 %v10095_v36, %v21553_v57  ;;  %10779 = vmatprep.mubr.bf16.mxu0 %v18101_v46  ;;  %v17270_v20 = vld [vmem:[%s26125_s1 + $0x608] ss:$16 sps:$4 sm:$0xff]   ;;  %v18105_v31 = vld [vmem:[%s26126_s0 + $0x484] ss:$144 sps:$4 sm:$0xff]  }
 0x296   :  { %10892 = vmatprep.mubr.bf16.mxu1 %v18102_v49  ;;  %v10097_v39 = vpop.f32.mrf.mxu0 }
 0x297   :  { %v10210_v3 = vpop.f32.mrf.mxu1  ;;  %v21931_v56 = vadd.f32 %v10208_v32, %v10096_v43  ;;  %v10098_v57 = vadd.f32 %v10097_v39, %v21565_v6  ;;  %10954 = vmatpush1.bf16.msra.mxu0 %v17255_v26  ;;  %v17276_v43 = vld [vmem:[%s26125_s1 + $0x7e8] ss:$16 sps:$4 sm:$0xff]   ;;  %v17281_v39 = vld [vmem:[%s26125_s1 + $0x5cc] ss:$16 sps:$4 sm:$0xff]  }
 0x298   :  { %11067 = vmatpush1.bf16.msra.mxu1 %v17258_v34  ;;  %v10099_v61 = vpop.f32.mrf.mxu0  ;;  %10955 = vmatprep.subr.bf16.mxu0 %v17263_v60  ;;  %v18106_v34 = vld [vmem:[%s26126_s0 + $0x48c] ss:$144 sps:$4 sm:$0xff]   ;;  %v17273_v60 = vld [vmem:[%s26125_s1 + $0x5e8] ss:$16 sps:$4 sm:$0xff]  }
 0x299   :  { %v10212_v47 = vpop.f32.mrf.mxu1  ;;  %11068 = vmatprep.subr.bf16.mxu1 %v17266_v37  ;;  %v21943_v2 = vadd.f32 %v10210_v3, %v10098_v57  ;;  %v10100_v6 = vadd.f32 %v10099_v61, %v21577_v19  ;;  %v17284_v3 = vld [vmem:[%s26125_s1 + $0x7cc] ss:$16 sps:$4 sm:$0xff]   ;;  %v18107_v61 = vld [vmem:[%s26126_s0 + $0x480] ss:$144 sps:$4 sm:$0xff]  }
 0x29a   :  { %v10103_v8 = vpop.f32.mrf.mxu0  ;;  %10780 = vmatmul.mubr.bf16.gmra.mxu0 %v18103_v17  ;;  %v17287_v17 = vld [vmem:[%s26125_s1 + $0x5ac] ss:$16 sps:$4 sm:$0xff]  }
 0x29b   :  { %v10216_v9 = vpop.f32.mrf.mxu1  ;;  %10893 = vmatmul.mubr.bf16.gmra.mxu1 %v18104_v44  ;;  %v21955_v11 = vadd.f32 %v10212_v47, %v10100_v6  ;;  %v10104_v19 = vadd.f32 %v10103_v8, %v21589_v30  ;;  %10956 = vmatpush1.bf16.msra.mxu0 %v17261_v50  ;;  %v18108_v47 = vld [vmem:[%s26126_s0 + $0x488] ss:$144 sps:$4 sm:$0xff]   ;;  %v17290_v44 = vld [vmem:[%s26125_s1 + $0x7ac] ss:$16 sps:$4 sm:$0xff]  }
 0x29c   :  { %11069 = vmatpush1.bf16.msra.mxu1 %v17264_v58  ;;  %v10105_v21 = vpop.f32.mrf.mxu0  ;;  %10957 = vmatprep.subr.bf16.mxu0 %v17269_v10  ;;  %v17279_v10 = vld [vmem:[%s26125_s1 + $0x5c8] ss:$16 sps:$4 sm:$0xff]  }
 0x29d   :  { %v10218_v22 = vpop.f32.mrf.mxu1  ;;  %11070 = vmatprep.subr.bf16.mxu1 %v17272_v62  ;;  %v21967_v26 = vadd.f32 %v10216_v9, %v10104_v19  ;;  %v10106_v30 = vadd.f32 %v10105_v21, %v21601_v42  ;;  %10789 = vmatprep.mubr.bf16.mxu0 %v18105_v31  ;;  %v17282_v6 = vld [vmem:[%s26125_s1 + $0x7c8] ss:$16 sps:$4 sm:$0xff]   ;;  %v18109_v19 = vld [vmem:[%s26126_s0 + $0x5a4] ss:$144 sps:$4 sm:$0xff]  }
 0x29e   :  { %10902 = vmatprep.mubr.bf16.mxu1 %v18106_v34  ;;  %v10107_v36 = vpop.f32.mrf.mxu0 }
 0x29f   :  { %v10220_v32 = vpop.f32.mrf.mxu1  ;;  %v21979_v37 = vadd.f32 %v10218_v22, %v10106_v30  ;;  %v10108_v42 = vadd.f32 %v10107_v36, %v21613_v54  ;;  %10958 = vmatpush1.bf16.msra.mxu0 %v17267_v13  ;;  %v17288_v30 = vld [vmem:[%s26125_s1 + $0x7a8] ss:$16 sps:$4 sm:$0xff]   ;;  %v17293_v36 = vld [vmem:[%s26125_s1 + $0x58c] ss:$16 sps:$4 sm:$0xff]  }
 0x2a0   :  { %11071 = vmatpush1.bf16.msra.mxu1 %v17270_v20  ;;  %v10109_v46 = vpop.f32.mrf.mxu0  ;;  %10959 = vmatprep.subr.bf16.mxu0 %v17275_v24  ;;  %v18110_v20 = vld [vmem:[%s26126_s0 + $0x5ac] ss:$144 sps:$4 sm:$0xff]   ;;  %v17285_v24 = vld [vmem:[%s26125_s1 + $0x5a8] ss:$16 sps:$4 sm:$0xff]  }
 0x2a1   :  { %v10222_v49 = vpop.f32.mrf.mxu1  ;;  %11072 = vmatprep.subr.bf16.mxu1 %v17278_v48  ;;  %v21991_v50 = vadd.f32 %v10220_v32, %v10108_v42  ;;  %v10110_v54 = vadd.f32 %v10109_v46, %v21625_v4  ;;  %v17296_v32 = vld [vmem:[%s26125_s1 + $0x78c] ss:$16 sps:$4 sm:$0xff]   ;;  %v18111_v46 = vld [vmem:[%s26126_s0 + $0x5a0] ss:$144 sps:$4 sm:$0xff]  }
 0x2a2   :  { %v10113_v57 = vpop.f32.mrf.mxu0  ;;  %10790 = vmatmul.mubr.bf16.gmra.mxu0 %v18107_v61  ;;  %v17299_v61 = vld [vmem:[%s26125_s1 + $0x56c] ss:$16 sps:$4 sm:$0xff]  }
 0x2a3   :  { %v10226_v58 = vpop.f32.mrf.mxu1  ;;  %10903 = vmatmul.mubr.bf16.gmra.mxu1 %v18108_v47  ;;  %v22003_v62 = vadd.f32 %v10222_v49, %v10110_v54  ;;  %v10114_v4 = vadd.f32 %v10113_v57, %v21637_v18  ;;  %10960 = vmatpush2.bf16.msra.mxu0 %v17273_v60  ;;  %v18112_v49 = vld [vmem:[%s26126_s0 + $0x5a8] ss:$144 sps:$4 sm:$0xff]   ;;  %v17302_v47 = vld [vmem:[%s26125_s1 + $0x76c] ss:$16 sps:$4 sm:$0xff]  }
 0x2a4   :  { %11073 = vmatpush2.bf16.msra.mxu1 %v17276_v43  ;;  %v10115_v8 = vpop.f32.mrf.mxu0  ;;  %10961 = vmatprep.subr.bf16.mxu0 %v17281_v39  ;;  %v17291_v39 = vld [vmem:[%s26125_s1 + $0x588] ss:$16 sps:$4 sm:$0xff]  }
 0x2a5   :  { %v10228_v9 = vpop.f32.mrf.mxu1  ;;  %11074 = vmatprep.subr.bf16.mxu1 %v17284_v3  ;;  %v22015_v13 = vadd.f32 %v10226_v58, %v10114_v4  ;;  %v10116_v18 = vadd.f32 %v10115_v8, %v21649_v28  ;;  %10799 = vmatprep.mubr.bf16.mxu0 %v18109_v19  ;;  %v17294_v54 = vld [vmem:[%s26125_s1 + $0x788] ss:$16 sps:$4 sm:$0xff]   ;;  %v18113_v4 = vld [vmem:[%s26126_s0 + $0x6c4] ss:$144 sps:$4 sm:$0xff]  }
 0x2a6   :  { %10912 = vmatprep.mubr.bf16.mxu1 %v18110_v20  ;;  %v10117_v21 = vpop.f32.mrf.mxu0 }
 0x2a7   :  { %v10230_v22 = vpop.f32.mrf.mxu1  ;;  %v22027_v48 = vadd.f32 %v10228_v9, %v10116_v18  ;;  %v10118_v28 = vadd.f32 %v10117_v21, %v21661_v40  ;;  %10962 = vmatpush2.bf16.msra.mxu0 %v17279_v10  ;;  %v17300_v18 = vld [vmem:[%s26125_s1 + $0x768] ss:$16 sps:$4 sm:$0xff]   ;;  %v17305_v21 = vld [vmem:[%s26125_s1 + $0x54c] ss:$16 sps:$4 sm:$0xff]  }
 0x2a8   :  { %11075 = vmatpush2.bf16.msra.mxu1 %v17282_v6  ;;  %v10119_v31 = vpop.f32.mrf.mxu0  ;;  %10963 = vmatprep.subr.bf16.mxu0 %v17287_v17  ;;  %v18114_v6 = vld [vmem:[%s26126_s0 + $0x6cc] ss:$144 sps:$4 sm:$0xff]   ;;  %v17297_v17 = vld [vmem:[%s26125_s1 + $0x568] ss:$16 sps:$4 sm:$0xff]  }
 0x2a9   :  { %v10232_v34 = vpop.f32.mrf.mxu1  ;;  %11076 = vmatprep.subr.bf16.mxu1 %v17290_v44  ;;  %v22039_v60 = vadd.f32 %v10230_v22, %v10118_v28  ;;  %v10120_v40 = vadd.f32 %v10119_v31, %v21673_v53  ;;  %v17308_v22 = vld [vmem:[%s26125_s1 + $0x74c] ss:$16 sps:$4 sm:$0xff]   ;;  %v18115_v31 = vld [vmem:[%s26126_s0 + $0x6c0] ss:$144 sps:$4 sm:$0xff]  }
 0x2aa   :  { %v10123_v42 = vpop.f32.mrf.mxu0  ;;  %10800 = vmatmul.mubr.bf16.gmra.mxu0 %v18111_v46  ;;  %v17311_v46 = vld [vmem:[%s26125_s1 + $0x52c] ss:$16 sps:$4 sm:$0xff]  }
 0x2ab   :  { %v10236_v43 = vpop.f32.mrf.mxu1  ;;  %10913 = vmatmul.mubr.bf16.gmra.mxu1 %v18112_v49  ;;  %v22051_v3 = vadd.f32 %v10232_v34, %v10120_v40  ;;  %v10124_v53 = vadd.f32 %v10123_v42, %v21685_v1  ;;  %10964 = vmatpush2.bf16.msra.mxu0 %v17285_v24  ;;  %v18116_v34 = vld [vmem:[%s26126_s0 + $0x6c8] ss:$144 sps:$4 sm:$0xff]   ;;  %v17314_v49 = vld [vmem:[%s26125_s1 + $0x72c] ss:$16 sps:$4 sm:$0xff]  }
 0x2ac   :  { %11077 = vmatpush2.bf16.msra.mxu1 %v17288_v30  ;;  %v10125_v57 = vpop.f32.mrf.mxu0  ;;  %10965 = vmatprep.subr.bf16.mxu0 %v17293_v36  ;;  %v17303_v36 = vld [vmem:[%s26125_s1 + $0x548] ss:$16 sps:$4 sm:$0xff]  }
 0x2ad   :  { %v10238_v58 = vpop.f32.mrf.mxu1  ;;  %11078 = vmatprep.subr.bf16.mxu1 %v17296_v32  ;;  %v22063_v10 = vadd.f32 %v10236_v43, %v10124_v53  ;;  %v10126_v1 = vadd.f32 %v10125_v57, %v21697_v16  ;;  %10809 = vmatprep.mubr.bf16.mxu0 %v18113_v4  ;;  %v17306_v40 = vld [vmem:[%s26125_s1 + $0x748] ss:$16 sps:$4 sm:$0xff]   ;;  %v18117_v53 = vld [vmem:[%s26126_s0 + $0x7e4] ss:$144 sps:$4 sm:$0xff]  }
 0x2ae   :  { %10922 = vmatprep.mubr.bf16.mxu1 %v18114_v6  ;;  %v10127_v8 = vpop.f32.mrf.mxu0 }
 0x2af   :  { %v10240_v9 = vpop.f32.mrf.mxu1  ;;  %v22075_v44 = vadd.f32 %v10238_v58, %v10126_v1  ;;  %v10128_v16 = vadd.f32 %v10127_v8, %v21709_v27  ;;  %10966 = vmatpush2.bf16.msra.mxu0 %v17291_v39  ;;  %v17312_v1 = vld [vmem:[%s26125_s1 + $0x728] ss:$16 sps:$4 sm:$0xff]   ;;  %v17317_v8 = vld [vmem:[%s26125_s1 + $0x50c] ss:$16 sps:$4 sm:$0xff]  }
 0x2b0   :  { %11079 = vmatpush2.bf16.msra.mxu1 %v17294_v54  ;;  %v10129_v19 = vpop.f32.mrf.mxu0  ;;  %10967 = vmatprep.subr.bf16.mxu0 %v17299_v61  ;;  %v18118_v54 = vld [vmem:[%s26126_s0 + $0x7ec] ss:$144 sps:$4 sm:$0xff]   ;;  %v17309_v61 = vld [vmem:[%s26125_s1 + $0x528] ss:$16 sps:$4 sm:$0xff]  }
 0x2b1   :  { %v10242_v20 = vpop.f32.mrf.mxu1  ;;  %11080 = vmatprep.subr.bf16.mxu1 %v17302_v47  ;;  %v22087_v24 = vadd.f32 %v10240_v9, %v10128_v16  ;;  %v10130_v27 = vadd.f32 %v10129_v19, %v21721_v38  ;;  %v17320_v9 = vld [vmem:[%s26125_s1 + $0x70c] ss:$16 sps:$4 sm:$0xff]   ;;  %v18119_v19 = vld [vmem:[%s26126_s0 + $0x7e0] ss:$144 sps:$4 sm:$0xff]  }
 0x2b2   :  { %v10133_v28 = vpop.f32.mrf.mxu0  ;;  %10810 = vmatmul.mubr.bf16.gmra.mxu0 %v18115_v31  ;;  %v17323_v31 = vld [vmem:[%s26125_s1 + $0x8ec] ss:$16 sps:$4 sm:$0xff]  }
 0x2b3   :  { %v10246_v30 = vpop.f32.mrf.mxu1  ;;  %10923 = vmatmul.mubr.bf16.gmra.mxu1 %v18116_v34  ;;  %v22099_v32 = vadd.f32 %v10242_v20, %v10130_v27  ;;  %v10134_v38 = vadd.f32 %v10133_v28, %v21733_v52  ;;  %10968 = vmatpush2.bf16.msra.mxu0 %v17297_v17  ;;  %v18120_v20 = vld [vmem:[%s26126_s0 + $0x7e8] ss:$144 sps:$4 sm:$0xff]   ;;  %v17326_v34 = vld [vmem:[%s26125_s1 + $0xaec] ss:$16 sps:$4 sm:$0xff]  }
 0x2b4   :  { %11081 = vmatpush2.bf16.msra.mxu1 %v17300_v18  ;;  %v10135_v42 = vpop.f32.mrf.mxu0  ;;  %10969 = vmatprep.subr.bf16.mxu0 %v17305_v21  ;;  %v17315_v21 = vld [vmem:[%s26125_s1 + $0x508] ss:$16 sps:$4 sm:$0xff]  }
 0x2b5   :  { %v10248_v43 = vpop.f32.mrf.mxu1  ;;  %11082 = vmatprep.subr.bf16.mxu1 %v17308_v22  ;;  %v22111_v39 = vadd.f32 %v10246_v30, %v10134_v38  ;;  %v10136_v52 = vadd.f32 %v10135_v42, %v21745_v0  ;;  %10819 = vmatprep.mubr.bf16.mxu0 %v18117_v53  ;;  %v17318_v27 = vld [vmem:[%s26125_s1 + $0x708] ss:$16 sps:$4 sm:$0xff]   ;;  %v18121_v38 = vld [vmem:[%s26126_s0 + $0x14] ss:$144 sps:$4 sm:$0xff]  }
 0x2b6   :  { %10932 = vmatprep.mubr.bf16.mxu1 %v18118_v54  ;;  %v10137_v57 = vpop.f32.mrf.mxu0 }
 0x2b7   :  { %v10250_v58 = vpop.f32.mrf.mxu1  ;;  %v22123_v47 = vadd.f32 %v10248_v43, %v10136_v52  ;;  %v10138_v0 = vadd.f32 %v10137_v57, %v21757_v12  ;;  %10970 = vmatpush2.bf16.msra.mxu0 %v17303_v36  ;;  %v17324_v52 = vld [vmem:[%s26125_s1 + $0xae8] ss:$16 sps:$4 sm:$0xff]   ;;  %v17329_v57 = vld [vmem:[%s26125_s1 + $0x8cc] ss:$16 sps:$4 sm:$0xff]  }
 0x2b8   :  { %11083 = vmatpush2.bf16.msra.mxu1 %v17306_v40  ;;  %v10139_v4 = vpop.f32.mrf.mxu0  ;;  %10971 = vmatprep.subr.bf16.mxu0 %v17311_v46  ;;  %v18122_v40 = vld [vmem:[%s26126_s0 + $0x1c] ss:$144 sps:$4 sm:$0xff]   ;;  %v17321_v46 = vld [vmem:[%s26125_s1 + $0x8e8] ss:$16 sps:$4 sm:$0xff]  }
 0x2b9   :  { %v10252_v6 = vpop.f32.mrf.mxu1  ;;  %11084 = vmatprep.subr.bf16.mxu1 %v17314_v49  ;;  %v22135_v17 = vadd.f32 %v10250_v58, %v10138_v0  ;;  %v10140_v12 = vadd.f32 %v10139_v4, %v21763_v55  ;;  %v17332_v58 = vld [vmem:[%s26125_s1 + $0xacc] ss:$16 sps:$4 sm:$0xff]   ;;  %v18123_v4 = vld [vmem:[%s26126_s0 + $0x10] ss:$144 sps:$4 sm:$0xff]  }
 0x2ba   :  { %v10143_v16 = vpop.f32.mrf.mxu0  ;;  %10820 = vmatmul.mubr.bf16.gmra.mxu0 %v18119_v19  ;;  %v17335_v19 = vld [vmem:[%s26125_s1 + $0x8ac] ss:$16 sps:$4 sm:$0xff]  }
 0x2bb   :  { %v10256_v18 = vpop.f32.mrf.mxu1  ;;  %10933 = vmatmul.mubr.bf16.gmra.mxu1 %v18120_v20  ;;  %v22147_v22 = vadd.f32 %v10252_v6, %v10140_v12  ;;  %v10144_v55 = vadd.f32 %v10143_v16, %v21775_v63  ;;  %10972 = vmatpush2.bf16.msra.mxu0 %v17309_v61  ;;  %v18124_v6 = vld [vmem:[%s26126_s0 + $0x18] ss:$144 sps:$4 sm:$0xff]   ;;  %v17338_v20 = vld [vmem:[%s26125_s1 + $0xaac] ss:$16 sps:$4 sm:$0xff]  }
 0x2bc   :  { %11085 = vmatpush2.bf16.msra.mxu1 %v17312_v1  ;;  %v10145_v28 = vpop.f32.mrf.mxu0  ;;  %10973 = vmatprep.subr.bf16.mxu0 %v17317_v8  ;;  %v17327_v8 = vld [vmem:[%s26125_s1 + $0x8c8] ss:$16 sps:$4 sm:$0xff]  }
 0x2bd   :  { %v10258_v30 = vpop.f32.mrf.mxu1  ;;  %11086 = vmatprep.subr.bf16.mxu1 %v17320_v9  ;;  %v22159_v36 = vadd.f32 %v10256_v18, %v10144_v55  ;;  %v10146_v63 = vadd.f32 %v10145_v28, %v21787_v7  ;;  %10975 = vmatprep.mubr.bf16.mxu0 %v18121_v38  ;;  %v17330_v12 = vld [vmem:[%s26125_s1 + $0xac8] ss:$16 sps:$4 sm:$0xff]   ;;  %v18125_v55 = vld [vmem:[%s26126_s0 + $0x134] ss:$144 sps:$4 sm:$0xff]  }
 0x2be   :  { %11088 = vmatprep.mubr.bf16.mxu1 %v18122_v40  ;;  %v10147_v42 = vpop.f32.mrf.mxu0 }
 0x2bf   :  { %v10260_v43 = vpop.f32.mrf.mxu1  ;;  %v22171_v49 = vadd.f32 %v10258_v30, %v10146_v63  ;;  %v10148_v7 = vadd.f32 %v10147_v42, %v21799_v15  ;;  %10974 = vmatpush2.bf16.msra.mxu0 %v17315_v21  ;;  %v17336_v63 = vld [vmem:[%s26125_s1 + $0xaa8] ss:$16 sps:$4 sm:$0xff]   ;;  %v17341_v42 = vld [vmem:[%s26125_s1 + $0x88c] ss:$16 sps:$4 sm:$0xff]  }
 0x2c0   :  { %11087 = vmatpush2.bf16.msra.mxu1 %v17318_v27  ;;  %v10149_v53 = vpop.f32.mrf.mxu0  ;;  %11169 = vmatprep.subr.bf16.mxu0 %v17323_v31  ;;  %v18126_v27 = vld [vmem:[%s26126_s0 + $0x13c] ss:$144 sps:$4 sm:$0xff]   ;;  %v17333_v31 = vld [vmem:[%s26125_s1 + $0x8a8] ss:$16 sps:$4 sm:$0xff]  }
 0x2c1   :  { %v10262_v54 = vpop.f32.mrf.mxu1  ;;  %11282 = vmatprep.subr.bf16.mxu1 %v17326_v34  ;;  %v22183_v61 = vadd.f32 %v10260_v43, %v10148_v7  ;;  %v10150_v15 = vadd.f32 %v10149_v53, %v21811_v23  ;;  %v17344_v43 = vld [vmem:[%s26125_s1 + $0xa8c] ss:$16 sps:$4 sm:$0xff]   ;;  %v18127_v53 = vld [vmem:[%s26126_s0 + $0x130] ss:$144 sps:$4 sm:$0xff]  }
 0x2c2   :  { %v10299_v0 = vpop.f32.mrf.mxu0  ;;  %10976 = vmatmul.mubr.bf16.vlgmr.msra.gmra.mxu0 %v18123_v4  ;;  %v17347_v4 = vld [vmem:[%s26125_s1 + $0x86c] ss:$16 sps:$4 sm:$0xff]  }
 0x2c3   :  { %v10412_v1 = vpop.f32.mrf.mxu1  ;;  %11089 = vmatmul.mubr.bf16.vlgmr.msra.gmra.mxu1 %v18124_v6  ;;  %v22195_v9 = vadd.f32 %v10262_v54, %v10150_v15  ;;  %v10300_v23 = vadd.f32 %v10299_v0, %v21823_v33  ;;  %11170 = vmatpush1.bf16.msra.mxu0 %v17321_v46  ;;  %v18128_v54 = vld [vmem:[%s26126_s0 + $0x138] ss:$144 sps:$4 sm:$0xff]   ;;  %v17350_v6 = vld [vmem:[%s26125_s1 + $0xa6c] ss:$16 sps:$4 sm:$0xff]  }
 0x2c4   :  { %11283 = vmatpush1.bf16.msra.mxu1 %v17324_v52  ;;  %v10301_v16 = vpop.f32.mrf.mxu0  ;;  %11171 = vmatprep.subr.bf16.mxu0 %v17329_v57  ;;  %v17339_v57 = vld [vmem:[%s26125_s1 + $0x888] ss:$16 sps:$4 sm:$0xff]  }
 0x2c5   :  { %v10414_v18 = vpop.f32.mrf.mxu1  ;;  %11284 = vmatprep.subr.bf16.mxu1 %v17332_v58  ;;  %v22207_v21 = vadd.f32 %v10412_v1, %v10300_v23  ;;  %v10302_v33 = vadd.f32 %v10301_v16, %v21835_v41  ;;  %10985 = vmatprep.mubr.bf16.mxu0 %v18125_v55  ;;  %v17342_v15 = vld [vmem:[%s26125_s1 + $0xa88] ss:$16 sps:$4 sm:$0xff]   ;;  %v18129_v23 = vld [vmem:[%s26126_s0 + $0x254] ss:$144 sps:$4 sm:$0xff]  }
 0x2c6   :  { %11098 = vmatprep.mubr.bf16.mxu1 %v18126_v27  ;;  %v10303_v28 = vpop.f32.mrf.mxu0 }
 0x2c7   :  { %v10416_v30 = vpop.f32.mrf.mxu1  ;;  %v22219_v34 = vadd.f32 %v10414_v18, %v10302_v33  ;;  %v10304_v41 = vadd.f32 %v10303_v28, %v21847_v51  ;;  %11172 = vmatpush1.bf16.msra.mxu0 %v17327_v8  ;;  %v17348_v33 = vld [vmem:[%s26125_s1 + $0xa68] ss:$16 sps:$4 sm:$0xff]   ;;  %v17353_v28 = vld [vmem:[%s26125_s1 + $0x84c] ss:$16 sps:$4 sm:$0xff]  }
 0x2c8   :  { %11285 = vmatpush1.bf16.msra.mxu1 %v17330_v12  ;;  %v10305_v38 = vpop.f32.mrf.mxu0  ;;  %11173 = vmatprep.subr.bf16.mxu0 %v17335_v19  ;;  %v18130_v12 = vld [vmem:[%s26126_s0 + $0x25c] ss:$144 sps:$4 sm:$0xff]   ;;  %v17345_v19 = vld [vmem:[%s26125_s1 + $0x868] ss:$16 sps:$4 sm:$0xff]  }
 0x2c9   :  { %v10418_v40 = vpop.f32.mrf.mxu1  ;;  %11286 = vmatprep.subr.bf16.mxu1 %v17338_v20  ;;  %v22231_v46 = vadd.f32 %v10416_v30, %v10304_v41  ;;  %v10306_v51 = vadd.f32 %v10305_v38, %v21859_v59  ;;  %v17356_v30 = vld [vmem:[%s26125_s1 + $0xa4c] ss:$16 sps:$4 sm:$0xff]   ;;  %v18131_v38 = vld [vmem:[%s26126_s0 + $0x250] ss:$144 sps:$4 sm:$0xff]  }
 0x2ca   :  { %v10309_v7 = vpop.f32.mrf.mxu0  ;;  %10986 = vmatmul.mubr.bf16.gmra.mxu0 %v18127_v53  ;;  %v17359_v53 = vld [vmem:[%s26125_s1 + $0x82c] ss:$16 sps:$4 sm:$0xff]  }
 0x2cb   :  { %v10422_v52 = vpop.f32.mrf.mxu1  ;;  %11099 = vmatmul.mubr.bf16.gmra.mxu1 %v18128_v54  ;;  %v22243_v58 = vadd.f32 %v10418_v40, %v10306_v51  ;;  %v10310_v59 = vadd.f32 %v10309_v7, %v21871_v5  ;;  %11174 = vmatpush1.bf16.msra.mxu0 %v17333_v31  ;;  %v18132_v40 = vld [vmem:[%s26126_s0 + $0x258] ss:$144 sps:$4 sm:$0xff]   ;;  %v17362_v54 = vld [vmem:[%s26125_s1 + $0xa2c] ss:$16 sps:$4 sm:$0xff]  }
 0x2cc   :  { %11287 = vmatpush1.bf16.msra.mxu1 %v17336_v63  ;;  %v10311_v0 = vpop.f32.mrf.mxu0  ;;  %11175 = vmatprep.subr.bf16.mxu0 %v17341_v42  ;;  %v17351_v42 = vld [vmem:[%s26125_s1 + $0x848] ss:$16 sps:$4 sm:$0xff]  }
 0x2cd   :  { %v10424_v1 = vpop.f32.mrf.mxu1  ;;  %11288 = vmatprep.subr.bf16.mxu1 %v17344_v43  ;;  %v22255_v8 = vadd.f32 %v10422_v52, %v10310_v59  ;;  %v10312_v5 = vadd.f32 %v10311_v0, %v21883_v14  ;;  %10995 = vmatprep.mubr.bf16.mxu0 %v18129_v23  ;;  %v17354_v51 = vld [vmem:[%s26125_s1 + $0xa48] ss:$16 sps:$4 sm:$0xff]   ;;  %v18133_v59 = vld [vmem:[%s26126_s0 + $0x374] ss:$144 sps:$4 sm:$0xff]  }
 0x2ce   :  { %11108 = vmatprep.mubr.bf16.mxu1 %v18130_v12  ;;  %v10313_v16 = vpop.f32.mrf.mxu0 }
 0x2cf   :  { %v10426_v18 = vpop.f32.mrf.mxu1  ;;  %v22267_v20 = vadd.f32 %v10424_v1, %v10312_v5  ;;  %v10314_v14 = vadd.f32 %v10313_v16, %v21895_v25  ;;  %11176 = vmatpush1.bf16.msra.mxu0 %v17339_v57  ;;  %v17360_v5 = vld [vmem:[%s26125_s1 + $0xa28] ss:$16 sps:$4 sm:$0xff]   ;;  %v17365_v16 = vld [vmem:[%s26125_s1 + $0x80c] ss:$16 sps:$4 sm:$0xff]  }
 0x2d0   :  { %11289 = vmatpush1.bf16.msra.mxu1 %v17342_v15  ;;  %v10315_v55 = vpop.f32.mrf.mxu0  ;;  %11177 = vmatprep.subr.bf16.mxu0 %v17347_v4  ;;  %v18134_v15 = vld [vmem:[%s26126_s0 + $0x37c] ss:$144 sps:$4 sm:$0xff]   ;;  %v17357_v4 = vld [vmem:[%s26125_s1 + $0x828] ss:$16 sps:$4 sm:$0xff]  }
 0x2d1   :  { %v10428_v27 = vpop.f32.mrf.mxu1  ;;  %11290 = vmatprep.subr.bf16.mxu1 %v17350_v6  ;;  %v22279_v31 = vadd.f32 %v10426_v18, %v10314_v14  ;;  %v10316_v25 = vadd.f32 %v10315_v55, %v21907_v35  ;;  %v17368_v18 = vld [vmem:[%s26125_s1 + $0xa0c] ss:$16 sps:$4 sm:$0xff]   ;;  %v18135_v55 = vld [vmem:[%s26126_s0 + $0x370] ss:$144 sps:$4 sm:$0xff]  }
 0x2d2   :  { %v10319_v41 = vpop.f32.mrf.mxu0  ;;  %10996 = vmatmul.mubr.bf16.gmra.mxu0 %v18131_v38  ;;  %v17371_v38 = vld [vmem:[%s26125_s1 + $0x9ec] ss:$16 sps:$4 sm:$0xff]  }
 0x2d3   :  { %v10432_v63 = vpop.f32.mrf.mxu1  ;;  %11109 = vmatmul.mubr.bf16.gmra.mxu1 %v18132_v40  ;;  %v22291_v43 = vadd.f32 %v10428_v27, %v10316_v25  ;;  %v10320_v35 = vadd.f32 %v10319_v41, %v21919_v45  ;;  %11178 = vmatpush1.bf16.msra.mxu0 %v17345_v19  ;;  %v18136_v27 = vld [vmem:[%s26126_s0 + $0x378] ss:$144 sps:$4 sm:$0xff]   ;;  %v17374_v40 = vld [vmem:[%s26125_s1 + $0xbec] ss:$16 sps:$4 sm:$0xff]  }
 0x2d4   :  { %11291 = vmatpush1.bf16.msra.mxu1 %v17348_v33  ;;  %v10321_v7 = vpop.f32.mrf.mxu0  ;;  %11179 = vmatprep.subr.bf16.mxu0 %v17353_v28  ;;  %v17363_v28 = vld [vmem:[%s26125_s1 + $0x808] ss:$16 sps:$4 sm:$0xff]  }
 0x2d5   :  { %v10434_v52 = vpop.f32.mrf.mxu1  ;;  %11292 = vmatprep.subr.bf16.mxu1 %v17356_v30  ;;  %v22303_v57 = vadd.f32 %v10432_v63, %v10320_v35  ;;  %v10322_v45 = vadd.f32 %v10321_v7, %v21931_v56  ;;  %11005 = vmatprep.mubr.bf16.mxu0 %v18133_v59  ;;  %v17366_v25 = vld [vmem:[%s26125_s1 + $0xa08] ss:$16 sps:$4 sm:$0xff]   ;;  %v18137_v35 = vld [vmem:[%s26126_s0 + $0x494] ss:$144 sps:$4 sm:$0xff]  }
 0x2d6   :  { %11118 = vmatprep.mubr.bf16.mxu1 %v18134_v15  ;;  %v10323_v0 = vpop.f32.mrf.mxu0 }
 0x2d7   :  { %v10436_v1 = vpop.f32.mrf.mxu1  ;;  %v22315_v6 = vadd.f32 %v10434_v52, %v10322_v45  ;;  %v10324_v56 = vadd.f32 %v10323_v0, %v21943_v2  ;;  %11180 = vmatpush1.bf16.msra.mxu0 %v17351_v42  ;;  %v17372_v45 = vld [vmem:[%s26125_s1 + $0xbe8] ss:$16 sps:$4 sm:$0xff]   ;;  %v17377_v0 = vld [vmem:[%s26125_s1 + $0x9cc] ss:$16 sps:$4 sm:$0xff]  }
 0x2d8   :  { %11293 = vmatpush1.bf16.msra.mxu1 %v17354_v51  ;;  %v10325_v23 = vpop.f32.mrf.mxu0  ;;  %11181 = vmatprep.subr.bf16.mxu0 %v17359_v53  ;;  %v18138_v51 = vld [vmem:[%s26126_s0 + $0x49c] ss:$144 sps:$4 sm:$0xff]   ;;  %v17369_v53 = vld [vmem:[%s26125_s1 + $0x9e8] ss:$16 sps:$4 sm:$0xff]  }
 0x2d9   :  { %v10438_v12 = vpop.f32.mrf.mxu1  ;;  %11294 = vmatprep.subr.bf16.mxu1 %v17362_v54  ;;  %v22327_v19 = vadd.f32 %v10436_v1, %v10324_v56  ;;  %v10326_v2 = vadd.f32 %v10325_v23, %v21955_v11  ;;  %v17380_v1 = vld [vmem:[%s26125_s1 + $0xbcc] ss:$16 sps:$4 sm:$0xff]   ;;  %v18139_v23 = vld [vmem:[%s26126_s0 + $0x490] ss:$144 sps:$4 sm:$0xff]  }
 0x2da   :  { %v10329_v14 = vpop.f32.mrf.mxu0  ;;  %11006 = vmatmul.mubr.bf16.gmra.mxu0 %v18135_v55  ;;  %v17383_v55 = vld [vmem:[%s26125_s1 + $0x9ac] ss:$16 sps:$4 sm:$0xff]  }
 0x2db   :  { %v10442_v33 = vpop.f32.mrf.mxu1  ;;  %11119 = vmatmul.mubr.bf16.gmra.mxu1 %v18136_v27  ;;  %v22339_v30 = vadd.f32 %v10438_v12, %v10326_v2  ;;  %v10330_v11 = vadd.f32 %v10329_v14, %v21967_v26  ;;  %11182 = vmatpush1.bf16.msra.mxu0 %v17357_v4  ;;  %v18140_v12 = vld [vmem:[%s26126_s0 + $0x498] ss:$144 sps:$4 sm:$0xff]   ;;  %v17386_v27 = vld [vmem:[%s26125_s1 + $0xbac] ss:$16 sps:$4 sm:$0xff]  }
 0x2dc   :  { %11295 = vmatpush1.bf16.msra.mxu1 %v17360_v5  ;;  %v10331_v41 = vpop.f32.mrf.mxu0  ;;  %11183 = vmatprep.subr.bf16.mxu0 %v17365_v16  ;;  %v17375_v16 = vld [vmem:[%s26125_s1 + $0x9c8] ss:$16 sps:$4 sm:$0xff]  }
 0x2dd   :  { %v10444_v63 = vpop.f32.mrf.mxu1  ;;  %11296 = vmatprep.subr.bf16.mxu1 %v17368_v18  ;;  %v22351_v42 = vadd.f32 %v10442_v33, %v10330_v11  ;;  %v10332_v26 = vadd.f32 %v10331_v41, %v21979_v37  ;;  %11015 = vmatprep.mubr.bf16.mxu0 %v18137_v35  ;;  %v17378_v2 = vld [vmem:[%s26125_s1 + $0xbc8] ss:$16 sps:$4 sm:$0xff]   ;;  %v18141_v11 = vld [vmem:[%s26126_s0 + $0x5b4] ss:$144 sps:$4 sm:$0xff]  }
 0x2de   :  { %11128 = vmatprep.mubr.bf16.mxu1 %v18138_v51  ;;  %v10333_v7 = vpop.f32.mrf.mxu0 }
 0x2df   :  { %v10446_v52 = vpop.f32.mrf.mxu1  ;;  %v22363_v54 = vadd.f32 %v10444_v63, %v10332_v26  ;;  %v10334_v37 = vadd.f32 %v10333_v7, %v21991_v50  ;;  %11184 = vmatpush1.bf16.msra.mxu0 %v17363_v28  ;;  %v17384_v26 = vld [vmem:[%s26125_s1 + $0xba8] ss:$16 sps:$4 sm:$0xff]   ;;  %v17389_v7 = vld [vmem:[%s26125_s1 + $0x98c] ss:$16 sps:$4 sm:$0xff]  }
 0x2e0   :  { %11297 = vmatpush1.bf16.msra.mxu1 %v17366_v25  ;;  %v10335_v59 = vpop.f32.mrf.mxu0  ;;  %11185 = vmatprep.subr.bf16.mxu0 %v17371_v38  ;;  %v18142_v25 = vld [vmem:[%s26126_s0 + $0x5bc] ss:$144 sps:$4 sm:$0xff]   ;;  %v17381_v38 = vld [vmem:[%s26125_s1 + $0x9a8] ss:$16 sps:$4 sm:$0xff]  }
 0x2e1   :  { %v10448_v15 = vpop.f32.mrf.mxu1  ;;  %11298 = vmatprep.subr.bf16.mxu1 %v17374_v40  ;;  %v22375_v4 = vadd.f32 %v10446_v52, %v10334_v37  ;;  %v10336_v50 = vadd.f32 %v10335_v59, %v22003_v62  ;;  %v17392_v52 = vld [vmem:[%s26125_s1 + $0xb8c] ss:$16 sps:$4 sm:$0xff]   ;;  %v18143_v59 = vld [vmem:[%s26126_s0 + $0x5b0] ss:$144 sps:$4 sm:$0xff]  }
 0x2e2   :  { %v10339_v56 = vpop.f32.mrf.mxu0  ;;  %11016 = vmatmul.mubr.bf16.gmra.mxu0 %v18139_v23  ;;  %v17395_v23 = vld [vmem:[%s26125_s1 + $0x96c] ss:$16 sps:$4 sm:$0xff]  }
 0x2e3   :  { %v10452_v5 = vpop.f32.mrf.mxu1  ;;  %11129 = vmatmul.mubr.bf16.gmra.mxu1 %v18140_v12  ;;  %v22387_v18 = vadd.f32 %v10448_v15, %v10336_v50  ;;  %v10340_v62 = vadd.f32 %v10339_v56, %v22015_v13  ;;  %11186 = vmatpush2.bf16.msra.mxu0 %v17369_v53  ;;  %v18144_v15 = vld [vmem:[%s26126_s0 + $0x5b8] ss:$144 sps:$4 sm:$0xff]   ;;  %v17398_v12 = vld [vmem:[%s26125_s1 + $0xb6c] ss:$16 sps:$4 sm:$0xff]  }
 0x2e4   :  { %11299 = vmatpush2.bf16.msra.mxu1 %v17372_v45  ;;  %v10341_v14 = vpop.f32.mrf.mxu0  ;;  %11187 = vmatprep.subr.bf16.mxu0 %v17377_v0  ;;  %v17387_v0 = vld [vmem:[%s26125_s1 + $0x988] ss:$16 sps:$4 sm:$0xff]  }
 0x2e5   :  { %v10454_v33 = vpop.f32.mrf.mxu1  ;;  %11300 = vmatprep.subr.bf16.mxu1 %v17380_v1  ;;  %v22399_v28 = vadd.f32 %v10452_v5, %v10340_v62  ;;  %v10342_v13 = vadd.f32 %v10341_v14, %v22027_v48  ;;  %11025 = vmatprep.mubr.bf16.mxu0 %v18141_v11  ;;  %v17390_v50 = vld [vmem:[%s26125_s1 + $0xb88] ss:$16 sps:$4 sm:$0xff]   ;;  %v18145_v62 = vld [vmem:[%s26126_s0 + $0x6d4] ss:$144 sps:$4 sm:$0xff]  }
 0x2e6   :  { %11138 = vmatprep.mubr.bf16.mxu1 %v18142_v25  ;;  %v10343_v41 = vpop.f32.mrf.mxu0 }
 0x2e7   :  { %v10456_v63 = vpop.f32.mrf.mxu1  ;;  %v22411_v40 = vadd.f32 %v10454_v33, %v10342_v13  ;;  %v10344_v48 = vadd.f32 %v10343_v41, %v22039_v60  ;;  %11188 = vmatpush2.bf16.msra.mxu0 %v17375_v16  ;;  %v17396_v13 = vld [vmem:[%s26125_s1 + $0xb68] ss:$16 sps:$4 sm:$0xff]   ;;  %v17401_v41 = vld [vmem:[%s26125_s1 + $0x94c] ss:$16 sps:$4 sm:$0xff]  }
 0x2e8   :  { %11301 = vmatpush2.bf16.msra.mxu1 %v17378_v2  ;;  %v10345_v35 = vpop.f32.mrf.mxu0  ;;  %11189 = vmatprep.subr.bf16.mxu0 %v17383_v55  ;;  %v18146_v2 = vld [vmem:[%s26126_s0 + $0x6dc] ss:$144 sps:$4 sm:$0xff]   ;;  %v17393_v55 = vld [vmem:[%s26125_s1 + $0x968] ss:$16 sps:$4 sm:$0xff]  }
 0x2e9   :  { %v10458_v51 = vpop.f32.mrf.mxu1  ;;  %11302 = vmatprep.subr.bf16.mxu1 %v17386_v27  ;;  %v22423_v53 = vadd.f32 %v10456_v63, %v10344_v48  ;;  %v10346_v60 = vadd.f32 %v10345_v35, %v22051_v3  ;;  %v17404_v63 = vld [vmem:[%s26125_s1 + $0xb4c] ss:$16 sps:$4 sm:$0xff]   ;;  %v18147_v35 = vld [vmem:[%s26126_s0 + $0x6d0] ss:$144 sps:$4 sm:$0xff]  }
 0x2ea   :  { %v10349_v37 = vpop.f32.mrf.mxu0  ;;  %11026 = vmatmul.mubr.bf16.gmra.mxu0 %v18143_v59  ;;  %v17407_v59 = vld [vmem:[%s26125_s1 + $0x92c] ss:$16 sps:$4 sm:$0xff]  }
 0x2eb   :  { %v10462_v45 = vpop.f32.mrf.mxu1  ;;  %11139 = vmatmul.mubr.bf16.gmra.mxu1 %v18144_v15  ;;  %v22435_v1 = vadd.f32 %v10458_v51, %v10346_v60  ;;  %v10350_v3 = vadd.f32 %v10349_v37, %v22063_v10  ;;  %11190 = vmatpush2.bf16.msra.mxu0 %v17381_v38  ;;  %v18148_v51 = vld [vmem:[%s26126_s0 + $0x6d8] ss:$144 sps:$4 sm:$0xff]   ;;  %v17410_v15 = vld [vmem:[%s26125_s1 + $0xb2c] ss:$16 sps:$4 sm:$0xff]  }
 0x2ec   :  { %11303 = vmatpush2.bf16.msra.mxu1 %v17384_v26  ;;  %v10351_v56 = vpop.f32.mrf.mxu0  ;;  %11191 = vmatprep.subr.bf16.mxu0 %v17389_v7  ;;  %v17399_v7 = vld [vmem:[%s26125_s1 + $0x948] ss:$16 sps:$4 sm:$0xff]  }
 0x2ed   :  { %v10464_v5 = vpop.f32.mrf.mxu1  ;;  %11304 = vmatprep.subr.bf16.mxu1 %v17392_v52  ;;  %v22447_v16 = vadd.f32 %v10462_v45, %v10350_v3  ;;  %v10352_v10 = vadd.f32 %v10351_v56, %v22075_v44  ;;  %11035 = vmatprep.mubr.bf16.mxu0 %v18145_v62  ;;  %v17402_v60 = vld [vmem:[%s26125_s1 + $0xb48] ss:$16 sps:$4 sm:$0xff]   ;;  %v18149_v3 = vld [vmem:[%s26126_s0 + $0x7f4] ss:$144 sps:$4 sm:$0xff]  }
 0x2ee   :  { %11148 = vmatprep.mubr.bf16.mxu1 %v18146_v2  ;;  %v10353_v14 = vpop.f32.mrf.mxu0 }
 0x2ef   :  { %v10466_v33 = vpop.f32.mrf.mxu1  ;;  %v22459_v27 = vadd.f32 %v10464_v5, %v10352_v10  ;;  %v10354_v44 = vadd.f32 %v10353_v14, %v22087_v24  ;;  %11192 = vmatpush2.bf16.msra.mxu0 %v17387_v0  ;;  %v17408_v10 = vld [vmem:[%s26125_s1 + $0xb28] ss:$16 sps:$4 sm:$0xff]   ;;  %v17413_v14 = vld [vmem:[%s26125_s1 + $0x90c] ss:$16 sps:$4 sm:$0xff]  }
 0x2f0   :  { %11305 = vmatpush2.bf16.msra.mxu1 %v17390_v50  ;;  %v10355_v11 = vpop.f32.mrf.mxu0  ;;  %11193 = vmatprep.subr.bf16.mxu0 %v17395_v23  ;;  %v18150_v50 = vld [vmem:[%s26126_s0 + $0x7fc] ss:$144 sps:$4 sm:$0xff]   ;;  %v17405_v23 = vld [vmem:[%s26125_s1 + $0x928] ss:$16 sps:$4 sm:$0xff]  }
 0x2f1   :  { %v10468_v25 = vpop.f32.mrf.mxu1  ;;  %11306 = vmatprep.subr.bf16.mxu1 %v17398_v12  ;;  %v22471_v38 = vadd.f32 %v10466_v33, %v10354_v44  ;;  %v10356_v24 = vadd.f32 %v10355_v11, %v22099_v32  ;;  %v17416_v33 = vld [vmem:[%s26125_s1 + $0xb0c] ss:$16 sps:$4 sm:$0xff]   ;;  %v18151_v11 = vld [vmem:[%s26126_s0 + $0x7f0] ss:$144 sps:$4 sm:$0xff]  }
 0x2f2   :  { %v10359_v48 = vpop.f32.mrf.mxu0  ;;  %11036 = vmatmul.mubr.bf16.gmra.mxu0 %v18147_v35  ;;  %v17419_v35 = vld [vmem:[%s26125_s1 + $0xcec] ss:$16 sps:$4 sm:$0xff]  }
 0x2f3   :  { %v10472_v26 = vpop.f32.mrf.mxu1  ;;  %11149 = vmatmul.mubr.bf16.gmra.mxu1 %v18148_v51  ;;  %v22483_v52 = vadd.f32 %v10468_v25, %v10356_v24  ;;  %v10360_v32 = vadd.f32 %v10359_v48, %v22111_v39  ;;  %11194 = vmatpush2.bf16.msra.mxu0 %v17393_v55  ;;  %v18152_v25 = vld [vmem:[%s26126_s0 + $0x7f8] ss:$144 sps:$4 sm:$0xff]   ;;  %v17422_v51 = vld [vmem:[%s26125_s1 + $0xeec] ss:$16 sps:$4 sm:$0xff]  }
 0x2f4   :  { %11307 = vmatpush2.bf16.msra.mxu1 %v17396_v13  ;;  %v10361_v37 = vpop.f32.mrf.mxu0  ;;  %11195 = vmatprep.subr.bf16.mxu0 %v17401_v41  ;;  %v17411_v41 = vld [vmem:[%s26125_s1 + $0x908] ss:$16 sps:$4 sm:$0xff]  }
 0x2f5   :  { %v10474_v45 = vpop.f32.mrf.mxu1  ;;  %11308 = vmatprep.subr.bf16.mxu1 %v17404_v63  ;;  %v22495_v0 = vadd.f32 %v10472_v26, %v10360_v32  ;;  %v10362_v39 = vadd.f32 %v10361_v37, %v22123_v47  ;;  %11045 = vmatprep.mubr.bf16.mxu0 %v18149_v3  ;;  %v17414_v24 = vld [vmem:[%s26125_s1 + $0xb08] ss:$16 sps:$4 sm:$0xff]   ;;  %v18153_v32 = vld [vmem:[%s26126_s0 + $0x24] ss:$144 sps:$4 sm:$0xff]  }
 0x2f6   :  { %11158 = vmatprep.mubr.bf16.mxu1 %v18150_v50  ;;  %v10363_v56 = vpop.f32.mrf.mxu0 }
 0x2f7   :  { %v10476_v5 = vpop.f32.mrf.mxu1  ;;  %v22507_v12 = vadd.f32 %v10474_v45, %v10362_v39  ;;  %v10364_v47 = vadd.f32 %v10363_v56, %v22135_v17  ;;  %11196 = vmatpush2.bf16.msra.mxu0 %v17399_v7  ;;  %v17420_v39 = vld [vmem:[%s26125_s1 + $0xee8] ss:$16 sps:$4 sm:$0xff]   ;;  %v17425_v56 = vld [vmem:[%s26125_s1 + $0xccc] ss:$16 sps:$4 sm:$0xff]  }
 0x2f8   :  { %11309 = vmatpush2.bf16.msra.mxu1 %v17402_v60  ;;  %v10365_v62 = vpop.f32.mrf.mxu0  ;;  %11197 = vmatprep.subr.bf16.mxu0 %v17407_v59  ;;  %v18154_v60 = vld [vmem:[%s26126_s0 + $0x2c] ss:$144 sps:$4 sm:$0xff]   ;;  %v17417_v59 = vld [vmem:[%s26125_s1 + $0xce8] ss:$16 sps:$4 sm:$0xff]  }
 0x2f9   :  { %v10478_v2 = vpop.f32.mrf.mxu1  ;;  %11310 = vmatprep.subr.bf16.mxu1 %v17410_v15  ;;  %v22519_v55 = vadd.f32 %v10476_v5, %v10364_v47  ;;  %v10366_v17 = vadd.f32 %v10365_v62, %v22147_v22  ;;  %v17428_v5 = vld [vmem:[%s26125_s1 + $0xecc] ss:$16 sps:$4 sm:$0xff]   ;;  %v18155_v62 = vld [vmem:[%s26126_s0 + $0x20] ss:$144 sps:$4 sm:$0xff]  }
 0x2fa   :  { %v10369_v44 = vpop.f32.mrf.mxu0  ;;  %11046 = vmatmul.mubr.bf16.gmra.mxu0 %v18151_v11  ;;  %v17431_v11 = vld [vmem:[%s26125_s1 + $0xcac] ss:$16 sps:$4 sm:$0xff]  }
 0x2fb   :  { %v10482_v13 = vpop.f32.mrf.mxu1  ;;  %11159 = vmatmul.mubr.bf16.gmra.mxu1 %v18152_v25  ;;  %v22531_v63 = vadd.f32 %v10478_v2, %v10366_v17  ;;  %v10370_v22 = vadd.f32 %v10369_v44, %v22159_v36  ;;  %11198 = vmatpush2.bf16.msra.mxu0 %v17405_v23  ;;  %v18156_v2 = vld [vmem:[%s26126_s0 + $0x28] ss:$144 sps:$4 sm:$0xff]   ;;  %v17434_v25 = vld [vmem:[%s26125_s1 + $0xeac] ss:$16 sps:$4 sm:$0xff]  }
 0x2fc   :  { %11311 = vmatpush2.bf16.msra.mxu1 %v17408_v10  ;;  %v10371_v48 = vpop.f32.mrf.mxu0  ;;  %11199 = vmatprep.subr.bf16.mxu0 %v17413_v14  ;;  %v17423_v14 = vld [vmem:[%s26125_s1 + $0xcc8] ss:$16 sps:$4 sm:$0xff]  }
 0x2fd   :  { %v10484_v26 = vpop.f32.mrf.mxu1  ;;  %11312 = vmatprep.subr.bf16.mxu1 %v17416_v33  ;;  %v22543_v7 = vadd.f32 %v10482_v13, %v10370_v22  ;;  %v10372_v36 = vadd.f32 %v10371_v48, %v22171_v49  ;;  %11201 = vmatprep.mubr.bf16.mxu0 %v18153_v32  ;;  %v17426_v17 = vld [vmem:[%s26125_s1 + $0xec8] ss:$16 sps:$4 sm:$0xff]   ;;  %v18157_v22 = vld [vmem:[%s26126_s0 + $0x144] ss:$144 sps:$4 sm:$0xff]  }
 0x2fe   :  { %11314 = vmatprep.mubr.bf16.mxu1 %v18154_v60  ;;  %v10373_v37 = vpop.f32.mrf.mxu0 }
 0x2ff   :  { %v10486_v45 = vpop.f32.mrf.mxu1  ;;  %v22555_v15 = vadd.f32 %v10484_v26, %v10372_v36  ;;  %v10374_v49 = vadd.f32 %v10373_v37, %v22183_v61  ;;  %11200 = vmatpush2.bf16.msra.mxu0 %v17411_v41  ;;  %v17432_v36 = vld [vmem:[%s26125_s1 + $0xea8] ss:$16 sps:$4 sm:$0xff]   ;;  %v17437_v37 = vld [vmem:[%s26125_s1 + $0xc8c] ss:$16 sps:$4 sm:$0xff]  }
 0x300   :  { %11313 = vmatpush2.bf16.msra.mxu1 %v17414_v24  ;;  %v10375_v3 = vpop.f32.mrf.mxu0  ;;  %11395 = vmatprep.subr.bf16.mxu0 %v17419_v35  ;;  %v18158_v24 = vld [vmem:[%s26126_s0 + $0x14c] ss:$144 sps:$4 sm:$0xff]   ;;  %v17429_v35 = vld [vmem:[%s26125_s1 + $0xca8] ss:$16 sps:$4 sm:$0xff]  }
 0x301   :  { %v10488_v50 = vpop.f32.mrf.mxu1  ;;  %11508 = vmatprep.subr.bf16.mxu1 %v17422_v51  ;;  %v22567_v23 = vadd.f32 %v10486_v45, %v10374_v49  ;;  %v10376_v61 = vadd.f32 %v10375_v3, %v22195_v9  ;;  %v17440_v45 = vld [vmem:[%s26125_s1 + $0xe8c] ss:$16 sps:$4 sm:$0xff]   ;;  %v18159_v3 = vld [vmem:[%s26126_s0 + $0x140] ss:$144 sps:$4 sm:$0xff]  }
 0x302   :  { %v10525_v47 = vpop.f32.mrf.mxu0  ;;  %11202 = vmatmul.mubr.bf16.vlgmr.msra.gmra.mxu0 %v18155_v62  ;;  %v17443_v62 = vld [vmem:[%s26125_s1 + $0xc6c] ss:$16 sps:$4 sm:$0xff]  }
 0x303   :  { %v10638_v10 = vpop.f32.mrf.mxu1  ;;  %11315 = vmatmul.mubr.bf16.vlgmr.msra.gmra.mxu1 %v18156_v2  ;;  %v22579_v33 = vadd.f32 %v10488_v50, %v10376_v61  ;;  %v10526_v9 = vadd.f32 %v10525_v47, %v22207_v21  ;;  %11396 = vmatpush1.bf16.msra.mxu0 %v17417_v59  ;;  %v18160_v50 = vld [vmem:[%s26126_s0 + $0x148] ss:$144 sps:$4 sm:$0xff]   ;;  %v17446_v2 = vld [vmem:[%s26125_s1 + $0xe6c] ss:$16 sps:$4 sm:$0xff]  }
 0x304   :  { %11509 = vmatpush1.bf16.msra.mxu1 %v17420_v39  ;;  %v10527_v44 = vpop.f32.mrf.mxu0  ;;  %11397 = vmatprep.subr.bf16.mxu0 %v17425_v56  ;;  %v17435_v56 = vld [vmem:[%s26125_s1 + $0xc88] ss:$16 sps:$4 sm:$0xff]  }
 0x305   :  { %v10640_v13 = vpop.f32.mrf.mxu1  ;;  %11510 = vmatprep.subr.bf16.mxu1 %v17428_v5  ;;  %v22591_v41 = vadd.f32 %v10638_v10, %v10526_v9  ;;  %v10528_v21 = vadd.f32 %v10527_v44, %v22219_v34  ;;  %11211 = vmatprep.mubr.bf16.mxu0 %v18157_v22  ;;  %v17438_v61 = vld [vmem:[%s26125_s1 + $0xe88] ss:$16 sps:$4 sm:$0xff]   ;;  %v18161_v9 = vld [vmem:[%s26126_s0 + $0x264] ss:$144 sps:$4 sm:$0xff]  }
 0x306   :  { %11324 = vmatprep.mubr.bf16.mxu1 %v18158_v24  ;;  %v10529_v48 = vpop.f32.mrf.mxu0 }
 0x307   :  { %26167 = vst [vmem:[#allocation2_spill] sm:$0xff] %v22591_v41  ;;  %v10642_v26 = vpop.f32.mrf.mxu1  ;;  %v22603_v51 = vadd.f32 %v10640_v13, %v10528_v21  ;;  %v10530_v34 = vadd.f32 %v10529_v48, %v22231_v46  ;;  %11398 = vmatpush1.bf16.msra.mxu0 %v17423_v14  ;;  %v18162_v13 = vld [vmem:[%s26126_s0 + $0x26c] ss:$144 sps:$4 sm:$0xff]   ;;  %v17444_v21 = vld [vmem:[%s26125_s1 + $0xe68] ss:$16 sps:$4 sm:$0xff]  }
 0x308   :  { %11511 = vmatpush1.bf16.msra.mxu1 %v17426_v17  ;;  %v10531_v32 = vpop.f32.mrf.mxu0  ;;  %11399 = vmatprep.subr.bf16.mxu0 %v17431_v11  ;;  %v17441_v11 = vld [vmem:[%s26125_s1 + $0xc68] ss:$16 sps:$4 sm:$0xff]   ;;  %v17449_v48 = vld [vmem:[%s26125_s1 + $0xc4c] ss:$16 sps:$4 sm:$0xff]  }
 0x309   :  { %26168 = vst [vmem:[#allocation3_spill] sm:$0xff] %v22603_v51  ;;  %v10644_v60 = vpop.f32.mrf.mxu1  ;;  %11512 = vmatprep.subr.bf16.mxu1 %v17434_v25  ;;  %v22615_v59 = vadd.f32 %v10642_v26, %v10530_v34  ;;  %v10532_v46 = vadd.f32 %v10531_v32, %v22243_v58  ;;  %v17452_v26 = vld [vmem:[%s26125_s1 + $0xe4c] ss:$16 sps:$4 sm:$0xff]   ;;  %v18163_v32 = vld [vmem:[%s26126_s0 + $0x260] ss:$144 sps:$4 sm:$0xff]  }
 0x30a   :  { %v10535_v49 = vpop.f32.mrf.mxu0  ;;  %11212 = vmatmul.mubr.bf16.gmra.mxu0 %v18159_v3  ;;  %v17455_v3 = vld [vmem:[%s26125_s1 + $0xc2c] ss:$16 sps:$4 sm:$0xff]  }
 0x30b   :  { %26169 = vst [vmem:[#allocation4_spill] sm:$0xff] %v22615_v59  ;;  %v10648_v39 = vpop.f32.mrf.mxu1  ;;  %11325 = vmatmul.mubr.bf16.gmra.mxu1 %v18160_v50  ;;  %v22627_v5 = vadd.f32 %v10644_v60, %v10532_v46  ;;  %v10536_v58 = vadd.f32 %v10535_v49, %v22255_v8  ;;  %11400 = vmatpush1.bf16.msra.mxu0 %v17429_v35  ;;  %v18164_v60 = vld [vmem:[%s26126_s0 + $0x268] ss:$144 sps:$4 sm:$0xff]   ;;  %v17458_v50 = vld [vmem:[%s26125_s1 + $0xe2c] ss:$16 sps:$4 sm:$0xff]  }
 0x30c   :  { %11513 = vmatpush1.bf16.msra.mxu1 %v17432_v36  ;;  %v10537_v47 = vpop.f32.mrf.mxu0  ;;  %11401 = vmatprep.subr.bf16.mxu0 %v17437_v37  ;;  %v17447_v37 = vld [vmem:[%s26125_s1 + $0xc48] ss:$16 sps:$4 sm:$0xff]  }
 0x30d   :  { %26170 = vst [vmem:[#allocation5_spill] sm:$0xff] %v22627_v5  ;;  %v10650_v10 = vpop.f32.mrf.mxu1  ;;  %11514 = vmatprep.subr.bf16.mxu1 %v17440_v45  ;;  %v22639_v14 = vadd.f32 %v10648_v39, %v10536_v58  ;;  %v10538_v8 = vadd.f32 %v10537_v47, %v22267_v20  ;;  %11221 = vmatprep.mubr.bf16.mxu0 %v18161_v9  ;;  %v17450_v46 = vld [vmem:[%s26125_s1 + $0xe48] ss:$16 sps:$4 sm:$0xff]   ;;  %v18165_v58 = vld [vmem:[%s26126_s0 + $0x384] ss:$144 sps:$4 sm:$0xff]  }
 0x30e   :  { %v10539_v17 = vpop.f32.mrf.mxu0  ;;  %11334 = vmatprep.mubr.bf16.mxu1 %v18162_v13  ;;  %v17464_v13 = vld [vmem:[%s26125_s1 + $0xe0c] ss:$16 sps:$4 sm:$0xff]  }
 0x30f   :  { %26171 = vst [vmem:[#allocation6_spill] sm:$0xff] %v22639_v14  ;;  %v10652_v44 = vpop.f32.mrf.mxu1  ;;  %v22651_v25 = vadd.f32 %v10650_v10, %v10538_v8  ;;  %v10540_v20 = vadd.f32 %v10539_v17, %v22279_v31  ;;  %11402 = vmatpush1.bf16.msra.mxu0 %v17435_v56  ;;  %v18166_v10 = vld [vmem:[%s26126_s0 + $0x38c] ss:$144 sps:$4 sm:$0xff]   ;;  %v17456_v8 = vld [vmem:[%s26125_s1 + $0xe28] ss:$16 sps:$4 sm:$0xff]  }
 0x310   :  { %11515 = vmatpush1.bf16.msra.mxu1 %v17438_v61  ;;  %v10541_v22 = vpop.f32.mrf.mxu0  ;;  %11403 = vmatprep.subr.bf16.mxu0 %v17443_v62  ;;  %v17453_v62 = vld [vmem:[%s26125_s1 + $0xc28] ss:$16 sps:$4 sm:$0xff]  }
 0x311   :  { %26172 = vst [vmem:[#allocation7_spill] sm:$0xff] %v22651_v25  ;;  %v10654_v24 = vpop.f32.mrf.mxu1  ;;  %11516 = vmatprep.subr.bf16.mxu1 %v17446_v2  ;;  %v22663_v35 = vadd.f32 %v10652_v44, %v10540_v20  ;;  %v10542_v31 = vadd.f32 %v10541_v22, %v22291_v43  ;;  %v17461_v44 = vld [vmem:[%s26125_s1 + $0xc0c] ss:$16 sps:$4 sm:$0xff]   ;;  %v18167_v22 = vld [vmem:[%s26126_s0 + $0x380] ss:$144 sps:$4 sm:$0xff]  }
 0x312   :  { %v10545_v34 = vpop.f32.mrf.mxu0  ;;  %11222 = vmatmul.mubr.bf16.gmra.mxu0 %v18163_v32  ;;  %v17467_v32 = vld [vmem:[%s26125_s1 + $0xdec] ss:$16 sps:$4 sm:$0xff]  }
 0x313   :  { %26173 = vst [vmem:[#allocation8_spill] sm:$0xff] %v22663_v35  ;;  %v10658_v36 = vpop.f32.mrf.mxu1  ;;  %11335 = vmatmul.mubr.bf16.gmra.mxu1 %v18164_v60  ;;  %v22675_v45 = vadd.f32 %v10654_v24, %v10542_v31  ;;  %v10546_v43 = vadd.f32 %v10545_v34, %v22303_v57  ;;  %11404 = vmatpush1.bf16.msra.mxu0 %v17441_v11  ;;  %v18168_v24 = vld [vmem:[%s26126_s0 + $0x388] ss:$144 sps:$4 sm:$0xff]   ;;  %v17470_v60 = vld [vmem:[%s26125_s1 + $0xfec] ss:$16 sps:$4 sm:$0xff]  }
 0x314   :  { %11517 = vmatpush1.bf16.msra.mxu1 %v17444_v21  ;;  %v10547_v49 = vpop.f32.mrf.mxu0  ;;  %11405 = vmatprep.subr.bf16.mxu0 %v17449_v48  ;;  %v17459_v48 = vld [vmem:[%s26125_s1 + $0xc08] ss:$16 sps:$4 sm:$0xff]  }
 0x315   :  { %26174 = vst [vmem:[#allocation9_spill] sm:$0xff] %v22675_v45  ;;  %v10660_v39 = vpop.f32.mrf.mxu1  ;;  %11518 = vmatprep.subr.bf16.mxu1 %v17452_v26  ;;  %v22687_v56 = vadd.f32 %v10658_v36, %v10546_v43  ;;  %v10548_v57 = vadd.f32 %v10547_v49, %v22315_v6  ;;  %11231 = vmatprep.mubr.bf16.mxu0 %v18165_v58  ;;  %v17462_v31 = vld [vmem:[%s26125_s1 + $0xe08] ss:$16 sps:$4 sm:$0xff]   ;;  %v18169_v43 = vld [vmem:[%s26126_s0 + $0x4a4] ss:$144 sps:$4 sm:$0xff]  }
 0x316   :  { %v10549_v61 = vpop.f32.mrf.mxu0  ;;  %11344 = vmatprep.mubr.bf16.mxu1 %v18166_v10  ;;  %v17476_v10 = vld [vmem:[%s26125_s1 + $0xfcc] ss:$16 sps:$4 sm:$0xff]  }
 0x317   :  { %26175 = vst [vmem:[#allocation10_spill] sm:$0xff] %v22687_v56  ;;  %v10662_v47 = vpop.f32.mrf.mxu1  ;;  %v22699_v2 = vadd.f32 %v10660_v39, %v10548_v57  ;;  %v10550_v6 = vadd.f32 %v10549_v61, %v22327_v19  ;;  %11406 = vmatpush1.bf16.msra.mxu0 %v17447_v37  ;;  %v18170_v39 = vld [vmem:[%s26126_s0 + $0x4ac] ss:$144 sps:$4 sm:$0xff]   ;;  %v17468_v57 = vld [vmem:[%s26125_s1 + $0xfe8] ss:$16 sps:$4 sm:$0xff]  }
 0x318   :  { %11519 = vmatpush1.bf16.msra.mxu1 %v17450_v46  ;;  %v10551_v9 = vpop.f32.mrf.mxu0  ;;  %11407 = vmatprep.subr.bf16.mxu0 %v17455_v3  ;;  %v17465_v3 = vld [vmem:[%s26125_s1 + $0xde8] ss:$16 sps:$4 sm:$0xff]  }
 0x319   :  { %26176 = vst [vmem:[#allocation11_spill] sm:$0xff] %v22699_v2  ;;  %v10664_v17 = vpop.f32.mrf.mxu1  ;;  %11520 = vmatprep.subr.bf16.mxu1 %v17458_v50  ;;  %v22711_v11 = vadd.f32 %v10662_v47, %v10550_v6  ;;  %v10552_v19 = vadd.f32 %v10551_v9, %v22339_v30  ;;  %v17473_v47 = vld [vmem:[%s26125_s1 + $0xdcc] ss:$16 sps:$4 sm:$0xff]   ;;  %v18171_v9 = vld [vmem:[%s26126_s0 + $0x4a0] ss:$144 sps:$4 sm:$0xff]  }
 0x31a   :  { %v10555_v20 = vpop.f32.mrf.mxu0  ;;  %11232 = vmatmul.mubr.bf16.gmra.mxu0 %v18167_v22  ;;  %v17479_v22 = vld [vmem:[%s26125_s1 + $0xdac] ss:$16 sps:$4 sm:$0xff]  }
 0x31b   :  { %26177 = vst [vmem:[#allocation12_spill] sm:$0xff] %v22711_v11  ;;  %v10668_v21 = vpop.f32.mrf.mxu1  ;;  %11345 = vmatmul.mubr.bf16.gmra.mxu1 %v18168_v24  ;;  %v22723_v26 = vadd.f32 %v10664_v17, %v10552_v19  ;;  %v10556_v30 = vadd.f32 %v10555_v20, %v22351_v42  ;;  %11408 = vmatpush1.bf16.msra.mxu0 %v17453_v62  ;;  %v18172_v17 = vld [vmem:[%s26126_s0 + $0x4a8] ss:$144 sps:$4 sm:$0xff]   ;;  %v17482_v24 = vld [vmem:[%s26125_s1 + $0xfac] ss:$16 sps:$4 sm:$0xff]  }
 0x31c   :  { %11521 = vmatpush1.bf16.msra.mxu1 %v17456_v8  ;;  %v10557_v34 = vpop.f32.mrf.mxu0  ;;  %11409 = vmatprep.subr.bf16.mxu0 %v17461_v44  ;;  %v17471_v44 = vld [vmem:[%s26125_s1 + $0xdc8] ss:$16 sps:$4 sm:$0xff]  }
 0x31d   :  { %26178 = vst [vmem:[#allocation13_spill] sm:$0xff] %v22723_v26  ;;  %v10670_v36 = vpop.f32.mrf.mxu1  ;;  %11522 = vmatprep.subr.bf16.mxu1 %v17464_v13  ;;  %v22735_v37 = vadd.f32 %v10668_v21, %v10556_v30  ;;  %v10558_v42 = vadd.f32 %v10557_v34, %v22363_v54  ;;  %11241 = vmatprep.mubr.bf16.mxu0 %v18169_v43  ;;  %v17474_v19 = vld [vmem:[%s26125_s1 + $0xfc8] ss:$16 sps:$4 sm:$0xff]   ;;  %v18173_v30 = vld [vmem:[%s26126_s0 + $0x5c4] ss:$144 sps:$4 sm:$0xff]  }
 0x31e   :  { %v10559_v46 = vpop.f32.mrf.mxu0  ;;  %11354 = vmatprep.mubr.bf16.mxu1 %v18170_v39  ;;  %v17488_v39 = vld [vmem:[%s26125_s1 + $0xf8c] ss:$16 sps:$4 sm:$0xff]  }
 0x31f   :  { %26179 = vst [vmem:[#allocation14_spill] sm:$0xff] %v22735_v37  ;;  %v10672_v49 = vpop.f32.mrf.mxu1  ;;  %v22747_v50 = vadd.f32 %v10670_v36, %v10558_v42  ;;  %v10560_v54 = vadd.f32 %v10559_v46, %v22375_v4  ;;  %11410 = vmatpush1.bf16.msra.mxu0 %v17459_v48  ;;  %v18174_v36 = vld [vmem:[%s26126_s0 + $0x5cc] ss:$144 sps:$4 sm:$0xff]   ;;  %v17480_v42 = vld [vmem:[%s26125_s1 + $0xfa8] ss:$16 sps:$4 sm:$0xff]  }
 0x320   :  { %11523 = vmatpush1.bf16.msra.mxu1 %v17462_v31  ;;  %v10561_v58 = vpop.f32.mrf.mxu0  ;;  %11411 = vmatprep.subr.bf16.mxu0 %v17467_v32  ;;  %v17477_v32 = vld [vmem:[%s26125_s1 + $0xda8] ss:$16 sps:$4 sm:$0xff]  }
 0x321   :  { %26180 = vst [vmem:[#allocation15_spill] sm:$0xff] %v22747_v50  ;;  %v10674_v61 = vpop.f32.mrf.mxu1  ;;  %11524 = vmatprep.subr.bf16.mxu1 %v17470_v60  ;;  %v22759_v62 = vadd.f32 %v10672_v49, %v10560_v54  ;;  %v10562_v4 = vadd.f32 %v10561_v58, %v22387_v18  ;;  %v17485_v49 = vld [vmem:[%s26125_s1 + $0xd8c] ss:$16 sps:$4 sm:$0xff]   ;;  %v18175_v58 = vld [vmem:[%s26126_s0 + $0x5c0] ss:$144 sps:$4 sm:$0xff]  }
 0x322   :  { %v10565_v6 = vpop.f32.mrf.mxu0  ;;  %11242 = vmatmul.mubr.bf16.gmra.mxu0 %v18171_v9  ;;  %v17491_v9 = vld [vmem:[%s26125_s1 + $0xd6c] ss:$16 sps:$4 sm:$0xff]  }
 0x323   :  { %26181 = vst [vmem:[#allocation16_spill] sm:$0xff] %v22759_v62  ;;  %v10678_v8 = vpop.f32.mrf.mxu1  ;;  %11355 = vmatmul.mubr.bf16.gmra.mxu1 %v18172_v17  ;;  %v22771_v13 = vadd.f32 %v10674_v61, %v10562_v4  ;;  %v10566_v18 = vadd.f32 %v10565_v6, %v22399_v28  ;;  %11412 = vmatpush2.bf16.msra.mxu0 %v17465_v3  ;;  %v18176_v61 = vld [vmem:[%s26126_s0 + $0x5c8] ss:$144 sps:$4 sm:$0xff]   ;;  %v17494_v17 = vld [vmem:[%s26125_s1 + $0xf6c] ss:$16 sps:$4 sm:$0xff]  }
 0x324   :  { %11525 = vmatpush2.bf16.msra.mxu1 %v17468_v57  ;;  %v10567_v20 = vpop.f32.mrf.mxu0  ;;  %11413 = vmatprep.subr.bf16.mxu0 %v17473_v47  ;;  %v17483_v47 = vld [vmem:[%s26125_s1 + $0xd88] ss:$16 sps:$4 sm:$0xff]  }
 0x325   :  { %26182 = vst [vmem:[#allocation17_spill] sm:$0xff] %v22771_v13  ;;  %v10680_v21 = vpop.f32.mrf.mxu1  ;;  %11526 = vmatprep.subr.bf16.mxu1 %v17476_v10  ;;  %v22783_v48 = vadd.f32 %v10678_v8, %v10566_v18  ;;  %v10568_v28 = vadd.f32 %v10567_v20, %v22411_v40  ;;  %11251 = vmatprep.mubr.bf16.mxu0 %v18173_v30  ;;  %v17486_v4 = vld [vmem:[%s26125_s1 + $0xf88] ss:$16 sps:$4 sm:$0xff]   ;;  %v18177_v18 = vld [vmem:[%s26126_s0 + $0x6e4] ss:$144 sps:$4 sm:$0xff]  }
 0x326   :  { %v10569_v31 = vpop.f32.mrf.mxu0  ;;  %11364 = vmatprep.mubr.bf16.mxu1 %v18174_v36  ;;  %v17500_v36 = vld [vmem:[%s26125_s1 + $0xf4c] ss:$16 sps:$4 sm:$0xff]  }
 0x327   :  { %26183 = vst [vmem:[#allocation18_spill] sm:$0xff] %v22783_v48  ;;  %v10682_v34 = vpop.f32.mrf.mxu1  ;;  %v22795_v60 = vadd.f32 %v10680_v21, %v10568_v28  ;;  %v10570_v40 = vadd.f32 %v10569_v31, %v22423_v53  ;;  %11414 = vmatpush2.bf16.msra.mxu0 %v17471_v44  ;;  %v18178_v21 = vld [vmem:[%s26126_s0 + $0x6ec] ss:$144 sps:$4 sm:$0xff]   ;;  %v17492_v28 = vld [vmem:[%s26125_s1 + $0xf68] ss:$16 sps:$4 sm:$0xff]  }
 0x328   :  { %11527 = vmatpush2.bf16.msra.mxu1 %v17474_v19  ;;  %v10571_v43 = vpop.f32.mrf.mxu0  ;;  %11415 = vmatprep.subr.bf16.mxu0 %v17479_v22  ;;  %v17489_v22 = vld [vmem:[%s26125_s1 + $0xd68] ss:$16 sps:$4 sm:$0xff]  }
 0x329   :  { %26184 = vst [vmem:[#allocation19_spill] sm:$0xff] %v22795_v60  ;;  %v10684_v46 = vpop.f32.mrf.mxu1  ;;  %11528 = vmatprep.subr.bf16.mxu1 %v17482_v24  ;;  %v22807_v3 = vadd.f32 %v10682_v34, %v10570_v40  ;;  %v10572_v53 = vadd.f32 %v10571_v43, %v22435_v1  ;;  %v17497_v34 = vld [vmem:[%s26125_s1 + $0xd4c] ss:$16 sps:$4 sm:$0xff]   ;;  %v18179_v43 = vld [vmem:[%s26126_s0 + $0x6e0] ss:$144 sps:$4 sm:$0xff]  }
 0x32a   :  { %v10575_v54 = vpop.f32.mrf.mxu0  ;;  %11252 = vmatmul.mubr.bf16.gmra.mxu0 %v18175_v58  ;;  %v17503_v58 = vld [vmem:[%s26125_s1 + $0xd2c] ss:$16 sps:$4 sm:$0xff]  }
 0x32b   :  { %26185 = vst [vmem:[#allocation20_spill] sm:$0xff] %v22807_v3  ;;  %v10688_v57 = vpop.f32.mrf.mxu1  ;;  %11365 = vmatmul.mubr.bf16.gmra.mxu1 %v18176_v61  ;;  %v22819_v10 = vadd.f32 %v10684_v46, %v10572_v53  ;;  %v10576_v1 = vadd.f32 %v10575_v54, %v22447_v16  ;;  %11416 = vmatpush2.bf16.msra.mxu0 %v17477_v32  ;;  %v18180_v46 = vld [vmem:[%s26126_s0 + $0x6e8] ss:$144 sps:$4 sm:$0xff]   ;;  %v17506_v61 = vld [vmem:[%s26125_s1 + $0xf2c] ss:$16 sps:$4 sm:$0xff]  }
 0x32c   :  { %11529 = vmatpush2.bf16.msra.mxu1 %v17480_v42  ;;  %v10577_v6 = vpop.f32.mrf.mxu0  ;;  %11417 = vmatprep.subr.bf16.mxu0 %v17485_v49  ;;  %v17495_v49 = vld [vmem:[%s26125_s1 + $0xd48] ss:$16 sps:$4 sm:$0xff]   ;;  %v17611_v3 = vld [vmem:[%s26125_s1 + $0x14ec] ss:$16 sps:$4 sm:$0xff]  }
 0x32d   :  { %26186 = vst [vmem:[#allocation21_spill] sm:$0xff] %v22819_v10  ;;  %v10690_v8 = vpop.f32.mrf.mxu1  ;;  %11530 = vmatprep.subr.bf16.mxu1 %v17488_v39  ;;  %v22831_v44 = vadd.f32 %v10688_v57, %v10576_v1  ;;  %v10578_v16 = vadd.f32 %v10577_v6, %v22459_v27  ;;  %11261 = vmatprep.mubr.bf16.mxu0 %v18177_v18  ;;  %v17498_v53 = vld [vmem:[%s26125_s1 + $0xf48] ss:$16 sps:$4 sm:$0xff]   ;;  %v18181_v1 = vld [vmem:[%s26126_s0 + $0x804] ss:$144 sps:$4 sm:$0xff]  }
 0x32e   :  { %v10579_v19 = vpop.f32.mrf.mxu0  ;;  %11374 = vmatprep.mubr.bf16.mxu1 %v18178_v21  ;;  %v17512_v21 = vld [vmem:[%s26125_s1 + $0xf0c] ss:$16 sps:$4 sm:$0xff]  }
 0x32f   :  { %26187 = vst [vmem:[#allocation22_spill] sm:$0xff] %v22831_v44  ;;  %v10692_v20 = vpop.f32.mrf.mxu1  ;;  %v22843_v24 = vadd.f32 %v10690_v8, %v10578_v16  ;;  %v10580_v27 = vadd.f32 %v10579_v19, %v22471_v38  ;;  %11418 = vmatpush2.bf16.msra.mxu0 %v17483_v47  ;;  %v18182_v8 = vld [vmem:[%s26126_s0 + $0x80c] ss:$144 sps:$4 sm:$0xff]   ;;  %v17504_v16 = vld [vmem:[%s26125_s1 + $0xf28] ss:$16 sps:$4 sm:$0xff]  }
 0x330   :  { %11531 = vmatpush2.bf16.msra.mxu1 %v17486_v4  ;;  %v10581_v30 = vpop.f32.mrf.mxu0  ;;  %11419 = vmatprep.subr.bf16.mxu0 %v17491_v9  ;;  %v17501_v9 = vld [vmem:[%s26125_s1 + $0xd28] ss:$16 sps:$4 sm:$0xff]  }
 0x331   :  { %26188 = vst [vmem:[#allocation23_spill] sm:$0xff] %v22843_v24  ;;  %v10694_v31 = vpop.f32.mrf.mxu1  ;;  %11532 = vmatprep.subr.bf16.mxu1 %v17494_v17  ;;  %v22855_v32 = vadd.f32 %v10692_v20, %v10580_v27  ;;  %v10582_v38 = vadd.f32 %v10581_v30, %v22483_v52  ;;  %v17509_v20 = vld [vmem:[%s26125_s1 + $0xd0c] ss:$16 sps:$4 sm:$0xff]   ;;  %v18183_v30 = vld [vmem:[%s26126_s0 + $0x800] ss:$144 sps:$4 sm:$0xff]  }
 0x332   :  { %v10585_v40 = vpop.f32.mrf.mxu0  ;;  %11262 = vmatmul.mubr.bf16.gmra.mxu0 %v18179_v43 }
 0x333   :  { %26189 = vst [vmem:[#allocation24_spill] sm:$0xff] %v22855_v32  ;;  %v10698_v42 = vpop.f32.mrf.mxu1  ;;  %11375 = vmatmul.mubr.bf16.gmra.mxu1 %v18180_v46  ;;  %v22867_v39 = vadd.f32 %v10694_v31, %v10582_v38  ;;  %v10586_v52 = vadd.f32 %v10585_v40, %v22495_v0  ;;  %11420 = vmatpush2.bf16.msra.mxu0 %v17489_v22  ;;  %v18184_v31 = vld [vmem:[%s26126_s0 + $0x808] ss:$144 sps:$4 sm:$0xff]   ;;  %v1473_v40 = vsub.s32 2, %v19453_v29  ;;  %v17515_v46 = vld [vmem:[%s26125_s1 + $0x10ec] ss:$16 sps:$4 sm:$0xff]  }
 0x334   :  { %11533 = vmatpush2.bf16.msra.mxu1 %v17492_v28  ;;  %v10587_v54 = vpop.f32.mrf.mxu0  ;;  %11421 = vmatprep.subr.bf16.mxu0 %v17497_v34  ;;  %v17507_v34 = vld [vmem:[%s26125_s1 + $0xd08] ss:$16 sps:$4 sm:$0xff]   ;;  %v17599_v32 = vld [vmem:[%s26125_s1 + $0x112c] ss:$16 sps:$4 sm:$0xff]  }
 0x335   :  { %26190 = vst [vmem:[#allocation25_spill] sm:$0xff] %v22867_v39  ;;  %v10700_v57 = vpop.f32.mrf.mxu1  ;;  %11534 = vmatprep.subr.bf16.mxu1 %v17500_v36  ;;  %v22879_v47 = vadd.f32 %v10698_v42, %v10586_v52  ;;  %v10588_v0 = vadd.f32 %v10587_v54, %v22507_v12  ;;  %11271 = vmatprep.mubr.bf16.mxu0 %v18181_v1  ;;  %v17510_v38 = vld [vmem:[%s26125_s1 + $0xf08] ss:$16 sps:$4 sm:$0xff]  }
 0x336   :  { %v10589_v4 = vpop.f32.mrf.mxu0  ;;  %11384 = vmatprep.mubr.bf16.mxu1 %v18182_v8  ;;  %v17513_v54 = vld [vmem:[%s26125_s1 + $0x10e8] ss:$16 sps:$4 sm:$0xff]   ;;  %v17521_v8 = vld [vmem:[%s26125_s1 + $0x10cc] ss:$16 sps:$4 sm:$0xff]  }
 0x337   :  { %26191 = vst [vmem:[#allocation26_spill] sm:$0xff] %v22879_v47  ;;  %v10702_v6 = vpop.f32.mrf.mxu1  ;;  %v22891_v17 = vadd.f32 %v10700_v57, %v10588_v0  ;;  %v10590_v12 = vadd.f32 %v10589_v4, %v22519_v55  ;;  %11422 = vmatpush2.bf16.msra.mxu0 %v17495_v49  ;;  %v1477_v57 = vsub.s32 3, %v19453_v29  ;;  %v18186_v0 = vld [vmem:[%s26126_s0 + $0x3c] ss:$144 sps:$4 sm:$0xff]   ;;  %v18187_v29 = vld [vmem:[%s26127_s2] sm:$0xf] }
 0x338   :  { %11535 = vmatpush2.bf16.msra.mxu1 %v17498_v53  ;;  %v10591_v18 = vpop.f32.mrf.mxu0  ;;  %11423 = vmatprep.subr.bf16.mxu0 %v17503_v58  ;;  %v18185_v53 = vld [vmem:[%s26126_s0 + $0x34] ss:$144 sps:$4 sm:$0xff]  }
 0x339   :  { %26192 = vst [vmem:[#allocation27_spill] sm:$0xff] %v22891_v17  ;;  %v10704_v19 = vpop.f32.mrf.mxu1  ;;  %11536 = vmatprep.subr.bf16.mxu1 %v17506_v61  ;;  %v22903_v22 = vadd.f32 %v10702_v6, %v10590_v12  ;;  %v10592_v55 = vadd.f32 %v10591_v18, %v22531_v63  ;;  %v22950_v6 = vrot.slane %v18187_v29, %v1473_v40  ;;  %v17530_v40 = vld [vmem:[%s26125_s1 + $0x12ac] ss:$16 sps:$4 sm:$0xff]  }
 0x33a   :  { %v10595_v27 = vpop.f32.mrf.mxu0  ;;  %11272 = vmatmul.mubr.bf16.gmra.mxu0 %v18183_v30 }
 0x33b   :  { %26193 = vst [vmem:[#allocation28_spill] sm:$0xff] %v22903_v22  ;;  %v10708_v28 = vpop.f32.mrf.mxu1  ;;  %11385 = vmatmul.mubr.bf16.gmra.mxu1 %v18184_v31  ;;  %v22915_v36 = vadd.f32 %v10704_v19, %v10592_v55  ;;  %v10596_v63 = vadd.f32 %v10595_v27, %v22543_v7  ;;  %11424 = vmatpush2.bf16.msra.mxu0 %v17501_v9  ;;  %v17518_v7 = vld [vmem:[%s26125_s1 + $0x12ec] ss:$16 sps:$4 sm:$0xff]  }
 0x33c   :  { %11537 = vmatpush2.bf16.msra.mxu1 %v17504_v16  ;;  %v10597_v42 = vpop.f32.mrf.mxu0  ;;  %11425 = vmatprep.subr.bf16.mxu0 %v17509_v20  ;;  %v22961_v19 = vrot.slane %v18187_v29, %v1477_v57  ;;  %v17519_v20 = vld [vmem:[%s26125_s1 + $0x10c8] ss:$16 sps:$4 sm:$0xff]   ;;  %v18191_v57 = vld [vmem:[%s26126_s0 + $0x15c] ss:$144 sps:$4 sm:$0xff]  }
 0x33d   :  { %26194 = vst [vmem:[#allocation29_spill] sm:$0xff] %v22915_v36  ;;  %v10710_v43 = vpop.f32.mrf.mxu1  ;;  %11538 = vmatprep.subr.bf16.mxu1 %v17512_v21  ;;  %v22928_v49 = vadd.f32 %v10708_v28, %v10596_v63  ;;  %v10598_v52 = vadd.f32 %v10597_v42, %v22555_v15  ;;  %11427 = vmatprep.mubr.bf16.mxu0 %v18185_v53  ;;  %v17516_v15 = vld [vmem:[%s26125_s1 + $0x12e8] ss:$16 sps:$4 sm:$0xff]   ;;  %v18188_v28 = vld [vmem:[%s26126_s0 + $0x30] ss:$144 sps:$4 sm:$0xff]  }
 0x33e   :  { %v10599_v58 = vpop.f32.mrf.mxu0  ;;  %11540 = vmatprep.mubr.bf16.mxu1 %v18186_v0  ;;  %v17522_v21 = vld [vmem:[%s26125_s1 + $0x12c8] ss:$16 sps:$4 sm:$0xff]   ;;  %v17536_v29 = vld [vmem:[%s26125_s1 + $0x128c] ss:$16 sps:$4 sm:$0xff]  }
 0x33f   :  { %26195 = vst [vmem:[#allocation30_spill] sm:$0xff] %v22928_v49  ;;  %v10712_v61 = vpop.f32.mrf.mxu1  ;;  %v22944_v1 = vadd.f32 %v10710_v43, %v10598_v52  ;;  %v10600_v4 = vadd.f32 %v10599_v58, %v22567_v23  ;;  %11426 = vmatpush2.bf16.msra.mxu0 %v17507_v34  ;;  %v17524_v23 = vld [vmem:[%s26125_s1 + $0x12cc] ss:$16 sps:$4 sm:$0xff]   ;;  %v17528_v52 = vld [vmem:[%s26125_s1 + $0x12a8] ss:$16 sps:$4 sm:$0xff]  }
 0x340   :  { %11539 = vmatpush2.bf16.msra.mxu1 %v17510_v38  ;;  %v10601_v9 = vpop.f32.mrf.mxu0  ;;  %11621 = vmatprep.subr.bf16.mxu0 %v17515_v46  ;;  %v17527_v38 = vld [vmem:[%s26125_s1 + $0x10ac] ss:$16 sps:$4 sm:$0xff]   ;;  %v18190_v46 = vld [vmem:[%s26126_s0 + $0x154] ss:$144 sps:$4 sm:$0xff]  }
 0x341   :  { %26196 = vst [vmem:[#allocation31_spill] sm:$0xff] %v22944_v1  ;;  %v10714_v12 = vpop.f32.mrf.mxu1  ;;  %11734 = vmatprep.subr.bf16.mxu1 %v17518_v7  ;;  %v22958_v16 = vadd.f32 %v10712_v61, %v10600_v4  ;;  %v10602_v18 = vadd.f32 %v10601_v9, %v22579_v33  ;;  %v18189_v33 = vld [vmem:[%s26126_s0 + $0x38] ss:$144 sps:$4 sm:$0xff]   ;;  %v17533_v4 = vld [vmem:[%s26125_s1 + $0x108c] ss:$16 sps:$4 sm:$0xff]  }
 0x342   :  { %v10751_v55 = vpop.f32.mrf.mxu0  ;;  %11428 = vmatmul.mubr.bf16.vlgmr.msra.gmra.mxu0 %v18188_v28  ;;  %v17525_v7 = vld [vmem:[%s26125_s1 + $0x10a8] ss:$16 sps:$4 sm:$0xff]   ;;  %v17587_v22 = vld [vmem:[%s26125_s1 + $0x116c] ss:$16 sps:$4 sm:$0xff]  }
 0x343   :  { %26197 = vst [vmem:[#allocation32_spill] sm:$0xff] %v22958_v16  ;;  %v10864_v27 = vpop.f32.mrf.mxu1  ;;  %11541 = vmatmul.mubr.bf16.vlgmr.msra.gmra.mxu1 %v18189_v33  ;;  %v22975_v30 = vadd.f32 %v10714_v12, %v10602_v18  ;;  %v10752_v31 = vadd.f32 %v10751_v55, %v22950_v6  ;;  %11622 = vmatpush1.bf16.msra.mxu0 %v17513_v54  ;;  %v17531_v12 = vld [vmem:[%s26125_s1 + $0x1088] ss:$16 sps:$4 sm:$0xff]   ;;  %v17575_v16 = vld [vmem:[%s26125_s1 + $0x11ac] ss:$16 sps:$4 sm:$0xff]  }
 0x344   :  { %11735 = vmatpush1.bf16.msra.mxu1 %v17516_v15  ;;  %v10753_v34 = vpop.f32.mrf.mxu0  ;;  %11623 = vmatprep.subr.bf16.mxu0 %v17521_v8  ;;  %v18193_v55 = vld [vmem:[%s26126_s0 + $0x158] ss:$144 sps:$4 sm:$0xff]  }
 0x345   :  { %26198 = vst [vmem:[#allocation33_spill] sm:$0xff] %v22975_v30  ;;  %v10866_v63 = vpop.f32.mrf.mxu1  ;;  %11736 = vmatprep.subr.bf16.mxu1 %v17524_v23  ;;  %v22984_v42 = vadd.f32 %v10864_v27, %v10752_v31  ;;  %v10754_v43 = vadd.f32 %v10753_v34, %v22961_v19  ;;  %11437 = vmatprep.mubr.bf16.mxu0 %v18190_v46  ;;  %v17534_v23 = vld [vmem:[%s26125_s1 + $0x1288] ss:$16 sps:$4 sm:$0xff]   ;;  %v17539_v34 = vld [vmem:[%s26125_s1 + $0x106c] ss:$16 sps:$4 sm:$0xff]  }
 0x346   :  { %v10755_v53 = vpop.f32.mrf.mxu0  ;;  %11550 = vmatprep.mubr.bf16.mxu1 %v18191_v57  ;;  %v18195_v46 = vld [vmem:[%s26126_s0 + $0x27c] ss:$144 sps:$4 sm:$0xff]  }
 0x347   :  { %v10868_v54 = vpop.f32.mrf.mxu1  ;;  %v22999_v58 = vadd.f32 %v10866_v63, %v10754_v43  ;;  %v10756_v61 = vadd.f32 %v10755_v53, %v22950_v6  ;;  %11624 = vmatpush1.bf16.msra.mxu0 %v17519_v20  ;;  %v17542_v63 = vld [vmem:[%s26125_s1 + $0x126c] ss:$16 sps:$4 sm:$0xff]   ;;  %v18194_v43 = vld [vmem:[%s26126_s0 + $0x274] ss:$144 sps:$4 sm:$0xff]  }
 0x348   :  { %11737 = vmatpush1.bf16.msra.mxu1 %v17522_v21  ;;  %v10757_v0 = vpop.f32.mrf.mxu0  ;;  %11625 = vmatprep.subr.bf16.mxu0 %v17527_v38  ;;  %v18192_v21 = vld [vmem:[%s26126_s0 + $0x150] ss:$144 sps:$4 sm:$0xff]  }
 0x349   :  { %v10870_v15 = vpop.f32.mrf.mxu1  ;;  %11738 = vmatprep.subr.bf16.mxu1 %v17530_v40  ;;  %v23008_v8 = vadd.f32 %v10868_v54, %v10756_v61  ;;  %v10758_v9 = vadd.f32 %v10757_v0, %v22961_v19 }
 0x34a   :  { %v10761_v18 = vpop.f32.mrf.mxu0  ;;  %11438 = vmatmul.mubr.bf16.gmra.mxu0 %v18192_v21 }
 0x34b   :  { %v10874_v20 = vpop.f32.mrf.mxu1  ;;  %11551 = vmatmul.mubr.bf16.gmra.mxu1 %v18193_v55  ;;  %v23023_v27 = vadd.f32 %v10870_v15, %v10758_v9  ;;  %v10762_v28 = vadd.f32 %v10761_v18, %v22950_v6  ;;  %11626 = vmatpush1.bf16.msra.mxu0 %v17525_v7  ;;  %v17537_v7 = vld [vmem:[%s26125_s1 + $0x1068] ss:$16 sps:$4 sm:$0xff]   ;;  %v18196_v55 = vld [vmem:[%s26126_s0 + $0x270] ss:$144 sps:$4 sm:$0xff]  }
 0x34c   :  { %11739 = vmatpush1.bf16.msra.mxu1 %v17528_v52  ;;  %v10763_v33 = vpop.f32.mrf.mxu0  ;;  %11627 = vmatprep.subr.bf16.mxu0 %v17533_v4  ;;  %v17540_v52 = vld [vmem:[%s26125_s1 + $0x1268] ss:$16 sps:$4 sm:$0xff]   ;;  %v17545_v4 = vld [vmem:[%s26125_s1 + $0x104c] ss:$16 sps:$4 sm:$0xff]  }
 0x34d   :  { %v10876_v31 = vpop.f32.mrf.mxu1  ;;  %11740 = vmatprep.subr.bf16.mxu1 %v17536_v29  ;;  %v23032_v38 = vadd.f32 %v10874_v20, %v10762_v28  ;;  %v10764_v40 = vadd.f32 %v10763_v33, %v22961_v19  ;;  %11447 = vmatprep.mubr.bf16.mxu0 %v18194_v43  ;;  %v17548_v29 = vld [vmem:[%s26125_s1 + $0x124c] ss:$16 sps:$4 sm:$0xff]   ;;  %v18197_v28 = vld [vmem:[%s26126_s0 + $0x278] ss:$144 sps:$4 sm:$0xff]  }
 0x34e   :  { %11560 = vmatprep.mubr.bf16.mxu1 %v18195_v46  ;;  %v10765_v53 = vpop.f32.mrf.mxu0  ;;  %v17554_v43 = vld [vmem:[%s26125_s1 + $0x122c] ss:$16 sps:$4 sm:$0xff]  }
 0x34f   :  { %v10878_v54 = vpop.f32.mrf.mxu1  ;;  %v23047_v57 = vadd.f32 %v10876_v31, %v10764_v40  ;;  %v10766_v61 = vadd.f32 %v10765_v53, %v22950_v6  ;;  %11628 = vmatpush1.bf16.msra.mxu0 %v17531_v12  ;;  %v17543_v12 = vld [vmem:[%s26125_s1 + $0x1048] ss:$16 sps:$4 sm:$0xff]   ;;  %v17551_v40 = vld [vmem:[%s26125_s1 + $0x102c] ss:$16 sps:$4 sm:$0xff]  }
 0x350   :  { %11741 = vmatpush1.bf16.msra.mxu1 %v17534_v23  ;;  %v10767_v0 = vpop.f32.mrf.mxu0  ;;  %11629 = vmatprep.subr.bf16.mxu0 %v17539_v34  ;;  %v17546_v23 = vld [vmem:[%s26125_s1 + $0x1248] ss:$16 sps:$4 sm:$0xff]  }
 0x351   :  { %v10880_v15 = vpop.f32.mrf.mxu1  ;;  %11742 = vmatprep.subr.bf16.mxu1 %v17542_v63  ;;  %v23056_v9 = vadd.f32 %v10878_v54, %v10766_v61  ;;  %v10768_v18 = vadd.f32 %v10767_v0, %v22961_v19  ;;  %v17549_v54 = vld [vmem:[%s26125_s1 + $0x1028] ss:$16 sps:$4 sm:$0xff]  }
 0x352   :  { %v10771_v20 = vpop.f32.mrf.mxu0  ;;  %11448 = vmatmul.mubr.bf16.gmra.mxu0 %v18196_v55  ;;  %v17552_v61 = vld [vmem:[%s26125_s1 + $0x1228] ss:$16 sps:$4 sm:$0xff]   ;;  %v17560_v55 = vld [vmem:[%s26125_s1 + $0x120c] ss:$16 sps:$4 sm:$0xff]  }
 0x353   :  { %v10884_v21 = vpop.f32.mrf.mxu1  ;;  %11561 = vmatmul.mubr.bf16.gmra.mxu1 %v18197_v28  ;;  %v23071_v33 = vadd.f32 %v10880_v15, %v10768_v18  ;;  %v10772_v31 = vadd.f32 %v10771_v20, %v22950_v6  ;;  %11630 = vmatpush1.bf16.msra.mxu0 %v17537_v7  ;;  %v18198_v7 = vld [vmem:[%s26126_s0 + $0x394] ss:$144 sps:$4 sm:$0xff]  }
 0x354   :  { %11743 = vmatpush1.bf16.msra.mxu1 %v17540_v52  ;;  %v10773_v34 = vpop.f32.mrf.mxu0  ;;  %11631 = vmatprep.subr.bf16.mxu0 %v17545_v4  ;;  %v18199_v52 = vld [vmem:[%s26126_s0 + $0x39c] ss:$144 sps:$4 sm:$0xff]  }
 0x355   :  { %v10886_v63 = vpop.f32.mrf.mxu1  ;;  %11744 = vmatprep.subr.bf16.mxu1 %v17548_v29  ;;  %v23080_v46 = vadd.f32 %v10884_v21, %v10772_v31  ;;  %v10774_v53 = vadd.f32 %v10773_v34, %v22961_v19  ;;  %11457 = vmatprep.mubr.bf16.mxu0 %v18198_v7  ;;  %v17557_v21 = vld [vmem:[%s26125_s1 + $0x100c] ss:$16 sps:$4 sm:$0xff]  }
 0x356   :  { %11570 = vmatprep.mubr.bf16.mxu1 %v18199_v52  ;;  %v10775_v0 = vpop.f32.mrf.mxu0 }
 0x357   :  { %v10888_v15 = vpop.f32.mrf.mxu1  ;;  %v23095_v4 = vadd.f32 %v10886_v63, %v10774_v53  ;;  %v10776_v29 = vadd.f32 %v10775_v0, %v22950_v6  ;;  %11632 = vmatpush1.bf16.msra.mxu0 %v17543_v12  ;;  %v17555_v12 = vld [vmem:[%s26125_s1 + $0x1008] ss:$16 sps:$4 sm:$0xff]  }
 0x358   :  { %11745 = vmatpush1.bf16.msra.mxu1 %v17546_v23  ;;  %v10777_v18 = vpop.f32.mrf.mxu0  ;;  %11633 = vmatprep.subr.bf16.mxu0 %v17551_v40  ;;  %v17558_v23 = vld [vmem:[%s26125_s1 + $0x1208] ss:$16 sps:$4 sm:$0xff]   ;;  %v18200_v40 = vld [vmem:[%s26126_s0 + $0x390] ss:$144 sps:$4 sm:$0xff]  }
 0x359   :  { %v10890_v20 = vpop.f32.mrf.mxu1  ;;  %11746 = vmatprep.subr.bf16.mxu1 %v17554_v43  ;;  %v23104_v28 = vadd.f32 %v10888_v15, %v10776_v29  ;;  %v10778_v31 = vadd.f32 %v10777_v18, %v22961_v19  ;;  %v18201_v43 = vld [vmem:[%s26126_s0 + $0x398] ss:$144 sps:$4 sm:$0xff]   ;;  %v17563_v15 = vld [vmem:[%s26125_s1 + $0x11ec] ss:$16 sps:$4 sm:$0xff]  }
 0x35a   :  { %v10781_v34 = vpop.f32.mrf.mxu0  ;;  %11458 = vmatmul.mubr.bf16.gmra.mxu0 %v18200_v40  ;;  %v17566_v29 = vld [vmem:[%s26125_s1 + $0x13ec] ss:$16 sps:$4 sm:$0xff]  }
 0x35b   :  { %v10894_v63 = vpop.f32.mrf.mxu1  ;;  %11571 = vmatmul.mubr.bf16.gmra.mxu1 %v18201_v43  ;;  %v23119_v53 = vadd.f32 %v10890_v20, %v10778_v31  ;;  %v10782_v7 = vadd.f32 %v10781_v34, %v22950_v6  ;;  %11634 = vmatpush1.bf16.msra.mxu0 %v17549_v54  ;;  %v18202_v54 = vld [vmem:[%s26126_s0 + $0x4b4] ss:$144 sps:$4 sm:$0xff]  }
 0x35c   :  { %11747 = vmatpush1.bf16.msra.mxu1 %v17552_v61  ;;  %v10783_v52 = vpop.f32.mrf.mxu0  ;;  %11635 = vmatprep.subr.bf16.mxu0 %v17557_v21  ;;  %v18203_v61 = vld [vmem:[%s26126_s0 + $0x4bc] ss:$144 sps:$4 sm:$0xff]   ;;  %v17561_v21 = vld [vmem:[%s26125_s1 + $0x11e8] ss:$16 sps:$4 sm:$0xff]  }
 0x35d   :  { %v10896_v0 = vpop.f32.mrf.mxu1  ;;  %11748 = vmatprep.subr.bf16.mxu1 %v17560_v55  ;;  %v23128_v18 = vadd.f32 %v10894_v63, %v10782_v7  ;;  %v10784_v20 = vadd.f32 %v10783_v52, %v22961_v19  ;;  %11467 = vmatprep.mubr.bf16.mxu0 %v18202_v54  ;;  %v17564_v55 = vld [vmem:[%s26125_s1 + $0x13e8] ss:$16 sps:$4 sm:$0xff]   ;;  %v17569_v52 = vld [vmem:[%s26125_s1 + $0x11cc] ss:$16 sps:$4 sm:$0xff]  }
 0x35e   :  { %11580 = vmatprep.mubr.bf16.mxu1 %v18203_v61  ;;  %v10785_v31 = vpop.f32.mrf.mxu0  ;;  %v17572_v54 = vld [vmem:[%s26125_s1 + $0x13cc] ss:$16 sps:$4 sm:$0xff]  }
 0x35f   :  { %v10898_v34 = vpop.f32.mrf.mxu1  ;;  %v23143_v63 = vadd.f32 %v10896_v0, %v10784_v20  ;;  %v10786_v40 = vadd.f32 %v10785_v31, %v22950_v6  ;;  %11636 = vmatpush1.bf16.msra.mxu0 %v17555_v12  ;;  %v17567_v12 = vld [vmem:[%s26125_s1 + $0x11c8] ss:$16 sps:$4 sm:$0xff]   ;;  %v18204_v20 = vld [vmem:[%s26126_s0 + $0x4b0] ss:$144 sps:$4 sm:$0xff]  }
 0x360   :  { %11749 = vmatpush1.bf16.msra.mxu1 %v17558_v23  ;;  %v10787_v43 = vpop.f32.mrf.mxu0  ;;  %11637 = vmatprep.subr.bf16.mxu0 %v17563_v15  ;;  %v17570_v23 = vld [vmem:[%s26125_s1 + $0x13c8] ss:$16 sps:$4 sm:$0xff]  }
 0x361   :  { %v10900_v7 = vpop.f32.mrf.mxu1  ;;  %11750 = vmatprep.subr.bf16.mxu1 %v17566_v29  ;;  %v23152_v61 = vadd.f32 %v10898_v34, %v10786_v40  ;;  %v10788_v0 = vadd.f32 %v10787_v43, %v22961_v19  ;;  %v18205_v31 = vld [vmem:[%s26126_s0 + $0x4b8] ss:$144 sps:$4 sm:$0xff]  }
 0x362   :  { %v10791_v15 = vpop.f32.mrf.mxu0  ;;  %11468 = vmatmul.mubr.bf16.gmra.mxu0 %v18204_v20  ;;  %v17578_v20 = vld [vmem:[%s26125_s1 + $0x13ac] ss:$16 sps:$4 sm:$0xff]  }
 0x363   :  { %v10904_v29 = vpop.f32.mrf.mxu1  ;;  %11581 = vmatmul.mubr.bf16.gmra.mxu1 %v18205_v31  ;;  %v23167_v34 = vadd.f32 %v10900_v7, %v10788_v0  ;;  %v10792_v40 = vadd.f32 %v10791_v15, %v22950_v6  ;;  %11638 = vmatpush2.bf16.msra.mxu0 %v17561_v21  ;;  %v18206_v21 = vld [vmem:[%s26126_s0 + $0x5d4] ss:$144 sps:$4 sm:$0xff]  }
 0x364   :  { %11751 = vmatpush2.bf16.msra.mxu1 %v17564_v55  ;;  %v10793_v43 = vpop.f32.mrf.mxu0  ;;  %11639 = vmatprep.subr.bf16.mxu0 %v17569_v52  ;;  %v18207_v55 = vld [vmem:[%s26126_s0 + $0x5dc] ss:$144 sps:$4 sm:$0xff]   ;;  %v17573_v52 = vld [vmem:[%s26125_s1 + $0x11a8] ss:$16 sps:$4 sm:$0xff]  }
 0x365   :  { %v10906_v49 = vpop.f32.mrf.mxu1  ;;  %11752 = vmatprep.subr.bf16.mxu1 %v17572_v54  ;;  %v23176_v1 = vadd.f32 %v10904_v29, %v10792_v40  ;;  %v10794_v7 = vadd.f32 %v10793_v43, %v22961_v19  ;;  %11477 = vmatprep.mubr.bf16.mxu0 %v18206_v21  ;;  %v17576_v54 = vld [vmem:[%s26125_s1 + $0x13a8] ss:$16 sps:$4 sm:$0xff]   ;;  %v17581_v21 = vld [vmem:[%s26125_s1 + $0x118c] ss:$16 sps:$4 sm:$0xff]  }
 0x366   :  { %11590 = vmatprep.mubr.bf16.mxu1 %v18207_v55  ;;  %v10795_v0 = vpop.f32.mrf.mxu0  ;;  %v17584_v55 = vld [vmem:[%s26125_s1 + $0x138c] ss:$16 sps:$4 sm:$0xff]  }
 0x367   :  { %v10908_v15 = vpop.f32.mrf.mxu1  ;;  %v23191_v29 = vadd.f32 %v10906_v49, %v10794_v7  ;;  %v10796_v31 = vadd.f32 %v10795_v0, %v22950_v6  ;;  %11640 = vmatpush2.bf16.msra.mxu0 %v17567_v12  ;;  %v17579_v12 = vld [vmem:[%s26125_s1 + $0x1188] ss:$16 sps:$4 sm:$0xff]   ;;  %v18208_v7 = vld [vmem:[%s26126_s0 + $0x5d0] ss:$144 sps:$4 sm:$0xff]  }
 0x368   :  { %11753 = vmatpush2.bf16.msra.mxu1 %v17570_v23  ;;  %v10797_v40 = vpop.f32.mrf.mxu0  ;;  %11641 = vmatprep.subr.bf16.mxu0 %v17575_v16  ;;  %v17582_v16 = vld [vmem:[%s26125_s1 + $0x1388] ss:$16 sps:$4 sm:$0xff]  }
 0x369   :  { %v10910_v43 = vpop.f32.mrf.mxu1  ;;  %11754 = vmatprep.subr.bf16.mxu1 %v17578_v20  ;;  %v23200_v47 = vadd.f32 %v10908_v15, %v10796_v31  ;;  %v10798_v49 = vadd.f32 %v10797_v40, %v22961_v19  ;;  %v18209_v0 = vld [vmem:[%s26126_s0 + $0x5d8] ss:$144 sps:$4 sm:$0xff]  }
 0x36a   :  { %v10801_v23 = vpop.f32.mrf.mxu0  ;;  %11478 = vmatmul.mubr.bf16.gmra.mxu0 %v18208_v7  ;;  %v17590_v7 = vld [vmem:[%s26125_s1 + $0x136c] ss:$16 sps:$4 sm:$0xff]  }
 0x36b   :  { %v10914_v20 = vpop.f32.mrf.mxu1  ;;  %11591 = vmatmul.mubr.bf16.gmra.mxu1 %v18209_v0  ;;  %v23215_v15 = vadd.f32 %v10910_v43, %v10798_v49  ;;  %v10802_v31 = vadd.f32 %v10801_v23, %v22950_v6  ;;  %11642 = vmatpush2.bf16.msra.mxu0 %v17573_v52  ;;  %v18210_v52 = vld [vmem:[%s26126_s0 + $0x6f4] ss:$144 sps:$4 sm:$0xff]  }
 0x36c   :  { %11755 = vmatpush2.bf16.msra.mxu1 %v17576_v54  ;;  %v10803_v40 = vpop.f32.mrf.mxu0  ;;  %11643 = vmatprep.subr.bf16.mxu0 %v17581_v21  ;;  %v18211_v54 = vld [vmem:[%s26126_s0 + $0x6fc] ss:$144 sps:$4 sm:$0xff]   ;;  %v17585_v21 = vld [vmem:[%s26125_s1 + $0x1168] ss:$16 sps:$4 sm:$0xff]  }
 0x36d   :  { %v10916_v30 = vpop.f32.mrf.mxu1  ;;  %11756 = vmatprep.subr.bf16.mxu1 %v17584_v55  ;;  %v23224_v17 = vadd.f32 %v10914_v20, %v10802_v31  ;;  %v10804_v43 = vadd.f32 %v10803_v40, %v22961_v19  ;;  %11487 = vmatprep.mubr.bf16.mxu0 %v18210_v52  ;;  %v17588_v55 = vld [vmem:[%s26125_s1 + $0x1368] ss:$16 sps:$4 sm:$0xff]   ;;  %v17593_v52 = vld [vmem:[%s26125_s1 + $0x114c] ss:$16 sps:$4 sm:$0xff]  }
 0x36e   :  { %11600 = vmatprep.mubr.bf16.mxu1 %v18211_v54  ;;  %v10805_v49 = vpop.f32.mrf.mxu0  ;;  %v17596_v54 = vld [vmem:[%s26125_s1 + $0x134c] ss:$16 sps:$4 sm:$0xff]  }
 0x36f   :  { %v10918_v23 = vpop.f32.mrf.mxu1  ;;  %v23239_v20 = vadd.f32 %v10916_v30, %v10804_v43  ;;  %v10806_v0 = vadd.f32 %v10805_v49, %v22950_v6  ;;  %11644 = vmatpush2.bf16.msra.mxu0 %v17579_v12  ;;  %v17591_v12 = vld [vmem:[%s26125_s1 + $0x1148] ss:$16 sps:$4 sm:$0xff]   ;;  %v18212_v43 = vld [vmem:[%s26126_s0 + $0x6f0] ss:$144 sps:$4 sm:$0xff]  }
 0x370   :  { %11757 = vmatpush2.bf16.msra.mxu1 %v17582_v16  ;;  %v10807_v31 = vpop.f32.mrf.mxu0  ;;  %11645 = vmatprep.subr.bf16.mxu0 %v17587_v22  ;;  %v17594_v22 = vld [vmem:[%s26125_s1 + $0x1348] ss:$16 sps:$4 sm:$0xff]  }
 0x371   :  { %v10920_v40 = vpop.f32.mrf.mxu1  ;;  %11758 = vmatprep.subr.bf16.mxu1 %v17590_v7  ;;  %v23248_v44 = vadd.f32 %v10918_v23, %v10806_v0  ;;  %v10808_v30 = vadd.f32 %v10807_v31, %v22961_v19  ;;  %v18213_v49 = vld [vmem:[%s26126_s0 + $0x6f8] ss:$144 sps:$4 sm:$0xff]  }
 0x372   :  { %v10811_v16 = vpop.f32.mrf.mxu0  ;;  %11488 = vmatmul.mubr.bf16.gmra.mxu0 %v18212_v43  ;;  %v17602_v43 = vld [vmem:[%s26125_s1 + $0x132c] ss:$16 sps:$4 sm:$0xff]  }
 0x373   :  { %v10924_v7 = vpop.f32.mrf.mxu1  ;;  %11601 = vmatmul.mubr.bf16.gmra.mxu1 %v18213_v49  ;;  %v23263_v23 = vadd.f32 %v10920_v40, %v10808_v30  ;;  %v10812_v0 = vadd.f32 %v10811_v16, %v22950_v6  ;;  %11646 = vmatpush2.bf16.msra.mxu0 %v17585_v21  ;;  %v18214_v21 = vld [vmem:[%s26126_s0 + $0x814] ss:$144 sps:$4 sm:$0xff]  }
 0x374   :  { %11759 = vmatpush2.bf16.msra.mxu1 %v17588_v55  ;;  %v10813_v31 = vpop.f32.mrf.mxu0  ;;  %11647 = vmatprep.subr.bf16.mxu0 %v17593_v52  ;;  %v18215_v55 = vld [vmem:[%s26126_s0 + $0x81c] ss:$144 sps:$4 sm:$0xff]   ;;  %v17597_v52 = vld [vmem:[%s26125_s1 + $0x1128] ss:$16 sps:$4 sm:$0xff]  }
 0x375   :  { %v10926_v36 = vpop.f32.mrf.mxu1  ;;  %11760 = vmatprep.subr.bf16.mxu1 %v17596_v54  ;;  %v23272_v24 = vadd.f32 %v10924_v7, %v10812_v0  ;;  %v10814_v40 = vadd.f32 %v10813_v31, %v22961_v19  ;;  %11497 = vmatprep.mubr.bf16.mxu0 %v18214_v21  ;;  %v17600_v54 = vld [vmem:[%s26125_s1 + $0x1328] ss:$16 sps:$4 sm:$0xff]   ;;  %v17605_v21 = vld [vmem:[%s26125_s1 + $0x110c] ss:$16 sps:$4 sm:$0xff]  }
 0x376   :  { %11610 = vmatprep.mubr.bf16.mxu1 %v18215_v55  ;;  %v10815_v30 = vpop.f32.mrf.mxu0  ;;  %v17608_v55 = vld [vmem:[%s26125_s1 + $0x130c] ss:$16 sps:$4 sm:$0xff]  }
 0x377   :  { %v10928_v16 = vpop.f32.mrf.mxu1  ;;  %v23287_v7 = vadd.f32 %v10926_v36, %v10814_v40  ;;  %v10816_v49 = vadd.f32 %v10815_v30, %v22950_v6  ;;  %11648 = vmatpush2.bf16.msra.mxu0 %v17591_v12  ;;  %v17603_v12 = vld [vmem:[%s26125_s1 + $0x1108] ss:$16 sps:$4 sm:$0xff]   ;;  %v18216_v40 = vld [vmem:[%s26126_s0 + $0x810] ss:$144 sps:$4 sm:$0xff]  }
 0x378   :  { %11761 = vmatpush2.bf16.msra.mxu1 %v17594_v22  ;;  %v10817_v0 = vpop.f32.mrf.mxu0  ;;  %11649 = vmatprep.subr.bf16.mxu0 %v17599_v32  ;;  %v17606_v32 = vld [vmem:[%s26125_s1 + $0x1308] ss:$16 sps:$4 sm:$0xff]  }
 0x379   :  { %v10930_v31 = vpop.f32.mrf.mxu1  ;;  %11762 = vmatprep.subr.bf16.mxu1 %v17602_v43  ;;  %v23296_v48 = vadd.f32 %v10928_v16, %v10816_v49  ;;  %v10818_v36 = vadd.f32 %v10817_v0, %v22961_v19  ;;  %v18217_v30 = vld [vmem:[%s26126_s0 + $0x818] ss:$144 sps:$4 sm:$0xff]  }
 0x37a   :  { %v10821_v22 = vpop.f32.mrf.mxu0  ;;  %11498 = vmatmul.mubr.bf16.gmra.mxu0 %v18216_v40  ;;  %v17614_v40 = vld [vmem:[%s26125_s1 + $0x16ec] ss:$16 sps:$4 sm:$0xff]  }
 0x37b   :  { %v10934_v43 = vpop.f32.mrf.mxu1  ;;  %11611 = vmatmul.mubr.bf16.gmra.mxu1 %v18217_v30  ;;  %v23311_v16 = vadd.f32 %v10930_v31, %v10818_v36  ;;  %v10822_v49 = vadd.f32 %v10821_v22, %v22950_v6  ;;  %11650 = vmatpush2.bf16.msra.mxu0 %v17597_v52  ;;  %v18218_v52 = vld [vmem:[%s26126_s0 + $0x44] ss:$144 sps:$4 sm:$0xff]  }
 0x37c   :  { %11763 = vmatpush2.bf16.msra.mxu1 %v17600_v54  ;;  %v10823_v0 = vpop.f32.mrf.mxu0  ;;  %11651 = vmatprep.subr.bf16.mxu0 %v17605_v21  ;;  %v18219_v54 = vld [vmem:[%s26126_s0 + $0x4c] ss:$144 sps:$4 sm:$0xff]   ;;  %v17609_v21 = vld [vmem:[%s26125_s1 + $0x14e8] ss:$16 sps:$4 sm:$0xff]  }
 0x37d   :  { %v10936_v39 = vpop.f32.mrf.mxu1  ;;  %11764 = vmatprep.subr.bf16.mxu1 %v17608_v55  ;;  %v23320_v60 = vadd.f32 %v10934_v43, %v10822_v49  ;;  %v10824_v31 = vadd.f32 %v10823_v0, %v22961_v19  ;;  %11653 = vmatprep.mubr.bf16.mxu0 %v18218_v52  ;;  %v17612_v55 = vld [vmem:[%s26125_s1 + $0x16e8] ss:$16 sps:$4 sm:$0xff]   ;;  %v17617_v52 = vld [vmem:[%s26125_s1 + $0x14cc] ss:$16 sps:$4 sm:$0xff]  }
 0x37e   :  { %11766 = vmatprep.mubr.bf16.mxu1 %v18219_v54  ;;  %v10825_v36 = vpop.f32.mrf.mxu0  ;;  %v17620_v54 = vld [vmem:[%s26125_s1 + $0x16cc] ss:$16 sps:$4 sm:$0xff]  }
 0x37f   :  { %v10938_v22 = vpop.f32.mrf.mxu1  ;;  %v23335_v43 = vadd.f32 %v10936_v39, %v10824_v31  ;;  %v10826_v30 = vadd.f32 %v10825_v36, %v22950_v6  ;;  %11652 = vmatpush2.bf16.msra.mxu0 %v17603_v12  ;;  %v17615_v6 = vld [vmem:[%s26125_s1 + $0x14c8] ss:$16 sps:$4 sm:$0xff]  }
 0x380   :  { %11765 = vmatpush2.bf16.msra.mxu1 %v17606_v32  ;;  %v10827_v49 = vpop.f32.mrf.mxu0  ;;  %11847 = vmatprep.subr.bf16.mxu0 %v17611_v3  ;;  %v17618_v3 = vld [vmem:[%s26125_s1 + $0x16c8] ss:$16 sps:$4 sm:$0xff]  }
 0x381   :  { %v10940_v0 = vpop.f32.mrf.mxu1  ;;  %11960 = vmatprep.subr.bf16.mxu1 %v17614_v40  ;;  %v23344_v37 = vadd.f32 %v10938_v22, %v10826_v30  ;;  %v10828_v39 = vadd.f32 %v10827_v49, %v22961_v19  ;;  %v18220_v40 = vld [vmem:[%s26126_s0 + $0x40] ss:$144 sps:$4 sm:$0xff]   ;;  %v18221_v31 = vld [vmem:[%s26126_s0 + $0x48] ss:$144 sps:$4 sm:$0xff]   ;;  %v17623_v49 = vld [vmem:[%s26125_s1 + $0x14ac] ss:$16 sps:$4 sm:$0xff]  }
 0x382   :  { %v10977_v12 = vpop.f32.mrf.mxu0  ;;  %11654 = vmatmul.mubr.bf16.vlgmr.msra.gmra.mxu0 %v18220_v40  ;;  %v17626_v40 = vld [vmem:[%s26125_s1 + $0x16ac] ss:$16 sps:$4 sm:$0xff]  }
 0x383   :  { %v11090_v32 = vpop.f32.mrf.mxu1  ;;  %11767 = vmatmul.mubr.bf16.vlgmr.msra.gmra.mxu1 %v18221_v31  ;;  %v23359_v19 = vadd.f32 %v10940_v0, %v10828_v39  ;;  %v10978_v36 = vadd.f32 %v10977_v12, %v22984_v42  ;;  %11848 = vmatpush1.bf16.msra.mxu0 %v17609_v21  ;;  %v18222_v42 = vld [vmem:[%s26126_s0 + $0x164] ss:$144 sps:$4 sm:$0xff]   ;;  %v18223_v21 = vld [vmem:[%s26126_s0 + $0x16c] ss:$144 sps:$4 sm:$0xff]  }
 0x384   :  { %11961 = vmatpush1.bf16.msra.mxu1 %v17612_v55  ;;  %v10979_v22 = vpop.f32.mrf.mxu0  ;;  %11849 = vmatprep.subr.bf16.mxu0 %v17617_v52  ;;  %v17621_v55 = vld [vmem:[%s26125_s1 + $0x14a8] ss:$16 sps:$4 sm:$0xff]  }
 0x385   :  { %v11092_v30 = vpop.f32.mrf.mxu1  ;;  %11962 = vmatprep.subr.bf16.mxu1 %v17620_v54  ;;  %v23368_v10 = vadd.f32 %v11090_v32, %v10978_v36  ;;  %v10980_v0 = vadd.f32 %v10979_v22, %v22999_v58  ;;  %11663 = vmatprep.mubr.bf16.mxu0 %v18222_v42  ;;  %v17624_v52 = vld [vmem:[%s26125_s1 + $0x16a8] ss:$16 sps:$4 sm:$0xff]   ;;  %v17629_v36 = vld [vmem:[%s26125_s1 + $0x148c] ss:$16 sps:$4 sm:$0xff]  }
 0x386   :  { %11776 = vmatprep.mubr.bf16.mxu1 %v18223_v21  ;;  %v10981_v54 = vpop.f32.mrf.mxu0  ;;  %v17632_v22 = vld [vmem:[%s26125_s1 + $0x168c] ss:$16 sps:$4 sm:$0xff]  }
 0x387   :  { %v11094_v58 = vpop.f32.mrf.mxu1  ;;  %v23383_v39 = vadd.f32 %v11092_v30, %v10980_v0  ;;  %v10982_v12 = vadd.f32 %v10981_v54, %v23008_v8  ;;  %11850 = vmatpush1.bf16.msra.mxu0 %v17615_v6  ;;  %v17627_v8 = vld [vmem:[%s26125_s1 + $0x1488] ss:$16 sps:$4 sm:$0xff]  }
 0x388   :  { %11963 = vmatpush1.bf16.msra.mxu1 %v17618_v3  ;;  %v10983_v32 = vpop.f32.mrf.mxu0  ;;  %11851 = vmatprep.subr.bf16.mxu0 %v17623_v49  ;;  %v17630_v6 = vld [vmem:[%s26125_s1 + $0x1688] ss:$16 sps:$4 sm:$0xff]  }
 0x389   :  { %v11096_v31 = vpop.f32.mrf.mxu1  ;;  %11964 = vmatprep.subr.bf16.mxu1 %v17626_v40  ;;  %v23392_v42 = vadd.f32 %v11094_v58, %v10982_v12  ;;  %v10984_v30 = vadd.f32 %v10983_v32, %v23023_v27  ;;  %v18224_v40 = vld [vmem:[%s26126_s0 + $0x160] ss:$144 sps:$4 sm:$0xff]   ;;  %v18225_v0 = vld [vmem:[%s26126_s0 + $0x168] ss:$144 sps:$4 sm:$0xff]   ;;  %v17635_v12 = vld [vmem:[%s26125_s1 + $0x146c] ss:$16 sps:$4 sm:$0xff]  }
 0x38a   :  { %v10987_v3 = vpop.f32.mrf.mxu0  ;;  %11664 = vmatmul.mubr.bf16.gmra.mxu0 %v18224_v40  ;;  %v17638_v32 = vld [vmem:[%s26125_s1 + $0x166c] ss:$16 sps:$4 sm:$0xff]  }
 0x38b   :  { %v11100_v49 = vpop.f32.mrf.mxu1  ;;  %11777 = vmatmul.mubr.bf16.gmra.mxu1 %v18225_v0  ;;  %v23407_v27 = vadd.f32 %v11096_v31, %v10984_v30  ;;  %v10988_v21 = vadd.f32 %v10987_v3, %v23032_v38  ;;  %11852 = vmatpush1.bf16.msra.mxu0 %v17621_v55  ;;  %v18226_v38 = vld [vmem:[%s26126_s0 + $0x284] ss:$144 sps:$4 sm:$0xff]   ;;  %v18227_v55 = vld [vmem:[%s26126_s0 + $0x28c] ss:$144 sps:$4 sm:$0xff]  }
 0x38c   :  { %11965 = vmatpush1.bf16.msra.mxu1 %v17624_v52  ;;  %v10989_v54 = vpop.f32.mrf.mxu0  ;;  %11853 = vmatprep.subr.bf16.mxu0 %v17629_v36  ;;  %v17633_v52 = vld [vmem:[%s26125_s1 + $0x1468] ss:$16 sps:$4 sm:$0xff]  }
 0x38d   :  { %v11102_v58 = vpop.f32.mrf.mxu1  ;;  %11966 = vmatprep.subr.bf16.mxu1 %v17632_v22  ;;  %v23416_v40 = vadd.f32 %v11100_v49, %v10988_v21  ;;  %v10990_v31 = vadd.f32 %v10989_v54, %v23047_v57  ;;  %11673 = vmatprep.mubr.bf16.mxu0 %v18226_v38  ;;  %v17636_v36 = vld [vmem:[%s26125_s1 + $0x1668] ss:$16 sps:$4 sm:$0xff]   ;;  %v17641_v21 = vld [vmem:[%s26125_s1 + $0x144c] ss:$16 sps:$4 sm:$0xff]  }
 0x38e   :  { %11786 = vmatprep.mubr.bf16.mxu1 %v18227_v55  ;;  %v10991_v22 = vpop.f32.mrf.mxu0  ;;  %v17644_v54 = vld [vmem:[%s26125_s1 + $0x164c] ss:$16 sps:$4 sm:$0xff]  }
 0x38f   :  { %v11104_v57 = vpop.f32.mrf.mxu1  ;;  %v23431_v30 = vadd.f32 %v11102_v58, %v10990_v31  ;;  %v10992_v3 = vadd.f32 %v10991_v22, %v23056_v9  ;;  %11854 = vmatpush1.bf16.msra.mxu0 %v17627_v8  ;;  %v17639_v9 = vld [vmem:[%s26125_s1 + $0x1448] ss:$16 sps:$4 sm:$0xff]  }
 0x390   :  { %11967 = vmatpush1.bf16.msra.mxu1 %v17630_v6  ;;  %v10993_v49 = vpop.f32.mrf.mxu0  ;;  %11855 = vmatprep.subr.bf16.mxu0 %v17635_v12  ;;  %v17642_v8 = vld [vmem:[%s26125_s1 + $0x1648] ss:$16 sps:$4 sm:$0xff]  }
 0x391   :  { %v11106_v0 = vpop.f32.mrf.mxu1  ;;  %11968 = vmatprep.subr.bf16.mxu1 %v17638_v32  ;;  %v23440_v38 = vadd.f32 %v11104_v57, %v10992_v3  ;;  %v10994_v58 = vadd.f32 %v10993_v49, %v23071_v33  ;;  %v18228_v32 = vld [vmem:[%s26126_s0 + $0x280] ss:$144 sps:$4 sm:$0xff]   ;;  %v18229_v31 = vld [vmem:[%s26126_s0 + $0x288] ss:$144 sps:$4 sm:$0xff]   ;;  %v17647_v3 = vld [vmem:[%s26125_s1 + $0x142c] ss:$16 sps:$4 sm:$0xff]  }
 0x392   :  { %v10997_v6 = vpop.f32.mrf.mxu0  ;;  %11674 = vmatmul.mubr.bf16.gmra.mxu0 %v18228_v32  ;;  %v17650_v49 = vld [vmem:[%s26125_s1 + $0x162c] ss:$16 sps:$4 sm:$0xff]  }
 0x393   :  { %v11110_v12 = vpop.f32.mrf.mxu1  ;;  %11787 = vmatmul.mubr.bf16.gmra.mxu1 %v18229_v31  ;;  %v23455_v33 = vadd.f32 %v11106_v0, %v10994_v58  ;;  %v10998_v55 = vadd.f32 %v10997_v6, %v23080_v46  ;;  %11856 = vmatpush1.bf16.msra.mxu0 %v17633_v52  ;;  %v18230_v46 = vld [vmem:[%s26126_s0 + $0x3a4] ss:$144 sps:$4 sm:$0xff]   ;;  %v18231_v52 = vld [vmem:[%s26126_s0 + $0x3ac] ss:$144 sps:$4 sm:$0xff]  }
 0x394   :  { %11969 = vmatpush1.bf16.msra.mxu1 %v17636_v36  ;;  %v10999_v22 = vpop.f32.mrf.mxu0  ;;  %11857 = vmatprep.subr.bf16.mxu0 %v17641_v21  ;;  %v17645_v36 = vld [vmem:[%s26125_s1 + $0x1428] ss:$16 sps:$4 sm:$0xff]  }
 0x395   :  { %v11112_v57 = vpop.f32.mrf.mxu1  ;;  %11970 = vmatprep.subr.bf16.mxu1 %v17644_v54  ;;  %v23464_v32 = vadd.f32 %v11110_v12, %v10998_v55  ;;  %v11000_v0 = vadd.f32 %v10999_v22, %v23095_v4  ;;  %11683 = vmatprep.mubr.bf16.mxu0 %v18230_v46  ;;  %v17648_v21 = vld [vmem:[%s26125_s1 + $0x1628] ss:$16 sps:$4 sm:$0xff]   ;;  %v17653_v55 = vld [vmem:[%s26125_s1 + $0x140c] ss:$16 sps:$4 sm:$0xff]  }
 0x396   :  { %11796 = vmatprep.mubr.bf16.mxu1 %v18231_v52  ;;  %v11001_v54 = vpop.f32.mrf.mxu0  ;;  %v17656_v22 = vld [vmem:[%s26125_s1 + $0x160c] ss:$16 sps:$4 sm:$0xff]  }
 0x397   :  { %v11114_v4 = vpop.f32.mrf.mxu1  ;;  %v23479_v58 = vadd.f32 %v11112_v57, %v11000_v0  ;;  %v11002_v6 = vadd.f32 %v11001_v54, %v23104_v28  ;;  %11858 = vmatpush1.bf16.msra.mxu0 %v17639_v9  ;;  %v17651_v28 = vld [vmem:[%s26125_s1 + $0x1408] ss:$16 sps:$4 sm:$0xff]  }
 0x398   :  { %11971 = vmatpush1.bf16.msra.mxu1 %v17642_v8  ;;  %v11003_v12 = vpop.f32.mrf.mxu0  ;;  %11859 = vmatprep.subr.bf16.mxu0 %v17647_v3  ;;  %v17654_v9 = vld [vmem:[%s26125_s1 + $0x1608] ss:$16 sps:$4 sm:$0xff]  }
 0x399   :  { %v11116_v31 = vpop.f32.mrf.mxu1  ;;  %11972 = vmatprep.subr.bf16.mxu1 %v17650_v49  ;;  %v23488_v46 = vadd.f32 %v11114_v4, %v11002_v6  ;;  %v11004_v57 = vadd.f32 %v11003_v12, %v23119_v53  ;;  %v18232_v49 = vld [vmem:[%s26126_s0 + $0x3a0] ss:$144 sps:$4 sm:$0xff]   ;;  %v18233_v0 = vld [vmem:[%s26126_s0 + $0x3a8] ss:$144 sps:$4 sm:$0xff]   ;;  %v17659_v6 = vld [vmem:[%s26125_s1 + $0x15ec] ss:$16 sps:$4 sm:$0xff]  }
 0x39a   :  { %v11007_v8 = vpop.f32.mrf.mxu0  ;;  %11684 = vmatmul.mubr.bf16.gmra.mxu0 %v18232_v49  ;;  %v17662_v12 = vld [vmem:[%s26125_s1 + $0x17ec] ss:$16 sps:$4 sm:$0xff]  }
 0x39b   :  { %v11120_v3 = vpop.f32.mrf.mxu1  ;;  %11797 = vmatmul.mubr.bf16.gmra.mxu1 %v18233_v0  ;;  %v23503_v53 = vadd.f32 %v11116_v31, %v11004_v57  ;;  %v11008_v52 = vadd.f32 %v11007_v8, %v23128_v18  ;;  %11860 = vmatpush1.bf16.msra.mxu0 %v17645_v36  ;;  %v18234_v18 = vld [vmem:[%s26126_s0 + $0x4c4] ss:$144 sps:$4 sm:$0xff]   ;;  %v18235_v36 = vld [vmem:[%s26126_s0 + $0x4cc] ss:$144 sps:$4 sm:$0xff]   ;;  %v17660_v8 = vld [vmem:[%s26125_s1 + $0x17e8] ss:$16 sps:$4 sm:$0xff]  }
 0x39c   :  { %11973 = vmatpush1.bf16.msra.mxu1 %v17648_v21  ;;  %v11009_v54 = vpop.f32.mrf.mxu0  ;;  %11861 = vmatprep.subr.bf16.mxu0 %v17653_v55 }
 0x39d   :  { %v11122_v4 = vpop.f32.mrf.mxu1  ;;  %11974 = vmatprep.subr.bf16.mxu1 %v17656_v22  ;;  %v23512_v49 = vadd.f32 %v11120_v3, %v11008_v52  ;;  %v11010_v31 = vadd.f32 %v11009_v54, %v23143_v63  ;;  %11693 = vmatprep.mubr.bf16.mxu0 %v18234_v18  ;;  %v17657_v63 = vld [vmem:[%s26125_s1 + $0x15e8] ss:$16 sps:$4 sm:$0xff]   ;;  %v17665_v52 = vld [vmem:[%s26125_s1 + $0x15cc] ss:$16 sps:$4 sm:$0xff]  }
 0x39e   :  { %11806 = vmatprep.mubr.bf16.mxu1 %v18235_v36  ;;  %v11011_v21 = vpop.f32.mrf.mxu0  ;;  %v17666_v36 = vld [vmem:[%s26125_s1 + $0x17c8] ss:$16 sps:$4 sm:$0xff]  }
 0x39f   :  { %v11124_v55 = vpop.f32.mrf.mxu1  ;;  %v23521_v22 = vadd.f32 %v11122_v4, %v11010_v31  ;;  %v11012_v57 = vadd.f32 %v11011_v21, %v23152_v61  ;;  %11862 = vmatpush1.bf16.msra.mxu0 %v17651_v28  ;;  %v17668_v61 = vld [vmem:[%s26125_s1 + $0x17cc] ss:$16 sps:$4 sm:$0xff]   ;;  %v18236_v31 = vld [vmem:[%s26126_s0 + $0x4c0] ss:$144 sps:$4 sm:$0xff]  }
 0x3a0   :  { %11975 = vmatpush1.bf16.msra.mxu1 %v17654_v9  ;;  %v11013_v3 = vpop.f32.mrf.mxu0  ;;  %11863 = vmatprep.subr.bf16.mxu0 %v17659_v6  ;;  %v18237_v6 = vld [vmem:[%s26126_s0 + $0x4c8] ss:$144 sps:$4 sm:$0xff]  }
 0x3a1   :  { %v11126_v0 = vpop.f32.mrf.mxu1  ;;  %11976 = vmatprep.subr.bf16.mxu1 %v17662_v12  ;;  %v23536_v28 = vadd.f32 %v11124_v55, %v11012_v57  ;;  %v11014_v9 = vadd.f32 %v11013_v3, %v23167_v34  ;;  %v17663_v34 = vld [vmem:[%s26125_s1 + $0x15c8] ss:$16 sps:$4 sm:$0xff]   ;;  %v17671_v57 = vld [vmem:[%s26125_s1 + $0x15ac] ss:$16 sps:$4 sm:$0xff]   ;;  %v18238_v3 = vld [vmem:[%s26126_s0 + $0x5e4] ss:$144 sps:$4 sm:$0xff]  }
 0x3a2   :  { %v11017_v54 = vpop.f32.mrf.mxu0  ;;  %11694 = vmatmul.mubr.bf16.gmra.mxu0 %v18236_v31 }
 0x3a3   :  { %v11130_v4 = vpop.f32.mrf.mxu1  ;;  %11807 = vmatmul.mubr.bf16.gmra.mxu1 %v18237_v6  ;;  %v23545_v12 = vadd.f32 %v11126_v0, %v11014_v9  ;;  %v11018_v18 = vadd.f32 %v11017_v54, %v23176_v1  ;;  %11864 = vmatpush2.bf16.msra.mxu0 %v17657_v63  ;;  %v17674_v1 = vld [vmem:[%s26125_s1 + $0x17ac] ss:$16 sps:$4 sm:$0xff]  }
 0x3a4   :  { %11977 = vmatpush2.bf16.msra.mxu1 %v17660_v8  ;;  %v11019_v21 = vpop.f32.mrf.mxu0  ;;  %11865 = vmatprep.subr.bf16.mxu0 %v17665_v52  ;;  %v18239_v0 = vld [vmem:[%s26126_s0 + $0x5ec] ss:$144 sps:$4 sm:$0xff]  }
 0x3a5   :  { %v11132_v55 = vpop.f32.mrf.mxu1  ;;  %11978 = vmatprep.subr.bf16.mxu1 %v17668_v61  ;;  %v23560_v63 = vadd.f32 %v11130_v4, %v11018_v18  ;;  %v11020_v8 = vadd.f32 %v11019_v21, %v23191_v29  ;;  %11703 = vmatprep.mubr.bf16.mxu0 %v18238_v3  ;;  %v17669_v29 = vld [vmem:[%s26125_s1 + $0x15a8] ss:$16 sps:$4 sm:$0xff]   ;;  %v17677_v18 = vld [vmem:[%s26125_s1 + $0x158c] ss:$16 sps:$4 sm:$0xff]  }
 0x3a6   :  { %11816 = vmatprep.mubr.bf16.mxu1 %v18239_v0  ;;  %v11021_v52 = vpop.f32.mrf.mxu0  ;;  %v17672_v4 = vld [vmem:[%s26125_s1 + $0x17a8] ss:$16 sps:$4 sm:$0xff]  }
 0x3a7   :  { %v11134_v61 = vpop.f32.mrf.mxu1  ;;  %v23569_v9 = vadd.f32 %v11132_v55, %v11020_v8  ;;  %v11022_v54 = vadd.f32 %v11021_v52, %v23200_v47  ;;  %11866 = vmatpush2.bf16.msra.mxu0 %v17663_v34  ;;  %v17680_v47 = vld [vmem:[%s26125_s1 + $0x178c] ss:$16 sps:$4 sm:$0xff]   ;;  %v18240_v8 = vld [vmem:[%s26126_s0 + $0x5e0] ss:$144 sps:$4 sm:$0xff]   ;;  %v17678_v0 = vld [vmem:[%s26125_s1 + $0x1788] ss:$16 sps:$4 sm:$0xff]  }
 0x3a8   :  { %11979 = vmatpush2.bf16.msra.mxu1 %v17666_v36  ;;  %v11023_v31 = vpop.f32.mrf.mxu0  ;;  %11867 = vmatprep.subr.bf16.mxu0 %v17671_v57  ;;  %v18241_v57 = vld [vmem:[%s26126_s0 + $0x5e8] ss:$144 sps:$4 sm:$0xff]  }
 0x3a9   :  { %v11136_v6 = vpop.f32.mrf.mxu1  ;;  %11980 = vmatprep.subr.bf16.mxu1 %v17674_v1  ;;  %v23584_v34 = vadd.f32 %v11134_v61, %v11022_v54  ;;  %v11024_v36 = vadd.f32 %v11023_v31, %v23215_v15  ;;  %v17675_v15 = vld [vmem:[%s26125_s1 + $0x1588] ss:$16 sps:$4 sm:$0xff]   ;;  %v17683_v54 = vld [vmem:[%s26125_s1 + $0x156c] ss:$16 sps:$4 sm:$0xff]   ;;  %v18242_v31 = vld [vmem:[%s26126_s0 + $0x704] ss:$144 sps:$4 sm:$0xff]  }
 0x3aa   :  { %v11027_v21 = vpop.f32.mrf.mxu0  ;;  %11704 = vmatmul.mubr.bf16.gmra.mxu0 %v18240_v8 }
 0x3ab   :  { %v11140_v55 = vpop.f32.mrf.mxu1  ;;  %11817 = vmatmul.mubr.bf16.gmra.mxu1 %v18241_v57  ;;  %v23593_v1 = vadd.f32 %v11136_v6, %v11024_v36  ;;  %v11028_v3 = vadd.f32 %v11027_v21, %v23224_v17  ;;  %11868 = vmatpush2.bf16.msra.mxu0 %v17669_v29  ;;  %v17686_v17 = vld [vmem:[%s26125_s1 + $0x176c] ss:$16 sps:$4 sm:$0xff]  }
 0x3ac   :  { %11981 = vmatpush2.bf16.msra.mxu1 %v17672_v4  ;;  %v11029_v52 = vpop.f32.mrf.mxu0  ;;  %11869 = vmatprep.subr.bf16.mxu0 %v17677_v18  ;;  %v18243_v6 = vld [vmem:[%s26126_s0 + $0x70c] ss:$144 sps:$4 sm:$0xff]  }
 0x3ad   :  { %v11142_v61 = vpop.f32.mrf.mxu1  ;;  %11982 = vmatprep.subr.bf16.mxu1 %v17680_v47  ;;  %v23608_v29 = vadd.f32 %v11140_v55, %v11028_v3  ;;  %v11030_v4 = vadd.f32 %v11029_v52, %v23239_v20  ;;  %11713 = vmatprep.mubr.bf16.mxu0 %v18242_v31  ;;  %v17681_v20 = vld [vmem:[%s26125_s1 + $0x1568] ss:$16 sps:$4 sm:$0xff]   ;;  %v17689_v3 = vld [vmem:[%s26125_s1 + $0x154c] ss:$16 sps:$4 sm:$0xff]  }
 0x3ae   :  { %11826 = vmatprep.mubr.bf16.mxu1 %v18243_v6  ;;  %v11031_v18 = vpop.f32.mrf.mxu0  ;;  %v17684_v55 = vld [vmem:[%s26125_s1 + $0x1768] ss:$16 sps:$4 sm:$0xff]  }
 0x3af   :  { %v11144_v47 = vpop.f32.mrf.mxu1  ;;  %v23617_v36 = vadd.f32 %v11142_v61, %v11030_v4  ;;  %v11032_v21 = vadd.f32 %v11031_v18, %v23248_v44  ;;  %11870 = vmatpush2.bf16.msra.mxu0 %v17675_v15  ;;  %v17692_v44 = vld [vmem:[%s26125_s1 + $0x174c] ss:$16 sps:$4 sm:$0xff]   ;;  %v18244_v4 = vld [vmem:[%s26126_s0 + $0x700] ss:$144 sps:$4 sm:$0xff]   ;;  %v17690_v6 = vld [vmem:[%s26125_s1 + $0x1748] ss:$16 sps:$4 sm:$0xff]  }
 0x3b0   :  { %11983 = vmatpush2.bf16.msra.mxu1 %v17678_v0  ;;  %v11033_v8 = vpop.f32.mrf.mxu0  ;;  %11871 = vmatprep.subr.bf16.mxu0 %v17683_v54  ;;  %v18245_v54 = vld [vmem:[%s26126_s0 + $0x708] ss:$144 sps:$4 sm:$0xff]  }
 0x3b1   :  { %v11146_v57 = vpop.f32.mrf.mxu1  ;;  %11984 = vmatprep.subr.bf16.mxu1 %v17686_v17  ;;  %v23632_v15 = vadd.f32 %v11144_v47, %v11032_v21  ;;  %v11034_v0 = vadd.f32 %v11033_v8, %v23263_v23  ;;  %v17687_v23 = vld [vmem:[%s26125_s1 + $0x1548] ss:$16 sps:$4 sm:$0xff]   ;;  %v17695_v21 = vld [vmem:[%s26125_s1 + $0x152c] ss:$16 sps:$4 sm:$0xff]   ;;  %v18246_v8 = vld [vmem:[%s26126_s0 + $0x824] ss:$144 sps:$4 sm:$0xff]  }
 0x3b2   :  { %v11037_v52 = vpop.f32.mrf.mxu0  ;;  %11714 = vmatmul.mubr.bf16.gmra.mxu0 %v18244_v4 }
 0x3b3   :  { %v11150_v61 = vpop.f32.mrf.mxu1  ;;  %11827 = vmatmul.mubr.bf16.gmra.mxu1 %v18245_v54  ;;  %v23641_v17 = vadd.f32 %v11146_v57, %v11034_v0  ;;  %v11038_v31 = vadd.f32 %v11037_v52, %v23272_v24  ;;  %11872 = vmatpush2.bf16.msra.mxu0 %v17681_v20  ;;  %v17698_v24 = vld [vmem:[%s26125_s1 + $0x172c] ss:$16 sps:$4 sm:$0xff]  }
 0x3b4   :  { %11985 = vmatpush2.bf16.msra.mxu1 %v17684_v55  ;;  %v11039_v18 = vpop.f32.mrf.mxu0  ;;  %11873 = vmatprep.subr.bf16.mxu0 %v17689_v3  ;;  %v18247_v57 = vld [vmem:[%s26126_s0 + $0x82c] ss:$144 sps:$4 sm:$0xff]  }
 0x3b5   :  { %v11152_v47 = vpop.f32.mrf.mxu1  ;;  %11986 = vmatprep.subr.bf16.mxu1 %v17692_v44  ;;  %v23656_v20 = vadd.f32 %v11150_v61, %v11038_v31  ;;  %v11040_v55 = vadd.f32 %v11039_v18, %v23287_v7  ;;  %11723 = vmatprep.mubr.bf16.mxu0 %v18246_v8  ;;  %v17693_v7 = vld [vmem:[%s26125_s1 + $0x1528] ss:$16 sps:$4 sm:$0xff]   ;;  %v17701_v31 = vld [vmem:[%s26125_s1 + $0x150c] ss:$16 sps:$4 sm:$0xff]  }
 0x3b6   :  { %11836 = vmatprep.mubr.bf16.mxu1 %v18247_v57  ;;  %v11041_v3 = vpop.f32.mrf.mxu0  ;;  %v17696_v61 = vld [vmem:[%s26125_s1 + $0x1728] ss:$16 sps:$4 sm:$0xff]  }
 0x3b7   :  { %v11154_v44 = vpop.f32.mrf.mxu1  ;;  %v23665_v0 = vadd.f32 %v11152_v47, %v11040_v55  ;;  %v11042_v52 = vadd.f32 %v11041_v3, %v23296_v48  ;;  %11874 = vmatpush2.bf16.msra.mxu0 %v17687_v23  ;;  %v17704_v48 = vld [vmem:[%s26125_s1 + $0x170c] ss:$16 sps:$4 sm:$0xff]   ;;  %v18248_v55 = vld [vmem:[%s26126_s0 + $0x820] ss:$144 sps:$4 sm:$0xff]   ;;  %v17702_v57 = vld [vmem:[%s26125_s1 + $0x1708] ss:$16 sps:$4 sm:$0xff]  }
 0x3b8   :  { %11987 = vmatpush2.bf16.msra.mxu1 %v17690_v6  ;;  %v11043_v4 = vpop.f32.mrf.mxu0  ;;  %11875 = vmatprep.subr.bf16.mxu0 %v17695_v21  ;;  %v18249_v21 = vld [vmem:[%s26126_s0 + $0x828] ss:$144 sps:$4 sm:$0xff]  }
 0x3b9   :  { %v11156_v54 = vpop.f32.mrf.mxu1  ;;  %11988 = vmatprep.subr.bf16.mxu1 %v17698_v24  ;;  %v23680_v23 = vadd.f32 %v11154_v44, %v11042_v52  ;;  %v11044_v6 = vadd.f32 %v11043_v4, %v23311_v16  ;;  %v17699_v16 = vld [vmem:[%s26125_s1 + $0x1508] ss:$16 sps:$4 sm:$0xff]   ;;  %v17707_v52 = vld [vmem:[%s26125_s1 + $0x18ec] ss:$16 sps:$4 sm:$0xff]   ;;  %v18250_v4 = vld [vmem:[%s26126_s0 + $0x54] ss:$144 sps:$4 sm:$0xff]  }
 0x3ba   :  { %v11047_v18 = vpop.f32.mrf.mxu0  ;;  %11724 = vmatmul.mubr.bf16.gmra.mxu0 %v18248_v55 }
 0x3bb   :  { %v11160_v47 = vpop.f32.mrf.mxu1  ;;  %11837 = vmatmul.mubr.bf16.gmra.mxu1 %v18249_v21  ;;  %v23689_v24 = vadd.f32 %v11156_v54, %v11044_v6  ;;  %v11048_v8 = vadd.f32 %v11047_v18, %v23320_v60  ;;  %11876 = vmatpush2.bf16.msra.mxu0 %v17693_v7  ;;  %v17710_v60 = vld [vmem:[%s26125_s1 + $0x1aec] ss:$16 sps:$4 sm:$0xff]  }
 0x3bc   :  { %11989 = vmatpush2.bf16.msra.mxu1 %v17696_v61  ;;  %v11049_v3 = vpop.f32.mrf.mxu0  ;;  %11877 = vmatprep.subr.bf16.mxu0 %v17701_v31  ;;  %v18251_v54 = vld [vmem:[%s26126_s0 + $0x5c] ss:$144 sps:$4 sm:$0xff]  }
 0x3bd   :  { %v11162_v44 = vpop.f32.mrf.mxu1  ;;  %11990 = vmatprep.subr.bf16.mxu1 %v17704_v48  ;;  %v23704_v7 = vadd.f32 %v11160_v47, %v11048_v8  ;;  %v11050_v61 = vadd.f32 %v11049_v3, %v23335_v43  ;;  %11879 = vmatprep.mubr.bf16.mxu0 %v18250_v4  ;;  %v17705_v43 = vld [vmem:[%s26125_s1 + $0x18e8] ss:$16 sps:$4 sm:$0xff]   ;;  %v17713_v8 = vld [vmem:[%s26125_s1 + $0x18cc] ss:$16 sps:$4 sm:$0xff]  }
 0x3be   :  { %11992 = vmatprep.mubr.bf16.mxu1 %v18251_v54  ;;  %v11051_v31 = vpop.f32.mrf.mxu0  ;;  %v17708_v47 = vld [vmem:[%s26125_s1 + $0x1ae8] ss:$16 sps:$4 sm:$0xff]  }
 0x3bf   :  { %v11164_v48 = vpop.f32.mrf.mxu1  ;;  %v23713_v6 = vadd.f32 %v11162_v44, %v11050_v61  ;;  %v11052_v18 = vadd.f32 %v11051_v31, %v23344_v37  ;;  %11878 = vmatpush2.bf16.msra.mxu0 %v17699_v16  ;;  %v17716_v37 = vld [vmem:[%s26125_s1 + $0x1acc] ss:$16 sps:$4 sm:$0xff]   ;;  %v18252_v61 = vld [vmem:[%s26126_s0 + $0x50] ss:$144 sps:$4 sm:$0xff]   ;;  %v17714_v54 = vld [vmem:[%s26125_s1 + $0x1ac8] ss:$16 sps:$4 sm:$0xff]  }
 0x3c0   :  { %11991 = vmatpush2.bf16.msra.mxu1 %v17702_v57  ;;  %v11053_v55 = vpop.f32.mrf.mxu0  ;;  %12073 = vmatprep.subr.bf16.mxu0 %v17707_v52  ;;  %v18253_v52 = vld [vmem:[%s26126_s0 + $0x58] ss:$144 sps:$4 sm:$0xff]  }
 0x3c1   :  { %v11166_v21 = vpop.f32.mrf.mxu1  ;;  %12186 = vmatprep.subr.bf16.mxu1 %v17710_v60  ;;  %v23728_v16 = vadd.f32 %v11164_v48, %v11052_v18  ;;  %v11054_v57 = vadd.f32 %v11053_v55, %v23359_v19  ;;  %v17711_v19 = vld [vmem:[%s26125_s1 + $0x18c8] ss:$16 sps:$4 sm:$0xff]   ;;  %v17719_v18 = vld [vmem:[%s26125_s1 + $0x18ac] ss:$16 sps:$4 sm:$0xff]   ;;  %v18254_v55 = vld [vmem:[%s26126_s0 + $0x174] ss:$144 sps:$4 sm:$0xff]  }
 0x3c2   :  { %v11203_v3 = vpop.f32.mrf.mxu0  ;;  %11880 = vmatmul.mubr.bf16.vlgmr.msra.gmra.mxu0 %v18252_v61 }
 0x3c3   :  { %v11316_v44 = vpop.f32.mrf.mxu1  ;;  %11993 = vmatmul.mubr.bf16.vlgmr.msra.gmra.mxu1 %v18253_v52  ;;  %v23737_v60 = vadd.f32 %v11166_v21, %v11054_v57  ;;  %v11204_v4 = vadd.f32 %v11203_v3, %v23368_v10  ;;  %12074 = vmatpush1.bf16.msra.mxu0 %v17705_v43  ;;  %v17722_v10 = vld [vmem:[%s26125_s1 + $0x1aac] ss:$16 sps:$4 sm:$0xff]  }
 0x3c4   :  { %12187 = vmatpush1.bf16.msra.mxu1 %v17708_v47  ;;  %v11205_v31 = vpop.f32.mrf.mxu0  ;;  %12075 = vmatprep.subr.bf16.mxu0 %v17713_v8  ;;  %v18255_v21 = vld [vmem:[%s26126_s0 + $0x17c] ss:$144 sps:$4 sm:$0xff]  }
 0x3c5   :  { %v11318_v48 = vpop.f32.mrf.mxu1  ;;  %12188 = vmatprep.subr.bf16.mxu1 %v17716_v37  ;;  %v23752_v43 = vadd.f32 %v11316_v44, %v11204_v4  ;;  %v11206_v47 = vadd.f32 %v11205_v31, %v23383_v39  ;;  %11889 = vmatprep.mubr.bf16.mxu0 %v18254_v55  ;;  %v17717_v39 = vld [vmem:[%s26125_s1 + $0x18a8] ss:$16 sps:$4 sm:$0xff]   ;;  %v17725_v4 = vld [vmem:[%s26125_s1 + $0x188c] ss:$16 sps:$4 sm:$0xff]  }
 0x3c6   :  { %12002 = vmatprep.mubr.bf16.mxu1 %v18255_v21  ;;  %v11207_v8 = vpop.f32.mrf.mxu0  ;;  %v17720_v44 = vld [vmem:[%s26125_s1 + $0x1aa8] ss:$16 sps:$4 sm:$0xff]  }
 0x3c7   :  { %v11320_v37 = vpop.f32.mrf.mxu1  ;;  %v23761_v57 = vadd.f32 %v11318_v48, %v11206_v47  ;;  %v11208_v3 = vadd.f32 %v11207_v8, %v23392_v42  ;;  %12076 = vmatpush1.bf16.msra.mxu0 %v17711_v19  ;;  %v17728_v42 = vld [vmem:[%s26125_s1 + $0x1a8c] ss:$16 sps:$4 sm:$0xff]   ;;  %v18256_v47 = vld [vmem:[%s26126_s0 + $0x170] ss:$144 sps:$4 sm:$0xff]   ;;  %v17726_v21 = vld [vmem:[%s26125_s1 + $0x1a88] ss:$16 sps:$4 sm:$0xff]  }
 0x3c8   :  { %12189 = vmatpush1.bf16.msra.mxu1 %v17714_v54  ;;  %v11209_v61 = vpop.f32.mrf.mxu0  ;;  %12077 = vmatprep.subr.bf16.mxu0 %v17719_v18  ;;  %v18257_v18 = vld [vmem:[%s26126_s0 + $0x178] ss:$144 sps:$4 sm:$0xff]  }
 0x3c9   :  { %v11322_v52 = vpop.f32.mrf.mxu1  ;;  %12190 = vmatprep.subr.bf16.mxu1 %v17722_v10  ;;  %v23776_v19 = vadd.f32 %v11320_v37, %v11208_v3  ;;  %v11210_v54 = vadd.f32 %v11209_v61, %v23407_v27  ;;  %v17723_v27 = vld [vmem:[%s26125_s1 + $0x1888] ss:$16 sps:$4 sm:$0xff]   ;;  %v17731_v3 = vld [vmem:[%s26125_s1 + $0x186c] ss:$16 sps:$4 sm:$0xff]   ;;  %v18258_v61 = vld [vmem:[%s26126_s0 + $0x294] ss:$144 sps:$4 sm:$0xff]  }
 0x3ca   :  { %v11213_v31 = vpop.f32.mrf.mxu0  ;;  %11890 = vmatmul.mubr.bf16.gmra.mxu0 %v18256_v47 }
 0x3cb   :  { %v11326_v48 = vpop.f32.mrf.mxu1  ;;  %12003 = vmatmul.mubr.bf16.gmra.mxu1 %v18257_v18  ;;  %v23785_v10 = vadd.f32 %v11322_v52, %v11210_v54  ;;  %v11214_v55 = vadd.f32 %v11213_v31, %v23416_v40  ;;  %12078 = vmatpush1.bf16.msra.mxu0 %v17717_v39  ;;  %v17734_v40 = vld [vmem:[%s26125_s1 + $0x1a6c] ss:$16 sps:$4 sm:$0xff]  }
 0x3cc   :  { %12191 = vmatpush1.bf16.msra.mxu1 %v17720_v44  ;;  %v11215_v8 = vpop.f32.mrf.mxu0  ;;  %12079 = vmatprep.subr.bf16.mxu0 %v17725_v4  ;;  %v18259_v52 = vld [vmem:[%s26126_s0 + $0x29c] ss:$144 sps:$4 sm:$0xff]  }
 0x3cd   :  { %v11328_v37 = vpop.f32.mrf.mxu1  ;;  %12192 = vmatprep.subr.bf16.mxu1 %v17728_v42  ;;  %v23800_v39 = vadd.f32 %v11326_v48, %v11214_v55  ;;  %v11216_v44 = vadd.f32 %v11215_v8, %v23431_v30  ;;  %11899 = vmatprep.mubr.bf16.mxu0 %v18258_v61  ;;  %v17729_v30 = vld [vmem:[%s26125_s1 + $0x1868] ss:$16 sps:$4 sm:$0xff]   ;;  %v17737_v55 = vld [vmem:[%s26125_s1 + $0x184c] ss:$16 sps:$4 sm:$0xff]  }
 0x3ce   :  { %12012 = vmatprep.mubr.bf16.mxu1 %v18259_v52  ;;  %v11217_v4 = vpop.f32.mrf.mxu0  ;;  %v17732_v48 = vld [vmem:[%s26125_s1 + $0x1a68] ss:$16 sps:$4 sm:$0xff]  }
 0x3cf   :  { %v11330_v42 = vpop.f32.mrf.mxu1  ;;  %v23809_v54 = vadd.f32 %v11328_v37, %v11216_v44  ;;  %v11218_v31 = vadd.f32 %v11217_v4, %v23440_v38  ;;  %12080 = vmatpush1.bf16.msra.mxu0 %v17723_v27  ;;  %v17740_v38 = vld [vmem:[%s26125_s1 + $0x1a4c] ss:$16 sps:$4 sm:$0xff]   ;;  %v18260_v44 = vld [vmem:[%s26126_s0 + $0x290] ss:$144 sps:$4 sm:$0xff]   ;;  %v17738_v52 = vld [vmem:[%s26125_s1 + $0x1a48] ss:$16 sps:$4 sm:$0xff]  }
 0x3d0   :  { %12193 = vmatpush1.bf16.msra.mxu1 %v17726_v21  ;;  %v11219_v47 = vpop.f32.mrf.mxu0  ;;  %12081 = vmatprep.subr.bf16.mxu0 %v17731_v3  ;;  %v18261_v3 = vld [vmem:[%s26126_s0 + $0x298] ss:$144 sps:$4 sm:$0xff]  }
 0x3d1   :  { %v11332_v18 = vpop.f32.mrf.mxu1  ;;  %12194 = vmatprep.subr.bf16.mxu1 %v17734_v40  ;;  %v23824_v27 = vadd.f32 %v11330_v42, %v11218_v31  ;;  %v11220_v21 = vadd.f32 %v11219_v47, %v23455_v33  ;;  %v17735_v33 = vld [vmem:[%s26125_s1 + $0x1848] ss:$16 sps:$4 sm:$0xff]   ;;  %v17743_v31 = vld [vmem:[%s26125_s1 + $0x182c] ss:$16 sps:$4 sm:$0xff]   ;;  %v18262_v47 = vld [vmem:[%s26126_s0 + $0x3b4] ss:$144 sps:$4 sm:$0xff]  }
 0x3d2   :  { %v11223_v8 = vpop.f32.mrf.mxu0  ;;  %11900 = vmatmul.mubr.bf16.gmra.mxu0 %v18260_v44 }
 0x3d3   :  { %v11336_v37 = vpop.f32.mrf.mxu1  ;;  %12013 = vmatmul.mubr.bf16.gmra.mxu1 %v18261_v3  ;;  %v23833_v40 = vadd.f32 %v11332_v18, %v11220_v21  ;;  %v11224_v61 = vadd.f32 %v11223_v8, %v23464_v32  ;;  %12082 = vmatpush1.bf16.msra.mxu0 %v17729_v30  ;;  %v17746_v32 = vld [vmem:[%s26125_s1 + $0x1a2c] ss:$16 sps:$4 sm:$0xff]  }
 0x3d4   :  { %12195 = vmatpush1.bf16.msra.mxu1 %v17732_v48  ;;  %v11225_v4 = vpop.f32.mrf.mxu0  ;;  %12083 = vmatprep.subr.bf16.mxu0 %v17737_v55  ;;  %v18263_v18 = vld [vmem:[%s26126_s0 + $0x3bc] ss:$144 sps:$4 sm:$0xff]  }
 0x3d5   :  { %v11338_v42 = vpop.f32.mrf.mxu1  ;;  %12196 = vmatprep.subr.bf16.mxu1 %v17740_v38  ;;  %v23848_v30 = vadd.f32 %v11336_v37, %v11224_v61  ;;  %v11226_v48 = vadd.f32 %v11225_v4, %v23479_v58  ;;  %11909 = vmatprep.mubr.bf16.mxu0 %v18262_v47  ;;  %v17741_v58 = vld [vmem:[%s26125_s1 + $0x1828] ss:$16 sps:$4 sm:$0xff]   ;;  %v17749_v61 = vld [vmem:[%s26125_s1 + $0x180c] ss:$16 sps:$4 sm:$0xff]  }
 0x3d6   :  { %12022 = vmatprep.mubr.bf16.mxu1 %v18263_v18  ;;  %v11227_v55 = vpop.f32.mrf.mxu0  ;;  %v17744_v37 = vld [vmem:[%s26125_s1 + $0x1a28] ss:$16 sps:$4 sm:$0xff]  }
 0x3d7   :  { %v11340_v38 = vpop.f32.mrf.mxu1  ;;  %v23857_v21 = vadd.f32 %v11338_v42, %v11226_v48  ;;  %v11228_v8 = vadd.f32 %v11227_v55, %v23488_v46  ;;  %12084 = vmatpush1.bf16.msra.mxu0 %v17735_v33  ;;  %v17752_v46 = vld [vmem:[%s26125_s1 + $0x1a0c] ss:$16 sps:$4 sm:$0xff]   ;;  %v18264_v48 = vld [vmem:[%s26126_s0 + $0x3b0] ss:$144 sps:$4 sm:$0xff]   ;;  %v17750_v18 = vld [vmem:[%s26125_s1 + $0x1a08] ss:$16 sps:$4 sm:$0xff]  }
 0x3d8   :  { %12197 = vmatpush1.bf16.msra.mxu1 %v17738_v52  ;;  %v11229_v44 = vpop.f32.mrf.mxu0  ;;  %12085 = vmatprep.subr.bf16.mxu0 %v17743_v31  ;;  %v18265_v31 = vld [vmem:[%s26126_s0 + $0x3b8] ss:$144 sps:$4 sm:$0xff]  }
 0x3d9   :  { %v11342_v3 = vpop.f32.mrf.mxu1  ;;  %12198 = vmatprep.subr.bf16.mxu1 %v17746_v32  ;;  %v23872_v33 = vadd.f32 %v11340_v38, %v11228_v8  ;;  %v11230_v52 = vadd.f32 %v11229_v44, %v23503_v53  ;;  %v17747_v53 = vld [vmem:[%s26125_s1 + $0x1808] ss:$16 sps:$4 sm:$0xff]   ;;  %v17755_v8 = vld [vmem:[%s26125_s1 + $0x19ec] ss:$16 sps:$4 sm:$0xff]   ;;  %v18266_v44 = vld [vmem:[%s26126_s0 + $0x4d4] ss:$144 sps:$4 sm:$0xff]  }
 0x3da   :  { %v11233_v4 = vpop.f32.mrf.mxu0  ;;  %11910 = vmatmul.mubr.bf16.gmra.mxu0 %v18264_v48 }
 0x3db   :  { %v11346_v42 = vpop.f32.mrf.mxu1  ;;  %12023 = vmatmul.mubr.bf16.gmra.mxu1 %v18265_v31  ;;  %v23881_v32 = vadd.f32 %v11342_v3, %v11230_v52  ;;  %v11234_v47 = vadd.f32 %v11233_v4, %v23512_v49  ;;  %12086 = vmatpush1.bf16.msra.mxu0 %v17741_v58  ;;  %v17758_v49 = vld [vmem:[%s26125_s1 + $0x1bec] ss:$16 sps:$4 sm:$0xff]  }
 0x3dc   :  { %12199 = vmatpush1.bf16.msra.mxu1 %v17744_v37  ;;  %v11235_v55 = vpop.f32.mrf.mxu0  ;;  %12087 = vmatprep.subr.bf16.mxu0 %v17749_v61  ;;  %v18267_v3 = vld [vmem:[%s26126_s0 + $0x4dc] ss:$144 sps:$4 sm:$0xff]  }
 0x3dd   :  { %v11348_v38 = vpop.f32.mrf.mxu1  ;;  %12200 = vmatprep.subr.bf16.mxu1 %v17752_v46  ;;  %v23896_v58 = vadd.f32 %v11346_v42, %v11234_v47  ;;  %v11236_v37 = vadd.f32 %v11235_v55, %v23521_v22  ;;  %11919 = vmatprep.mubr.bf16.mxu0 %v18266_v44  ;;  %v17753_v22 = vld [vmem:[%s26125_s1 + $0x19e8] ss:$16 sps:$4 sm:$0xff]   ;;  %v17761_v47 = vld [vmem:[%s26125_s1 + $0x19cc] ss:$16 sps:$4 sm:$0xff]  }
 0x3de   :  { %12032 = vmatprep.mubr.bf16.mxu1 %v18267_v3  ;;  %v11237_v61 = vpop.f32.mrf.mxu0  ;;  %v17756_v42 = vld [vmem:[%s26125_s1 + $0x1be8] ss:$16 sps:$4 sm:$0xff]  }
 0x3df   :  { %v11350_v46 = vpop.f32.mrf.mxu1  ;;  %v23905_v52 = vadd.f32 %v11348_v38, %v11236_v37  ;;  %v11238_v4 = vadd.f32 %v11237_v61, %v23536_v28  ;;  %12088 = vmatpush1.bf16.msra.mxu0 %v17747_v53  ;;  %v17764_v28 = vld [vmem:[%s26125_s1 + $0x1bcc] ss:$16 sps:$4 sm:$0xff]   ;;  %v18268_v37 = vld [vmem:[%s26126_s0 + $0x4d0] ss:$144 sps:$4 sm:$0xff]   ;;  %v17762_v3 = vld [vmem:[%s26125_s1 + $0x1bc8] ss:$16 sps:$4 sm:$0xff]  }
 0x3e0   :  { %12201 = vmatpush1.bf16.msra.mxu1 %v17750_v18  ;;  %v11239_v48 = vpop.f32.mrf.mxu0  ;;  %12089 = vmatprep.subr.bf16.mxu0 %v17755_v8  ;;  %v18269_v8 = vld [vmem:[%s26126_s0 + $0x4d8] ss:$144 sps:$4 sm:$0xff]  }
 0x3e1   :  { %v11352_v31 = vpop.f32.mrf.mxu1  ;;  %12202 = vmatprep.subr.bf16.mxu1 %v17758_v49  ;;  %v23920_v53 = vadd.f32 %v11350_v46, %v11238_v4  ;;  %v11240_v18 = vadd.f32 %v11239_v48, %v23545_v12  ;;  %v17759_v12 = vld [vmem:[%s26125_s1 + $0x19c8] ss:$16 sps:$4 sm:$0xff]   ;;  %v17767_v4 = vld [vmem:[%s26125_s1 + $0x19ac] ss:$16 sps:$4 sm:$0xff]   ;;  %v18270_v48 = vld [vmem:[%s26126_s0 + $0x5f4] ss:$144 sps:$4 sm:$0xff]  }
 0x3e2   :  { %v11243_v55 = vpop.f32.mrf.mxu0  ;;  %11920 = vmatmul.mubr.bf16.gmra.mxu0 %v18268_v37 }
 0x3e3   :  { %v11356_v38 = vpop.f32.mrf.mxu1  ;;  %12033 = vmatmul.mubr.bf16.gmra.mxu1 %v18269_v8  ;;  %v23929_v49 = vadd.f32 %v11352_v31, %v11240_v18  ;;  %v11244_v44 = vadd.f32 %v11243_v55, %v23560_v63  ;;  %12090 = vmatpush2.bf16.msra.mxu0 %v17753_v22  ;;  %v17770_v63 = vld [vmem:[%s26125_s1 + $0x1bac] ss:$16 sps:$4 sm:$0xff]  }
 0x3e4   :  { %12203 = vmatpush2.bf16.msra.mxu1 %v17756_v42  ;;  %v11245_v61 = vpop.f32.mrf.mxu0  ;;  %12091 = vmatprep.subr.bf16.mxu0 %v17761_v47  ;;  %v18271_v31 = vld [vmem:[%s26126_s0 + $0x5fc] ss:$144 sps:$4 sm:$0xff]  }
 0x3e5   :  { %v11358_v46 = vpop.f32.mrf.mxu1  ;;  %12204 = vmatprep.subr.bf16.mxu1 %v17764_v28  ;;  %v23944_v22 = vadd.f32 %v11356_v38, %v11244_v44  ;;  %v11246_v42 = vadd.f32 %v11245_v61, %v23569_v9  ;;  %11929 = vmatprep.mubr.bf16.mxu0 %v18270_v48  ;;  %v17765_v9 = vld [vmem:[%s26125_s1 + $0x19a8] ss:$16 sps:$4 sm:$0xff]   ;;  %v17773_v44 = vld [vmem:[%s26125_s1 + $0x198c] ss:$16 sps:$4 sm:$0xff]  }
 0x3e6   :  { %12042 = vmatprep.mubr.bf16.mxu1 %v18271_v31  ;;  %v11247_v47 = vpop.f32.mrf.mxu0  ;;  %v17768_v38 = vld [vmem:[%s26125_s1 + $0x1ba8] ss:$16 sps:$4 sm:$0xff]  }
 0x3e7   :  { %v11360_v28 = vpop.f32.mrf.mxu1  ;;  %v23953_v18 = vadd.f32 %v11358_v46, %v11246_v42  ;;  %v11248_v55 = vadd.f32 %v11247_v47, %v23584_v34  ;;  %12092 = vmatpush2.bf16.msra.mxu0 %v17759_v12  ;;  %v17776_v34 = vld [vmem:[%s26125_s1 + $0x1b8c] ss:$16 sps:$4 sm:$0xff]   ;;  %v18272_v42 = vld [vmem:[%s26126_s0 + $0x5f0] ss:$144 sps:$4 sm:$0xff]   ;;  %v17774_v31 = vld [vmem:[%s26125_s1 + $0x1b88] ss:$16 sps:$4 sm:$0xff]  }
 0x3e8   :  { %12205 = vmatpush2.bf16.msra.mxu1 %v17762_v3  ;;  %v11249_v37 = vpop.f32.mrf.mxu0  ;;  %12093 = vmatprep.subr.bf16.mxu0 %v17767_v4  ;;  %v18273_v4 = vld [vmem:[%s26126_s0 + $0x5f8] ss:$144 sps:$4 sm:$0xff]  }
 0x3e9   :  { %v11362_v8 = vpop.f32.mrf.mxu1  ;;  %12206 = vmatprep.subr.bf16.mxu1 %v17770_v63  ;;  %v23968_v12 = vadd.f32 %v11360_v28, %v11248_v55  ;;  %v11250_v3 = vadd.f32 %v11249_v37, %v23593_v1  ;;  %v17771_v1 = vld [vmem:[%s26125_s1 + $0x1988] ss:$16 sps:$4 sm:$0xff]   ;;  %v17779_v55 = vld [vmem:[%s26125_s1 + $0x196c] ss:$16 sps:$4 sm:$0xff]   ;;  %v18274_v37 = vld [vmem:[%s26126_s0 + $0x714] ss:$144 sps:$4 sm:$0xff]  }
 0x3ea   :  { %v11253_v61 = vpop.f32.mrf.mxu0  ;;  %11930 = vmatmul.mubr.bf16.gmra.mxu0 %v18272_v42 }
 0x3eb   :  { %v11366_v46 = vpop.f32.mrf.mxu1  ;;  %12043 = vmatmul.mubr.bf16.gmra.mxu1 %v18273_v4  ;;  %v23977_v63 = vadd.f32 %v11362_v8, %v11250_v3  ;;  %v11254_v48 = vadd.f32 %v11253_v61, %v23608_v29  ;;  %12094 = vmatpush2.bf16.msra.mxu0 %v17765_v9  ;;  %v17782_v29 = vld [vmem:[%s26125_s1 + $0x1b6c] ss:$16 sps:$4 sm:$0xff]  }
 0x3ec   :  { %12207 = vmatpush2.bf16.msra.mxu1 %v17768_v38  ;;  %v11255_v47 = vpop.f32.mrf.mxu0  ;;  %12095 = vmatprep.subr.bf16.mxu0 %v17773_v44  ;;  %v18275_v8 = vld [vmem:[%s26126_s0 + $0x71c] ss:$144 sps:$4 sm:$0xff]  }
 0x3ed   :  { %v11368_v28 = vpop.f32.mrf.mxu1  ;;  %12208 = vmatprep.subr.bf16.mxu1 %v17776_v34  ;;  %v23992_v9 = vadd.f32 %v11366_v46, %v11254_v48  ;;  %v11256_v38 = vadd.f32 %v11255_v47, %v23617_v36  ;;  %11939 = vmatprep.mubr.bf16.mxu0 %v18274_v37  ;;  %v17777_v36 = vld [vmem:[%s26125_s1 + $0x1968] ss:$16 sps:$4 sm:$0xff]   ;;  %v17785_v48 = vld [vmem:[%s26125_s1 + $0x194c] ss:$16 sps:$4 sm:$0xff]  }
 0x3ee   :  { %12052 = vmatprep.mubr.bf16.mxu1 %v18275_v8  ;;  %v11257_v44 = vpop.f32.mrf.mxu0  ;;  %v17780_v46 = vld [vmem:[%s26125_s1 + $0x1b68] ss:$16 sps:$4 sm:$0xff]  }
 0x3ef   :  { %v11370_v34 = vpop.f32.mrf.mxu1  ;;  %v24001_v3 = vadd.f32 %v11368_v28, %v11256_v38  ;;  %v11258_v61 = vadd.f32 %v11257_v44, %v23632_v15  ;;  %12096 = vmatpush2.bf16.msra.mxu0 %v17771_v1  ;;  %v17788_v15 = vld [vmem:[%s26125_s1 + $0x1b4c] ss:$16 sps:$4 sm:$0xff]   ;;  %v18276_v38 = vld [vmem:[%s26126_s0 + $0x710] ss:$144 sps:$4 sm:$0xff]   ;;  %v17786_v8 = vld [vmem:[%s26125_s1 + $0x1b48] ss:$16 sps:$4 sm:$0xff]  }
 0x3f0   :  { %12209 = vmatpush2.bf16.msra.mxu1 %v17774_v31  ;;  %v11259_v42 = vpop.f32.mrf.mxu0  ;;  %12097 = vmatprep.subr.bf16.mxu0 %v17779_v55  ;;  %v18277_v55 = vld [vmem:[%s26126_s0 + $0x718] ss:$144 sps:$4 sm:$0xff]  }
 0x3f1   :  { %v11372_v4 = vpop.f32.mrf.mxu1  ;;  %12210 = vmatprep.subr.bf16.mxu1 %v17782_v29  ;;  %v24016_v1 = vadd.f32 %v11370_v34, %v11258_v61  ;;  %v11260_v31 = vadd.f32 %v11259_v42, %v23641_v17  ;;  %v17783_v17 = vld [vmem:[%s26125_s1 + $0x1948] ss:$16 sps:$4 sm:$0xff]   ;;  %v17791_v61 = vld [vmem:[%s26125_s1 + $0x192c] ss:$16 sps:$4 sm:$0xff]   ;;  %v18278_v42 = vld [vmem:[%s26126_s0 + $0x834] ss:$144 sps:$4 sm:$0xff]  }
 0x3f2   :  { %v11263_v47 = vpop.f32.mrf.mxu0  ;;  %11940 = vmatmul.mubr.bf16.gmra.mxu0 %v18276_v38 }
 0x3f3   :  { %v11376_v28 = vpop.f32.mrf.mxu1  ;;  %12053 = vmatmul.mubr.bf16.gmra.mxu1 %v18277_v55  ;;  %v24025_v29 = vadd.f32 %v11372_v4, %v11260_v31  ;;  %v11264_v37 = vadd.f32 %v11263_v47, %v23656_v20  ;;  %12098 = vmatpush2.bf16.msra.mxu0 %v17777_v36  ;;  %v17794_v20 = vld [vmem:[%s26125_s1 + $0x1b2c] ss:$16 sps:$4 sm:$0xff]  }
 0x3f4   :  { %12211 = vmatpush2.bf16.msra.mxu1 %v17780_v46  ;;  %v11265_v44 = vpop.f32.mrf.mxu0  ;;  %12099 = vmatprep.subr.bf16.mxu0 %v17785_v48  ;;  %v18279_v4 = vld [vmem:[%s26126_s0 + $0x83c] ss:$144 sps:$4 sm:$0xff]  }
 0x3f5   :  { %v11378_v34 = vpop.f32.mrf.mxu1  ;;  %12212 = vmatprep.subr.bf16.mxu1 %v17788_v15  ;;  %v24040_v36 = vadd.f32 %v11376_v28, %v11264_v37  ;;  %v11266_v46 = vadd.f32 %v11265_v44, %v23665_v0  ;;  %11949 = vmatprep.mubr.bf16.mxu0 %v18278_v42  ;;  %v17789_v0 = vld [vmem:[%s26125_s1 + $0x1928] ss:$16 sps:$4 sm:$0xff]   ;;  %v17797_v37 = vld [vmem:[%s26125_s1 + $0x190c] ss:$16 sps:$4 sm:$0xff]  }
 0x3f6   :  { %12062 = vmatprep.mubr.bf16.mxu1 %v18279_v4  ;;  %v11267_v48 = vpop.f32.mrf.mxu0  ;;  %v17792_v28 = vld [vmem:[%s26125_s1 + $0x1b28] ss:$16 sps:$4 sm:$0xff]  }
 0x3f7   :  { %v11380_v15 = vpop.f32.mrf.mxu1  ;;  %v24049_v31 = vadd.f32 %v11378_v34, %v11266_v46  ;;  %v11268_v47 = vadd.f32 %v11267_v48, %v23680_v23  ;;  %12100 = vmatpush2.bf16.msra.mxu0 %v17783_v17  ;;  %v17800_v23 = vld [vmem:[%s26125_s1 + $0x1b0c] ss:$16 sps:$4 sm:$0xff]   ;;  %v18280_v46 = vld [vmem:[%s26126_s0 + $0x830] ss:$144 sps:$4 sm:$0xff]   ;;  %v17798_v4 = vld [vmem:[%s26125_s1 + $0x1b08] ss:$16 sps:$4 sm:$0xff]  }
 0x3f8   :  { %12213 = vmatpush2.bf16.msra.mxu1 %v17786_v8  ;;  %v11269_v38 = vpop.f32.mrf.mxu0  ;;  %12101 = vmatprep.subr.bf16.mxu0 %v17791_v61  ;;  %v18281_v61 = vld [vmem:[%s26126_s0 + $0x838] ss:$144 sps:$4 sm:$0xff]  }
 0x3f9   :  { %v11382_v55 = vpop.f32.mrf.mxu1  ;;  %12214 = vmatprep.subr.bf16.mxu1 %v17794_v20  ;;  %v24064_v17 = vadd.f32 %v11380_v15, %v11268_v47  ;;  %v11270_v8 = vadd.f32 %v11269_v38, %v23689_v24  ;;  %v17795_v24 = vld [vmem:[%s26125_s1 + $0x1908] ss:$16 sps:$4 sm:$0xff]   ;;  %v17803_v47 = vld [vmem:[%s26125_s1 + $0x1cec] ss:$16 sps:$4 sm:$0xff]   ;;  %v18282_v38 = vld [vmem:[%s26126_s0 + $0x64] ss:$144 sps:$4 sm:$0xff]  }
 0x3fa   :  { %v11273_v44 = vpop.f32.mrf.mxu0  ;;  %11950 = vmatmul.mubr.bf16.gmra.mxu0 %v18280_v46 }
 0x3fb   :  { %v11386_v34 = vpop.f32.mrf.mxu1  ;;  %12063 = vmatmul.mubr.bf16.gmra.mxu1 %v18281_v61  ;;  %v24073_v20 = vadd.f32 %v11382_v55, %v11270_v8  ;;  %v11274_v42 = vadd.f32 %v11273_v44, %v23704_v7  ;;  %12102 = vmatpush2.bf16.msra.mxu0 %v17789_v0  ;;  %v17806_v7 = vld [vmem:[%s26125_s1 + $0x1eec] ss:$16 sps:$4 sm:$0xff]  }
 0x3fc   :  { %12215 = vmatpush2.bf16.msra.mxu1 %v17792_v28  ;;  %v11275_v48 = vpop.f32.mrf.mxu0  ;;  %12103 = vmatprep.subr.bf16.mxu0 %v17797_v37  ;;  %v18283_v55 = vld [vmem:[%s26126_s0 + $0x6c] ss:$144 sps:$4 sm:$0xff]  }
 0x3fd   :  { %v11388_v15 = vpop.f32.mrf.mxu1  ;;  %12216 = vmatprep.subr.bf16.mxu1 %v17800_v23  ;;  %v24088_v0 = vadd.f32 %v11386_v34, %v11274_v42  ;;  %v11276_v28 = vadd.f32 %v11275_v48, %v23713_v6  ;;  %12105 = vmatprep.mubr.bf16.mxu0 %v18282_v38  ;;  %v17801_v6 = vld [vmem:[%s26125_s1 + $0x1ce8] ss:$16 sps:$4 sm:$0xff]   ;;  %v17809_v42 = vld [vmem:[%s26125_s1 + $0x1ccc] ss:$16 sps:$4 sm:$0xff]  }
 0x3fe   :  { %12218 = vmatprep.mubr.bf16.mxu1 %v18283_v55  ;;  %v11277_v37 = vpop.f32.mrf.mxu0  ;;  %v17804_v34 = vld [vmem:[%s26125_s1 + $0x1ee8] ss:$16 sps:$4 sm:$0xff]  }
 0x3ff   :  { %v11390_v23 = vpop.f32.mrf.mxu1  ;;  %v24097_v8 = vadd.f32 %v11388_v15, %v11276_v28  ;;  %v11278_v44 = vadd.f32 %v11277_v37, %v23728_v16  ;;  %12104 = vmatpush2.bf16.msra.mxu0 %v17795_v24  ;;  %v17812_v16 = vld [vmem:[%s26125_s1 + $0x1ecc] ss:$16 sps:$4 sm:$0xff]   ;;  %v18284_v28 = vld [vmem:[%s26126_s0 + $0x60] ss:$144 sps:$4 sm:$0xff]   ;;  %v17810_v55 = vld [vmem:[%s26125_s1 + $0x1ec8] ss:$16 sps:$4 sm:$0xff]  }
 0x400   :  { %12217 = vmatpush2.bf16.msra.mxu1 %v17798_v4  ;;  %v11279_v46 = vpop.f32.mrf.mxu0  ;;  %12299 = vmatprep.subr.bf16.mxu0 %v17803_v47  ;;  %v18285_v47 = vld [vmem:[%s26126_s0 + $0x68] ss:$144 sps:$4 sm:$0xff]  }
 0x401   :  { %v11392_v61 = vpop.f32.mrf.mxu1  ;;  %12412 = vmatprep.subr.bf16.mxu1 %v17806_v7  ;;  %v24112_v24 = vadd.f32 %v11390_v23, %v11278_v44  ;;  %v11280_v4 = vadd.f32 %v11279_v46, %v23737_v60  ;;  %v17807_v60 = vld [vmem:[%s26125_s1 + $0x1cc8] ss:$16 sps:$4 sm:$0xff]   ;;  %v17815_v44 = vld [vmem:[%s26125_s1 + $0x1cac] ss:$16 sps:$4 sm:$0xff]   ;;  %v18286_v46 = vld [vmem:[%s26126_s0 + $0x184] ss:$144 sps:$4 sm:$0xff]  }
 0x402   :  { %v11429_v48 = vpop.f32.mrf.mxu0  ;;  %12106 = vmatmul.mubr.bf16.vlgmr.msra.gmra.mxu0 %v18284_v28 }
 0x403   :  { %v11542_v15 = vpop.f32.mrf.mxu1  ;;  %12219 = vmatmul.mubr.bf16.vlgmr.msra.gmra.mxu1 %v18285_v47  ;;  %v24121_v7 = vadd.f32 %v11392_v61, %v11280_v4  ;;  %v11430_v38 = vadd.f32 %v11429_v48, %v23752_v43  ;;  %12300 = vmatpush1.bf16.msra.mxu0 %v17801_v6  ;;  %v17818_v43 = vld [vmem:[%s26125_s1 + $0x1eac] ss:$16 sps:$4 sm:$0xff]  }
 0x404   :  { %12413 = vmatpush1.bf16.msra.mxu1 %v17804_v34  ;;  %v11431_v37 = vpop.f32.mrf.mxu0  ;;  %12301 = vmatprep.subr.bf16.mxu0 %v17809_v42  ;;  %v18287_v61 = vld [vmem:[%s26126_s0 + $0x18c] ss:$144 sps:$4 sm:$0xff]  }
 0x405   :  { %v11544_v23 = vpop.f32.mrf.mxu1  ;;  %12414 = vmatprep.subr.bf16.mxu1 %v17812_v16  ;;  %v24136_v6 = vadd.f32 %v11542_v15, %v11430_v38  ;;  %v11432_v34 = vadd.f32 %v11431_v37, %v23761_v57  ;;  %12115 = vmatprep.mubr.bf16.mxu0 %v18286_v46  ;;  %v17813_v57 = vld [vmem:[%s26125_s1 + $0x1ca8] ss:$16 sps:$4 sm:$0xff]   ;;  %v17821_v38 = vld [vmem:[%s26125_s1 + $0x1c8c] ss:$16 sps:$4 sm:$0xff]  }
 0x406   :  { %12228 = vmatprep.mubr.bf16.mxu1 %v18287_v61  ;;  %v11433_v42 = vpop.f32.mrf.mxu0  ;;  %v17816_v15 = vld [vmem:[%s26125_s1 + $0x1ea8] ss:$16 sps:$4 sm:$0xff]  }
 0x407   :  { %v11546_v16 = vpop.f32.mrf.mxu1  ;;  %v24145_v4 = vadd.f32 %v11544_v23, %v11432_v34  ;;  %v11434_v48 = vadd.f32 %v11433_v42, %v23776_v19  ;;  %12302 = vmatpush1.bf16.msra.mxu0 %v17807_v60  ;;  %v17824_v19 = vld [vmem:[%s26125_s1 + $0x1e8c] ss:$16 sps:$4 sm:$0xff]   ;;  %v18288_v34 = vld [vmem:[%s26126_s0 + $0x180] ss:$144 sps:$4 sm:$0xff]   ;;  %v17822_v61 = vld [vmem:[%s26125_s1 + $0x1e88] ss:$16 sps:$4 sm:$0xff]  }
 0x408   :  { %12415 = vmatpush1.bf16.msra.mxu1 %v17810_v55  ;;  %v11435_v28 = vpop.f32.mrf.mxu0  ;;  %12303 = vmatprep.subr.bf16.mxu0 %v17815_v44  ;;  %v18289_v44 = vld [vmem:[%s26126_s0 + $0x188] ss:$144 sps:$4 sm:$0xff]  }
 0x409   :  { %v11548_v47 = vpop.f32.mrf.mxu1  ;;  %12416 = vmatprep.subr.bf16.mxu1 %v17818_v43  ;;  %v24160_v60 = vadd.f32 %v11546_v16, %v11434_v48  ;;  %v11436_v55 = vadd.f32 %v11435_v28, %v23785_v10  ;;  %v17819_v10 = vld [vmem:[%s26125_s1 + $0x1c88] ss:$16 sps:$4 sm:$0xff]   ;;  %v17827_v48 = vld [vmem:[%s26125_s1 + $0x1c6c] ss:$16 sps:$4 sm:$0xff]   ;;  %v18290_v28 = vld [vmem:[%s26126_s0 + $0x2a4] ss:$144 sps:$4 sm:$0xff]  }
 0x40a   :  { %v11439_v37 = vpop.f32.mrf.mxu0  ;;  %12116 = vmatmul.mubr.bf16.gmra.mxu0 %v18288_v34 }
 0x40b   :  { %v11552_v23 = vpop.f32.mrf.mxu1  ;;  %12229 = vmatmul.mubr.bf16.gmra.mxu1 %v18289_v44  ;;  %v24169_v43 = vadd.f32 %v11548_v47, %v11436_v55  ;;  %v11440_v46 = vadd.f32 %v11439_v37, %v23800_v39  ;;  %12304 = vmatpush1.bf16.msra.mxu0 %v17813_v57  ;;  %v17830_v39 = vld [vmem:[%s26125_s1 + $0x1e6c] ss:$16 sps:$4 sm:$0xff]  }
 0x40c   :  { %12417 = vmatpush1.bf16.msra.mxu1 %v17816_v15  ;;  %v11441_v42 = vpop.f32.mrf.mxu0  ;;  %12305 = vmatprep.subr.bf16.mxu0 %v17821_v38  ;;  %v18291_v47 = vld [vmem:[%s26126_s0 + $0x2ac] ss:$144 sps:$4 sm:$0xff]  }
 0x40d   :  { %v11554_v16 = vpop.f32.mrf.mxu1  ;;  %12418 = vmatprep.subr.bf16.mxu1 %v17824_v19  ;;  %v24184_v57 = vadd.f32 %v11552_v23, %v11440_v46  ;;  %v11442_v15 = vadd.f32 %v11441_v42, %v23809_v54  ;;  %12125 = vmatprep.mubr.bf16.mxu0 %v18290_v28  ;;  %v17825_v54 = vld [vmem:[%s26125_s1 + $0x1c68] ss:$16 sps:$4 sm:$0xff]   ;;  %v17833_v46 = vld [vmem:[%s26125_s1 + $0x1c4c] ss:$16 sps:$4 sm:$0xff]  }
 0x40e   :  { %12238 = vmatprep.mubr.bf16.mxu1 %v18291_v47  ;;  %v11443_v38 = vpop.f32.mrf.mxu0  ;;  %v17828_v23 = vld [vmem:[%s26125_s1 + $0x1e68] ss:$16 sps:$4 sm:$0xff]  }
 0x40f   :  { %v11556_v19 = vpop.f32.mrf.mxu1  ;;  %v24193_v55 = vadd.f32 %v11554_v16, %v11442_v15  ;;  %v11444_v37 = vadd.f32 %v11443_v38, %v23824_v27  ;;  %12306 = vmatpush1.bf16.msra.mxu0 %v17819_v10  ;;  %v17836_v27 = vld [vmem:[%s26125_s1 + $0x1e4c] ss:$16 sps:$4 sm:$0xff]   ;;  %v18292_v15 = vld [vmem:[%s26126_s0 + $0x2a0] ss:$144 sps:$4 sm:$0xff]   ;;  %v17834_v47 = vld [vmem:[%s26125_s1 + $0x1e48] ss:$16 sps:$4 sm:$0xff]  }
 0x410   :  { %12419 = vmatpush1.bf16.msra.mxu1 %v17822_v61  ;;  %v11445_v34 = vpop.f32.mrf.mxu0  ;;  %12307 = vmatprep.subr.bf16.mxu0 %v17827_v48  ;;  %v18293_v48 = vld [vmem:[%s26126_s0 + $0x2a8] ss:$144 sps:$4 sm:$0xff]  }
 0x411   :  { %v11558_v44 = vpop.f32.mrf.mxu1  ;;  %12420 = vmatprep.subr.bf16.mxu1 %v17830_v39  ;;  %v24208_v10 = vadd.f32 %v11556_v19, %v11444_v37  ;;  %v11446_v61 = vadd.f32 %v11445_v34, %v23833_v40  ;;  %v17831_v40 = vld [vmem:[%s26125_s1 + $0x1c48] ss:$16 sps:$4 sm:$0xff]   ;;  %v17839_v37 = vld [vmem:[%s26125_s1 + $0x1c2c] ss:$16 sps:$4 sm:$0xff]   ;;  %v18294_v34 = vld [vmem:[%s26126_s0 + $0x3c4] ss:$144 sps:$4 sm:$0xff]  }
 0x412   :  { %v11449_v42 = vpop.f32.mrf.mxu0  ;;  %12126 = vmatmul.mubr.bf16.gmra.mxu0 %v18292_v15 }
 0x413   :  { %v11562_v16 = vpop.f32.mrf.mxu1  ;;  %12239 = vmatmul.mubr.bf16.gmra.mxu1 %v18293_v48  ;;  %v24217_v39 = vadd.f32 %v11558_v44, %v11446_v61  ;;  %v11450_v28 = vadd.f32 %v11449_v42, %v23848_v30  ;;  %12308 = vmatpush1.bf16.msra.mxu0 %v17825_v54  ;;  %v17842_v30 = vld [vmem:[%s26125_s1 + $0x1e2c] ss:$16 sps:$4 sm:$0xff]  }
 0x414   :  { %12421 = vmatpush1.bf16.msra.mxu1 %v17828_v23  ;;  %v11451_v38 = vpop.f32.mrf.mxu0  ;;  %12309 = vmatprep.subr.bf16.mxu0 %v17833_v46  ;;  %v18295_v44 = vld [vmem:[%s26126_s0 + $0x3cc] ss:$144 sps:$4 sm:$0xff]  }
 0x415   :  { %v11564_v19 = vpop.f32.mrf.mxu1  ;;  %12422 = vmatprep.subr.bf16.mxu1 %v17836_v27  ;;  %v24232_v54 = vadd.f32 %v11562_v16, %v11450_v28  ;;  %v11452_v23 = vadd.f32 %v11451_v38, %v23857_v21  ;;  %12135 = vmatprep.mubr.bf16.mxu0 %v18294_v34  ;;  %v17837_v21 = vld [vmem:[%s26125_s1 + $0x1c28] ss:$16 sps:$4 sm:$0xff]   ;;  %v17845_v28 = vld [vmem:[%s26125_s1 + $0x1c0c] ss:$16 sps:$4 sm:$0xff]  }
 0x416   :  { %12248 = vmatprep.mubr.bf16.mxu1 %v18295_v44  ;;  %v11453_v46 = vpop.f32.mrf.mxu0  ;;  %v17840_v16 = vld [vmem:[%s26125_s1 + $0x1e28] ss:$16 sps:$4 sm:$0xff]  }
 0x417   :  { %v11566_v27 = vpop.f32.mrf.mxu1  ;;  %v24241_v61 = vadd.f32 %v11564_v19, %v11452_v23  ;;  %v11454_v42 = vadd.f32 %v11453_v46, %v23872_v33  ;;  %12310 = vmatpush1.bf16.msra.mxu0 %v17831_v40  ;;  %v17848_v33 = vld [vmem:[%s26125_s1 + $0x1e0c] ss:$16 sps:$4 sm:$0xff]   ;;  %v18296_v23 = vld [vmem:[%s26126_s0 + $0x3c0] ss:$144 sps:$4 sm:$0xff]   ;;  %v17846_v44 = vld [vmem:[%s26125_s1 + $0x1e08] ss:$16 sps:$4 sm:$0xff]  }
 0x418   :  { %12423 = vmatpush1.bf16.msra.mxu1 %v17834_v47  ;;  %v11455_v15 = vpop.f32.mrf.mxu0  ;;  %12311 = vmatprep.subr.bf16.mxu0 %v17839_v37  ;;  %v18297_v37 = vld [vmem:[%s26126_s0 + $0x3c8] ss:$144 sps:$4 sm:$0xff]  }
 0x419   :  { %v11568_v48 = vpop.f32.mrf.mxu1  ;;  %12424 = vmatprep.subr.bf16.mxu1 %v17842_v30  ;;  %v24256_v40 = vadd.f32 %v11566_v27, %v11454_v42  ;;  %v11456_v47 = vadd.f32 %v11455_v15, %v23881_v32  ;;  %v17843_v32 = vld [vmem:[%s26125_s1 + $0x1c08] ss:$16 sps:$4 sm:$0xff]   ;;  %v17851_v42 = vld [vmem:[%s26125_s1 + $0x1dec] ss:$16 sps:$4 sm:$0xff]   ;;  %v18298_v15 = vld [vmem:[%s26126_s0 + $0x4e4] ss:$144 sps:$4 sm:$0xff]  }
 0x41a   :  { %v11459_v38 = vpop.f32.mrf.mxu0  ;;  %12136 = vmatmul.mubr.bf16.gmra.mxu0 %v18296_v23  ;;  %v17857_v23 = vld [vmem:[%s26125_s1 + $0x1dcc] ss:$16 sps:$4 sm:$0xff]  }
 0x41b   :  { %v11572_v19 = vpop.f32.mrf.mxu1  ;;  %12249 = vmatmul.mubr.bf16.gmra.mxu1 %v18297_v37  ;;  %v24265_v30 = vadd.f32 %v11568_v48, %v11456_v47  ;;  %v11460_v34 = vadd.f32 %v11459_v38, %v23896_v58  ;;  %12312 = vmatpush1.bf16.msra.mxu0 %v17837_v21  ;;  %v17854_v58 = vld [vmem:[%s26125_s1 + $0x1fec] ss:$16 sps:$4 sm:$0xff]  }
 0x41c   :  { %12425 = vmatpush1.bf16.msra.mxu1 %v17840_v16  ;;  %v11461_v46 = vpop.f32.mrf.mxu0  ;;  %12313 = vmatprep.subr.bf16.mxu0 %v17845_v28  ;;  %v18299_v48 = vld [vmem:[%s26126_s0 + $0x4ec] ss:$144 sps:$4 sm:$0xff]  }
 0x41d   :  { %v11574_v27 = vpop.f32.mrf.mxu1  ;;  %12426 = vmatprep.subr.bf16.mxu1 %v17848_v33  ;;  %v24280_v21 = vadd.f32 %v11572_v19, %v11460_v34  ;;  %v11462_v16 = vadd.f32 %v11461_v46, %v23905_v52  ;;  %12145 = vmatprep.mubr.bf16.mxu0 %v18298_v15  ;;  %v17849_v52 = vld [vmem:[%s26125_s1 + $0x1de8] ss:$16 sps:$4 sm:$0xff]  }
 0x41e   :  { %12258 = vmatprep.mubr.bf16.mxu1 %v18299_v48  ;;  %v11463_v28 = vpop.f32.mrf.mxu0  ;;  %v17852_v19 = vld [vmem:[%s26125_s1 + $0x1fe8] ss:$16 sps:$4 sm:$0xff]  }
 0x41f   :  { %v11576_v33 = vpop.f32.mrf.mxu1  ;;  %v24289_v47 = vadd.f32 %v11574_v27, %v11462_v16  ;;  %v11464_v38 = vadd.f32 %v11463_v28, %v23920_v53  ;;  %12314 = vmatpush1.bf16.msra.mxu0 %v17843_v32  ;;  %v17860_v53 = vld [vmem:[%s26125_s1 + $0x1fcc] ss:$16 sps:$4 sm:$0xff]   ;;  %v17855_v46 = vld [vmem:[%s26125_s1 + $0x1dc8] ss:$16 sps:$4 sm:$0xff]  }
 0x420   :  { %12427 = vmatpush1.bf16.msra.mxu1 %v17846_v44  ;;  %v11465_v37 = vpop.f32.mrf.mxu0  ;;  %12315 = vmatprep.subr.bf16.mxu0 %v17851_v42  ;;  %v17858_v27 = vld [vmem:[%s26125_s1 + $0x1fc8] ss:$16 sps:$4 sm:$0xff]   ;;  %v18300_v42 = vld [vmem:[%s26126_s0 + $0x4e0] ss:$144 sps:$4 sm:$0xff]  }
 0x421   :  { %v11578_v34 = vpop.f32.mrf.mxu1  ;;  %12428 = vmatprep.subr.bf16.mxu1 %v17854_v58  ;;  %v24304_v32 = vadd.f32 %v11576_v33, %v11464_v38  ;;  %v11466_v44 = vadd.f32 %v11465_v37, %v23929_v49  ;;  %v18301_v58 = vld [vmem:[%s26126_s0 + $0x4e8] ss:$144 sps:$4 sm:$0xff]   ;;  %v17863_v49 = vld [vmem:[%s26125_s1 + $0x1dac] ss:$16 sps:$4 sm:$0xff]  }
 0x422   :  { %v11469_v16 = vpop.f32.mrf.mxu0  ;;  %12146 = vmatmul.mubr.bf16.gmra.mxu0 %v18300_v42  ;;  %v17866_v37 = vld [vmem:[%s26125_s1 + $0x1fac] ss:$16 sps:$4 sm:$0xff]  }
 0x423   :  { %v11582_v15 = vpop.f32.mrf.mxu1  ;;  %12259 = vmatmul.mubr.bf16.gmra.mxu1 %v18301_v58  ;;  %v24322_v48 = vadd.f32 %v11578_v34, %v11466_v44  ;;  %v11470_v28 = vadd.f32 %v11469_v16, %v23944_v22  ;;  %12316 = vmatpush2.bf16.msra.mxu0 %v17849_v52  ;;  %v18302_v34 = vld [vmem:[%s26126_s0 + $0x604] ss:$144 sps:$4 sm:$0xff]   ;;  %v18303_v22 = vld [vmem:[%s26126_s0 + $0x60c] ss:$144 sps:$4 sm:$0xff]   ;;  %v17861_v52 = vld [vmem:[%s26125_s1 + $0x1da8] ss:$16 sps:$4 sm:$0xff]  }
 0x424   :  { %12429 = vmatpush2.bf16.msra.mxu1 %v17852_v19  ;;  %v11471_v33 = vpop.f32.mrf.mxu0  ;;  %12317 = vmatprep.subr.bf16.mxu0 %v17857_v23  ;;  %v17864_v19 = vld [vmem:[%s26125_s1 + $0x1fa8] ss:$16 sps:$4 sm:$0xff]  }
 0x425   :  { %v11584_v38 = vpop.f32.mrf.mxu1  ;;  %12430 = vmatprep.subr.bf16.mxu1 %v17860_v53  ;;  %v24328_v42 = vadd.f32 %v11582_v15, %v11470_v28  ;;  %v11472_v58 = vadd.f32 %v11471_v33, %v23953_v18  ;;  %12155 = vmatprep.mubr.bf16.mxu0 %v18302_v34  ;;  %v17869_v53 = vld [vmem:[%s26125_s1 + $0x1d8c] ss:$16 sps:$4 sm:$0xff]  }
 0x426   :  { %12268 = vmatprep.mubr.bf16.mxu1 %v18303_v22  ;;  %v11473_v23 = vpop.f32.mrf.mxu0  ;;  %v17872_v33 = vld [vmem:[%s26125_s1 + $0x1f8c] ss:$16 sps:$4 sm:$0xff]  }
 0x427   :  { %v11586_v18 = vpop.f32.mrf.mxu1  ;;  %v24346_v44 = vadd.f32 %v11584_v38, %v11472_v58  ;;  %v11474_v16 = vadd.f32 %v11473_v23, %v23968_v12  ;;  %12318 = vmatpush2.bf16.msra.mxu0 %v17855_v46  ;;  %v17867_v38 = vld [vmem:[%s26125_s1 + $0x1d88] ss:$16 sps:$4 sm:$0xff]  }
 0x428   :  { %12431 = vmatpush2.bf16.msra.mxu1 %v17858_v27  ;;  %v11475_v15 = vpop.f32.mrf.mxu0  ;;  %12319 = vmatprep.subr.bf16.mxu0 %v17863_v49  ;;  %v17870_v12 = vld [vmem:[%s26125_s1 + $0x1f88] ss:$16 sps:$4 sm:$0xff]   ;;  %v18304_v49 = vld [vmem:[%s26126_s0 + $0x600] ss:$144 sps:$4 sm:$0xff]  }
 0x429   :  { %v11588_v28 = vpop.f32.mrf.mxu1  ;;  %12432 = vmatprep.subr.bf16.mxu1 %v17866_v37  ;;  %v24352_v34 = vadd.f32 %v11586_v18, %v11474_v16  ;;  %v11476_v22 = vadd.f32 %v11475_v15, %v23977_v63  ;;  %v18305_v37 = vld [vmem:[%s26126_s0 + $0x608] ss:$144 sps:$4 sm:$0xff]   ;;  %v17875_v63 = vld [vmem:[%s26125_s1 + $0x1d6c] ss:$16 sps:$4 sm:$0xff]  }
 0x42a   :  { %v11479_v46 = vpop.f32.mrf.mxu0  ;;  %12156 = vmatmul.mubr.bf16.gmra.mxu0 %v18304_v49  ;;  %v17878_v15 = vld [vmem:[%s26125_s1 + $0x1f6c] ss:$16 sps:$4 sm:$0xff]  }
 0x42b   :  { %v11592_v27 = vpop.f32.mrf.mxu1  ;;  %12269 = vmatmul.mubr.bf16.gmra.mxu1 %v18305_v37  ;;  %v24370_v58 = vadd.f32 %v11588_v28, %v11476_v22  ;;  %v11480_v23 = vadd.f32 %v11479_v46, %v23992_v9  ;;  %12320 = vmatpush2.bf16.msra.mxu0 %v17861_v52  ;;  %v18306_v28 = vld [vmem:[%s26126_s0 + $0x724] ss:$144 sps:$4 sm:$0xff]   ;;  %v18307_v9 = vld [vmem:[%s26126_s0 + $0x72c] ss:$144 sps:$4 sm:$0xff]   ;;  %v17873_v52 = vld [vmem:[%s26125_s1 + $0x1d68] ss:$16 sps:$4 sm:$0xff]  }
 0x42c   :  { %12433 = vmatpush2.bf16.msra.mxu1 %v17864_v19  ;;  %v11481_v18 = vpop.f32.mrf.mxu0  ;;  %12321 = vmatprep.subr.bf16.mxu0 %v17869_v53  ;;  %v17876_v19 = vld [vmem:[%s26125_s1 + $0x1f68] ss:$16 sps:$4 sm:$0xff]  }
 0x42d   :  { %v11594_v16 = vpop.f32.mrf.mxu1  ;;  %12434 = vmatprep.subr.bf16.mxu1 %v17872_v33  ;;  %v24376_v49 = vadd.f32 %v11592_v27, %v11480_v23  ;;  %v11482_v37 = vadd.f32 %v11481_v18, %v24001_v3  ;;  %12165 = vmatprep.mubr.bf16.mxu0 %v18306_v28  ;;  %v17881_v33 = vld [vmem:[%s26125_s1 + $0x1d4c] ss:$16 sps:$4 sm:$0xff]  }
 0x42e   :  { %12278 = vmatprep.mubr.bf16.mxu1 %v18307_v9  ;;  %v11483_v53 = vpop.f32.mrf.mxu0  ;;  %v17884_v18 = vld [vmem:[%s26125_s1 + $0x1f4c] ss:$16 sps:$4 sm:$0xff]  }
 0x42f   :  { %v11596_v3 = vpop.f32.mrf.mxu1  ;;  %v24394_v22 = vadd.f32 %v11594_v16, %v11482_v37  ;;  %v11484_v46 = vadd.f32 %v11483_v53, %v24016_v1  ;;  %12322 = vmatpush2.bf16.msra.mxu0 %v17867_v38  ;;  %v17879_v16 = vld [vmem:[%s26125_s1 + $0x1d48] ss:$16 sps:$4 sm:$0xff]  }
 0x430   :  { %12435 = vmatpush2.bf16.msra.mxu1 %v17870_v12  ;;  %v11485_v27 = vpop.f32.mrf.mxu0  ;;  %12323 = vmatprep.subr.bf16.mxu0 %v17875_v63  ;;  %v17882_v1 = vld [vmem:[%s26125_s1 + $0x1f48] ss:$16 sps:$4 sm:$0xff]   ;;  %v18308_v63 = vld [vmem:[%s26126_s0 + $0x720] ss:$144 sps:$4 sm:$0xff]  }
 0x431   :  { %v11598_v23 = vpop.f32.mrf.mxu1  ;;  %12436 = vmatprep.subr.bf16.mxu1 %v17878_v15  ;;  %v24400_v28 = vadd.f32 %v11596_v3, %v11484_v46  ;;  %v11486_v9 = vadd.f32 %v11485_v27, %v24025_v29  ;;  %v18309_v15 = vld [vmem:[%s26126_s0 + $0x728] ss:$144 sps:$4 sm:$0xff]   ;;  %v17887_v29 = vld [vmem:[%s26125_s1 + $0x1d2c] ss:$16 sps:$4 sm:$0xff]  }
 0x432   :  { %v11489_v38 = vpop.f32.mrf.mxu0  ;;  %12166 = vmatmul.mubr.bf16.gmra.mxu0 %v18308_v63  ;;  %v17890_v27 = vld [vmem:[%s26125_s1 + $0x1f2c] ss:$16 sps:$4 sm:$0xff]  }
 0x433   :  { %v11602_v12 = vpop.f32.mrf.mxu1  ;;  %12279 = vmatmul.mubr.bf16.gmra.mxu1 %v18309_v15  ;;  %v24418_v37 = vadd.f32 %v11598_v23, %v11486_v9  ;;  %v11490_v53 = vadd.f32 %v11489_v38, %v24040_v36  ;;  %12324 = vmatpush2.bf16.msra.mxu0 %v17873_v52  ;;  %v18310_v23 = vld [vmem:[%s26126_s0 + $0x844] ss:$144 sps:$4 sm:$0xff]   ;;  %v18311_v36 = vld [vmem:[%s26126_s0 + $0x84c] ss:$144 sps:$4 sm:$0xff]   ;;  %v17885_v52 = vld [vmem:[%s26125_s1 + $0x1d28] ss:$16 sps:$4 sm:$0xff]  }
 0x434   :  { %12437 = vmatpush2.bf16.msra.mxu1 %v17876_v19  ;;  %v11491_v3 = vpop.f32.mrf.mxu0  ;;  %12325 = vmatprep.subr.bf16.mxu0 %v17881_v33  ;;  %v17888_v19 = vld [vmem:[%s26125_s1 + $0x1f28] ss:$16 sps:$4 sm:$0xff]  }
 0x435   :  { %v11604_v46 = vpop.f32.mrf.mxu1  ;;  %12438 = vmatprep.subr.bf16.mxu1 %v17884_v18  ;;  %v24424_v63 = vadd.f32 %v11602_v12, %v11490_v53  ;;  %v11492_v15 = vadd.f32 %v11491_v3, %v24049_v31  ;;  %12175 = vmatprep.mubr.bf16.mxu0 %v18310_v23  ;;  %v17893_v18 = vld [vmem:[%s26125_s1 + $0x1d0c] ss:$16 sps:$4 sm:$0xff]  }
 0x436   :  { %12288 = vmatprep.mubr.bf16.mxu1 %v18311_v36  ;;  %v11493_v33 = vpop.f32.mrf.mxu0  ;;  %v17896_v3 = vld [vmem:[%s26125_s1 + $0x1f0c] ss:$16 sps:$4 sm:$0xff]  }
 0x437   :  { %v11606_v31 = vpop.f32.mrf.mxu1  ;;  %v24442_v9 = vadd.f32 %v11604_v46, %v11492_v15  ;;  %v11494_v38 = vadd.f32 %v11493_v33, %v24064_v17  ;;  %12326 = vmatpush2.bf16.msra.mxu0 %v17879_v16  ;;  %v18312_v17 = vld [vmem:[%s26126_s0 + $0x840] ss:$144 sps:$4 sm:$0xff]   ;;  %v18313_v16 = vld [vmem:[%s26126_s0 + $0x848] ss:$144 sps:$4 sm:$0xff]   ;;  %v17899_v33 = vld [vmem:[%s26125_s1 + $0x20ec] ss:$16 sps:$4 sm:$0xff]  }
 0x438   :  { %12439 = vmatpush2.bf16.msra.mxu1 %v17882_v1  ;;  %v11495_v12 = vpop.f32.mrf.mxu0  ;;  %12327 = vmatprep.subr.bf16.mxu0 %v17887_v29  ;;  %v17894_v46 = vld [vmem:[%s26125_s1 + $0x1f08] ss:$16 sps:$4 sm:$0xff]  }
 0x439   :  { %v11608_v53 = vpop.f32.mrf.mxu1  ;;  %12440 = vmatprep.subr.bf16.mxu1 %v17890_v27  ;;  %v24448_v23 = vadd.f32 %v11606_v31, %v11494_v38  ;;  %v11496_v36 = vadd.f32 %v11495_v12, %v24073_v20  ;;  %v17891_v20 = vld [vmem:[%s26125_s1 + $0x1d08] ss:$16 sps:$4 sm:$0xff]   ;;  %v18315_v31 = vld [vmem:[%s26126_s0 + $0x7c] ss:$144 sps:$4 sm:$0xff]  }
 0x43a   :  { %v11499_v62 = vpop.f32.mrf.mxu0  ;;  %12176 = vmatmul.mubr.bf16.gmra.mxu0 %v18312_v17  ;;  %v17905_v17 = vld [vmem:[%s26125_s1 + $0x20cc] ss:$16 sps:$4 sm:$0xff]  }
 0x43b   :  { %v11612_v50 = vpop.f32.mrf.mxu1  ;;  %12289 = vmatmul.mubr.bf16.gmra.mxu1 %v18313_v16  ;;  %v24457_v1 = vadd.f32 %v11608_v53, %v11496_v36  ;;  %v11500_v29 = vadd.f32 %v11499_v62, %v24088_v0  ;;  %12328 = vmatpush2.bf16.msra.mxu0 %v17885_v52  ;;  %v17902_v62 = vld [vmem:[%s26125_s1 + $0x22ec] ss:$16 sps:$4 sm:$0xff]  }
 0x43c   :  { %12441 = vmatpush2.bf16.msra.mxu1 %v17888_v19  ;;  %v11501_v27 = vpop.f32.mrf.mxu0  ;;  %12329 = vmatprep.subr.bf16.mxu0 %v17893_v18  ;;  %v18314_v19 = vld [vmem:[%s26126_s0 + $0x74] ss:$144 sps:$4 sm:$0xff]  }
 0x43d   :  { %v11614_v15 = vpop.f32.mrf.mxu1  ;;  %12442 = vmatprep.subr.bf16.mxu1 %v17896_v3  ;;  %v24472_v0 = vadd.f32 %v11612_v50, %v11500_v29  ;;  %v11502_v52 = vadd.f32 %v11501_v27, %v24097_v8  ;;  %12331 = vmatprep.mubr.bf16.mxu0 %v18314_v19  ;;  %v17897_v50 = vld [vmem:[%s26125_s1 + $0x20e8] ss:$16 sps:$4 sm:$0xff]   ;;  %v18316_v27 = vld [vmem:[%s26126_s0 + $0x70] ss:$144 sps:$4 sm:$0xff]  }
 0x43e   :  { %12444 = vmatprep.mubr.bf16.mxu1 %v18315_v31  ;;  %v11503_v18 = vpop.f32.mrf.mxu0  ;;  %v17900_v8 = vld [vmem:[%s26125_s1 + $0x22e8] ss:$16 sps:$4 sm:$0xff]  }
 0x43f   :  { %v11616_v38 = vpop.f32.mrf.mxu1  ;;  %v24481_v12 = vadd.f32 %v11614_v15, %v11502_v52  ;;  %v11504_v53 = vadd.f32 %v11503_v18, %v24112_v24  ;;  %12330 = vmatpush2.bf16.msra.mxu0 %v17891_v20  ;;  %v17908_v24 = vld [vmem:[%s26125_s1 + $0x22cc] ss:$16 sps:$4 sm:$0xff]   ;;  %v18317_v15 = vld [vmem:[%s26126_s0 + $0x78] ss:$144 sps:$4 sm:$0xff]  }
 0x440   :  { %12443 = vmatpush2.bf16.msra.mxu1 %v17894_v46  ;;  %v11505_v3 = vpop.f32.mrf.mxu0  ;;  %12525 = vmatprep.subr.bf16.mxu0 %v17899_v33  ;;  %v17906_v52 = vld [vmem:[%s26125_s1 + $0x22c8] ss:$16 sps:$4 sm:$0xff]   ;;  %v17911_v18 = vld [vmem:[%s26125_s1 + $0x20ac] ss:$16 sps:$4 sm:$0xff]  }
 0x441   :  { %v11618_v36 = vpop.f32.mrf.mxu1  ;;  %12638 = vmatprep.subr.bf16.mxu1 %v17902_v62  ;;  %v24496_v16 = vadd.f32 %v11616_v38, %v11504_v53  ;;  %v11506_v29 = vadd.f32 %v11505_v3, %v24121_v7  ;;  %v17903_v7 = vld [vmem:[%s26125_s1 + $0x20c8] ss:$16 sps:$4 sm:$0xff]  }
 0x442   :  { %v11655_v20 = vpop.f32.mrf.mxu0  ;;  %12332 = vmatmul.mubr.bf16.vlgmr.msra.gmra.mxu0 %v18316_v27  ;;  %v17917_v27 = vld [vmem:[%s26125_s1 + $0x208c] ss:$16 sps:$4 sm:$0xff]  }
 0x443   :  { %v11768_v46 = vpop.f32.mrf.mxu1  ;;  %12445 = vmatmul.mubr.bf16.vlgmr.msra.gmra.mxu1 %v18317_v15  ;;  %v24505_v33 = vadd.f32 %v11618_v36, %v11506_v29  ;;  %v11656_v62 = vadd.f32 %v11655_v20, %v24136_v6  ;;  %12526 = vmatpush1.bf16.msra.mxu0 %v17897_v50  ;;  %v17914_v6 = vld [vmem:[%s26125_s1 + $0x22ac] ss:$16 sps:$4 sm:$0xff]   ;;  %v18318_v50 = vld [vmem:[%s26126_s0 + $0x194] ss:$144 sps:$4 sm:$0xff]   ;;  %v17912_v29 = vld [vmem:[%s26125_s1 + $0x22a8] ss:$16 sps:$4 sm:$0xff]  }
 0x444   :  { %12639 = vmatpush1.bf16.msra.mxu1 %v17900_v8  ;;  %v11657_v19 = vpop.f32.mrf.mxu0  ;;  %12527 = vmatprep.subr.bf16.mxu0 %v17905_v17  ;;  %v18319_v8 = vld [vmem:[%s26126_s0 + $0x19c] ss:$144 sps:$4 sm:$0xff]  }
 0x445   :  { %v11770_v31 = vpop.f32.mrf.mxu1  ;;  %12640 = vmatprep.subr.bf16.mxu1 %v17908_v24  ;;  %v24520_v38 = vadd.f32 %v11768_v46, %v11656_v62  ;;  %v11658_v53 = vadd.f32 %v11657_v19, %v24145_v4  ;;  %12341 = vmatprep.mubr.bf16.mxu0 %v18318_v50  ;;  %v17909_v4 = vld [vmem:[%s26125_s1 + $0x20a8] ss:$16 sps:$4 sm:$0xff]   ;;  %v18320_v19 = vld [vmem:[%s26126_s0 + $0x190] ss:$144 sps:$4 sm:$0xff]  }
 0x446   :  { %12454 = vmatprep.mubr.bf16.mxu1 %v18319_v8  ;;  %v11659_v3 = vpop.f32.mrf.mxu0 }
 0x447   :  { %v11772_v36 = vpop.f32.mrf.mxu1  ;;  %v24529_v17 = vadd.f32 %v11770_v31, %v11658_v53  ;;  %v11660_v24 = vadd.f32 %v11659_v3, %v24160_v60  ;;  %12528 = vmatpush1.bf16.msra.mxu0 %v17903_v7  ;;  %v17920_v60 = vld [vmem:[%s26125_s1 + $0x228c] ss:$16 sps:$4 sm:$0xff]   ;;  %v18321_v31 = vld [vmem:[%s26126_s0 + $0x198] ss:$144 sps:$4 sm:$0xff]  }
 0x448   :  { %12641 = vmatpush1.bf16.msra.mxu1 %v17906_v52  ;;  %v11661_v20 = vpop.f32.mrf.mxu0  ;;  %12529 = vmatprep.subr.bf16.mxu0 %v17911_v18  ;;  %v17918_v53 = vld [vmem:[%s26125_s1 + $0x2288] ss:$16 sps:$4 sm:$0xff]   ;;  %v17923_v3 = vld [vmem:[%s26125_s1 + $0x206c] ss:$16 sps:$4 sm:$0xff]  }
 0x449   :  { %v11774_v46 = vpop.f32.mrf.mxu1  ;;  %12642 = vmatprep.subr.bf16.mxu1 %v17914_v6  ;;  %v24544_v15 = vadd.f32 %v11772_v36, %v11660_v24  ;;  %v11662_v62 = vadd.f32 %v11661_v20, %v24169_v43  ;;  %v17915_v43 = vld [vmem:[%s26125_s1 + $0x2088] ss:$16 sps:$4 sm:$0xff]  }
 0x44a   :  { %v11665_v7 = vpop.f32.mrf.mxu0  ;;  %12342 = vmatmul.mubr.bf16.gmra.mxu0 %v18320_v19  ;;  %v17929_v19 = vld [vmem:[%s26125_s1 + $0x204c] ss:$16 sps:$4 sm:$0xff]  }
 0x44b   :  { %v11778_v52 = vpop.f32.mrf.mxu1  ;;  %12455 = vmatmul.mubr.bf16.gmra.mxu1 %v18321_v31  ;;  %v24553_v18 = vadd.f32 %v11774_v46, %v11662_v62  ;;  %v11666_v6 = vadd.f32 %v11665_v7, %v24184_v57  ;;  %12530 = vmatpush1.bf16.msra.mxu0 %v17909_v4  ;;  %v17926_v57 = vld [vmem:[%s26125_s1 + $0x226c] ss:$16 sps:$4 sm:$0xff]   ;;  %v18322_v4 = vld [vmem:[%s26126_s0 + $0x2b4] ss:$144 sps:$4 sm:$0xff]   ;;  %v17924_v62 = vld [vmem:[%s26125_s1 + $0x2268] ss:$16 sps:$4 sm:$0xff]  }
 0x44c   :  { %12643 = vmatpush1.bf16.msra.mxu1 %v17912_v29  ;;  %v11667_v50 = vpop.f32.mrf.mxu0  ;;  %12531 = vmatprep.subr.bf16.mxu0 %v17917_v27  ;;  %v18323_v29 = vld [vmem:[%s26126_s0 + $0x2bc] ss:$144 sps:$4 sm:$0xff]  }
 0x44d   :  { %v11780_v8 = vpop.f32.mrf.mxu1  ;;  %12644 = vmatprep.subr.bf16.mxu1 %v17920_v60  ;;  %v24568_v36 = vadd.f32 %v11778_v52, %v11666_v6  ;;  %v11668_v24 = vadd.f32 %v11667_v50, %v24193_v55  ;;  %12351 = vmatprep.mubr.bf16.mxu0 %v18322_v4  ;;  %v17921_v55 = vld [vmem:[%s26125_s1 + $0x2068] ss:$16 sps:$4 sm:$0xff]   ;;  %v18324_v50 = vld [vmem:[%s26126_s0 + $0x2b0] ss:$144 sps:$4 sm:$0xff]  }
 0x44e   :  { %12464 = vmatprep.mubr.bf16.mxu1 %v18323_v29  ;;  %v11669_v20 = vpop.f32.mrf.mxu0 }
 0x44f   :  { %v11782_v46 = vpop.f32.mrf.mxu1  ;;  %v24577_v27 = vadd.f32 %v11780_v8, %v11668_v24  ;;  %v11670_v60 = vadd.f32 %v11669_v20, %v24208_v10  ;;  %12532 = vmatpush1.bf16.msra.mxu0 %v17915_v43  ;;  %v17932_v10 = vld [vmem:[%s26125_s1 + $0x224c] ss:$16 sps:$4 sm:$0xff]   ;;  %v18325_v8 = vld [vmem:[%s26126_s0 + $0x2b8] ss:$144 sps:$4 sm:$0xff]  }
 0x450   :  { %12645 = vmatpush1.bf16.msra.mxu1 %v17918_v53  ;;  %v11671_v7 = vpop.f32.mrf.mxu0  ;;  %12533 = vmatprep.subr.bf16.mxu0 %v17923_v3  ;;  %v17930_v24 = vld [vmem:[%s26125_s1 + $0x2248] ss:$16 sps:$4 sm:$0xff]   ;;  %v17935_v20 = vld [vmem:[%s26125_s1 + $0x202c] ss:$16 sps:$4 sm:$0xff]  }
 0x451   :  { %v11784_v52 = vpop.f32.mrf.mxu1  ;;  %12646 = vmatprep.subr.bf16.mxu1 %v17926_v57  ;;  %v24592_v31 = vadd.f32 %v11782_v46, %v11670_v60  ;;  %v11672_v6 = vadd.f32 %v11671_v7, %v24217_v39  ;;  %v17927_v39 = vld [vmem:[%s26125_s1 + $0x2048] ss:$16 sps:$4 sm:$0xff]  }
 0x452   :  { %v11675_v43 = vpop.f32.mrf.mxu0  ;;  %12352 = vmatmul.mubr.bf16.gmra.mxu0 %v18324_v50  ;;  %v17941_v50 = vld [vmem:[%s26125_s1 + $0x200c] ss:$16 sps:$4 sm:$0xff]  }
 0x453   :  { %v11788_v53 = vpop.f32.mrf.mxu1  ;;  %12465 = vmatmul.mubr.bf16.gmra.mxu1 %v18325_v8  ;;  %v24601_v3 = vadd.f32 %v11784_v52, %v11672_v6  ;;  %v11676_v57 = vadd.f32 %v11675_v43, %v24232_v54  ;;  %12534 = vmatpush1.bf16.msra.mxu0 %v17921_v55  ;;  %v17938_v54 = vld [vmem:[%s26125_s1 + $0x222c] ss:$16 sps:$4 sm:$0xff]   ;;  %v18326_v55 = vld [vmem:[%s26126_s0 + $0x3d4] ss:$144 sps:$4 sm:$0xff]   ;;  %v17936_v6 = vld [vmem:[%s26125_s1 + $0x2228] ss:$16 sps:$4 sm:$0xff]  }
 0x454   :  { %12647 = vmatpush1.bf16.msra.mxu1 %v17924_v62  ;;  %v11677_v4 = vpop.f32.mrf.mxu0  ;;  %12535 = vmatprep.subr.bf16.mxu0 %v17929_v19  ;;  %v18327_v62 = vld [vmem:[%s26126_s0 + $0x3dc] ss:$144 sps:$4 sm:$0xff]  }
 0x455   :  { %v11790_v29 = vpop.f32.mrf.mxu1  ;;  %12648 = vmatprep.subr.bf16.mxu1 %v17932_v10  ;;  %v24616_v46 = vadd.f32 %v11788_v53, %v11676_v57  ;;  %v11678_v60 = vadd.f32 %v11677_v4, %v24241_v61  ;;  %12361 = vmatprep.mubr.bf16.mxu0 %v18326_v55  ;;  %v17933_v61 = vld [vmem:[%s26125_s1 + $0x2028] ss:$16 sps:$4 sm:$0xff]   ;;  %v18328_v4 = vld [vmem:[%s26126_s0 + $0x3d0] ss:$144 sps:$4 sm:$0xff]  }
 0x456   :  { %12474 = vmatprep.mubr.bf16.mxu1 %v18327_v62  ;;  %v11679_v7 = vpop.f32.mrf.mxu0 }
 0x457   :  { %v11792_v52 = vpop.f32.mrf.mxu1  ;;  %v24625_v19 = vadd.f32 %v11790_v29, %v11678_v60  ;;  %v11680_v10 = vadd.f32 %v11679_v7, %v24256_v40  ;;  %12536 = vmatpush1.bf16.msra.mxu0 %v17927_v39  ;;  %v17944_v40 = vld [vmem:[%s26125_s1 + $0x220c] ss:$16 sps:$4 sm:$0xff]   ;;  %v18329_v29 = vld [vmem:[%s26126_s0 + $0x3d8] ss:$144 sps:$4 sm:$0xff]  }
 0x458   :  { %12649 = vmatpush1.bf16.msra.mxu1 %v17930_v24  ;;  %v11681_v43 = vpop.f32.mrf.mxu0  ;;  %12537 = vmatprep.subr.bf16.mxu0 %v17935_v20  ;;  %v17942_v60 = vld [vmem:[%s26125_s1 + $0x2208] ss:$16 sps:$4 sm:$0xff]   ;;  %v17947_v7 = vld [vmem:[%s26125_s1 + $0x21ec] ss:$16 sps:$4 sm:$0xff]  }
 0x459   :  { %v11794_v53 = vpop.f32.mrf.mxu1  ;;  %12650 = vmatprep.subr.bf16.mxu1 %v17938_v54  ;;  %v24640_v8 = vadd.f32 %v11792_v52, %v11680_v10  ;;  %v11682_v57 = vadd.f32 %v11681_v43, %v24265_v30  ;;  %v17939_v30 = vld [vmem:[%s26125_s1 + $0x2008] ss:$16 sps:$4 sm:$0xff]  }
 0x45a   :  { %v11685_v39 = vpop.f32.mrf.mxu0  ;;  %12362 = vmatmul.mubr.bf16.gmra.mxu0 %v18328_v4  ;;  %v17953_v4 = vld [vmem:[%s26125_s1 + $0x21cc] ss:$16 sps:$4 sm:$0xff]  }
 0x45b   :  { %v11798_v24 = vpop.f32.mrf.mxu1  ;;  %12475 = vmatmul.mubr.bf16.gmra.mxu1 %v18329_v29  ;;  %v24649_v20 = vadd.f32 %v11794_v53, %v11682_v57  ;;  %v11686_v54 = vadd.f32 %v11685_v39, %v24280_v21  ;;  %12538 = vmatpush1.bf16.msra.mxu0 %v17933_v61  ;;  %v17950_v21 = vld [vmem:[%s26125_s1 + $0x23ec] ss:$16 sps:$4 sm:$0xff]   ;;  %v18330_v61 = vld [vmem:[%s26126_s0 + $0x4f4] ss:$144 sps:$4 sm:$0xff]   ;;  %v17948_v57 = vld [vmem:[%s26125_s1 + $0x23e8] ss:$16 sps:$4 sm:$0xff]  }
 0x45c   :  { %12651 = vmatpush1.bf16.msra.mxu1 %v17936_v6  ;;  %v11687_v55 = vpop.f32.mrf.mxu0  ;;  %12539 = vmatprep.subr.bf16.mxu0 %v17941_v50  ;;  %v18331_v6 = vld [vmem:[%s26126_s0 + $0x4fc] ss:$144 sps:$4 sm:$0xff]  }
 0x45d   :  { %v11800_v62 = vpop.f32.mrf.mxu1  ;;  %12652 = vmatprep.subr.bf16.mxu1 %v17944_v40  ;;  %v24664_v52 = vadd.f32 %v11798_v24, %v11686_v54  ;;  %v11688_v10 = vadd.f32 %v11687_v55, %v24289_v47  ;;  %12371 = vmatprep.mubr.bf16.mxu0 %v18330_v61  ;;  %v17945_v47 = vld [vmem:[%s26125_s1 + $0x21e8] ss:$16 sps:$4 sm:$0xff]   ;;  %v18332_v55 = vld [vmem:[%s26126_s0 + $0x4f0] ss:$144 sps:$4 sm:$0xff]  }
 0x45e   :  { %12484 = vmatprep.mubr.bf16.mxu1 %v18331_v6  ;;  %v11689_v43 = vpop.f32.mrf.mxu0 }
 0x45f   :  { %v11802_v53 = vpop.f32.mrf.mxu1  ;;  %v24673_v50 = vadd.f32 %v11800_v62, %v11688_v10  ;;  %v11690_v40 = vadd.f32 %v11689_v43, %v24304_v32  ;;  %12540 = vmatpush1.bf16.msra.mxu0 %v17939_v30  ;;  %v17956_v32 = vld [vmem:[%s26125_s1 + $0x23cc] ss:$16 sps:$4 sm:$0xff]   ;;  %v18333_v62 = vld [vmem:[%s26126_s0 + $0x4f8] ss:$144 sps:$4 sm:$0xff]  }
 0x460   :  { %12653 = vmatpush1.bf16.msra.mxu1 %v17942_v60  ;;  %v11691_v39 = vpop.f32.mrf.mxu0  ;;  %12541 = vmatprep.subr.bf16.mxu0 %v17947_v7  ;;  %v17954_v10 = vld [vmem:[%s26125_s1 + $0x23c8] ss:$16 sps:$4 sm:$0xff]   ;;  %v17959_v43 = vld [vmem:[%s26125_s1 + $0x21ac] ss:$16 sps:$4 sm:$0xff]  }
 0x461   :  { %v11804_v24 = vpop.f32.mrf.mxu1  ;;  %12654 = vmatprep.subr.bf16.mxu1 %v17950_v21  ;;  %v24688_v29 = vadd.f32 %v11802_v53, %v11690_v40  ;;  %v11692_v54 = vadd.f32 %v11691_v39, %v24322_v48  ;;  %v17951_v48 = vld [vmem:[%s26125_s1 + $0x21c8] ss:$16 sps:$4 sm:$0xff]  }
 0x462   :  { %v11695_v30 = vpop.f32.mrf.mxu0  ;;  %12372 = vmatmul.mubr.bf16.gmra.mxu0 %v18332_v55  ;;  %v17965_v55 = vld [vmem:[%s26125_s1 + $0x218c] ss:$16 sps:$4 sm:$0xff]  }
 0x463   :  { %v11808_v60 = vpop.f32.mrf.mxu1  ;;  %12485 = vmatmul.mubr.bf16.gmra.mxu1 %v18333_v62  ;;  %v24697_v7 = vadd.f32 %v11804_v24, %v11692_v54  ;;  %v11696_v21 = vadd.f32 %v11695_v30, %v24328_v42  ;;  %12542 = vmatpush2.bf16.msra.mxu0 %v17945_v47  ;;  %v17962_v42 = vld [vmem:[%s26125_s1 + $0x23ac] ss:$16 sps:$4 sm:$0xff]   ;;  %v18334_v47 = vld [vmem:[%s26126_s0 + $0x614] ss:$144 sps:$4 sm:$0xff]   ;;  %v17960_v54 = vld [vmem:[%s26125_s1 + $0x23a8] ss:$16 sps:$4 sm:$0xff]  }
 0x464   :  { %12655 = vmatpush2.bf16.msra.mxu1 %v17948_v57  ;;  %v11697_v61 = vpop.f32.mrf.mxu0  ;;  %12543 = vmatprep.subr.bf16.mxu0 %v17953_v4  ;;  %v18335_v57 = vld [vmem:[%s26126_s0 + $0x61c] ss:$144 sps:$4 sm:$0xff]  }
 0x465   :  { %v11810_v6 = vpop.f32.mrf.mxu1  ;;  %12656 = vmatprep.subr.bf16.mxu1 %v17956_v32  ;;  %v24712_v53 = vadd.f32 %v11808_v60, %v11696_v21  ;;  %v11698_v40 = vadd.f32 %v11697_v61, %v24346_v44  ;;  %12381 = vmatprep.mubr.bf16.mxu0 %v18334_v47  ;;  %v17957_v44 = vld [vmem:[%s26125_s1 + $0x21a8] ss:$16 sps:$4 sm:$0xff]   ;;  %v18336_v61 = vld [vmem:[%s26126_s0 + $0x610] ss:$144 sps:$4 sm:$0xff]  }
 0x466   :  { %12494 = vmatprep.mubr.bf16.mxu1 %v18335_v57  ;;  %v11699_v39 = vpop.f32.mrf.mxu0 }
 0x467   :  { %v11812_v24 = vpop.f32.mrf.mxu1  ;;  %v24721_v4 = vadd.f32 %v11810_v6, %v11698_v40  ;;  %v11700_v32 = vadd.f32 %v11699_v39, %v24352_v34  ;;  %12544 = vmatpush2.bf16.msra.mxu0 %v17951_v48  ;;  %v17968_v34 = vld [vmem:[%s26125_s1 + $0x238c] ss:$16 sps:$4 sm:$0xff]   ;;  %v18337_v6 = vld [vmem:[%s26126_s0 + $0x618] ss:$144 sps:$4 sm:$0xff]  }
 0x468   :  { %12657 = vmatpush2.bf16.msra.mxu1 %v17954_v10  ;;  %v11701_v30 = vpop.f32.mrf.mxu0  ;;  %12545 = vmatprep.subr.bf16.mxu0 %v17959_v43  ;;  %v17966_v40 = vld [vmem:[%s26125_s1 + $0x2388] ss:$16 sps:$4 sm:$0xff]   ;;  %v17971_v39 = vld [vmem:[%s26125_s1 + $0x216c] ss:$16 sps:$4 sm:$0xff]  }
 0x469   :  { %v11814_v60 = vpop.f32.mrf.mxu1  ;;  %12658 = vmatprep.subr.bf16.mxu1 %v17962_v42  ;;  %v24736_v62 = vadd.f32 %v11812_v24, %v11700_v32  ;;  %v11702_v21 = vadd.f32 %v11701_v30, %v24370_v58  ;;  %v17963_v58 = vld [vmem:[%s26125_s1 + $0x2188] ss:$16 sps:$4 sm:$0xff]  }
 0x46a   :  { %v11705_v48 = vpop.f32.mrf.mxu0  ;;  %12382 = vmatmul.mubr.bf16.gmra.mxu0 %v18336_v61  ;;  %v17977_v61 = vld [vmem:[%s26125_s1 + $0x214c] ss:$16 sps:$4 sm:$0xff]  }
 0x46b   :  { %v11818_v10 = vpop.f32.mrf.mxu1  ;;  %12495 = vmatmul.mubr.bf16.gmra.mxu1 %v18337_v6  ;;  %v24745_v43 = vadd.f32 %v11814_v60, %v11702_v21  ;;  %v11706_v42 = vadd.f32 %v11705_v48, %v24376_v49  ;;  %12546 = vmatpush2.bf16.msra.mxu0 %v17957_v44  ;;  %v17974_v49 = vld [vmem:[%s26125_s1 + $0x236c] ss:$16 sps:$4 sm:$0xff]   ;;  %v18338_v44 = vld [vmem:[%s26126_s0 + $0x734] ss:$144 sps:$4 sm:$0xff]   ;;  %v17972_v21 = vld [vmem:[%s26125_s1 + $0x2368] ss:$16 sps:$4 sm:$0xff]  }
 0x46c   :  { %12659 = vmatpush2.bf16.msra.mxu1 %v17960_v54  ;;  %v11707_v47 = vpop.f32.mrf.mxu0  ;;  %12547 = vmatprep.subr.bf16.mxu0 %v17965_v55  ;;  %v18339_v54 = vld [vmem:[%s26126_s0 + $0x73c] ss:$144 sps:$4 sm:$0xff]  }
 0x46d   :  { %v11820_v57 = vpop.f32.mrf.mxu1  ;;  %12660 = vmatprep.subr.bf16.mxu1 %v17968_v34  ;;  %v24760_v24 = vadd.f32 %v11818_v10, %v11706_v42  ;;  %v11708_v32 = vadd.f32 %v11707_v47, %v24394_v22  ;;  %12391 = vmatprep.mubr.bf16.mxu0 %v18338_v44  ;;  %v17969_v22 = vld [vmem:[%s26125_s1 + $0x2168] ss:$16 sps:$4 sm:$0xff]   ;;  %v18340_v47 = vld [vmem:[%s26126_s0 + $0x730] ss:$144 sps:$4 sm:$0xff]  }
 0x46e   :  { %12504 = vmatprep.mubr.bf16.mxu1 %v18339_v54  ;;  %v11709_v30 = vpop.f32.mrf.mxu0 }
 0x46f   :  { %v11822_v60 = vpop.f32.mrf.mxu1  ;;  %v24769_v55 = vadd.f32 %v11820_v57, %v11708_v32  ;;  %v11710_v34 = vadd.f32 %v11709_v30, %v24400_v28  ;;  %12548 = vmatpush2.bf16.msra.mxu0 %v17963_v58  ;;  %v17980_v28 = vld [vmem:[%s26125_s1 + $0x234c] ss:$16 sps:$4 sm:$0xff]   ;;  %v18341_v57 = vld [vmem:[%s26126_s0 + $0x738] ss:$144 sps:$4 sm:$0xff]  }
 0x470   :  { %12661 = vmatpush2.bf16.msra.mxu1 %v17966_v40  ;;  %v11711_v48 = vpop.f32.mrf.mxu0  ;;  %12549 = vmatprep.subr.bf16.mxu0 %v17971_v39  ;;  %v17978_v32 = vld [vmem:[%s26125_s1 + $0x2348] ss:$16 sps:$4 sm:$0xff]   ;;  %v17983_v30 = vld [vmem:[%s26125_s1 + $0x212c] ss:$16 sps:$4 sm:$0xff]  }
 0x471   :  { %v11824_v10 = vpop.f32.mrf.mxu1  ;;  %12662 = vmatprep.subr.bf16.mxu1 %v17974_v49  ;;  %v24784_v6 = vadd.f32 %v11822_v60, %v11710_v34  ;;  %v11712_v42 = vadd.f32 %v11711_v48, %v24418_v37  ;;  %v17975_v37 = vld [vmem:[%s26125_s1 + $0x2148] ss:$16 sps:$4 sm:$0xff]  }
 0x472   :  { %v11715_v58 = vpop.f32.mrf.mxu0  ;;  %12392 = vmatmul.mubr.bf16.gmra.mxu0 %v18340_v47  ;;  %v17989_v47 = vld [vmem:[%s26125_s1 + $0x210c] ss:$16 sps:$4 sm:$0xff]  }
 0x473   :  { %v11828_v40 = vpop.f32.mrf.mxu1  ;;  %12505 = vmatmul.mubr.bf16.gmra.mxu1 %v18341_v57  ;;  %v24793_v39 = vadd.f32 %v11824_v10, %v11712_v42  ;;  %v11716_v49 = vadd.f32 %v11715_v58, %v24424_v63  ;;  %12550 = vmatpush2.bf16.msra.mxu0 %v17969_v22  ;;  %v17986_v63 = vld [vmem:[%s26125_s1 + $0x232c] ss:$16 sps:$4 sm:$0xff]   ;;  %v18342_v22 = vld [vmem:[%s26126_s0 + $0x854] ss:$144 sps:$4 sm:$0xff]   ;;  %v17984_v42 = vld [vmem:[%s26125_s1 + $0x2328] ss:$16 sps:$4 sm:$0xff]  }
 0x474   :  { %12663 = vmatpush2.bf16.msra.mxu1 %v17972_v21  ;;  %v11717_v44 = vpop.f32.mrf.mxu0  ;;  %12551 = vmatprep.subr.bf16.mxu0 %v17977_v61  ;;  %v18343_v21 = vld [vmem:[%s26126_s0 + $0x85c] ss:$144 sps:$4 sm:$0xff]  }
 0x475   :  { %v11830_v54 = vpop.f32.mrf.mxu1  ;;  %12664 = vmatprep.subr.bf16.mxu1 %v17980_v28  ;;  %v24808_v60 = vadd.f32 %v11828_v40, %v11716_v49  ;;  %v11718_v34 = vadd.f32 %v11717_v44, %v24442_v9  ;;  %12401 = vmatprep.mubr.bf16.mxu0 %v18342_v22  ;;  %v17981_v9 = vld [vmem:[%s26125_s1 + $0x2128] ss:$16 sps:$4 sm:$0xff]   ;;  %v18344_v44 = vld [vmem:[%s26126_s0 + $0x850] ss:$144 sps:$4 sm:$0xff]  }
 0x476   :  { %12514 = vmatprep.mubr.bf16.mxu1 %v18343_v21  ;;  %v11719_v48 = vpop.f32.mrf.mxu0 }
 0x477   :  { %v11832_v10 = vpop.f32.mrf.mxu1  ;;  %v24817_v61 = vadd.f32 %v11830_v54, %v11718_v34  ;;  %v11720_v28 = vadd.f32 %v11719_v48, %v24448_v23  ;;  %12552 = vmatpush2.bf16.msra.mxu0 %v17975_v37  ;;  %v17992_v23 = vld [vmem:[%s26125_s1 + $0x230c] ss:$16 sps:$4 sm:$0xff]   ;;  %v18345_v54 = vld [vmem:[%s26126_s0 + $0x858] ss:$144 sps:$4 sm:$0xff]  }
 0x478   :  { %12665 = vmatpush2.bf16.msra.mxu1 %v17978_v32  ;;  %v11721_v58 = vpop.f32.mrf.mxu0  ;;  %12553 = vmatprep.subr.bf16.mxu0 %v17983_v30  ;;  %v17990_v34 = vld [vmem:[%s26125_s1 + $0x2308] ss:$16 sps:$4 sm:$0xff]  }
 0x479   :  { %v11834_v40 = vpop.f32.mrf.mxu1  ;;  %12666 = vmatprep.subr.bf16.mxu1 %v17986_v63  ;;  %v24832_v57 = vadd.f32 %v11832_v10, %v11720_v28  ;;  %v11722_v49 = vadd.f32 %v11721_v58, %v24457_v1  ;;  %v17987_v1 = vld [vmem:[%s26125_s1 + $0x2108] ss:$16 sps:$4 sm:$0xff]   ;;  %v18346_v28 = vld [vmem:[%s26126_s0 + $0x84] ss:$144 sps:$4 sm:$0xff]  }
 0x47a   :  { %v11725_v37 = vpop.f32.mrf.mxu0  ;;  %12402 = vmatmul.mubr.bf16.gmra.mxu0 %v18344_v44  ;;  %v17993_v48 = vld [vmem:[%s26128_s3 + $0x78] sm:$0xff]   ;;  %v17995_v44 = vld [vmem:[%s26128_s3 + $0x70] sm:$0xff]  }
 0x47b   :  { %v11838_v32 = vpop.f32.mrf.mxu1  ;;  %12515 = vmatmul.mubr.bf16.gmra.mxu1 %v18345_v54  ;;  %v24841_v30 = vadd.f32 %v11834_v40, %v11722_v49  ;;  %v11726_v63 = vadd.f32 %v11725_v37, %v24472_v0  ;;  %12554 = vmatpush2.bf16.msra.mxu0 %v17981_v9  ;;  %v18347_v9 = vld [vmem:[%s26126_s0 + $0x8c] ss:$144 sps:$4 sm:$0xff]  }
 0x47c   :  { %12667 = vmatpush2.bf16.msra.mxu1 %v17984_v42  ;;  %v11727_v22 = vpop.f32.mrf.mxu0  ;;  %12555 = vmatprep.subr.bf16.mxu0 %v17989_v47  ;;  %v17994_v49 = vld [vmem:[%s26128_s3 + $0x38] sm:$0xff]  }
 0x47d   :  { %v11840_v21 = vpop.f32.mrf.mxu1  ;;  %12668 = vmatprep.subr.bf16.mxu1 %v17992_v23  ;;  %v24853_v10 = vadd.f32 %v11838_v32, %v11726_v63  ;;  %v11728_v0 = vadd.f32 %v11727_v22, %v24481_v12  ;;  %12557 = vmatprep.mubr.bf16.mxu0 %v18346_v28  ;;  %v18350_v22 = vld [vmem:[%s26126_s0 + $0x1a4] ss:$144 sps:$4 sm:$0xff]  }
 0x47e   :  { %12670 = vmatprep.mubr.bf16.mxu1 %v18347_v9  ;;  %v11729_v42 = vpop.f32.mrf.mxu0  ;;  %v17996_v28 = vld [vmem:[%s26128_s3 + $0x30] sm:$0xff]  }
 0x47f   :  { %v11842_v58 = vpop.f32.mrf.mxu1  ;;  %v24862_v40 = vadd.f32 %v11840_v21, %v11728_v0  ;;  %v11730_v47 = vadd.f32 %v11729_v42, %v24496_v16  ;;  %12556 = vmatpush2.bf16.msra.mxu0 %v17987_v1  ;;  %v18348_v16 = vld [vmem:[%s26126_s0 + $0x80] ss:$144 sps:$4 sm:$0xff]   ;;  %v18349_v1 = vld [vmem:[%s26126_s0 + $0x88] ss:$144 sps:$4 sm:$0xff]   ;;  %v18351_v21 = vld [vmem:[%s26126_s0 + $0x1ac] ss:$144 sps:$4 sm:$0xff]  }
 0x480   :  { %12669 = vmatpush2.bf16.msra.mxu1 %v17990_v34  ;;  %v11731_v23 = vpop.f32.mrf.mxu0  ;;  %15704 = vmatprep.subr.bf16.mxu0 %v17993_v48  ;;  %v17997_v42 = vld [vmem:[%s26128_s3 + $0x68] sm:$0xff]  }
 0x481   :  { %v11844_v12 = vpop.f32.mrf.mxu1  ;;  %v24868_v37 = vadd.f32 %v11842_v58, %v11730_v47  ;;  %v11732_v32 = vadd.f32 %v11731_v23, %v24505_v33 }
 0x482   :  { %v11881_v54 = vpop.f32.mrf.mxu0  ;;  %12558 = vmatmul.mubr.bf16.vlgmr.msra.gmra.mxu0 %v18348_v16 }
 0x483   :  { %v11994_v63 = vpop.f32.mrf.mxu1  ;;  %12671 = vmatmul.mubr.bf16.vlgmr.msra.gmra.mxu1 %v18349_v1  ;;  %v24880_v34 = vadd.f32 %v11844_v12, %v11732_v32  ;;  %v11882_v33 = vadd.f32 %v11881_v54, %v24520_v38  ;;  %12567 = vmatprep.mubr.bf16.mxu0 %v18350_v22  ;;  %v17998_v54 = vld [vmem:[%s26128_s3 + $0x28] sm:$0xff]  }
 0x484   :  { %12680 = vmatprep.mubr.bf16.mxu1 %v18351_v21  ;;  %v11883_v48 = vpop.f32.mrf.mxu0  ;;  %15705 = vmatpush3.bf16.msra.mxu0 %v17994_v49  ;;  %v18354_v21 = vld [vmem:[%s26126_s0 + $0x2c4] ss:$144 sps:$4 sm:$0xff]  }
 0x485   :  { %v11996_v0 = vpop.f32.mrf.mxu1  ;;  %v24892_v9 = vadd.f32 %v11994_v63, %v11882_v33  ;;  %v11884_v38 = vadd.f32 %v11883_v48, %v24529_v17  ;;  %15706 = vmatprep.subr.bf16.mxu0 %v17995_v44  ;;  %v17999_v44 = vld [vmem:[%s26128_s3 + $0x60] sm:$0xff]   ;;  %v18353_v33 = vld [vmem:[%s26126_s0 + $0x1a8] ss:$144 sps:$4 sm:$0xff]   ;;  %v18355_v48 = vld [vmem:[%s26126_s0 + $0x2cc] ss:$144 sps:$4 sm:$0xff]  }
 0x486   :  { %v11885_v58 = vpop.f32.mrf.mxu0 }
 0x487   :  { %v11998_v47 = vpop.f32.mrf.mxu1  ;;  %v24898_v23 = vadd.f32 %v11996_v0, %v11884_v38  ;;  %v11886_v12 = vadd.f32 %v11885_v58, %v24544_v15  ;;  %v18352_v15 = vld [vmem:[%s26126_s0 + $0x1a0] ss:$144 sps:$4 sm:$0xff]   ;;  %v18001_v58 = vld [vmem:[%s26128_s3 + $0x58] sm:$0xff]  }
 0x488   :  { %v11887_v49 = vpop.f32.mrf.mxu0  ;;  %15707 = vmatpush3.bf16.msra.mxu0 %v17996_v28  ;;  %v18000_v38 = vld [vmem:[%s26128_s3 + $0x20] sm:$0xff]  }
 0x489   :  { %v12000_v32 = vpop.f32.mrf.mxu1  ;;  %v24904_v63 = vadd.f32 %v11998_v47, %v11886_v12  ;;  %v11888_v17 = vadd.f32 %v11887_v49, %v24553_v18  ;;  %15708 = vmatprep.subr.bf16.mxu0 %v17997_v42 }
 0x48a   :  { %v11891_v16 = vpop.f32.mrf.mxu0  ;;  %12568 = vmatmul.mubr.bf16.gmra.mxu0 %v18352_v15 }
 0x48b   :  { %v12004_v1 = vpop.f32.mrf.mxu1  ;;  %12681 = vmatmul.mubr.bf16.gmra.mxu1 %v18353_v33  ;;  %v24916_v22 = vadd.f32 %v12000_v32, %v11888_v17  ;;  %v11892_v18 = vadd.f32 %v11891_v16, %v24568_v36  ;;  %12577 = vmatprep.mubr.bf16.mxu0 %v18354_v21  ;;  %v18002_v16 = vld [vmem:[%s26128_s3 + $0x18] sm:$0xff]  }
 0x48c   :  { %12690 = vmatprep.mubr.bf16.mxu1 %v18355_v48  ;;  %v11893_v0 = vpop.f32.mrf.mxu0  ;;  %15709 = vmatpush3.bf16.msra.mxu0 %v17998_v54  ;;  %v18358_v48 = vld [vmem:[%s26126_s0 + $0x3e4] ss:$144 sps:$4 sm:$0xff]  }
 0x48d   :  { %v12006_v28 = vpop.f32.mrf.mxu1  ;;  %v24928_v42 = vadd.f32 %v12004_v1, %v11892_v18  ;;  %v11894_v36 = vadd.f32 %v11893_v0, %v24577_v27  ;;  %15710 = vmatprep.subr.bf16.mxu0 %v17999_v44  ;;  %v18003_v44 = vld [vmem:[%s26128_s3 + $0x50] sm:$0xff]   ;;  %v18357_v18 = vld [vmem:[%s26126_s0 + $0x2c8] ss:$144 sps:$4 sm:$0xff]   ;;  %v18359_v0 = vld [vmem:[%s26126_s0 + $0x3ec] ss:$144 sps:$4 sm:$0xff]  }
 0x48e   :  { %v11895_v47 = vpop.f32.mrf.mxu0 }
 0x48f   :  { %v12008_v12 = vpop.f32.mrf.mxu1  ;;  %v24934_v49 = vadd.f32 %v12006_v28, %v11894_v36  ;;  %v11896_v32 = vadd.f32 %v11895_v47, %v24592_v31  ;;  %v18356_v31 = vld [vmem:[%s26126_s0 + $0x2c0] ss:$144 sps:$4 sm:$0xff]   ;;  %v18005_v47 = vld [vmem:[%s26128_s3 + $0x48] sm:$0xff]  }
 0x490   :  { %v11897_v54 = vpop.f32.mrf.mxu0  ;;  %15711 = vmatpush3.bf16.msra.mxu0 %v18000_v38  ;;  %v18004_v36 = vld [vmem:[%s26128_s3 + $0x10] sm:$0xff]  }
 0x491   :  { %v12010_v17 = vpop.f32.mrf.mxu1  ;;  %v24940_v1 = vadd.f32 %v12008_v12, %v11896_v32  ;;  %v11898_v27 = vadd.f32 %v11897_v54, %v24601_v3  ;;  %15712 = vmatprep.subr.bf16.mxu0 %v18001_v58  ;;  %v18009_v12 = vld [vmem:[%s26128_s3 + $0xf8] sm:$0xff]  }
 0x492   :  { %v11901_v15 = vpop.f32.mrf.mxu0  ;;  %12578 = vmatmul.mubr.bf16.gmra.mxu0 %v18356_v31  ;;  %v18010_v32 = vld [vmem:[%s26128_s3 + $0xb8] sm:$0xff]   ;;  %15768 = vmatprep.subr.bf16.mxu1 %v18009_v12  ;;  %v18008_v12 = vld [vmem:[%s26128_s3] sm:$0xff]  }
 0x493   :  { %v12014_v33 = vpop.f32.mrf.mxu1  ;;  %12691 = vmatmul.mubr.bf16.gmra.mxu1 %v18357_v18  ;;  %v24952_v21 = vadd.f32 %v12010_v17, %v11898_v27  ;;  %v11902_v3 = vadd.f32 %v11901_v15, %v24616_v46  ;;  %12587 = vmatprep.mubr.bf16.mxu0 %v18358_v48  ;;  %v18006_v15 = vld [vmem:[%s26128_s3 + $0x8] sm:$0xff]   ;;  %v18007_v18 = vld [vmem:[%s26128_s3 + $0x40] sm:$0xff]  }
 0x494   :  { %12700 = vmatprep.mubr.bf16.mxu1 %v18359_v0  ;;  %v11903_v28 = vpop.f32.mrf.mxu0  ;;  %15713 = vmatpush3.bf16.msra.mxu0 %v18002_v16  ;;  %v18360_v48 = vld [vmem:[%s26126_s0 + $0x3e0] ss:$144 sps:$4 sm:$0xff]   ;;  %v18361_v0 = vld [vmem:[%s26126_s0 + $0x3e8] ss:$144 sps:$4 sm:$0xff]  }
 0x495   :  { %v12016_v38 = vpop.f32.mrf.mxu1  ;;  %v24964_v58 = vadd.f32 %v12014_v33, %v11902_v3  ;;  %v11904_v46 = vadd.f32 %v11903_v28, %v24625_v19  ;;  %15714 = vmatprep.subr.bf16.mxu0 %v18003_v44  ;;  %15769 = vmatpush3.bf16.msra.mxu1 %v18010_v32 }
 0x496   :  { %v11905_v54 = vpop.f32.mrf.mxu0 }
 0x497   :  { %v12018_v17 = vpop.f32.mrf.mxu1  ;;  %v24976_v16 = vadd.f32 %v12016_v38, %v11904_v46  ;;  %v11906_v27 = vadd.f32 %v11905_v54, %v24640_v8  ;;  %v18362_v38 = vld [vmem:[%s26126_s0 + $0x504] ss:$144 sps:$4 sm:$0xff]  }
 0x498   :  { %v11907_v19 = vpop.f32.mrf.mxu0  ;;  %15715 = vmatpush3.bf16.msra.mxu0 %v18004_v36  ;;  %v18363_v36 = vld [vmem:[%s26126_s0 + $0x50c] ss:$144 sps:$4 sm:$0xff]   ;;  %v18011_v54 = vld [vmem:[%s26128_s3 + $0xf0] sm:$0xff]  }
 0x499   :  { %v12020_v44 = vpop.f32.mrf.mxu1  ;;  %v24982_v33 = vadd.f32 %v12018_v17, %v11906_v27  ;;  %v11908_v31 = vadd.f32 %v11907_v19, %v24649_v20  ;;  %15716 = vmatprep.subr.bf16.mxu0 %v18005_v47  ;;  %v18012_v17 = vld [vmem:[%s26128_s3 + $0xb0] sm:$0xff]   ;;  %15770 = vmatprep.subr.bf16.mxu1 %v18011_v54  ;;  %v18014_v54 = vld [vmem:[%s26128_s3 + $0xa8] sm:$0xff]  }
 0x49a   :  { %v11911_v3 = vpop.f32.mrf.mxu0  ;;  %12588 = vmatmul.mubr.bf16.gmra.mxu0 %v18360_v48  ;;  %15771 = vmatpush3.bf16.msra.mxu1 %v18012_v17 }
 0x49b   :  { %v12024_v8 = vpop.f32.mrf.mxu1  ;;  %12701 = vmatmul.mubr.bf16.gmra.mxu1 %v18361_v0  ;;  %v24994_v28 = vadd.f32 %v12020_v44, %v11908_v31  ;;  %v11912_v20 = vadd.f32 %v11911_v3, %v24664_v52  ;;  %12597 = vmatprep.mubr.bf16.mxu0 %v18362_v38  ;;  %v18364_v0 = vld [vmem:[%s26126_s0 + $0x500] ss:$144 sps:$4 sm:$0xff]  }
 0x49c   :  { %12710 = vmatprep.mubr.bf16.mxu1 %v18363_v36  ;;  %v11913_v46 = vpop.f32.mrf.mxu0  ;;  %15717 = vmatpush3.bf16.msra.mxu0 %v18006_v15  ;;  %v18367_v36 = vld [vmem:[%s26126_s0 + $0x62c] ss:$144 sps:$4 sm:$0xff]  }
 0x49d   :  { %v12026_v47 = vpop.f32.mrf.mxu1  ;;  %v25006_v32 = vadd.f32 %v12024_v8, %v11912_v20  ;;  %v11914_v52 = vadd.f32 %v11913_v46, %v24673_v50  ;;  %15718 = vmatprep.subr.bf16.mxu0 %v18007_v18 }
 0x49e   :  { %v11915_v27 = vpop.f32.mrf.mxu0 }
 0x49f   :  { %v12028_v19 = vpop.f32.mrf.mxu1  ;;  %v25015_v44 = vadd.f32 %v12026_v47, %v11914_v52  ;;  %v11916_v15 = vadd.f32 %v11915_v27, %v24688_v29  ;;  %v18365_v29 = vld [vmem:[%s26126_s0 + $0x508] ss:$144 sps:$4 sm:$0xff]  }
 0x4a0   :  { %v11917_v31 = vpop.f32.mrf.mxu0  ;;  %15719 = vmatpush3.bf16.msra.mxu0 %v18008_v12 }
 0x4a1   :  { %v12030_v3 = vpop.f32.mrf.mxu1  ;;  %v25018_v50 = vadd.f32 %v12028_v19, %v11916_v15  ;;  %v11918_v18 = vadd.f32 %v11917_v31, %v24697_v7  ;;  %v18366_v7 = vld [vmem:[%s26126_s0 + $0x624] ss:$144 sps:$4 sm:$0xff]  }
 0x4a2   :  { %v11921_v8 = vpop.f32.mrf.mxu0  ;;  %12598 = vmatmul.mubr.bf16.gmra.mxu0 %v18364_v0  ;;  %v18368_v0 = vld [vmem:[%s26126_s0 + $0x620] ss:$144 sps:$4 sm:$0xff]  }
 0x4a3   :  { %v12034_v48 = vpop.f32.mrf.mxu1  ;;  %12711 = vmatmul.mubr.bf16.gmra.mxu1 %v18365_v29  ;;  %v25027_v20 = vadd.f32 %v12030_v3, %v11918_v18  ;;  %v11922_v38 = vadd.f32 %v11921_v8, %v24712_v53  ;;  %12607 = vmatprep.mubr.bf16.mxu0 %v18366_v7  ;;  %v18013_v53 = vld [vmem:[%s26128_s3 + $0xe8] sm:$0xff]  }
 0x4a4   :  { %12720 = vmatprep.mubr.bf16.mxu1 %v18367_v36  ;;  %v11923_v46 = vpop.f32.mrf.mxu0  ;;  %15772 = vmatprep.subr.bf16.mxu1 %v18013_v53 }
 0x4a5   :  { %v12036_v47 = vpop.f32.mrf.mxu1  ;;  %v25036_v12 = vadd.f32 %v12034_v48, %v11922_v38  ;;  %v11924_v52 = vadd.f32 %v11923_v46, %v24721_v4  ;;  %15773 = vmatpush3.bf16.msra.mxu1 %v18014_v54  ;;  %v18370_v38 = vld [vmem:[%s26126_s0 + $0x744] ss:$144 sps:$4 sm:$0xff]  }
 0x4a6   :  { %v11925_v17 = vpop.f32.mrf.mxu0 }
 0x4a7   :  { %v12038_v27 = vpop.f32.mrf.mxu1  ;;  %v25045_v19 = vadd.f32 %v12036_v47, %v11924_v52  ;;  %v11926_v15 = vadd.f32 %v11925_v17, %v24736_v62  ;;  %v18369_v62 = vld [vmem:[%s26126_s0 + $0x628] ss:$144 sps:$4 sm:$0xff]   ;;  %v18016_v52 = vld [vmem:[%s26128_s3 + $0xa0] sm:$0xff]  }
 0x4a8   :  { %v11927_v31 = vpop.f32.mrf.mxu0 }
 0x4a9   :  { %v25048_v3 = vpop.f32.mrf.mxu1  ;;  %v25050_v4 = vadd.f32 %v12038_v27, %v11926_v15  ;;  %v25053_v18 = vadd.f32 %v11927_v31, %v24745_v43  ;;  %v18371_v43 = vld [vmem:[%s26126_s0 + $0x74c] ss:$144 sps:$4 sm:$0xff]  }
 0x4aa   :  { %26199 = vst [vmem:[#allocation34_spill] sm:$0xff] %v25048_v3  ;;  %v11931_v8 = vpop.f32.mrf.mxu0  ;;  %12608 = vmatmul.mubr.bf16.gmra.mxu0 %v18368_v0 }
 0x4ab   :  { %26200 = vst [vmem:[#allocation35_spill] sm:$0xff] %v25053_v18  ;;  %v12044_v48 = vpop.f32.mrf.mxu1  ;;  %12721 = vmatmul.mubr.bf16.gmra.mxu1 %v18369_v62  ;;  %v11932_v29 = vadd.f32 %v11931_v8, %v24760_v24  ;;  %12617 = vmatprep.mubr.bf16.mxu0 %v18370_v38  ;;  %v18015_v24 = vld [vmem:[%s26128_s3 + $0xe0] sm:$0xff]  }
 0x4ac   :  { %12730 = vmatprep.mubr.bf16.mxu1 %v18371_v43  ;;  %v11933_v7 = vpop.f32.mrf.mxu0  ;;  %15774 = vmatprep.subr.bf16.mxu1 %v18015_v24  ;;  %v18372_v62 = vld [vmem:[%s26126_s0 + $0x740] ss:$144 sps:$4 sm:$0xff]   ;;  %v18374_v38 = vld [vmem:[%s26126_s0 + $0x864] ss:$144 sps:$4 sm:$0xff]  }
 0x4ad   :  { %v12046_v36 = vpop.f32.mrf.mxu1  ;;  %v25068_v46 = vadd.f32 %v12044_v48, %v11932_v29  ;;  %v11934_v47 = vadd.f32 %v11933_v7, %v24769_v55  ;;  %15775 = vmatpush3.bf16.msra.mxu1 %v18016_v52  ;;  %v18018_v52 = vld [vmem:[%s26128_s3 + $0x98] sm:$0xff]  }
 0x4ae   :  { %v11935_v53 = vpop.f32.mrf.mxu0 }
 0x4af   :  { %v12048_v54 = vpop.f32.mrf.mxu1  ;;  %v25077_v17 = vadd.f32 %v12046_v36, %v11934_v47  ;;  %v11936_v27 = vadd.f32 %v11935_v53, %v24784_v6  ;;  %v18373_v6 = vld [vmem:[%s26126_s0 + $0x748] ss:$144 sps:$4 sm:$0xff]   ;;  %v12756_v36 = vmul.f32 %v22627_v5, %v22627_v5 }
 0x4b0   :  { %v11937_v15 = vpop.f32.mrf.mxu0 }
 0x4b1   :  { %v25080_v31 = vpop.f32.mrf.mxu1  ;;  %v25082_v55 = vadd.f32 %v12048_v54, %v11936_v27  ;;  %v25085_v8 = vadd.f32 %v11937_v15, %v24793_v39  ;;  %v18375_v39 = vld [vmem:[%s26126_s0 + $0x86c] ss:$144 sps:$4 sm:$0xff]   ;;  %v12752_v27 = vmul.f32 %v22603_v51, %v22603_v51  ;;  %v26233_v51 = vld [vmem:[#allocation32_spill] sm:$0xff] }
 0x4b2   :  { %26201 = vst [vmem:[#allocation36_spill] sm:$0xff] %v25080_v31  ;;  %v11941_v48 = vpop.f32.mrf.mxu0  ;;  %12618 = vmatmul.mubr.bf16.gmra.mxu0 %v18372_v62 }
 0x4b3   :  { %26202 = vst [vmem:[#allocation37_spill] sm:$0xff] %v25085_v8  ;;  %v12054_v0 = vpop.f32.mrf.mxu1  ;;  %12731 = vmatmul.mubr.bf16.gmra.mxu1 %v18373_v6  ;;  %v11942_v29 = vadd.f32 %v11941_v48, %v24808_v60  ;;  %12627 = vmatprep.mubr.bf16.mxu0 %v18374_v38  ;;  %v18017_v60 = vld [vmem:[%s26128_s3 + $0xd8] sm:$0xff]  }
 0x4b4   :  { %12740 = vmatprep.mubr.bf16.mxu1 %v18375_v39  ;;  %v11943_v43 = vpop.f32.mrf.mxu0  ;;  %15776 = vmatprep.subr.bf16.mxu1 %v18017_v60  ;;  %v12764_v60 = vmul.f32 %v22675_v45, %v22675_v45 }
 0x4b5   :  { %v12056_v7 = vpop.f32.mrf.mxu1  ;;  %v25102_v47 = vadd.f32 %v12054_v0, %v11942_v29  ;;  %v11944_v24 = vadd.f32 %v11943_v43, %v24817_v61  ;;  %15777 = vmatpush3.bf16.msra.mxu1 %v18018_v52  ;;  %v12816_v29 = vpack.c.bf16 %v12756_v36, %v12752_v27  ;;  %v18376_v43 = vld [vmem:[%s26126_s0 + $0x860] ss:$144 sps:$4 sm:$0xff]   ;;  %v12751_v27 = vmul.f32 %v22591_v41, %v22591_v41 }
 0x4b6   :  { %v11945_v53 = vpop.f32.mrf.mxu0  ;;  %v12811_v41 = vmul.f32 %v26233_v51, %v26233_v51 }
 0x4b7   :  { %v12058_v54 = vpop.f32.mrf.mxu1  ;;  %v25113_v15 = vadd.f32 %v12056_v7, %v11944_v24  ;;  %v11946_v48 = vadd.f32 %v11945_v53, %v24832_v57  ;;  %v18377_v57 = vld [vmem:[%s26126_s0 + $0x868] ss:$144 sps:$4 sm:$0xff]  }
 0x4b8   :  { %v11947_v0 = vpop.f32.mrf.mxu0 }
 0x4b9   :  { %v25116_v61 = vpop.f32.mrf.mxu1  ;;  %v25118_v62 = vadd.f32 %v12058_v54, %v11946_v48  ;;  %v25121_v6 = vadd.f32 %v11947_v0, %v24841_v30  ;;  %v12755_v30 = vmul.f32 %v22615_v59, %v22615_v59  ;;  %v18019_v54 = vld [vmem:[%s26128_s3 + $0xd0] sm:$0xff]  }
 0x4ba   :  { %26203 = vst [vmem:[#allocation38_spill] sm:$0xff] %v25116_v61  ;;  %v11951_v38 = vpop.f32.mrf.mxu0  ;;  %12628 = vmatmul.mubr.bf16.gmra.mxu0 %v18376_v43  ;;  %15778 = vmatprep.subr.bf16.mxu1 %v18019_v54  ;;  %v12772_v54 = vmul.f32 %v22723_v26, %v22723_v26 }
 0x4bb   :  { %26204 = vst [vmem:[#allocation39_spill] sm:$0xff] %v25121_v6  ;;  %v12064_v39 = vpop.f32.mrf.mxu1  ;;  %12741 = vmatmul.mubr.bf16.gmra.mxu1 %v18377_v57  ;;  %v11952_v7 = vadd.f32 %v11951_v38, %v24853_v10  ;;  %13135 = vmatprep.mubr.bf16.mxu0 %v12816_v29  ;;  %v18020_v10 = vld [vmem:[%s26128_s3 + $0x90] sm:$0xff]   ;;  %v12760_v29 = vmul.f32 %v22651_v25, %v22651_v25 }
 0x4bc   :  { %v11953_v24 = vpop.f32.mrf.mxu0  ;;  %15779 = vmatpush3.bf16.msra.mxu1 %v18020_v10 }
 0x4bd   :  { %v12066_v36 = vpop.f32.mrf.mxu1  ;;  %v25134_v52 = vadd.f32 %v12064_v39, %v11952_v7  ;;  %v11954_v53 = vadd.f32 %v11953_v24, %v24862_v40  ;;  %v12815_v39 = vpack.c.bf16 %v12755_v30, %v12751_v27  ;;  %v12820_v45 = vpack.c.bf16 %v12764_v60, %v12760_v29 }
 0x4be   :  { %v11955_v48 = vpop.f32.mrf.mxu0  ;;  %v12759_v60 = vmul.f32 %v22639_v14, %v22639_v14 }
 0x4bf   :  { %v12068_v0 = vpop.f32.mrf.mxu1  ;;  %v25147_v38 = vadd.f32 %v12066_v36, %v11954_v53  ;;  %v11956_v40 = vadd.f32 %v11955_v48, %v24868_v37  ;;  %v12763_v37 = vmul.f32 %v22663_v35, %v22663_v35 }
 0x4c0   :  { %v11957_v43 = vpop.f32.mrf.mxu0 }
 0x4c1   :  { %v25150_v57 = vpop.f32.mrf.mxu1  ;;  %v25152_v7 = vadd.f32 %v12068_v0, %v11956_v40  ;;  %v25155_v24 = vadd.f32 %v11957_v43, %v24880_v34  ;;  %v18021_v0 = vld [vmem:[%s26128_s3 + $0xc8] sm:$0xff]  }
 0x4c2   :  { %26205 = vst [vmem:[#allocation40_spill] sm:$0xff] %v25150_v57  ;;  %v12107_v5 = vpop.f32.mrf.mxu0  ;;  %13136 = vmatmul.mubr.bf16.vlgmr.msra.gmra.mxu0 %v12815_v39  ;;  %15780 = vmatprep.subr.bf16.mxu1 %v18021_v0  ;;  %v18024_v0 = vld [vmem:[%s26128_s3 + $0x80] sm:$0xff]  }
 0x4c3   :  { %26206 = vst [vmem:[#allocation41_spill] sm:$0xff] %v25155_v24  ;;  %v12220_v59 = vpop.f32.mrf.mxu1  ;;  %v12108_v36 = vadd.f32 %v12107_v5, %v24892_v9  ;;  %13143 = vmatprep.mubr.bf16.mxu0 %v12820_v45  ;;  %v12768_v5 = vmul.f32 %v22699_v2, %v22699_v2 }
 0x4c4   :  { %v12109_v30 = vpop.f32.mrf.mxu0 }
 0x4c5   :  { %v12222_v53 = vpop.f32.mrf.mxu1  ;;  %v25162_v10 = vadd.f32 %v12220_v59, %v12108_v36  ;;  %v12110_v34 = vadd.f32 %v12109_v30, %v24898_v23  ;;  %v18022_v59 = vld [vmem:[%s26128_s3 + $0x88] sm:$0xff]   ;;  %v12819_v23 = vpack.c.bf16 %v12763_v37, %v12759_v60  ;;  %v12824_v36 = vpack.c.bf16 %v12772_v54, %v12768_v5  ;;  %v18023_v54 = vld [vmem:[%s26128_s3 + $0xc0] sm:$0xff]  }
 0x4c6   :  { %v12111_v27 = vpop.f32.mrf.mxu0  ;;  %15781 = vmatpush3.bf16.msra.mxu1 %v18022_v59  ;;  %v12771_v37 = vmul.f32 %v22711_v11, %v22711_v11  ;;  %v26207_v59 = vld [vmem:[#allocation15_spill] sm:$0xff] }
 0x4c7   :  { %v12224_v48 = vpop.f32.mrf.mxu1  ;;  %v25169_v45 = vadd.f32 %v12222_v53, %v12110_v34  ;;  %v12112_v9 = vadd.f32 %v12111_v27, %v24904_v63  ;;  %v12780_v27 = vmul.f32 %v22771_v13, %v22771_v13  ;;  %15782 = vmatprep.subr.bf16.mxu1 %v18023_v54 }
 0x4c8   :  { %v12113_v29 = vpop.f32.mrf.mxu0 }
 0x4c9   :  { %v25178_v40 = vpop.f32.mrf.mxu1  ;;  %v25180_v39 = vadd.f32 %v12224_v48, %v12112_v9  ;;  %v25183_v43 = vadd.f32 %v12113_v29, %v24916_v22 }
 0x4ca   :  { %v12117_v63 = vpop.f32.mrf.mxu0  ;;  %13144 = vmatmul.mubr.bf16.gmra.mxu0 %v12819_v23  ;;  %v12776_v23 = vmul.f32 %v26207_v59, %v26207_v59  ;;  %15783 = vmatpush3.bf16.msra.mxu1 %v18024_v0  ;;  %v26210_v0 = vld [vmem:[#allocation14_spill] sm:$0xff] }
 0x4cb   :  { %v12230_v30 = vpop.f32.mrf.mxu1  ;;  %v12118_v53 = vadd.f32 %v12117_v63, %v24928_v42  ;;  %13151 = vmatprep.mubr.bf16.mxu0 %v12824_v36  ;;  %v12767_v42 = vmul.f32 %v22687_v56, %v22687_v56  ;;  %v26226_v56 = vld [vmem:[#allocation28_spill] sm:$0xff] }
 0x4cc   :  { %v12119_v34 = vpop.f32.mrf.mxu0  ;;  %v12828_v13 = vpack.c.bf16 %v12780_v27, %v12776_v23  ;;  %v12775_v27 = vmul.f32 %v26210_v0, %v26210_v0  ;;  %v12803_v35 = vmul.f32 %v26226_v56, %v26226_v56 }
 0x4cd   :  { %v12232_v60 = vpop.f32.mrf.mxu1  ;;  %v25190_v48 = vadd.f32 %v12230_v30, %v12118_v53  ;;  %v12120_v22 = vadd.f32 %v12119_v34, %v24934_v49  ;;  %v12823_v36 = vpack.c.bf16 %v12771_v37, %v12767_v42  ;;  %v26209_v42 = vld [vmem:[#allocation21_spill] sm:$0xff] }
 0x4ce   :  { %v12121_v5 = vpop.f32.mrf.mxu0 }
 0x4cf   :  { %v12234_v9 = vpop.f32.mrf.mxu1  ;;  %v25203_v29 = vadd.f32 %v12232_v60, %v12120_v22  ;;  %v12122_v49 = vadd.f32 %v12121_v5, %v24940_v1  ;;  %v26208_v22 = vld [vmem:[#allocation16_spill] sm:$0xff]  ;;  %v12788_v5 = vmul.f32 %v26209_v42, %v26209_v42 }
 0x4d0   :  { %v12123_v63 = vpop.f32.mrf.mxu0  ;;  %v12779_v1 = vmul.f32 %v26208_v22, %v26208_v22 }
 0x4d1   :  { %v25206_v30 = vpop.f32.mrf.mxu1  ;;  %v25208_v53 = vadd.f32 %v12234_v9, %v12122_v49  ;;  %v25211_v34 = vadd.f32 %v12123_v63, %v24952_v21 }
 0x4d2   :  { %v12127_v26 = vpop.f32.mrf.mxu0  ;;  %13152 = vmatmul.mubr.bf16.gmra.mxu0 %v12823_v36  ;;  %v26211_v36 = vld [vmem:[#allocation19_spill] sm:$0xff]  ;;  %v12827_v63 = vpack.c.bf16 %v12779_v1, %v12775_v27  ;;  %v26213_v27 = vld [vmem:[#allocation25_spill] sm:$0xff] }
 0x4d3   :  { %v12240_v11 = vpop.f32.mrf.mxu1  ;;  %v12128_v60 = vadd.f32 %v12127_v26, %v24964_v58  ;;  %13159 = vmatprep.mubr.bf16.mxu0 %v12828_v13  ;;  %v12784_v26 = vmul.f32 %v26211_v36, %v26211_v36 }
 0x4d4   :  { %v12129_v37 = vpop.f32.mrf.mxu0 }
 0x4d5   :  { %v12242_v54 = vpop.f32.mrf.mxu1  ;;  %v25218_v9 = vadd.f32 %v12240_v11, %v12128_v60  ;;  %v12130_v21 = vadd.f32 %v12129_v37, %v24976_v16  ;;  %v12832_v60 = vpack.c.bf16 %v12788_v5, %v12784_v26 }
 0x4d6   :  { %v12131_v23 = vpop.f32.mrf.mxu0 }
 0x4d7   :  { %v12244_v49 = vpop.f32.mrf.mxu1  ;;  %v25225_v13 = vadd.f32 %v12242_v54, %v12130_v21  ;;  %v12132_v58 = vadd.f32 %v12131_v23, %v24982_v33  ;;  %v26212_v54 = vld [vmem:[#allocation20_spill] sm:$0xff]  ;;  %v12796_v23 = vmul.f32 %v26213_v27, %v26213_v27 }
 0x4d8   :  { %v12133_v22 = vpop.f32.mrf.mxu0  ;;  %v12787_v21 = vmul.f32 %v26212_v54, %v26212_v54 }
 0x4d9   :  { %v25228_v59 = vpop.f32.mrf.mxu1  ;;  %v25230_v11 = vadd.f32 %v12244_v49, %v12132_v58  ;;  %v25233_v16 = vadd.f32 %v12133_v22, %v24994_v28  ;;  %v26214_v22 = vld [vmem:[#allocation18_spill] sm:$0xff] }
 0x4da   :  { %v12137_v37 = vpop.f32.mrf.mxu0  ;;  %13160 = vmatmul.mubr.bf16.gmra.mxu0 %v12827_v63  ;;  %v12783_v5 = vmul.f32 %v26214_v22, %v26214_v22  ;;  %v26215_v63 = vld [vmem:[#allocation23_spill] sm:$0xff] }
 0x4db   :  { %v12250_v42 = vpop.f32.mrf.mxu1  ;;  %v12138_v0 = vadd.f32 %v12137_v37, %v25006_v32  ;;  %13167 = vmatprep.mubr.bf16.mxu0 %v12832_v60  ;;  %v12792_v32 = vmul.f32 %v26215_v63, %v26215_v63 }
 0x4dc   :  { %v12139_v33 = vpop.f32.mrf.mxu0  ;;  %v12831_v54 = vpack.c.bf16 %v12787_v21, %v12783_v5  ;;  %v26220_v5 = vld [vmem:[#allocation29_spill] sm:$0xff] }
 0x4dd   :  { %v12252_v1 = vpop.f32.mrf.mxu1  ;;  %v25240_v49 = vadd.f32 %v12250_v42, %v12138_v0  ;;  %v12140_v28 = vadd.f32 %v12139_v33, %v25015_v44  ;;  %v12836_v0 = vpack.c.bf16 %v12796_v23, %v12792_v32  ;;  %v26222_v32 = vld [vmem:[#allocation27_spill] sm:$0xff] }
 0x4de   :  { %v12141_v26 = vpop.f32.mrf.mxu0 }
 0x4df   :  { %v12254_v58 = vpop.f32.mrf.mxu1  ;;  %v25247_v60 = vadd.f32 %v12252_v1, %v12140_v28  ;;  %v12142_v37 = vadd.f32 %v12141_v26, %v25018_v50  ;;  %v26219_v1 = vld [vmem:[#allocation24_spill] sm:$0xff]  ;;  %v12804_v26 = vmul.f32 %v26220_v5, %v26220_v5 }
 0x4e0   :  { %v12143_v36 = vpop.f32.mrf.mxu0  ;;  %v12795_v28 = vmul.f32 %v26219_v1, %v26219_v1 }
 0x4e1   :  { %v25250_v2 = vpop.f32.mrf.mxu1  ;;  %v25252_v42 = vadd.f32 %v12254_v58, %v12142_v37  ;;  %v25255_v44 = vadd.f32 %v12143_v36, %v25027_v20  ;;  %v26221_v20 = vld [vmem:[#allocation22_spill] sm:$0xff] }
 0x4e2   :  { %26216 = vst [vmem:[#allocation42_spill] sm:$0xff] %v25250_v2  ;;  %v12147_v33 = vpop.f32.mrf.mxu0  ;;  %13168 = vmatmul.mubr.bf16.gmra.mxu0 %v12831_v54  ;;  %v12791_v36 = vmul.f32 %v26221_v20, %v26221_v20 }
 0x4e3   :  { %26217 = vst [vmem:[#allocation43_spill] sm:$0xff] %v25252_v42  ;;  %26218 = vst [vmem:[#allocation44_spill] sm:$0xff] %v25255_v44  ;;  %v12260_v27 = vpop.f32.mrf.mxu1  ;;  %v12148_v22 = vadd.f32 %v12147_v33, %v25036_v12  ;;  %13175 = vmatprep.mubr.bf16.mxu0 %v12836_v0  ;;  %v12800_v12 = vmul.f32 %v26222_v32, %v26222_v32 }
 0x4e4   :  { %v25260_v50 = vpop.f32.mrf.mxu0  ;;  %v12835_v0 = vpack.c.bf16 %v12795_v28, %v12791_v36  ;;  %v26227_v28 = vld [vmem:[#allocation33_spill] sm:$0xff] }
 0x4e5   :  { %v25262_v21 = vpop.f32.mrf.mxu1  ;;  %v25266_v58 = vadd.f32 %v12260_v27, %v12148_v22  ;;  %v12840_v5 = vpack.c.bf16 %v12804_v26, %v12800_v12  ;;  %v12812_v36 = vmul.f32 %v26227_v28, %v26227_v28  ;;  %v12150_v3 = vadd.f32 %v25260_v50, %v25045_v19 }
 0x4e6   :  { %v12151_v23 = vpop.f32.mrf.mxu0 }
 0x4e7   :  { %v12264_v54 = vpop.f32.mrf.mxu1  ;;  %v12152_v37 = vadd.f32 %v12151_v23, %v25050_v4 }
 0x4e8   :  { %v25273_v33 = vpop.f32.mrf.mxu0 }
 0x4e9   :  { %26223 = vst [vmem:[#allocation45_spill] sm:$0xff] %v25273_v33  ;;  %v25275_v1 = vpop.f32.mrf.mxu1  ;;  %v25277_v63 = vadd.f32 %v12264_v54, %v12152_v37  ;;  %v26228_v54 = vld [vmem:[#allocation26_spill] sm:$0xff] }
 0x4ea   :  { %26224 = vst [vmem:[#allocation46_spill] sm:$0xff] %v25275_v1  ;;  %v12157_v27 = vpop.f32.mrf.mxu0  ;;  %13176 = vmatmul.mubr.bf16.gmra.mxu0 %v12835_v0  ;;  %v12799_v26 = vmul.f32 %v26228_v54, %v26228_v54  ;;  %v26229_v0 = vld [vmem:[#allocation31_spill] sm:$0xff] }
 0x4eb   :  { %26225 = vst [vmem:[#allocation47_spill] sm:$0xff] %v25277_v63  ;;  %v12270_v22 = vpop.f32.mrf.mxu1  ;;  %v12158_v20 = vadd.f32 %v12157_v27, %v25068_v46  ;;  %13183 = vmatprep.mubr.bf16.mxu0 %v12840_v5  ;;  %v12808_v46 = vmul.f32 %v26229_v0, %v26229_v0 }
 0x4ec   :  { %v25282_v32 = vpop.f32.mrf.mxu0  ;;  %v12839_v27 = vpack.c.bf16 %v12803_v35, %v12799_v26  ;;  %v26234_v26 = vld [vmem:[#allocation30_spill] sm:$0xff] }
 0x4ed   :  { %v25284_v4 = vpop.f32.mrf.mxu1  ;;  %v25288_v23 = vadd.f32 %v12270_v22, %v12158_v20  ;;  %v12844_v28 = vpack.c.bf16 %v12812_v36, %v12808_v46  ;;  %v12160_v19 = vadd.f32 %v25282_v32, %v25077_v17 }
 0x4ee   :  { %v12161_v12 = vpop.f32.mrf.mxu0 }
 0x4ef   :  { %v12274_v37 = vpop.f32.mrf.mxu1  ;;  %v12162_v5 = vadd.f32 %v12161_v12, %v25082_v55  ;;  %v12807_v12 = vmul.f32 %v26234_v26, %v26234_v26 }
 0x4f0   :  { %v25295_v56 = vpop.f32.mrf.mxu0 }
 0x4f1   :  { %26230 = vst [vmem:[#allocation48_spill] sm:$0xff] %v25295_v56  ;;  %v25297_v25 = vpop.f32.mrf.mxu1  ;;  %v25299_v14 = vadd.f32 %v12274_v37, %v12162_v5  ;;  %v12843_v5 = vpack.c.bf16 %v12811_v41, %v12807_v12 }
 0x4f2   :  { %26231 = vst [vmem:[#allocation49_spill] sm:$0xff] %v25297_v25  ;;  %v12167_v20 = vpop.f32.mrf.mxu0  ;;  %13184 = vmatmul.mubr.bf16.gmra.mxu0 %v12839_v27 }
 0x4f3   :  { %26232 = vst [vmem:[#allocation50_spill] sm:$0xff] %v25299_v14  ;;  %v12280_v22 = vpop.f32.mrf.mxu1  ;;  %v12168_v54 = vadd.f32 %v12167_v20, %v25102_v47  ;;  %13191 = vmatprep.mubr.bf16.mxu0 %v12844_v28 }
 0x4f4   :  { %v25304_v0 = vpop.f32.mrf.mxu0 }
 0x4f5   :  { %v25306_v55 = vpop.f32.mrf.mxu1  ;;  %v25308_v35 = vadd.f32 %v12280_v22, %v12168_v54  ;;  %v12170_v32 = vadd.f32 %v25304_v0, %v25113_v15 }
 0x4f6   :  { %v12171_v37 = vpop.f32.mrf.mxu0 }
 0x4f7   :  { %v12284_v36 = vpop.f32.mrf.mxu1  ;;  %v12172_v46 = vadd.f32 %v12171_v37, %v25118_v62 }
 0x4f8   :  { %v25313_v27 = vpop.f32.mrf.mxu0 }
 0x4f9   :  { %26235 = vst [vmem:[#allocation51_spill] sm:$0xff] %v25313_v27  ;;  %v25315_v47 = vpop.f32.mrf.mxu1  ;;  %v25317_v28 = vadd.f32 %v12284_v36, %v12172_v46 }
 0x4fa   :  { %26236 = vst [vmem:[#allocation52_spill] sm:$0xff] %v25315_v47  ;;  %v12177_v20 = vpop.f32.mrf.mxu0  ;;  %13192 = vmatmul.mubr.bf16.gmra.mxu0 %v12843_v5 }
 0x4fb   :  { %26237 = vst [vmem:[#allocation53_spill] sm:$0xff] %v25317_v28  ;;  %v12290_v51 = vpop.f32.mrf.mxu1  ;;  %v12178_v54 = vadd.f32 %v12177_v20, %v25134_v52 }
 0x4fc   :  { %v25320_v22 = vpop.f32.mrf.mxu0 }
 0x4fd   :  { %v25322_v57 = vpop.f32.mrf.mxu1  ;;  %v25324_v26 = vadd.f32 %v12290_v51, %v12178_v54  ;;  %v12180_v0 = vadd.f32 %v25320_v22, %v25147_v38 }
 0x4fe   :  { %v12181_v24 = vpop.f32.mrf.mxu0 }
 0x4ff   :  { %v12294_v62 = vpop.f32.mrf.mxu1  ;;  %v12182_v41 = vadd.f32 %v12181_v24, %v25152_v7 }
 0x500   :  { %v25327_v12 = vpop.f32.mrf.mxu0 }
 0x501   :  { %26238 = vst [vmem:[#allocation54_spill] sm:$0xff] %v25327_v12  ;;  %v25329_v37 = vpop.f32.mrf.mxu1  ;;  %v25331_v36 = vadd.f32 %v12294_v62, %v12182_v41 }
 0x502   :  { %26239 = vst [vmem:[#allocation55_spill] sm:$0xff] %v25329_v37  ;;  %v12333_v46 = vpop.f32.mrf.mxu0 }
 0x503   :  { %26240 = vst [vmem:[#allocation56_spill] sm:$0xff] %v25331_v36  ;;  %v12446_v5 = vpop.f32.mrf.mxu1  ;;  %v12334_v52 = vadd.f32 %v12333_v46, %v25162_v10 }
 0x504   :  { %v25334_v20 = vpop.f32.mrf.mxu0 }
 0x505   :  { %v25336_v28 = vpop.f32.mrf.mxu1  ;;  %v25338_v51 = vadd.f32 %v12446_v5, %v12334_v52  ;;  %v12336_v22 = vadd.f32 %v25334_v20, %v25169_v45  ;;  %v13472_v45 = vld [vmem:[%s26129_s4 + $0x78] sm:$0xff]  ;;  %v13469_v20 = vld [vmem:[%s26129_s4 + $0x60] sm:$0xff] }
 0x506   :  { %v25340_v54 = vpop.f32.mrf.mxu0  ;;  %13707 = vmatprep.subr.mxu1 %v13472_v45 }
 0x507   :  { %v25342_v47 = vpop.f32.mrf.mxu1 }
 0x508   :  { %v25344_v7 = vpop.f32.mrf.mxu0 }
 0x509   :  { %v25346_v24 = vpop.f32.mrf.mxu1 }
 0x50a   :  { %v12343_v62 = vpop.f32.mrf.mxu0 }
 0x50b   :  { %v12456_v41 = vpop.f32.mrf.mxu1  ;;  %v12344_v36 = vadd.f32 %v12343_v62, %v25190_v48 }
 0x50c   :  { %v25349_v37 = vpop.f32.mrf.mxu0 }
 0x50d   :  { %v25351_v10 = vpop.f32.mrf.mxu1  ;;  %v25353_v46 = vadd.f32 %v12456_v41, %v12344_v36  ;;  %v12346_v45 = vadd.f32 %v25349_v37, %v25203_v29 }
 0x50e   :  { %v25355_v5 = vpop.f32.mrf.mxu0 }
 0x50f   :  { %v25357_v52 = vpop.f32.mrf.mxu1  ;;  %v12459_v37 = vadd.f32 %v25351_v10, %v12346_v45 }
 0x510   :  { %v25359_v12 = vpop.f32.mrf.mxu0 }
 0x511   :  { %v25361_v27 = vpop.f32.mrf.mxu1 }
 0x512   :  { %v12353_v61 = vpop.f32.mrf.mxu0 }
 0x513   :  { %v12466_v6 = vpop.f32.mrf.mxu1  ;;  %v12354_v14 = vadd.f32 %v12353_v61, %v25218_v9 }
 0x514   :  { %v25364_v25 = vpop.f32.mrf.mxu0 }
 0x515   :  { %v25366_v48 = vpop.f32.mrf.mxu1  ;;  %v25368_v62 = vadd.f32 %v12466_v6, %v12354_v14 }
 0x516   :  { %v25370_v36 = vpop.f32.mrf.mxu0 }
 0x517   :  { %v25372_v41 = vpop.f32.mrf.mxu1 }
 0x518   :  { %v25374_v56 = vpop.f32.mrf.mxu0 }
 0x519   :  { %v25376_v31 = vpop.f32.mrf.mxu1 }
 0x51a   :  { %v12363_v8 = vpop.f32.mrf.mxu0 }
 0x51b   :  { %v12476_v63 = vpop.f32.mrf.mxu1  ;;  %v12364_v1 = vadd.f32 %v12363_v8, %v25240_v49  ;;  %v12263_v8 = vadd.f32 %v25262_v21, %v12150_v3  ;;  %v12273_v21 = vadd.f32 %v25284_v4, %v12160_v19  ;;  %v12283_v19 = vadd.f32 %v25306_v55, %v12170_v32 }
 0x51c   :  { %v25379_v33 = vpop.f32.mrf.mxu0  ;;  %v12293_v32 = vadd.f32 %v25322_v57, %v12180_v0  ;;  %v12227_v57 = vadd.f32 %v25178_v40, %v25183_v43 }
 0x51d   :  { %v25381_v61 = vpop.f32.mrf.mxu1  ;;  %v25383_v9 = vadd.f32 %v12476_v63, %v12364_v1 }
 0x51e   :  { %26241 = vst [vmem:[#allocation57_spill] sm:$0xff] %v25381_v61  ;;  %v25385_v14 = vpop.f32.mrf.mxu0  ;;  %v12340_v40 = vadd.f32 %v25344_v7, %v12227_v57 }
 0x51f   :  { %26242 = vst [vmem:[#allocation58_spill] sm:$0xff] %v25383_v9  ;;  %26243 = vst [vmem:[#allocation59_spill] sm:$0xff] %v25385_v14  ;;  %v25387_v6 = vpop.f32.mrf.mxu1 }
 0x520   :  { %26244 = vst [vmem:[#allocation60_spill] sm:$0xff] %v25387_v6  ;;  %v25391_v18 = vpop.f32.mrf.mxu0 }
 0x521   :  { %26245 = vst [vmem:[#allocation61_spill] sm:$0xff] %v25391_v18  ;;  %v25393_v42 = vpop.f32.mrf.mxu1 }
 0x522   :  { %26246 = vst [vmem:[#allocation62_spill] sm:$0xff] %v25393_v42  ;;  %v12373_v2 = vpop.f32.mrf.mxu0 }
 0x523   :  { %v12486_v44 = vpop.f32.mrf.mxu1  ;;  %v12374_v49 = vadd.f32 %v12373_v2, %v25266_v58 }
 0x524   :  { %v12375_v61 = vpop.f32.mrf.mxu0 }
 0x525   :  { %v12488_v63 = vpop.f32.mrf.mxu1  ;;  %v25397_v1 = vadd.f32 %v12486_v44, %v12374_v49  ;;  %v12376_v9 = vadd.f32 %v12375_v61, %v12263_v8 }
 0x526   :  { %v25399_v14 = vpop.f32.mrf.mxu0 }
 0x527   :  { %26247 = vst [vmem:[#allocation63_spill] sm:$0xff] %v25397_v1  ;;  %v25401_v6 = vpop.f32.mrf.mxu1  ;;  %v25405_v50 = vadd.f32 %v12488_v63, %v12376_v9 }
 0x528   :  { %v25407_v42 = vpop.f32.mrf.mxu0 }
 0x529   :  { %v25409_v18 = vpop.f32.mrf.mxu1 }
 0x52a   :  { %26248 = vst [vmem:[#allocation64_spill] sm:$0xff] %v25409_v18  ;;  %v12383_v3 = vpop.f32.mrf.mxu0 }
 0x52b   :  { %v12496_v2 = vpop.f32.mrf.mxu1  ;;  %v12384_v44 = vadd.f32 %v12383_v3, %v25288_v23 }
 0x52c   :  { %v12385_v58 = vpop.f32.mrf.mxu0 }
 0x52d   :  { %v12498_v61 = vpop.f32.mrf.mxu1  ;;  %v25413_v8 = vadd.f32 %v12496_v2, %v12384_v44  ;;  %v12386_v49 = vadd.f32 %v12385_v58, %v12273_v21 }
 0x52e   :  { %v25415_v1 = vpop.f32.mrf.mxu0 }
 0x52f   :  { %26249 = vst [vmem:[#allocation65_spill] sm:$0xff] %v25413_v8  ;;  %v25417_v17 = vpop.f32.mrf.mxu1  ;;  %v25421_v9 = vadd.f32 %v12498_v61, %v12386_v49 }
 0x530   :  { %v25423_v63 = vpop.f32.mrf.mxu0 }
 0x531   :  { %v25425_v18 = vpop.f32.mrf.mxu1 }
 0x532   :  { %26250 = vst [vmem:[#allocation66_spill] sm:$0xff] %v25425_v18  ;;  %v12393_v4 = vpop.f32.mrf.mxu0 }
 0x533   :  { %v12506_v23 = vpop.f32.mrf.mxu1  ;;  %v12394_v3 = vadd.f32 %v12393_v4, %v25308_v35 }
 0x534   :  { %v12395_v2 = vpop.f32.mrf.mxu0 }
 0x535   :  { %v12508_v21 = vpop.f32.mrf.mxu1  ;;  %v25429_v44 = vadd.f32 %v12506_v23, %v12394_v3  ;;  %v12396_v58 = vadd.f32 %v12395_v2, %v12283_v19 }
 0x536   :  { %v25431_v8 = vpop.f32.mrf.mxu0 }
 0x537   :  { %26251 = vst [vmem:[#allocation67_spill] sm:$0xff] %v25429_v44  ;;  %v25433_v15 = vpop.f32.mrf.mxu1  ;;  %v25437_v61 = vadd.f32 %v12508_v21, %v12396_v58 }
 0x538   :  { %v25439_v49 = vpop.f32.mrf.mxu0 }
 0x539   :  { %v25441_v18 = vpop.f32.mrf.mxu1 }
 0x53a   :  { %26252 = vst [vmem:[#allocation68_spill] sm:$0xff] %v25441_v18  ;;  %v12403_v55 = vpop.f32.mrf.mxu0 }
 0x53b   :  { %v12516_v35 = vpop.f32.mrf.mxu1  ;;  %v12404_v4 = vadd.f32 %v12403_v55, %v25324_v26  ;;  %v12338_v26 = vadd.f32 %v25340_v54, %v25180_v39  ;;  %v13466_v39 = vld [vmem:[%s26129_s4 + $0x48] sm:$0xff] }
 0x53c   :  { %v12405_v23 = vpop.f32.mrf.mxu0 }
 0x53d   :  { %v12518_v19 = vpop.f32.mrf.mxu1  ;;  %v25445_v3 = vadd.f32 %v12516_v35, %v12404_v4  ;;  %v12406_v2 = vadd.f32 %v12405_v23, %v12293_v32  ;;  %v13470_v35 = vld [vmem:[%s26129_s4 + $0x68] sm:$0xff]  ;;  %v12449_v32 = vadd.f32 %v25336_v28, %v12336_v22  ;;  %v13465_v4 = vld [vmem:[%s26129_s4 + $0x40] sm:$0xff]  ;;  %v12451_v28 = vadd.f32 %v25342_v47, %v12338_v26 }
 0x53e   :  { %v25447_v44 = vpop.f32.mrf.mxu0  ;;  %13546 = vmatprep.subr.mxu0 %v13470_v35  ;;  %v13462_v23 = vld [vmem:[%s26129_s4 + $0x28] sm:$0xff]  ;;  %v12453_v35 = vadd.f32 %v25346_v24, %v12340_v40  ;;  %v12237_v47 = vadd.f32 %v25206_v30, %v25211_v34 }
 0x53f   :  { %v25449_v38 = vpop.f32.mrf.mxu1  ;;  %v25453_v21 = vadd.f32 %v12518_v19, %v12406_v2  ;;  %13547 = vmatpush1.msra.mxu0 %v13469_v20  ;;  %v13461_v19 = vld [vmem:[%s26129_s4 + $0x20] sm:$0xff] }
 0x540   :  { %v25455_v58 = vpop.f32.mrf.mxu0  ;;  %13548 = vmatprep.subr.mxu0 %v13466_v39  ;;  %v12348_v39 = vadd.f32 %v25355_v5, %v25208_v53 }
 0x541   :  { %v25457_v18 = vpop.f32.mrf.mxu1  ;;  %13549 = vmatpush1.msra.mxu0 %v13465_v4  ;;  %v12350_v4 = vadd.f32 %v25359_v12, %v12237_v47 }
 0x542   :  { %v12559_v0 = vpop.f32.mrf.mxu0  ;;  %13550 = vmatprep.subr.mxu0 %v13462_v23  ;;  %v12461_v5 = vadd.f32 %v25357_v52, %v12348_v39 }
 0x543   :  { %v12672_v55 = vpop.f32.mrf.mxu1  ;;  %v12560_v2 = vadd.f32 %v12559_v0, %v25338_v51  ;;  %13551 = vmatpush1.msra.mxu0 %v13461_v19 }
 0x544   :  { %v12561_v43 = vpop.f32.mrf.mxu0 }
 0x545   :  { %v12674_v54 = vpop.f32.mrf.mxu1  ;;  %v12562_v7 = vadd.f32 %v12561_v43, %v12449_v32  ;;  %v25499_v24 = vadd.f32 %v12672_v55, %v12560_v2  ;;  %v12463_v2 = vadd.f32 %v25361_v27, %v12350_v4 }
 0x546   :  { %v12563_v22 = vpop.f32.mrf.mxu0 }
 0x547   :  { %v12676_v57 = vpop.f32.mrf.mxu1  ;;  %v12564_v20 = vadd.f32 %v12563_v22, %v12451_v28  ;;  %v25495_v51 = vadd.f32 %v12674_v54, %v12562_v7  ;;  %v12753_v10 = vmul.f32 %v25499_v24, %v25499_v24  ;;  %v12356_v22 = vadd.f32 %v25364_v25, %v25225_v13 }
 0x548   :  { %v12565_v26 = vpop.f32.mrf.mxu0 }
 0x549   :  { %v12678_v32 = vpop.f32.mrf.mxu1  ;;  %v25497_v0 = vadd.f32 %v12676_v57, %v12564_v20  ;;  %v12566_v43 = vadd.f32 %v12565_v26, %v12453_v35  ;;  %v12754_v54 = vmul.f32 %v25495_v51, %v25495_v51  ;;  %v12247_v35 = vadd.f32 %v25228_v59, %v25233_v16  ;;  %v13471_v26 = vld [vmem:[%s26129_s4 + $0x70] sm:$0xff]  ;;  %v13468_v59 = vld [vmem:[%s26129_s4 + $0x58] sm:$0xff] }
 0x54a   :  { %v12569_v40 = vpop.f32.mrf.mxu0 }
 0x54b   :  { %v12682_v29 = vpop.f32.mrf.mxu1  ;;  %v25503_v30 = vadd.f32 %v12678_v32, %v12566_v43  ;;  %v12757_v34 = vmul.f32 %v25497_v0, %v25497_v0  ;;  %v12570_v12 = vadd.f32 %v12569_v40, %v25353_v46  ;;  %v12358_v46 = vadd.f32 %v25370_v36, %v25230_v11  ;;  %v13467_v43 = vld [vmem:[%s26129_s4 + $0x50] sm:$0xff] }
 0x54c   :  { %v12571_v23 = vpop.f32.mrf.mxu0  ;;  %v12469_v11 = vadd.f32 %v25366_v48, %v12356_v22  ;;  %v12360_v36 = vadd.f32 %v25374_v56, %v12247_v35  ;;  %v26254_v22 = vld [vmem:[#allocation42_spill] sm:$0xff] }
 0x54d   :  { %v12684_v53 = vpop.f32.mrf.mxu1  ;;  %v12758_v55 = vmul.f32 %v25503_v30, %v25503_v30  ;;  %v12572_v28 = vadd.f32 %v12571_v23, %v12459_v37  ;;  %v12817_v45 = vpack.c.bf16 %v12757_v34, %v12753_v10  ;;  %v25532_v13 = vadd.f32 %v12682_v29, %v12570_v12  ;;  %v13464_v37 = vld [vmem:[%s26129_s4 + $0x38] sm:$0xff]  ;;  %v13463_v23 = vld [vmem:[%s26129_s4 + $0x30] sm:$0xff] }
 0x54e   :  { %v12573_v7 = vpop.f32.mrf.mxu0  ;;  %v12471_v48 = vadd.f32 %v25372_v41, %v12358_v46  ;;  %v12473_v12 = vadd.f32 %v25376_v31, %v12360_v36  ;;  %v12366_v41 = vadd.f32 %v25379_v33, %v25247_v60  ;;  %v26258_v60 = vld [vmem:[#allocation34_spill] sm:$0xff] }
 0x54f   :  { %v12686_v19 = vpop.f32.mrf.mxu1  ;;  %v12574_v52 = vadd.f32 %v12573_v7, %v12461_v5  ;;  %v12818_v57 = vpack.c.bf16 %v12758_v55, %v12754_v54  ;;  %v25525_v32 = vadd.f32 %v12684_v53, %v12572_v28  ;;  %v12761_v54 = vmul.f32 %v25532_v13, %v25532_v13 }
 0x550   :  { %v12575_v20 = vpop.f32.mrf.mxu0 }
 0x551   :  { %v12688_v47 = vpop.f32.mrf.mxu1  ;;  %v25527_v27 = vadd.f32 %v12686_v19, %v12574_v52  ;;  %v12576_v25 = vadd.f32 %v12575_v20, %v12463_v2  ;;  %13232 = vmatprep.mubr.bf16.mxu1 %v12818_v57  ;;  %v12762_v56 = vmul.f32 %v25525_v32, %v25525_v32  ;;  %v26253_v2 = vld [vmem:[#allocation44_spill] sm:$0xff]  ;;  %v26255_v20 = vld [vmem:[#allocation43_spill] sm:$0xff] }
 0x552   :  { %v12579_v16 = vpop.f32.mrf.mxu0  ;;  %13233 = vmatmul.mubr.bf16.vlgmr.msra.gmra.mxu1 %v12817_v45  ;;  %v12257_v52 = vadd.f32 %v26254_v22, %v26253_v2  ;;  %v26264_v2 = vld [vmem:[#allocation62_spill] sm:$0xff] }
 0x553   :  { %v12692_v39 = vpop.f32.mrf.mxu1  ;;  %v25539_v40 = vadd.f32 %v12688_v47, %v12576_v25  ;;  %13708 = vmatpush1.msra.mxu1 %v13471_v26  ;;  %v12765_v29 = vmul.f32 %v25527_v27, %v25527_v27  ;;  %v12580_v55 = vadd.f32 %v12579_v16, %v25368_v62  ;;  %v26256_v47 = vld [vmem:[#allocation59_spill] sm:$0xff] }
 0x554   :  { %v12581_v4 = vpop.f32.mrf.mxu0  ;;  %13709 = vmatprep.subr.mxu1 %v13468_v59  ;;  %v12368_v62 = vadd.f32 %v26256_v47, %v26255_v20  ;;  %v26257_v25 = vld [vmem:[#allocation35_spill] sm:$0xff] }
 0x555   :  { %v12694_v34 = vpop.f32.mrf.mxu1  ;;  %v12766_v53 = vmul.f32 %v25539_v40, %v25539_v40  ;;  %v12582_v5 = vadd.f32 %v12581_v4, %v12469_v11  ;;  %13710 = vmatpush1.msra.mxu1 %v13467_v43  ;;  %v12821_v57 = vpack.c.bf16 %v12765_v29, %v12761_v54  ;;  %v12041_v33 = vadd.f32 %v26258_v60, %v26257_v25  ;;  %v26259_v11 = vld [vmem:[#allocation57_spill] sm:$0xff] }
 0x556   :  { %v12583_v28 = vpop.f32.mrf.mxu0  ;;  %13711 = vmatprep.subr.mxu1 %v13464_v37  ;;  %v25570_v59 = vadd.f32 %v12692_v39, %v12580_v55  ;;  %v12479_v36 = vadd.f32 %v26259_v11, %v12366_v41  ;;  %v26260_v37 = vld [vmem:[#allocation61_spill] sm:$0xff] }
 0x557   :  { %v12696_v10 = vpop.f32.mrf.mxu1  ;;  %v12584_v7 = vadd.f32 %v12583_v28, %v12471_v48  ;;  %v12822_v19 = vpack.c.bf16 %v12766_v53, %v12762_v56  ;;  %13712 = vmatpush1.msra.mxu1 %v13463_v23  ;;  %v25564_v26 = vadd.f32 %v12694_v34, %v12582_v5  ;;  %v12370_v29 = vadd.f32 %v26260_v37, %v12257_v52  ;;  %v26261_v34 = vld [vmem:[#allocation45_spill] sm:$0xff]  ;;  %v26262_v5 = vld [vmem:[#allocation60_spill] sm:$0xff] }
 0x558   :  { %v12585_v35 = vpop.f32.mrf.mxu0  ;;  %v12154_v23 = vadd.f32 %v26261_v34, %v12041_v33  ;;  %v12481_v54 = vadd.f32 %v26262_v5, %v12368_v62  ;;  %v26269_v5 = vld [vmem:[#allocation48_spill] sm:$0xff] }
 0x559   :  { %v12698_v45 = vpop.f32.mrf.mxu1  ;;  %v25566_v46 = vadd.f32 %v12696_v10, %v12584_v7  ;;  %v12586_v31 = vadd.f32 %v12585_v35, %v12473_v12  ;;  %13240 = vmatprep.mubr.bf16.mxu1 %v12822_v19  ;;  %v12770_v39 = vmul.f32 %v25564_v26, %v25564_v26  ;;  %v12769_v10 = vmul.f32 %v25570_v59, %v25570_v59  ;;  %v26263_v12 = vld [vmem:[#allocation58_spill] sm:$0xff] }
 0x55a   :  { %v12589_v16 = vpop.f32.mrf.mxu0  ;;  %13241 = vmatmul.mubr.bf16.gmra.mxu1 %v12821_v57  ;;  %v12483_v22 = vadd.f32 %v26264_v2, %v12370_v29  ;;  %v26265_v35 = vld [vmem:[#allocation46_spill] sm:$0xff]  ;;  %v26271_v2 = vld [vmem:[#allocation64_spill] sm:$0xff] }
 0x55b   :  { %v12702_v43 = vpop.f32.mrf.mxu1  ;;  %v25574_v4 = vadd.f32 %v12698_v45, %v12586_v31  ;;  %v12773_v48 = vmul.f32 %v25566_v46, %v25566_v46  ;;  %v12590_v41 = vadd.f32 %v12589_v16, %v26263_v12  ;;  %v12267_v45 = vadd.f32 %v26265_v35, %v12154_v23  ;;  %v26266_v31 = vld [vmem:[#allocation47_spill] sm:$0xff]  ;;  %v26267_v16 = vld [vmem:[#allocation37_spill] sm:$0xff] }
 0x55c   :  { %v12591_v56 = vpop.f32.mrf.mxu0  ;;  %v12378_v25 = vadd.f32 %v25399_v14, %v26266_v31  ;;  %v26270_v12 = vld [vmem:[#allocation63_spill] sm:$0xff] }
 0x55d   :  { %v12704_v53 = vpop.f32.mrf.mxu1  ;;  %v12774_v55 = vmul.f32 %v25574_v4, %v25574_v4  ;;  %v12592_v28 = vadd.f32 %v12591_v56, %v12479_v36  ;;  %v12825_v20 = vpack.c.bf16 %v12773_v48, %v12769_v10  ;;  %v26268_v36 = vld [vmem:[#allocation36_spill] sm:$0xff]  ;;  %v25597_v29 = vadd.f32 %v12702_v43, %v12590_v41 }
 0x55e   :  { %v12593_v7 = vpop.f32.mrf.mxu0  ;;  %v12051_v37 = vadd.f32 %v26268_v36, %v26267_v16  ;;  %v12380_v23 = vadd.f32 %v25407_v42, %v12267_v45  ;;  %v26274_v16 = vld [vmem:[#allocation39_spill] sm:$0xff]  ;;  %v26275_v36 = vld [vmem:[#allocation38_spill] sm:$0xff] }
 0x55f   :  { %v12706_v19 = vpop.f32.mrf.mxu1  ;;  %v12594_v52 = vadd.f32 %v12593_v7, %v12481_v54  ;;  %v12826_v57 = vpack.c.bf16 %v12774_v55, %v12770_v39  ;;  %v25591_v60 = vadd.f32 %v12704_v53, %v12592_v28  ;;  %v12491_v55 = vadd.f32 %v25401_v6, %v12378_v25  ;;  %v26272_v6 = vld [vmem:[#allocation49_spill] sm:$0xff] }
 0x560   :  { %v12595_v47 = vpop.f32.mrf.mxu0  ;;  %v12164_v14 = vadd.f32 %v26269_v5, %v12051_v37  ;;  %v12777_v42 = vmul.f32 %v25597_v29, %v25597_v29  ;;  %v12061_v37 = vadd.f32 %v26275_v36, %v26274_v16  ;;  %v26281_v16 = vld [vmem:[#allocation41_spill] sm:$0xff]  ;;  %v26282_v36 = vld [vmem:[#allocation40_spill] sm:$0xff] }
 0x561   :  { %v12708_v62 = vpop.f32.mrf.mxu1  ;;  %v25593_v33 = vadd.f32 %v12706_v19, %v12594_v52  ;;  %v12596_v11 = vadd.f32 %v12595_v47, %v12483_v22  ;;  %13248 = vmatprep.mubr.bf16.mxu1 %v12826_v57  ;;  %v12778_v43 = vmul.f32 %v25591_v60, %v25591_v60  ;;  %v12493_v22 = vadd.f32 %v26271_v2, %v12380_v23  ;;  %v26278_v2 = vld [vmem:[#allocation66_spill] sm:$0xff] }
 0x562   :  { %v12599_v34 = vpop.f32.mrf.mxu0  ;;  %13249 = vmatmul.mubr.bf16.gmra.mxu1 %v12825_v20  ;;  %v12277_v35 = vadd.f32 %v26272_v6, %v12164_v14 }
 0x563   :  { %v12712_v56 = vpop.f32.mrf.mxu1  ;;  %v25600_v48 = vadd.f32 %v12708_v62, %v12596_v11  ;;  %v12781_v53 = vmul.f32 %v25593_v33, %v25593_v33  ;;  %v12600_v41 = vadd.f32 %v12599_v34, %v26270_v12  ;;  %v26273_v62 = vld [vmem:[#allocation50_spill] sm:$0xff]  ;;  %v26277_v12 = vld [vmem:[#allocation65_spill] sm:$0xff] }
 0x564   :  { %v12601_v54 = vpop.f32.mrf.mxu0  ;;  %v12388_v31 = vadd.f32 %v25415_v1, %v26273_v62  ;;  %v12390_v14 = vadd.f32 %v25423_v63, %v12277_v35 }
 0x565   :  { %v12714_v39 = vpop.f32.mrf.mxu1  ;;  %v12782_v28 = vmul.f32 %v25600_v48, %v25600_v48  ;;  %v12602_v10 = vadd.f32 %v12601_v54, %v25405_v50  ;;  %v12829_v45 = vpack.c.bf16 %v12781_v53, %v12777_v42  ;;  %v25624_v34 = vadd.f32 %v12712_v56, %v12600_v41  ;;  %v26276_v54 = vld [vmem:[#allocation51_spill] sm:$0xff] }
 0x566   :  { %v12603_v7 = vpop.f32.mrf.mxu0  ;;  %v12174_v1 = vadd.f32 %v26276_v54, %v12061_v37  ;;  %v12071_v37 = vadd.f32 %v26282_v36, %v26281_v16 }
 0x567   :  { %v12716_v19 = vpop.f32.mrf.mxu1  ;;  %v12604_v52 = vadd.f32 %v12603_v7, %v12491_v55  ;;  %v12830_v57 = vpack.c.bf16 %v12782_v28, %v12778_v43  ;;  %v25618_v50 = vadd.f32 %v12714_v39, %v12602_v10  ;;  %v12501_v28 = vadd.f32 %v25417_v17, %v12388_v31  ;;  %v26279_v17 = vld [vmem:[#allocation52_spill] sm:$0xff] }
 0x568   :  { %v12605_v20 = vpop.f32.mrf.mxu0  ;;  %v12785_v63 = vmul.f32 %v25624_v34, %v25624_v34  ;;  %v12287_v6 = vadd.f32 %v26279_v17, %v12174_v1 }
 0x569   :  { %v12718_v47 = vpop.f32.mrf.mxu1  ;;  %v25620_v25 = vadd.f32 %v12716_v19, %v12604_v52  ;;  %v12606_v11 = vadd.f32 %v12605_v20, %v12493_v22  ;;  %13256 = vmatprep.mubr.bf16.mxu1 %v12830_v57  ;;  %v12786_v56 = vmul.f32 %v25618_v50, %v25618_v50  ;;  %v12503_v22 = vadd.f32 %v26278_v2, %v12390_v14  ;;  %v26285_v2 = vld [vmem:[#allocation68_spill] sm:$0xff] }
 0x56a   :  { %v12609_v23 = vpop.f32.mrf.mxu0  ;;  %13257 = vmatmul.mubr.bf16.gmra.mxu1 %v12829_v45  ;;  %v12400_v1 = vadd.f32 %v25439_v49, %v12287_v6 }
 0x56b   :  { %v12722_v5 = vpop.f32.mrf.mxu1  ;;  %v25627_v53 = vadd.f32 %v12718_v47, %v12606_v11  ;;  %v12789_v39 = vmul.f32 %v25620_v25, %v25620_v25  ;;  %v12610_v41 = vadd.f32 %v12609_v23, %v26277_v12  ;;  %v26280_v47 = vld [vmem:[#allocation53_spill] sm:$0xff]  ;;  %v26284_v12 = vld [vmem:[#allocation67_spill] sm:$0xff] }
 0x56c   :  { %v12611_v55 = vpop.f32.mrf.mxu0  ;;  %v12398_v62 = vadd.f32 %v25431_v8, %v26280_v47 }
 0x56d   :  { %v12724_v43 = vpop.f32.mrf.mxu1  ;;  %v12790_v10 = vmul.f32 %v25627_v53, %v25627_v53  ;;  %v12612_v42 = vadd.f32 %v12611_v55, %v25421_v9  ;;  %v12833_v35 = vpack.c.bf16 %v12789_v39, %v12785_v63  ;;  %v25651_v23 = vadd.f32 %v12722_v5, %v12610_v41  ;;  %v26283_v55 = vld [vmem:[#allocation54_spill] sm:$0xff] }
 0x56e   :  { %v12613_v7 = vpop.f32.mrf.mxu0  ;;  %v12184_v8 = vadd.f32 %v26283_v55, %v12071_v37 }
 0x56f   :  { %v12726_v19 = vpop.f32.mrf.mxu1  ;;  %v12614_v52 = vadd.f32 %v12613_v7, %v12501_v28  ;;  %v12834_v57 = vpack.c.bf16 %v12790_v10, %v12786_v56  ;;  %v25645_v9 = vadd.f32 %v12724_v43, %v12612_v42  ;;  %v12511_v10 = vadd.f32 %v25433_v15, %v12398_v62  ;;  %v26286_v15 = vld [vmem:[#allocation55_spill] sm:$0xff] }
 0x570   :  { %v12615_v45 = vpop.f32.mrf.mxu0  ;;  %v12793_v49 = vmul.f32 %v25651_v23, %v25651_v23  ;;  %v12297_v17 = vadd.f32 %v26286_v15, %v12184_v8 }
 0x571   :  { %v12728_v20 = vpop.f32.mrf.mxu1  ;;  %v25647_v31 = vadd.f32 %v12726_v19, %v12614_v52  ;;  %v12616_v11 = vadd.f32 %v12615_v45, %v12503_v22  ;;  %13264 = vmatprep.mubr.bf16.mxu1 %v12834_v57  ;;  %v12794_v5 = vmul.f32 %v25645_v9, %v25645_v9  ;;  %v12513_v22 = vadd.f32 %v26285_v2, %v12400_v1 }
 0x572   :  { %v12619_v14 = vpop.f32.mrf.mxu0  ;;  %13265 = vmatmul.mubr.bf16.gmra.mxu1 %v12833_v35 }
 0x573   :  { %v12732_v54 = vpop.f32.mrf.mxu1  ;;  %v25654_v39 = vadd.f32 %v12728_v20, %v12616_v11  ;;  %v12797_v43 = vmul.f32 %v25647_v31, %v25647_v31  ;;  %v12620_v41 = vadd.f32 %v12619_v14, %v26284_v12  ;;  %v26287_v20 = vld [vmem:[#allocation56_spill] sm:$0xff]  ;;  %v12410_v14 = vadd.f32 %v25455_v58, %v12297_v17 }
 0x574   :  { %v12621_v28 = vpop.f32.mrf.mxu0  ;;  %v12408_v47 = vadd.f32 %v25447_v44, %v26287_v20  ;;  %v13457_v20 = vld [vmem:[%s26129_s4] sm:$0xff] }
 0x575   :  { %v12734_v56 = vpop.f32.mrf.mxu1  ;;  %v12798_v42 = vmul.f32 %v25654_v39, %v25654_v39  ;;  %v12622_v63 = vadd.f32 %v12621_v28, %v25437_v61  ;;  %v12837_v6 = vpack.c.bf16 %v12797_v43, %v12793_v49  ;;  %v25676_v16 = vadd.f32 %v12732_v54, %v12620_v41 }
 0x576   :  { %v12623_v7 = vpop.f32.mrf.mxu0  ;;  %v12521_v43 = vadd.f32 %v25449_v38, %v12408_v47  ;;  %v13459_v47 = vld [vmem:[%s26129_s4 + $0x10] sm:$0xff] }
 0x577   :  { %v12736_v19 = vpop.f32.mrf.mxu1  ;;  %v12624_v52 = vadd.f32 %v12623_v7, %v12511_v10  ;;  %v12838_v57 = vpack.c.bf16 %v12798_v42, %v12794_v5  ;;  %v25672_v61 = vadd.f32 %v12734_v56, %v12622_v63  ;;  %v12801_v58 = vmul.f32 %v25676_v16, %v25676_v16 }
 0x578   :  { %v12625_v35 = vpop.f32.mrf.mxu0  ;;  %v12523_v63 = vadd.f32 %v25457_v18, %v12410_v14 }
 0x579   :  { %v12738_v45 = vpop.f32.mrf.mxu1  ;;  %v25674_v62 = vadd.f32 %v12736_v19, %v12624_v52  ;;  %v12626_v11 = vadd.f32 %v12625_v35, %v12513_v22  ;;  %13272 = vmatprep.mubr.bf16.mxu1 %v12838_v57  ;;  %v12802_v28 = vmul.f32 %v25672_v61, %v25672_v61  ;;  %v13458_v35 = vld [vmem:[%s26129_s4 + $0x8] sm:$0xff] }
 0x57a   :  { %v12629_v36 = vpop.f32.mrf.mxu0  ;;  %13273 = vmatmul.mubr.bf16.gmra.mxu1 %v12837_v6  ;;  %13552 = vmatprep.subr.mxu0 %v13458_v35 }
 0x57b   :  { %v12742_v37 = vpop.f32.mrf.mxu1  ;;  %v25679_v1 = vadd.f32 %v12738_v45, %v12626_v11  ;;  %v12805_v55 = vmul.f32 %v25674_v62, %v25674_v62  ;;  %v12630_v10 = vadd.f32 %v12629_v36, %v25445_v3  ;;  %v13460_v45 = vld [vmem:[%s26129_s4 + $0x18] sm:$0xff]  ;;  %13553 = vmatpush1.msra.mxu0 %v13457_v20  ;;  %v26163_v11 = vmov 0.0  }
 0x57c   :  { %v12631_v8 = vpop.f32.mrf.mxu0  ;;  %13713 = vmatprep.subr.mxu1 %v13460_v45  ;;  %13586 = vmatprep.mubr.f32.mxu0 %v26163_v11 }
 0x57d   :  { %v12744_v44 = vpop.f32.mrf.mxu1  ;;  %v12806_v54 = vmul.f32 %v25679_v1, %v25679_v1  ;;  %v12632_v56 = vadd.f32 %v12631_v8, %v25453_v21  ;;  %v12841_v38 = vpack.c.bf16 %v12805_v55, %v12801_v58  ;;  %v25697_v21 = vadd.f32 %v12742_v37, %v12630_v10  ;;  %13714 = vmatpush1.msra.mxu1 %v13459_v47 }
 0x57e   :  { %v12633_v5 = vpop.f32.mrf.mxu0 }
 0x57f   :  { %v12746_v42 = vpop.f32.mrf.mxu1  ;;  %v12634_v49 = vadd.f32 %v12633_v5, %v12521_v43  ;;  %v12842_v12 = vpack.c.bf16 %v12806_v54, %v12802_v28  ;;  %v25693_v7 = vadd.f32 %v12744_v44, %v12632_v56  ;;  %v12809_v15 = vmul.f32 %v25697_v21, %v25697_v21 }
 0x580   :  { %v12635_v41 = vpop.f32.mrf.mxu0 }
 0x581   :  { %v25695_v19 = vadd.f32 %v12746_v42, %v12634_v49  ;;  %v12636_v2 = vadd.f32 %v12635_v41, %v12523_v63  ;;  %13280 = vmatprep.mubr.bf16.mxu1 %v12842_v12  ;;  %v12748_v22 = vpop.f32.mrf.mxu1  ;;  %v12810_v18 = vmul.f32 %v25693_v7, %v25693_v7 }
 0x582   :  { %13281 = vmatmul.mubr.bf16.gmra.mxu1 %v12841_v38  ;;  %v15720_v36 = vpop.f32.mrf.mxu0 }
 0x583   :  { %26288 = vst [vmem:[#allocation44_spill] sm:$0xff] %v25695_v19  ;;  %v25699_v52 = vadd.f32 %v12748_v22, %v12636_v2  ;;  %v12813_v3 = vmul.f32 %v25695_v19, %v25695_v19 }
 0x584   :  { %v15721_v37 = vpop.f32.mrf.mxu0 }
 0x585   :  { %26289 = vst [vmem:[#allocation42_spill] sm:$0xff] %v25699_v52  ;;  %v12814_v57 = vmul.f32 %v25699_v52, %v25699_v52  ;;  %v12845_v6 = vpack.c.bf16 %v12813_v3, %v12809_v15  ;;  %v15722_v2 = vadd.f32 %v15721_v37, %v15720_v36 }
 0x586   :  { %v15723_v14 = vpop.f32.mrf.mxu0 }
 0x587   :  { %v12846_v17 = vpack.c.bf16 %v12814_v57, %v12810_v18 }
 0x588   :  { %v15724_v55 = vpop.f32.mrf.mxu0 }
 0x589   :  { %13288 = vmatprep.mubr.bf16.mxu1 %v12846_v17 }
 0x58a   :  { %13289 = vmatmul.mubr.bf16.gmra.mxu1 %v12845_v6  ;;  %v15726_v8 = vpop.f32.mrf.mxu0  ;;  %v15725_v6 = vadd.f32 %v15724_v55, %v15723_v14 }
 0x58b   :  { %13747 = vmatprep.mubr.f32.mxu1 %v26163_v11 }
 0x58c   :  { %v15727_v44 = vpop.f32.mrf.mxu0 }
 0x58d   :  { %v15728_v52 = vadd.f32 %v15727_v44, %v15726_v8 }
 0x58e   :  { %v15729_v43 = vpop.f32.mrf.mxu0 }
 0x590   :  { %v15730_v28 = vpop.f32.mrf.mxu0 }
 0x591   :  { %v15731_v14 = vadd.f32 %v15730_v28, %v15729_v43 }
 0x592   :  { %v15732_v54 = vpop.f32.mrf.mxu0 }
 0x594   :  { %v15733_v56 = vpop.f32.mrf.mxu0 }
 0x596   :  { %v15735_v58 = vpop.f32.mrf.mxu0 }
 0x598   :  { %v15736_v10 = vpop.f32.mrf.mxu0 }
 0x59a   :  { %v25723_v5 = vpop.f32.mrf.mxu0 }
 0x59c   :  { %v25725_v42 = vpop.f32.mrf.mxu0 }
 0x59e   :  { %v25727_v63 = vpop.f32.mrf.mxu0 }
 0x5a0   :  { %v25729_v49 = vpop.f32.mrf.mxu0 }
 0x5a2   :  { %v25731_v12 = vpop.f32.mrf.mxu0 }
 0x5a4   :  { %v25733_v22 = vpop.f32.mrf.mxu0 }
 0x5a6   :  { %v25735_v17 = vpop.f32.mrf.mxu0 }
 0x5a8   :  { %v25739_v19 = vpop.f32.mrf.mxu0 }
 0x5aa   :  { %v25745_v55 = vpop.f32.mrf.mxu0 }
 0x612   :  { %v15784_v38 = vpop.f32.mrf.mxu1 }
 0x614   :  { %v15785_v41 = vpop.f32.mrf.mxu1 }
 0x615   :  { %v15786_v3 = vadd.f32 %v15785_v41, %v15784_v38 }
 0x616   :  { %v15787_v18 = vpop.f32.mrf.mxu1 }
 0x617   :  { %v13235_v57 = vadd.f32 %v15786_v3, %v15722_v2 }
 0x618   :  { %v15788_v15 = vpop.f32.mrf.mxu1 }
 0x619   :  { %18025 = vrsqrt.f32 %v13235_v57  ;;  %v13409_v35 = vadd.f32 1.0, %v13235_v57  ;;  %v15789_v45 = vadd.f32 %v15788_v15, %v15787_v18  ;;  %v15734_v15 = vadd.f32 %v15733_v56, %v15732_v54 }
 0x61a   :  { %v15790_v20 = vpop.f32.mrf.mxu1  ;;  %vm13299_vm0 = vcmp.eq.f32.partialorder %v13235_v57, inf  ;;  %vm13301_vm1 = vcmp.eq.f32.partialorder %v13235_v57, 0.0 }
 0x61b   :  { %v25737_v47 = vadd.f32 %v15789_v45, %v15725_v6  ;;  %18027 = vrcp.f32 %v13409_v35 }
 0x61c   :  { %v15791_v11 = vpop.f32.mrf.mxu1 }
 0x61d   :  { %v15792_v36 = vadd.f32 %v15791_v11, %v15790_v20  ;;  %18029 = vrsqrt.f32 %v25737_v47  ;;  %v13410_v41 = vadd.f32 1.0, %v25737_v47  ;;  %vm13306_vm3 = vcmp.eq.f32.partialorder %v25737_v47, inf }
 0x61e   :  { %v15793_v37 = vpop.f32.mrf.mxu1  ;;  %vm13308_vm4 = vcmp.eq.f32.partialorder %v25737_v47, 0.0 }
 0x61f   :  { %v25742_v38 = vadd.f32 %v15792_v36, %v15728_v52  ;;  %v25751_v52 = vpop.f32.mrf.mxu0  ;;  %v15737_v36 = vadd.f32 %v15736_v10, %v15735_v58  ;;  %v15740_v10 = vadd.f32 %v25725_v42, %v25723_v5  ;;  %v26290_v5 = vmov 0.0  }
 0x620   :  { %v15794_v2 = vpop.f32.mrf.mxu1 }
 0x621   :  { %18031 = vrsqrt.f32 %v25742_v38  ;;  %v15795_v3 = vadd.f32 %v15794_v2, %v15793_v37  ;;  %v13411_v8 = vadd.f32 1.0, %v25742_v38  ;;  %v13302_v37 = vand.u32 2147483648, %v13235_v57  ;;  %v25757_v2 = vpop.f32.mrf.mxu0 }
 0x622   :  { %v15796_v18 = vpop.f32.mrf.mxu1  ;;  %18033 = vrcp.f32 %v13410_v41  ;;  %vm13313_vm5 = vcmp.eq.f32.partialorder %v25742_v38, inf  ;;  %vm13315_vm6 = vcmp.eq.f32.partialorder %v25742_v38, 0.0 }
 0x623   :  { %v25749_v44 = vadd.f32 %v15795_v3, %v15731_v14  ;;  %18035 = vrcp.f32 %v13411_v8 }
 0x624   :  { %v15797_v11 = vpop.f32.mrf.mxu1 }
 0x625   :  { %18037 = vrsqrt.f32 %v25749_v44  ;;  %v15798_v6 = vadd.f32 %v15797_v11, %v15796_v18  ;;  %v13412_v35 = vadd.f32 1.0, %v25749_v44  ;;  %vm13320_vm7 = vcmp.eq.f32.partialorder %v25749_v44, inf }
 0x626   :  { %v18026_v43 = vpop.eup %18025  ;;  %v15799_v28 = vpop.f32.mrf.mxu1  ;;  %vm13322_vm8 = vcmp.eq.f32.partialorder %v25749_v44, 0.0 }
 0x627   :  { %v13298_v45 = vmul.f32 %v18026_v43, %v13235_v57  ;;  %v25755_v20 = vadd.f32 %v15798_v6, %v15734_v15  ;;  %18039 = vrcp.f32 %v13412_v35  ;;  %v13309_v35 = vand.u32 2147483648, %v25737_v47 }
 0x628   :  { %v15800_v41 = vpop.f32.mrf.mxu1  ;;  %v18028_v14 = vpop.eup %18027 }
 0x629   :  { %v13300_v54 = vsel %vm13299_vm0, %v13235_v57, %v13298_v45  ;;  %18041 = vrsqrt.f32 %v25755_v20  ;;  %v15801_v56 = vadd.f32 %v15800_v41, %v15799_v28  ;;  %v13413_v8 = vadd.f32 1.0, %v25755_v20  ;;  %v25766_v57 = vpop.f32.mrf.mxu0 }
 0x62a   :  { %v15802_v3 = vpop.f32.mrf.mxu1  ;;  %v13303_v18 = vsel %vm13301_vm1, %v13302_v37, %v13300_v54  ;;  %v18030_v11 = vpop.eup %18029  ;;  %v15743_v54 = vadd.f32 %v25729_v49, %v25727_v63  ;;  %vm13327_vm9 = vcmp.eq.f32.partialorder %v25755_v20, inf  ;;  %vm13329_vm10 = vcmp.eq.f32.partialorder %v25755_v20, 0.0 }
 0x62b   :  { %v25761_v15 = vadd.f32 %v15801_v56, %v15737_v36  ;;  %v13441_v58 = vmul.f32 %v18028_v14, %v13303_v18  ;;  %v13305_v43 = vmul.f32 %v18030_v11, %v25737_v47  ;;  %18043 = vrcp.f32 %v13413_v8 }
 0x62c   :  { %v15803_v6 = vpop.f32.mrf.mxu1  ;;  %v13316_v11 = vand.u32 2147483648, %v25742_v38 }
 0x62d   :  { %18045 = vrsqrt.f32 %v25761_v15  ;;  %v15804_v28 = vadd.f32 %v15803_v6, %v15802_v3  ;;  %15608 = vmatmul.mubr.msk.f32.vlgmr.msra.gmra.mxu0 %vm13473_vm2, %v13441_v58  ;;  %15624 = vmatmul.mubr.msk.f32.vlgmr.msra.gmra.mxu1 %vm13473_vm2, %v13441_v58  ;;  %v13307_v42 = vsel %vm13306_vm3, %v25737_v47, %v13305_v43  ;;  %v13414_v37 = vadd.f32 1.0, %v25761_v15  ;;  %v25785_v47 = vpop.f32.mrf.mxu0 }
 0x62e   :  { %v18032_v45 = vpop.eup %18031  ;;  %v15805_v36 = vpop.f32.mrf.mxu1  ;;  %13592 = vmatprep.mubr.f32.mxu0 %v26290_v5  ;;  %13753 = vmatprep.mubr.f32.mxu1 %v26290_v5  ;;  %v13310_v14 = vsel %vm13308_vm4, %v13309_v35, %v13307_v42  ;;  %vm13334_vm11 = vcmp.eq.f32.partialorder %v25761_v15, inf  ;;  %vm13336_vm12 = vcmp.eq.f32.partialorder %v25761_v15, 0.0 }
 0x62f   :  { %v18034_v41 = vpop.eup %18033  ;;  %v25780_v56 = vadd.f32 %v15804_v28, %v15740_v10  ;;  %v13312_v3 = vmul.f32 %v18032_v45, %v25742_v38  ;;  %18047 = vrcp.f32 %v13414_v37  ;;  %v13323_v37 = vand.u32 2147483648, %v25749_v44 }
 0x630   :  { %v15806_v18 = vpop.f32.mrf.mxu1  ;;  %v13442_v8 = vmul.f32 %v18034_v41, %v13310_v14  ;;  %v18036_v58 = vpop.eup %18035 }
 0x631   :  { %18049 = vrsqrt.f32 %v25780_v56  ;;  %v15807_v6 = vadd.f32 %v15806_v18, %v15805_v36  ;;  %v13314_v63 = vsel %vm13313_vm5, %v25742_v38, %v13312_v3  ;;  %v13415_v28 = vadd.f32 1.0, %v25780_v56  ;;  %v25802_v14 = vpop.f32.mrf.mxu0 }
 0x632   :  { %v18038_v49 = vpop.eup %18037  ;;  %15609 = vmatmul.mubr.msk.f32.gmra.mxu0 %vm13473_vm2, %v13442_v8  ;;  %15625 = vmatmul.mubr.msk.f32.gmra.mxu1 %vm13473_vm2, %v13442_v8  ;;  %v15808_v10 = vpop.f32.mrf.mxu1  ;;  %v13317_v43 = vsel %vm13315_vm6, %v13316_v11, %v13314_v63  ;;  %v15746_v38 = vadd.f32 %v25733_v22, %v25731_v12  ;;  %vm13341_vm13 = vcmp.eq.f32.partialorder %v25780_v56, inf  ;;  %vm13343_vm14 = vcmp.eq.f32.partialorder %v25780_v56, 0.0 }
 0x633   :  { %v25793_v35 = vadd.f32 %v15807_v6, %v15743_v54  ;;  %13598 = vmatprep.mubr.f32.mxu0 %v26290_v5  ;;  %13759 = vmatprep.mubr.f32.mxu1 %v26290_v5  ;;  %v13443_v45 = vmul.f32 %v18036_v58, %v13317_v43  ;;  %v13319_v36 = vmul.f32 %v18038_v49, %v25749_v44  ;;  %18051 = vrcp.f32 %v13415_v28  ;;  %v25819_v43 = vpop.f32.mrf.mxu0 }
 0x634   :  { %v15809_v42 = vpop.f32.mrf.mxu1  ;;  %v18040_v41 = vpop.eup %18039  ;;  %v13330_v49 = vand.u32 2147483648, %v25755_v20 }
 0x635   :  { %18053 = vrsqrt.f32 %v25793_v35  ;;  %v15810_v54 = vadd.f32 %v15809_v42, %v15808_v10  ;;  %v13321_v3 = vsel %vm13320_vm7, %v25749_v44, %v13319_v36  ;;  %v13416_v8 = vadd.f32 1.0, %v25793_v35 }
 0x636   :  { %v18042_v18 = vpop.eup %18041  ;;  %15610 = vmatmul.mubr.msk.f32.gmra.mxu0 %vm13473_vm2, %v13443_v45  ;;  %15626 = vmatmul.mubr.msk.f32.gmra.mxu1 %vm13473_vm2, %v13443_v45  ;;  %v15811_v12 = vpop.f32.mrf.mxu1  ;;  %v13324_v22 = vsel %vm13322_vm8, %v13323_v37, %v13321_v3  ;;  %v15749_v44 = vadd.f32 %v25739_v19, %v25735_v17  ;;  %v13337_v3 = vand.u32 2147483648, %v25761_v15  ;;  %vm13348_vm15 = vcmp.eq.f32.partialorder %v25793_v35, inf }
 0x637   :  { %v25810_v11 = vadd.f32 %v15810_v54, %v15746_v38  ;;  %13604 = vmatprep.mubr.f32.mxu0 %v26290_v5  ;;  %13765 = vmatprep.mubr.f32.mxu1 %v26290_v5  ;;  %v13444_v58 = vmul.f32 %v18040_v41, %v13324_v22  ;;  %v13326_v6 = vmul.f32 %v18042_v18, %v25755_v20  ;;  %18055 = vrcp.f32 %v13416_v8 }
 0x638   :  { %v15812_v63 = vpop.f32.mrf.mxu1  ;;  %v18044_v10 = vpop.eup %18043  ;;  %vm13350_vm0 = vcmp.eq.f32.partialorder %v25793_v35, 0.0 }
 0x639   :  { %18057 = vrsqrt.f32 %v25810_v11  ;;  %v15813_v28 = vadd.f32 %v15812_v63, %v15811_v12  ;;  %v13328_v45 = vsel %vm13327_vm9, %v25755_v20, %v13326_v6  ;;  %v13417_v38 = vadd.f32 1.0, %v25810_v11  ;;  %v15760_v12 = vpop.f32.mrf.mxu0 }
 0x63a   :  { %v18046_v36 = vpop.eup %18045  ;;  %15611 = vmatmul.mubr.msk.f32.gmra.mxu0 %vm13473_vm2, %v13444_v58  ;;  %15627 = vmatmul.mubr.msk.f32.gmra.mxu1 %vm13473_vm2, %v13444_v58  ;;  %v15814_v19 = vpop.f32.mrf.mxu1  ;;  %v13331_v17 = vsel %vm13329_vm10, %v13330_v49, %v13328_v45  ;;  %v15752_v20 = vadd.f32 %v25751_v52, %v25745_v55  ;;  %vm13355_vm1 = vcmp.eq.f32.partialorder %v25810_v11, inf  ;;  %vm13357_vm3 = vcmp.eq.f32.partialorder %v25810_v11, 0.0 }
 0x63b   :  { %v25827_v42 = vadd.f32 %v15813_v28, %v15749_v44  ;;  %13610 = vmatprep.mubr.f32.mxu0 %v26290_v5  ;;  %13771 = vmatprep.mubr.f32.mxu1 %v26290_v5  ;;  %v13445_v37 = vmul.f32 %v18044_v10, %v13331_v17  ;;  %v13333_v41 = vmul.f32 %v18046_v36, %v25761_v15  ;;  %18059 = vrcp.f32 %v13417_v38  ;;  %v15762_v36 = vpop.f32.mrf.mxu0 }
 0x63c   :  { %v15815_v54 = vpop.f32.mrf.mxu1  ;;  %v18048_v18 = vpop.eup %18047  ;;  %v13344_v28 = vand.u32 2147483648, %v25780_v56 }
 0x63d   :  { %18061 = vrsqrt.f32 %v25827_v42  ;;  %v15816_v22 = vadd.f32 %v15815_v54, %v15814_v19  ;;  %v13335_v8 = vsel %vm13334_vm11, %v25761_v15, %v13333_v41  ;;  %v13418_v6 = vadd.f32 1.0, %v25827_v42 }
 0x63e   :  { %v18050_v58 = vpop.eup %18049  ;;  %15612 = vmatmul.mubr.msk.f32.gmra.mxu0 %vm13473_vm2, %v13445_v37  ;;  %15628 = vmatmul.mubr.msk.f32.gmra.mxu1 %vm13473_vm2, %v13445_v37  ;;  %v15817_v55 = vpop.f32.mrf.mxu1  ;;  %v13338_v52 = vsel %vm13336_vm12, %v13337_v3, %v13335_v8  ;;  %v15755_v15 = vadd.f32 %v25766_v57, %v25757_v2  ;;  %vm13362_vm4 = vcmp.eq.f32.partialorder %v25827_v42, inf  ;;  %vm13364_vm5 = vcmp.eq.f32.partialorder %v25827_v42, 0.0 }
 0x63f   :  { %v25842_v44 = vadd.f32 %v15816_v22, %v15752_v20  ;;  %13616 = vmatprep.mubr.f32.mxu0 %v26290_v5  ;;  %13777 = vmatprep.mubr.f32.mxu1 %v26290_v5  ;;  %v13446_v63 = vmul.f32 %v18048_v18, %v13338_v52  ;;  %v13340_v49 = vmul.f32 %v18050_v58, %v25780_v56  ;;  %18063 = vrcp.f32 %v13418_v6  ;;  %v15763_v8 = vpop.f32.mrf.mxu0 }
 0x640   :  { %v15818_v10 = vpop.f32.mrf.mxu1  ;;  %v18052_v45 = vpop.eup %18051  ;;  %v13351_v18 = vand.u32 2147483648, %v25793_v35 }
 0x641   :  { %18065 = vrsqrt.f32 %v25842_v44  ;;  %v15819_v19 = vadd.f32 %v15818_v10, %v15817_v55  ;;  %v13342_v17 = vsel %vm13341_vm13, %v25780_v56, %v13340_v49  ;;  %v13419_v37 = vadd.f32 1.0, %v25842_v44 }
 0x642   :  { %v18054_v38 = vpop.eup %18053  ;;  %15613 = vmatmul.mubr.msk.f32.gmra.mxu0 %vm13473_vm2, %v13446_v63  ;;  %15629 = vmatmul.mubr.msk.f32.gmra.mxu1 %vm13473_vm2, %v13446_v63  ;;  %v15820_v2 = vpop.f32.mrf.mxu1  ;;  %v13345_v57 = vsel %vm13343_vm14, %v13344_v28, %v13342_v17  ;;  %v15758_v56 = vadd.f32 %v25802_v14, %v25785_v47  ;;  %v13358_v28 = vand.u32 2147483648, %v25810_v11  ;;  %vm13369_vm6 = vcmp.eq.f32.partialorder %v25842_v44, inf }
 0x643   :  { %v25857_v41 = vadd.f32 %v15819_v19, %v15755_v15  ;;  %13622 = vmatprep.mubr.f32.mxu0 %v26290_v5  ;;  %13783 = vmatprep.mubr.f32.mxu1 %v26290_v5  ;;  %v13447_v20 = vmul.f32 %v18052_v45, %v13345_v57  ;;  %v13347_v54 = vmul.f32 %v18054_v38, %v25793_v35  ;;  %18067 = vrcp.f32 %v13419_v37  ;;  %v15765_v19 = vpop.f32.mrf.mxu0 }
 0x644   :  { %v15821_v3 = vpop.f32.mrf.mxu1  ;;  %v18056_v22 = vpop.eup %18055  ;;  %vm13371_vm7 = vcmp.eq.f32.partialorder %v25842_v44, 0.0 }
 0x645   :  { %18069 = vrsqrt.f32 %v25857_v41  ;;  %v15822_v58 = vadd.f32 %v15821_v3, %v15820_v2  ;;  %v13349_v55 = vsel %vm13348_vm15, %v25793_v35, %v13347_v54  ;;  %v13420_v6 = vadd.f32 1.0, %v25857_v41 }
 0x646   :  { %v18058_v52 = vpop.eup %18057  ;;  %15614 = vmatmul.mubr.msk.f32.gmra.mxu0 %vm13473_vm2, %v13447_v20  ;;  %15630 = vmatmul.mubr.msk.f32.gmra.mxu1 %vm13473_vm2, %v13447_v20  ;;  %v15823_v47 = vpop.f32.mrf.mxu1  ;;  %v13352_v14 = vsel %vm13350_vm0, %v13351_v18, %v13349_v55  ;;  %v15761_v35 = vadd.f32 %v15760_v12, %v25819_v43  ;;  %v13365_v3 = vand.u32 2147483648, %v25827_v42  ;;  %vm13376_vm8 = vcmp.eq.f32.partialorder %v25857_v41, inf }
 0x647   :  { %v25872_v63 = vadd.f32 %v15822_v58, %v15758_v56  ;;  %13628 = vmatprep.mubr.f32.mxu0 %v26290_v5  ;;  %13789 = vmatprep.mubr.f32.mxu1 %v26290_v5  ;;  %v13448_v49 = vmul.f32 %v18056_v22, %v13352_v14  ;;  %v13354_v15 = vmul.f32 %v18058_v52, %v25810_v11  ;;  %18071 = vrcp.f32 %v13420_v6  ;;  %v15766_v22 = vpop.f32.mrf.mxu0 }
 0x648   :  { %v15824_v10 = vpop.f32.mrf.mxu1  ;;  %v18060_v45 = vpop.eup %18059  ;;  %v15764_v56 = vadd.f32 %v15763_v8, %v15762_v36  ;;  %vm13378_vm9 = vcmp.eq.f32.partialorder %v25857_v41, 0.0 }
 0x649   :  { %18073 = vrsqrt.f32 %v25872_v63  ;;  %v15825_v17 = vadd.f32 %v15824_v10, %v15823_v47  ;;  %v13356_v38 = vsel %vm13355_vm1, %v25810_v11, %v13354_v15  ;;  %v13421_v57 = vadd.f32 1.0, %v25872_v63 }
 0x64a   :  { %v18062_v2 = vpop.eup %18061  ;;  %15615 = vmatmul.mubr.msk.f32.gmra.mxu0 %vm13473_vm2, %v13448_v49  ;;  %15631 = vmatmul.mubr.msk.f32.gmra.mxu1 %vm13473_vm2, %v13448_v49  ;;  %v15826_v43 = vpop.f32.mrf.mxu1  ;;  %v13359_v12 = vsel %vm13357_vm3, %v13358_v28, %v13356_v38  ;;  %v15767_v15 = vadd.f32 %v15766_v22, %v15765_v19  ;;  %vm13383_vm10 = vcmp.eq.f32.partialorder %v25872_v63, inf  ;;  %v13386_v22 = vand.u32 2147483648, %v25872_v63 }
 0x64b   :  { %v25886_v37 = vadd.f32 %v15825_v17, %v15761_v35  ;;  %13634 = vmatprep.mubr.f32.mxu0 %v26290_v5  ;;  %13795 = vmatprep.mubr.f32.mxu1 %v26290_v5  ;;  %v13449_v20 = vmul.f32 %v18060_v45, %v13359_v12  ;;  %v13361_v54 = vmul.f32 %v18062_v2, %v25827_v42  ;;  %18075 = vrcp.f32 %v13421_v57 }
 0x64c   :  { %v15827_v11 = vpop.f32.mrf.mxu1  ;;  %v18064_v18 = vpop.eup %18063  ;;  %v13372_v35 = vand.u32 2147483648, %v25842_v44  ;;  %vm13385_vm11 = vcmp.eq.f32.partialorder %v25872_v63, 0.0 }
 0x64d   :  { %18077 = vrsqrt.f32 %v25886_v37  ;;  %v15828_v58 = vadd.f32 %v15827_v11, %v15826_v43  ;;  %v13363_v55 = vsel %vm13362_vm4, %v25827_v42, %v13361_v54  ;;  %v13422_v47 = vadd.f32 1.0, %v25886_v37 }
 0x64e   :  { %v18066_v52 = vpop.eup %18065  ;;  %15616 = vmatmul.mubr.msk.f32.gmra.mxu0 %vm13473_vm2, %v13449_v20  ;;  %15632 = vmatmul.mubr.msk.f32.gmra.mxu1 %vm13473_vm2, %v13449_v20  ;;  %v15829_v36 = vpop.f32.mrf.mxu1  ;;  %v13366_v8 = vsel %vm13364_vm5, %v13365_v3, %v13363_v55  ;;  %vm13390_vm12 = vcmp.eq.f32.partialorder %v25886_v37, inf  ;;  %vm13392_vm13 = vcmp.eq.f32.partialorder %v25886_v37, 0.0 }
 0x64f   :  { %v25899_v14 = vadd.f32 %v15828_v58, %v15764_v56  ;;  %13640 = vmatprep.mubr.f32.mxu0 %v26290_v5  ;;  %13801 = vmatprep.mubr.f32.mxu1 %v26290_v5  ;;  %v13450_v6 = vmul.f32 %v18064_v18, %v13366_v8  ;;  %v13368_v49 = vmul.f32 %v18066_v52, %v25842_v44  ;;  %18079 = vrcp.f32 %v13422_v47 }
 0x650   :  { %v15830_v42 = vpop.f32.mrf.mxu1  ;;  %v18068_v10 = vpop.eup %18067  ;;  %v13393_v47 = vand.u32 2147483648, %v25886_v37 }
 0x651   :  { %18081 = vrsqrt.f32 %v25899_v14  ;;  %v15831_v28 = vadd.f32 %v15830_v42, %v15829_v36  ;;  %v13370_v45 = vsel %vm13369_vm6, %v25842_v44, %v13368_v49  ;;  %v13423_v38 = vadd.f32 1.0, %v25899_v14 }
 0x652   :  { %v18070_v17 = vpop.eup %18069  ;;  %15617 = vmatmul.mubr.msk.f32.gmra.mxu0 %vm13473_vm2, %v13450_v6  ;;  %15633 = vmatmul.mubr.msk.f32.gmra.mxu1 %vm13473_vm2, %v13450_v6  ;;  %v13373_v19 = vsel %vm13371_vm7, %v13372_v35, %v13370_v45  ;;  %v13379_v44 = vand.u32 2147483648, %v25857_v41  ;;  %vm13397_vm14 = vcmp.eq.f32.partialorder %v25899_v14, inf  ;;  %vm13399_vm15 = vcmp.eq.f32.partialorder %v25899_v14, 0.0 }
 0x653   :  { %v25912_v2 = vadd.f32 %v15831_v28, %v15767_v15  ;;  %13646 = vmatprep.mubr.f32.mxu0 %v26290_v5  ;;  %13807 = vmatprep.mubr.f32.mxu1 %v26290_v5  ;;  %v13451_v43 = vmul.f32 %v18068_v10, %v13373_v19  ;;  %v13375_v12 = vmul.f32 %v18070_v17, %v25857_v41  ;;  %18083 = vrcp.f32 %v13423_v38 }
 0x654   :  { %v18072_v57 = vpop.eup %18071  ;;  %v13400_v10 = vand.u32 2147483648, %v25899_v14 }
 0x655   :  { %18085 = vrsqrt.f32 %v25912_v2  ;;  %v13377_v20 = vsel %vm13376_vm8, %v25857_v41, %v13375_v12  ;;  %v13424_v11 = vadd.f32 1.0, %v25912_v2  ;;  %vm13404_vm0 = vcmp.eq.f32.partialorder %v25912_v2, inf }
 0x656   :  { %v18074_v54 = vpop.eup %18073  ;;  %15618 = vmatmul.mubr.msk.f32.gmra.mxu0 %vm13473_vm2, %v13451_v43  ;;  %15634 = vmatmul.mubr.msk.f32.gmra.mxu1 %vm13473_vm2, %v13451_v43  ;;  %v13380_v56 = vsel %vm13378_vm9, %v13379_v44, %v13377_v20  ;;  %v13407_v43 = vand.u32 2147483648, %v25912_v2  ;;  %vm13406_vm1 = vcmp.eq.f32.partialorder %v25912_v2, 0.0 }
 0x657   :  { %13652 = vmatprep.mubr.f32.mxu0 %v26290_v5  ;;  %13813 = vmatprep.mubr.f32.mxu1 %v26290_v5  ;;  %v13452_v3 = vmul.f32 %v18072_v57, %v13380_v56  ;;  %v13382_v18 = vmul.f32 %v18074_v54, %v25872_v63  ;;  %18087 = vrcp.f32 %v13424_v11 }
 0x658   :  { %v18076_v41 = vpop.eup %18075 }
 0x659   :  { %v13384_v58 = vsel %vm13383_vm10, %v25872_v63, %v13382_v18 }
 0x65a   :  { %v18078_v55 = vpop.eup %18077  ;;  %15619 = vmatmul.mubr.msk.f32.gmra.mxu0 %vm13473_vm2, %v13452_v3  ;;  %15635 = vmatmul.mubr.msk.f32.gmra.mxu1 %vm13473_vm2, %v13452_v3  ;;  %v13387_v52 = vsel %vm13385_vm11, %v13386_v22, %v13384_v58  ;;  %v26292_v22 = vld [vmem:[#allocation3_spill] sm:$0xff] }
 0x65b   :  { %13658 = vmatprep.mubr.f32.mxu0 %v26290_v5  ;;  %13819 = vmatprep.mubr.f32.mxu1 %v26290_v5  ;;  %v13453_v36 = vmul.f32 %v18076_v41, %v13387_v52  ;;  %v13389_v8 = vmul.f32 %v18078_v55, %v25886_v37 }
 0x65c   :  { %v18080_v6 = vpop.eup %18079 }
 0x65d   :  { %v13391_v63 = vsel %vm13390_vm12, %v25886_v37, %v13389_v8 }
 0x65e   :  { %v18082_v49 = vpop.eup %18081  ;;  %15620 = vmatmul.mubr.msk.f32.gmra.mxu0 %vm13473_vm2, %v13453_v36  ;;  %15636 = vmatmul.mubr.msk.f32.gmra.mxu1 %vm13473_vm2, %v13453_v36  ;;  %v13394_v15 = vsel %vm13392_vm13, %v13393_v47, %v13391_v63 }
 0x65f   :  { %13664 = vmatprep.mubr.f32.mxu0 %v26290_v5  ;;  %13825 = vmatprep.mubr.f32.mxu1 %v26290_v5  ;;  %v13454_v42 = vmul.f32 %v18080_v6, %v13394_v15  ;;  %v13396_v35 = vmul.f32 %v18082_v49, %v25899_v14  ;;  %v26293_v6 = vld [vmem:[#allocation4_spill] sm:$0xff]  ;;  %v26294_v49 = vld [vmem:[#allocation5_spill] sm:$0xff] }
 0x660   :  { %v18084_v28 = vpop.eup %18083 }
 0x661   :  { %v13398_v37 = vsel %vm13397_vm14, %v25899_v14, %v13396_v35 }
 0x662   :  { %v18086_v45 = vpop.eup %18085  ;;  %15621 = vmatmul.mubr.msk.f32.gmra.mxu0 %vm13473_vm2, %v13454_v42  ;;  %15637 = vmatmul.mubr.msk.f32.gmra.mxu1 %vm13473_vm2, %v13454_v42  ;;  %v13401_v17 = vsel %vm13399_vm15, %v13400_v10, %v13398_v37 }
 0x663   :  { %13670 = vmatprep.mubr.f32.mxu0 %v26290_v5  ;;  %13831 = vmatprep.mubr.f32.mxu1 %v26290_v5  ;;  %v13455_v19 = vmul.f32 %v18084_v28, %v13401_v17  ;;  %v13403_v38 = vmul.f32 %v18086_v45, %v25912_v2  ;;  %v26295_v17 = vld [vmem:[#allocation6_spill] sm:$0xff] }
 0x664   :  { %v18088_v14 = vpop.eup %18087 }
 0x665   :  { %v13405_v12 = vsel %vm13404_vm0, %v25912_v2, %v13403_v38  ;;  %v26291_v2 = vld [vmem:[#allocation2_spill] sm:$0xff]  ;;  %v26296_v38 = vld [vmem:[#allocation7_spill] sm:$0xff] }
 0x666   :  { %15622 = vmatmul.mubr.msk.f32.gmra.mxu0 %vm13473_vm2, %v13455_v19  ;;  %15638 = vmatmul.mubr.msk.f32.gmra.mxu1 %vm13473_vm2, %v13455_v19  ;;  %v13408_v44 = vsel %vm13406_vm1, %v13407_v43, %v13405_v12 }
 0x667   :  { %13676 = vmatprep.mubr.f32.mxu0 %v26290_v5  ;;  %13837 = vmatprep.mubr.f32.mxu1 %v26290_v5  ;;  %v13456_v57 = vmul.f32 %v18088_v14, %v13408_v44 }
 0x66a   :  { %15623 = vmatmul.mubr.msk.f32.gmra.mxu0 %vm13473_vm2, %v13456_v57  ;;  %15639 = vmatmul.mubr.msk.f32.gmra.mxu1 %vm13473_vm2, %v13456_v57 }
 0x6ed   :  { %v13588_v20 = vpop.f32.mrf.mxu0  ;;  %v13749_v54 = vpop.f32.mrf.mxu1 }
 0x6ee   :  { %v13844_v3 = vmul.f32 %v13588_v20, %v26291_v2  ;;  %v13846_v18 = vmul.f32 %v13749_v54, %v25499_v24  ;;  %v26298_v2 = vld [vmem:[#allocation9_spill] sm:$0xff] }
 0x6ef   :  { %v13590_v56 = vpop.f32.mrf.mxu0  ;;  %v13751_v11 = vpop.f32.mrf.mxu1 }
 0x6f0   :  { %v13845_v41 = vmul.f32 %v13590_v56, %v26292_v22  ;;  %v13847_v58 = vmul.f32 %v13751_v11, %v25495_v51  ;;  %v26297_v56 = vld [vmem:[#allocation8_spill] sm:$0xff] }
 0x6f2   :  { %v15672_v55 = vpack.c.bf16 %v13845_v41, %v13844_v3  ;;  %v15673_v52 = vpack.c.bf16 %v13847_v58, %v13846_v18  ;;  %v13594_v5 = vpop.f32.mrf.mxu0  ;;  %v13755_v36 = vpop.f32.mrf.mxu1 }
 0x6f3   :  { %v13848_v24 = vmul.f32 %v13594_v5, %v26293_v6  ;;  %v13850_v63 = vmul.f32 %v13755_v36, %v25497_v0  ;;  %v26299_v5 = vld [vmem:[#allocation10_spill] sm:$0xff] }
 0x6f4   :  { %14100 = vst [vmem:[%s26130_s5] sm:$0xff] %v15672_v55  ;;  %14101 = vst [vmem:[%s26130_s5 + $0x8] sm:$0xff] %v15673_v52  ;;  %v13596_v8 = vpop.f32.mrf.mxu0  ;;  %v13757_v47 = vpop.f32.mrf.mxu1 }
 0x6f5   :  { %v13849_v51 = vmul.f32 %v13596_v8, %v26294_v49  ;;  %v13851_v15 = vmul.f32 %v13757_v47, %v25503_v30  ;;  %v26300_v8 = vld [vmem:[#allocation11_spill] sm:$0xff] }
 0x6f6   :  { %v13600_v42 = vpop.f32.mrf.mxu0  ;;  %v13761_v35 = vpop.f32.mrf.mxu1 }
 0x6f7   :  { %v15674_v10 = vpack.c.bf16 %v13849_v51, %v13848_v24  ;;  %v15675_v28 = vpack.c.bf16 %v13851_v15, %v13850_v63  ;;  %v13852_v0 = vmul.f32 %v13600_v42, %v26295_v17  ;;  %v13854_v19 = vmul.f32 %v13761_v35, %v25532_v13  ;;  %v26301_v42 = vld [vmem:[#allocation12_spill] sm:$0xff] }
 0x6f8   :  { %v13602_v37 = vpop.f32.mrf.mxu0  ;;  %v13763_v45 = vpop.f32.mrf.mxu1 }
 0x6f9   :  { %14102 = vst [vmem:[%s26130_s5 + $0x10] sm:$0xff] %v15674_v10  ;;  %14103 = vst [vmem:[%s26130_s5 + $0x18] sm:$0xff] %v15675_v28  ;;  %v13853_v30 = vmul.f32 %v13602_v37, %v26296_v38  ;;  %v13855_v43 = vmul.f32 %v13763_v45, %v25525_v32  ;;  %v26302_v10 = vld [vmem:[#allocation13_spill] sm:$0xff] }
 0x6fa   :  { %v13606_v12 = vpop.f32.mrf.mxu0  ;;  %v13767_v14 = vpop.f32.mrf.mxu1 }
 0x6fb   :  { %v15676_v44 = vpack.c.bf16 %v13853_v30, %v13852_v0  ;;  %v15677_v57 = vpack.c.bf16 %v13855_v43, %v13854_v19  ;;  %v13856_v13 = vmul.f32 %v13606_v12, %v26297_v56  ;;  %v13858_v11 = vmul.f32 %v13767_v14, %v25527_v27  ;;  %v26303_v30 = vld [vmem:[#allocation14_spill] sm:$0xff]  ;;  %v26304_v12 = vld [vmem:[#allocation15_spill] sm:$0xff] }
 0x6fc   :  { %v13608_v20 = vpop.f32.mrf.mxu0  ;;  %v13769_v54 = vpop.f32.mrf.mxu1 }
 0x6fd   :  { %14104 = vst [vmem:[%s26130_s5 + $0x20] sm:$0xff] %v15676_v44  ;;  %14105 = vst [vmem:[%s26130_s5 + $0x28] sm:$0xff] %v15677_v57  ;;  %v13857_v32 = vmul.f32 %v13608_v20, %v26298_v2  ;;  %v13859_v3 = vmul.f32 %v13769_v54, %v25539_v40 }
 0x6fe   :  { %v13612_v18 = vpop.f32.mrf.mxu0  ;;  %v13773_v22 = vpop.f32.mrf.mxu1 }
 0x6ff   :  { %v15678_v41 = vpack.c.bf16 %v13857_v32, %v13856_v13  ;;  %v15679_v58 = vpack.c.bf16 %v13859_v3, %v13858_v11  ;;  %v13860_v27 = vmul.f32 %v13612_v18, %v26299_v5  ;;  %v13862_v36 = vmul.f32 %v13773_v22, %v25570_v59  ;;  %v26305_v11 = vld [vmem:[#allocation16_spill] sm:$0xff]  ;;  %v26306_v32 = vld [vmem:[#allocation17_spill] sm:$0xff]  ;;  %v26307_v5 = vld [vmem:[#allocation18_spill] sm:$0xff] }
 0x700   :  { %v13614_v55 = vpop.f32.mrf.mxu0  ;;  %v13775_v52 = vpop.f32.mrf.mxu1 }
 0x701   :  { %14106 = vst [vmem:[%s26130_s5 + $0x30] sm:$0xff] %v15678_v41  ;;  %14107 = vst [vmem:[%s26130_s5 + $0x38] sm:$0xff] %v15679_v58  ;;  %v13861_v40 = vmul.f32 %v13614_v55, %v26300_v8  ;;  %v13863_v47 = vmul.f32 %v13775_v52, %v25564_v26 }
 0x702   :  { %v13618_v6 = vpop.f32.mrf.mxu0  ;;  %v13779_v24 = vpop.f32.mrf.mxu1 }
 0x703   :  { %v15680_v63 = vpack.c.bf16 %v13861_v40, %v13860_v27  ;;  %v15681_v49 = vpack.c.bf16 %v13863_v47, %v13862_v36  ;;  %v13864_v59 = vmul.f32 %v13618_v6, %v26301_v42  ;;  %v13866_v35 = vmul.f32 %v13779_v24, %v25566_v46  ;;  %v26308_v36 = vld [vmem:[#allocation19_spill] sm:$0xff]  ;;  %v26310_v42 = vld [vmem:[#allocation21_spill] sm:$0xff] }
 0x704   :  { %v13620_v51 = vpop.f32.mrf.mxu0  ;;  %v13781_v15 = vpop.f32.mrf.mxu1 }
 0x705   :  { %14108 = vst [vmem:[%s26130_s5 + $0x40] sm:$0xff] %v15680_v63  ;;  %14109 = vst [vmem:[%s26130_s5 + $0x48] sm:$0xff] %v15681_v49  ;;  %v13865_v26 = vmul.f32 %v13620_v51, %v26302_v10  ;;  %v13867_v28 = vmul.f32 %v13781_v15, %v25574_v4  ;;  %v26309_v51 = vld [vmem:[#allocation20_spill] sm:$0xff] }
 0x706   :  { %v13624_v37 = vpop.f32.mrf.mxu0  ;;  %v13785_v45 = vpop.f32.mrf.mxu1 }
 0x707   :  { %v15682_v17 = vpack.c.bf16 %v13865_v26, %v13864_v59  ;;  %v15683_v0 = vpack.c.bf16 %v13867_v28, %v13866_v35  ;;  %v13868_v46 = vmul.f32 %v13624_v37, %v26303_v30  ;;  %v13870_v43 = vmul.f32 %v13785_v45, %v25597_v29 }
 0x708   :  { %v13626_v19 = vpop.f32.mrf.mxu0  ;;  %v13787_v38 = vpop.f32.mrf.mxu1 }
 0x709   :  { %14110 = vst [vmem:[%s26130_s5 + $0x50] sm:$0xff] %v15682_v17  ;;  %14111 = vst [vmem:[%s26130_s5 + $0x58] sm:$0xff] %v15683_v0  ;;  %v13869_v4 = vmul.f32 %v13626_v19, %v26304_v12  ;;  %v13871_v14 = vmul.f32 %v13787_v38, %v25591_v60  ;;  %v26311_v17 = vld [vmem:[#allocation22_spill] sm:$0xff]  ;;  %v26312_v19 = vld [vmem:[#allocation23_spill] sm:$0xff] }
 0x70a   :  { %v13630_v44 = vpop.f32.mrf.mxu0  ;;  %v13791_v57 = vpop.f32.mrf.mxu1 }
 0x70b   :  { %v15684_v20 = vpack.c.bf16 %v13869_v4, %v13868_v46  ;;  %v15685_v54 = vpack.c.bf16 %v13871_v14, %v13870_v43  ;;  %v13872_v29 = vmul.f32 %v13630_v44, %v26305_v11  ;;  %v13874_v2 = vmul.f32 %v13791_v57, %v25593_v33  ;;  %v26313_v44 = vld [vmem:[#allocation24_spill] sm:$0xff] }
 0x70c   :  { %v13632_v56 = vpop.f32.mrf.mxu0  ;;  %v13793_v13 = vpop.f32.mrf.mxu1 }
 0x70d   :  { %14112 = vst [vmem:[%s26130_s5 + $0x60] sm:$0xff] %v15684_v20  ;;  %14113 = vst [vmem:[%s26130_s5 + $0x68] sm:$0xff] %v15685_v54  ;;  %v13873_v60 = vmul.f32 %v13632_v56, %v26306_v32  ;;  %v13875_v3 = vmul.f32 %v13793_v13, %v25600_v48  ;;  %v26314_v20 = vld [vmem:[#allocation25_spill] sm:$0xff] }
 0x70e   :  { %v13636_v18 = vpop.f32.mrf.mxu0  ;;  %v13797_v22 = vpop.f32.mrf.mxu1 }
 0x70f   :  { %v15686_v41 = vpack.c.bf16 %v13873_v60, %v13872_v29  ;;  %v15687_v58 = vpack.c.bf16 %v13875_v3, %v13874_v2  ;;  %v13876_v33 = vmul.f32 %v13636_v18, %v26307_v5  ;;  %v13878_v27 = vmul.f32 %v13797_v22, %v25624_v34  ;;  %v26315_v60 = vld [vmem:[#allocation26_spill] sm:$0xff]  ;;  %v26316_v18 = vld [vmem:[#allocation27_spill] sm:$0xff] }
 0x710   :  { %v13638_v55 = vpop.f32.mrf.mxu0  ;;  %v13799_v52 = vpop.f32.mrf.mxu1 }
 0x711   :  { %14114 = vst [vmem:[%s26130_s5 + $0x70] sm:$0xff] %v15686_v41  ;;  %14115 = vst [vmem:[%s26130_s5 + $0x78] sm:$0xff] %v15687_v58  ;;  %v13877_v48 = vmul.f32 %v13638_v55, %v26308_v36  ;;  %v13879_v8 = vmul.f32 %v13799_v52, %v25618_v50 }
 0x712   :  { %v13642_v40 = vpop.f32.mrf.mxu0  ;;  %v13803_v47 = vpop.f32.mrf.mxu1 }
 0x713   :  { %v15688_v6 = vpack.c.bf16 %v13877_v48, %v13876_v33  ;;  %v15689_v24 = vpack.c.bf16 %v13879_v8, %v13878_v27  ;;  %v13880_v34 = vmul.f32 %v13642_v40, %v26309_v51  ;;  %v13882_v15 = vmul.f32 %v13803_v47, %v25620_v25  ;;  %v26317_v27 = vld [vmem:[#allocation28_spill] sm:$0xff]  ;;  %v26318_v48 = vld [vmem:[#allocation29_spill] sm:$0xff]  ;;  %v26319_v51 = vld [vmem:[#allocation30_spill] sm:$0xff] }
 0x714   :  { %v13644_v63 = vpop.f32.mrf.mxu0  ;;  %v13805_v49 = vpop.f32.mrf.mxu1 }
 0x715   :  { %14116 = vst [vmem:[%s26130_s5 + $0x80] sm:$0xff] %v15688_v6  ;;  %14117 = vst [vmem:[%s26130_s5 + $0x88] sm:$0xff] %v15689_v24  ;;  %v13881_v50 = vmul.f32 %v13644_v63, %v26310_v42  ;;  %v13883_v59 = vmul.f32 %v13805_v49, %v25627_v53 }
 0x716   :  { %v13648_v35 = vpop.f32.mrf.mxu0  ;;  %v13809_v10 = vpop.f32.mrf.mxu1 }
 0x717   :  { %v15690_v26 = vpack.c.bf16 %v13881_v50, %v13880_v34  ;;  %v15691_v28 = vpack.c.bf16 %v13883_v59, %v13882_v15  ;;  %v13884_v25 = vmul.f32 %v13648_v35, %v26311_v17  ;;  %v13886_v0 = vmul.f32 %v13809_v10, %v25651_v23  ;;  %v26320_v15 = vld [vmem:[#allocation31_spill] sm:$0xff] }
 0x718   :  { %v13650_v37 = vpop.f32.mrf.mxu0  ;;  %v13811_v45 = vpop.f32.mrf.mxu1 }
 0x719   :  { %14118 = vst [vmem:[%s26130_s5 + $0x90] sm:$0xff] %v15690_v26  ;;  %14119 = vst [vmem:[%s26130_s5 + $0x98] sm:$0xff] %v15691_v28  ;;  %v13885_v53 = vmul.f32 %v13650_v37, %v26312_v19  ;;  %v13887_v38 = vmul.f32 %v13811_v45, %v25645_v9  ;;  %v26321_v37 = vld [vmem:[#allocation32_spill] sm:$0xff] }
 0x71a   :  { %v13654_v30 = vpop.f32.mrf.mxu0  ;;  %v13815_v46 = vpop.f32.mrf.mxu1  ;;  %v26322_v45 = vld [vmem:[#allocation44_spill] sm:$0xff] }
 0x71b   :  { %v15692_v43 = vpack.c.bf16 %v13885_v53, %v13884_v25  ;;  %v15693_v12 = vpack.c.bf16 %v13887_v38, %v13886_v0  ;;  %v13888_v23 = vmul.f32 %v13654_v30, %v26313_v44  ;;  %v13890_v57 = vmul.f32 %v13815_v46, %v25647_v31  ;;  %v26323_v25 = vld [vmem:[#allocation33_spill] sm:$0xff]  ;;  %v26324_v0 = vld [vmem:[#allocation42_spill] sm:$0xff] }
 0x71c   :  { %v13656_v4 = vpop.f32.mrf.mxu0  ;;  %v13817_v14 = vpop.f32.mrf.mxu1 }
 0x71d   :  { %14120 = vst [vmem:[%s26130_s5 + $0xa0] sm:$0xff] %v15692_v43  ;;  %14121 = vst [vmem:[%s26130_s5 + $0xa8] sm:$0xff] %v15693_v12  ;;  %v13889_v9 = vmul.f32 %v13656_v4, %v26314_v20  ;;  %v13891_v54 = vmul.f32 %v13817_v14, %v25654_v39 }
 0x71e   :  { %v13660_v56 = vpop.f32.mrf.mxu0  ;;  %v13821_v13 = vpop.f32.mrf.mxu1 }
 0x71f   :  { %v15694_v11 = vpack.c.bf16 %v13889_v9, %v13888_v23  ;;  %v15695_v29 = vpack.c.bf16 %v13891_v54, %v13890_v57  ;;  %v13892_v31 = vmul.f32 %v13660_v56, %v26315_v60  ;;  %v13894_v3 = vmul.f32 %v13821_v13, %v25676_v16 }
 0x720   :  { %v13662_v2 = vpop.f32.mrf.mxu0  ;;  %v13823_v32 = vpop.f32.mrf.mxu1 }
 0x721   :  { %14122 = vst [vmem:[%s26130_s5 + $0xb0] sm:$0xff] %v15694_v11  ;;  %14123 = vst [vmem:[%s26130_s5 + $0xb8] sm:$0xff] %v15695_v29  ;;  %v13893_v39 = vmul.f32 %v13662_v2, %v26316_v18  ;;  %v13895_v22 = vmul.f32 %v13823_v32, %v25672_v61 }
 0x722   :  { %v13666_v41 = vpop.f32.mrf.mxu0  ;;  %v13827_v58 = vpop.f32.mrf.mxu1 }
 0x723   :  { %v15696_v55 = vpack.c.bf16 %v13893_v39, %v13892_v31  ;;  %v15697_v52 = vpack.c.bf16 %v13895_v22, %v13894_v3  ;;  %v13896_v16 = vmul.f32 %v13666_v41, %v26317_v27  ;;  %v13898_v36 = vmul.f32 %v13827_v58, %v25674_v62 }
 0x724   :  { %v13668_v5 = vpop.f32.mrf.mxu0  ;;  %v13829_v33 = vpop.f32.mrf.mxu1 }
 0x725   :  { %14124 = vst [vmem:[%s26130_s5 + $0xc0] sm:$0xff] %v15696_v55  ;;  %14125 = vst [vmem:[%s26130_s5 + $0xc8] sm:$0xff] %v15697_v52  ;;  %v13897_v61 = vmul.f32 %v13668_v5, %v26318_v48  ;;  %v13899_v8 = vmul.f32 %v13829_v33, %v25679_v1 }
 0x726   :  { %v13672_v40 = vpop.f32.mrf.mxu0  ;;  %v13833_v47 = vpop.f32.mrf.mxu1 }
 0x727   :  { %v15698_v6 = vpack.c.bf16 %v13897_v61, %v13896_v16  ;;  %v15699_v24 = vpack.c.bf16 %v13899_v8, %v13898_v36  ;;  %v13900_v62 = vmul.f32 %v13672_v40, %v26319_v51  ;;  %v13902_v34 = vmul.f32 %v13833_v47, %v25697_v21 }
 0x728   :  { %v13674_v63 = vpop.f32.mrf.mxu0  ;;  %v13835_v49 = vpop.f32.mrf.mxu1 }
 0x729   :  { %14126 = vst [vmem:[%s26130_s5 + $0xd0] sm:$0xff] %v15698_v6  ;;  %14127 = vst [vmem:[%s26130_s5 + $0xd8] sm:$0xff] %v15699_v24  ;;  %v13901_v1 = vmul.f32 %v13674_v63, %v26320_v15  ;;  %v13903_v42 = vmul.f32 %v13835_v49, %v25693_v7 }
 0x72a   :  { %v13678_v50 = vpop.f32.mrf.mxu0  ;;  %v13839_v59 = vpop.f32.mrf.mxu1 }
 0x72b   :  { %v15700_v35 = vpack.c.bf16 %v13901_v1, %v13900_v62  ;;  %v15701_v10 = vpack.c.bf16 %v13903_v42, %v13902_v34  ;;  %v13904_v21 = vmul.f32 %v13678_v50, %v26321_v37  ;;  %v13906_v17 = vmul.f32 %v13839_v59, %v26322_v45 }
 0x72c   :  { %v13680_v26 = vpop.f32.mrf.mxu0  ;;  %v13841_v28 = vpop.f32.mrf.mxu1 }
 0x72d   :  { %14128 = vst [vmem:[%s26130_s5 + $0xe0] sm:$0xff] %v15700_v35  ;;  %14129 = vst [vmem:[%s26130_s5 + $0xe8] sm:$0xff] %v15701_v10  ;;  %v13905_v7 = vmul.f32 %v13680_v26, %v26323_v25  ;;  %v13907_v19 = vmul.f32 %v13841_v28, %v26324_v0 }
 0x72f   :  { %v15702_v53 = vpack.c.bf16 %v13905_v7, %v13904_v21  ;;  %v15703_v38 = vpack.c.bf16 %v13907_v19, %v13906_v17 }
 0x731   :  { %14130 = vst [vmem:[%s26130_s5 + $0xf0] sm:$0xff] %v15702_v53  ;;  %14131 = vst [vmem:[%s26130_s5 + $0xf8] sm:$0xff] %v15703_v38 }

</bundles_post_ra>
